<compile_context>
chip_gen: v7x
topology: tpu7x:2x2x1
jax: 0.10.0
libtpu: 0.0.40
codegen_flags: <defaults>
</compile_context>

<pallas_src>
import jax
import jax.numpy as jnp
from jax.experimental import pallas as pl
from jax.experimental.pallas import tpu as pltpu

OUT_DIM = 3072
N_CHUNKS = 4
CHUNK = OUT_DIM // N_CHUNKS          # 768 = 6 * 128 lanes (lane-aligned)


def _leaky_relu(x, slope=0.2):
    # slope < 1  =>  max(x, slope*x) == LeakyReLU(x); avoids a compare+select.
    return jnp.maximum(x, slope * x)


def _round_up(n, m):
    return ((n + m - 1) // m) * m


def _chip_traits():
    """Best-effort TPU generation detection with safe fallbacks."""
    try:
        kind = jax.devices()[0].device_kind.lower()
    except Exception:
        kind = ""
    is_v7 = "v7" in kind
    is_v6 = "v6" in kind
    is_v5 = "v5" in kind
    return {
        "is_v7": is_v7,
        "big_vmem": is_v5 or is_v6,      # 128 MiB VMEM chips
        "bf16_tanh": is_v6 or is_v7,     # bf16 EUP path exists
    }


def _make_kernel(tanh_dtype):
    def generator_kernel(x_ref, w1_ref, b1_ref, w2_ref, b2_ref, w3_ref, b3_ref, o_ref):
        # Layer 1: Linear(input_dim, 512) + LeakyReLU(0.2)
        x = x_ref[...].astype(jnp.bfloat16)
        h = jnp.dot(x, w1_ref[...], preferred_element_type=jnp.float32) + b1_ref[...]
        h = _leaky_relu(h)

        # Layer 2: Linear(512, 1024) + LeakyReLU(0.2)
        h = jnp.dot(h.astype(jnp.bfloat16), w2_ref[...],
                    preferred_element_type=jnp.float32) + b2_ref[...]
        h = _leaky_relu(h).astype(jnp.bfloat16)

        # Layer 3: Linear(1024, 3072) + Tanh, chunked over output columns so the
        # EUP tanh + output store of chunk c overlaps the MXU matmul of chunk c+1.
        for c in range(N_CHUNKS):
            lo = c * CHUNK
            g = jnp.dot(h, w3_ref[:, lo:lo + CHUNK],
                        preferred_element_type=jnp.float32) + b3_ref[:, lo:lo + CHUNK]
            o_ref[:, lo:lo + CHUNK] = jnp.tanh(g.astype(tanh_dtype)).astype(o_ref.dtype)

    return generator_kernel


def generator_forward(x, params, *, tm=None, out_dtype=jnp.bfloat16):
    """Runs the full Generator MLP in one Pallas kernel, tiled over the batch.

    Expects weights in bf16 and biases in f32 (see init_params)."""
    w1, b1, w2, b2, w3, b3 = params
    B, D = x.shape
    out_dim = w3.shape[1]
    traits = _chip_traits()

    # Pad the feature dim to a full 128-lane vreg; zero rows added to W1 keep
    # the math exact while feeding the MXU a full K dim for layer 1.
    d_pad = _round_up(max(D, 128), 128)
    if d_pad != D:
        x = jnp.pad(x, ((0, 0), (0, d_pad - D)))
        w1 = jnp.pad(w1, ((0, d_pad - D), (0, 0)))

    # Batch tile: multiple of 16 (bf16 LHS packs 16 sublanes per vreg).
    if tm is None:
        if traits["is_v7"]:
            # >= 2 grid steps for B > 16 so CORE_PARALLEL can use both TCs;
            # cap at 256 to stay well under v7x's 64 MiB per-TC VMEM.
            tm = min(256, _round_up((B + 1) // 2, 16))
        elif traits["big_vmem"]:
            tm = min(512, _round_up(B, 16))      # 128 MiB chips: bigger tiles
        else:
            tm = min(256, _round_up(B, 16))      # conservative default
    tm = max(16, _round_up(tm, 16))

    # Pad the batch so the grid covers it exactly (padded rows are garbage and
    # sliced off below).
    grid_m = (B + tm - 1) // tm
    b_pad = grid_m * tm
    if b_pad != B:
        x = jnp.pad(x, ((0, b_pad - B), (0, 0)))

    def _resident(shape):
        # Constant block index across the grid -> single-buffered (no 2x VMEM).
        return pl.BlockSpec(shape, lambda i: (0,) * len(shape),
                            pipeline_mode=pl.Buffered(1))

    if traits["is_v7"]:
        dim_sem = (getattr(pltpu, "CORE_PARALLEL", "parallel"),)
        vmem_limit = 48 << 20
    else:
        dim_sem = ("parallel",)
        vmem_limit = (80 << 20) if (traits["big_vmem"] and tm > 256) else (48 << 20)

    tanh_dtype = jnp.bfloat16 if traits["bf16_tanh"] else jnp.float32

    out = pl.pallas_call(
        _make_kernel(tanh_dtype),
        out_shape=jax.ShapeDtypeStruct((b_pad, out_dim), out_dtype),
        grid_spec=pltpu.PrefetchScalarGridSpec(
            num_scalar_prefetch=0,
            grid=(grid_m,),
            in_specs=[
                pl.BlockSpec((tm, d_pad), lambda i: (i, 0)),   # x tile (pipelined)
                _resident(w1.shape), _resident(b1.shape),      # resident weights/biases
                _resident(w2.shape), _resident(b2.shape),
                _resident(w3.shape), _resident(b3.shape),
            ],
            out_specs=pl.BlockSpec((tm, out_dim), lambda i: (i, 0)),
        ),
        compiler_params=pltpu.CompilerParams(
            dimension_semantics=dim_sem,
            vmem_limit_bytes=vmem_limit,
        ),
    )(x, w1, b1, w2, b2, w3, b3)

    return out if b_pad == B else out[:B]


def init_params(key, input_dim):
    """Synthetic params matching the module's shapes; weights bf16, biases f32."""
    k1, k2, k3, k4, k5, k6 = jax.random.split(key, 6)
    scale = 0.02
    w1 = (scale * jax.random.normal(k1, (input_dim, 512), jnp.float32)).astype(jnp.bfloat16)
    b1 = scale * jax.random.normal(k2, (1, 512), jnp.float32)
    w2 = (scale * jax.random.normal(k3, (512, 1024), jnp.float32)).astype(jnp.bfloat16)
    b2 = scale * jax.random.normal(k4, (1, 1024), jnp.float32)
    w3 = (scale * jax.random.normal(k5, (1024, 3072), jnp.float32)).astype(jnp.bfloat16)
    b3 = scale * jax.random.normal(k6, (1, 3072), jnp.float32)
    return (w1, b1, w2, b2, w3, b3)


def reference_forward(x, params):
    """Pure-JAX f32 reference mimicking the kernel's bf16-in / f32-accumulate matmuls."""
    w1, b1, w2, b2, w3, b3 = params
    hi = jax.lax.Precision.HIGHEST
    bf = lambda a: a.astype(jnp.bfloat16).astype(jnp.float32)
    f32 = lambda a: a.astype(jnp.float32)
    h = _leaky_relu(jnp.dot(bf(x), f32(w1), precision=hi) + b1)
    h = _leaky_relu(jnp.dot(bf(h), f32(w2), precision=hi) + b2)
    return jnp.tanh(jnp.dot(bf(h), f32(w3), precision=hi) + b3)


if __name__ == "__main__":
    key = jax.random.PRNGKey(0)
    k_x, k_p = jax.random.split(key)

    batch, input_dim = 8, 64
    x = jax.random.normal(k_x, (batch, input_dim), jnp.float32)
    params = init_params(k_p, input_dim)

    out = jax.block_until_ready(generator_forward(x, params))
    ref = reference_forward(x, params)
    assert out.shape == (batch, 3072), out.shape
    assert out.dtype == jnp.bfloat16, out.dtype
    err = float(jnp.max(jnp.abs(out.astype(jnp.float32) - ref)))
    assert err < 5e-3, err

    # Exercise the grid / batch-padding path (B not a multiple of the tile).
    batch2 = 20
    x2 = jax.random.normal(k_x, (batch2, input_dim), jnp.float32)
    out2 = jax.block_until_ready(generator_forward(x2, params))
    ref2 = reference_forward(x2, params)
    assert out2.shape == (batch2, 3072), out2.shape
    err2 = float(jnp.max(jnp.abs(out2.astype(jnp.float32) - ref2)))
    assert err2 < 5e-3, err2

    print("KERNEL_OK")
</pallas_src>

<mosaic_0001>
module attributes {stable_mosaic.version = 11 : i64} {
  func.func @generator_kernel(%arg0: i32, %arg1: memref<16x128xf32, #tpu.memory_space<vmem>>, %arg2: memref<128x512xbf16, #tpu.memory_space<vmem>>, %arg3: memref<1x512xf32, #tpu.memory_space<vmem>>, %arg4: memref<512x1024xbf16, #tpu.memory_space<vmem>>, %arg5: memref<1x1024xf32, #tpu.memory_space<vmem>>, %arg6: memref<1024x3072xbf16, #tpu.memory_space<vmem>>, %arg7: memref<1x3072xf32, #tpu.memory_space<vmem>>, %arg8: memref<16x3072xbf16, #tpu.memory_space<vmem>>) attributes {dimension_semantics = [#tpu.dimension_semantics<parallel>], iteration_bounds = array<i64: 1>, scalar_prefetch = 0 : i64, scratch_operands = 0 : i64, tpu.core_type = #tpu.core_type<tc>, window_params = [{transform_indices = @transform_0, window_bounds = array<i64: 16, 128>}, {pipeline_mode = #tpu.pipeline_mode<synchronous>, transform_indices = @transform_1, window_bounds = array<i64: 128, 512>}, {pipeline_mode = #tpu.pipeline_mode<synchronous>, transform_indices = @transform_2, window_bounds = array<i64: 1, 512>}, {pipeline_mode = #tpu.pipeline_mode<synchronous>, transform_indices = @transform_3, window_bounds = array<i64: 512, 1024>}, {pipeline_mode = #tpu.pipeline_mode<synchronous>, transform_indices = @transform_4, window_bounds = array<i64: 1, 1024>}, {pipeline_mode = #tpu.pipeline_mode<synchronous>, transform_indices = @transform_5, window_bounds = array<i64: 1024, 3072>}, {pipeline_mode = #tpu.pipeline_mode<synchronous>, transform_indices = @transform_6, window_bounds = array<i64: 1, 3072>}, {transform_indices = @transform_7, window_bounds = array<i64: 16, 3072>}]} {
    %c0 = arith.constant 0 : index
    %c0_0 = arith.constant 0 : index
    %0 = vector.load %arg1[%c0, %c0_0] : memref<16x128xf32, #tpu.memory_space<vmem>>, vector<16x128xf32>
    %1 = arith.truncf %0 : vector<16x128xf32> to vector<16x128xbf16>
    %c0_1 = arith.constant 0 : index
    %c0_2 = arith.constant 0 : index
    %2 = vector.load %arg2[%c0_1, %c0_2] : memref<128x512xbf16, #tpu.memory_space<vmem>>, vector<128x512xbf16>
    %cst = arith.constant dense<0.000000e+00> : vector<16x512xf32>
    %3 = tpu.matmul %1, %2, %cst {dimension_numbers = #tpu.dot_dimension_numbers<[1], [0], [0], [1], [0, 0, 1, 1], [], []>} : vector<16x128xbf16>, vector<128x512xbf16>, vector<16x512xf32> -> vector<16x512xf32>
    %c0_3 = arith.constant 0 : index
    %c0_4 = arith.constant 0 : index
    %4 = vector.load %arg3[%c0_3, %c0_4] : memref<1x512xf32, #tpu.memory_space<vmem>>, vector<1x512xf32>
    %5 = vector.broadcast %4 : vector<1x512xf32> to vector<16x512xf32>
    %6 = arith.addf %3, %5 : vector<16x512xf32>
    %cst_5 = arith.constant 2.000000e-01 : f32
    %7 = vector.broadcast %cst_5 : f32 to vector<16x512xf32>
    %8 = arith.mulf %7, %6 : vector<16x512xf32>
    %9 = arith.maximumf %6, %8 : vector<16x512xf32>
    %10 = arith.truncf %9 : vector<16x512xf32> to vector<16x512xbf16>
    %c0_6 = arith.constant 0 : index
    %c0_7 = arith.constant 0 : index
    %11 = vector.load %arg4[%c0_6, %c0_7] : memref<512x1024xbf16, #tpu.memory_space<vmem>>, vector<512x1024xbf16>
    %cst_8 = arith.constant dense<0.000000e+00> : vector<16x1024xf32>
    %12 = tpu.matmul %10, %11, %cst_8 {dimension_numbers = #tpu.dot_dimension_numbers<[1], [0], [0], [1], [0, 0, 1, 1], [], []>} : vector<16x512xbf16>, vector<512x1024xbf16>, vector<16x1024xf32> -> vector<16x1024xf32>
    %c0_9 = arith.constant 0 : index
    %c0_10 = arith.constant 0 : index
    %13 = vector.load %arg5[%c0_9, %c0_10] : memref<1x1024xf32, #tpu.memory_space<vmem>>, vector<1x1024xf32>
    %14 = vector.broadcast %13 : vector<1x1024xf32> to vector<16x1024xf32>
    %15 = arith.addf %12, %14 : vector<16x1024xf32>
    %cst_11 = arith.constant 2.000000e-01 : f32
    %16 = vector.broadcast %cst_11 : f32 to vector<16x1024xf32>
    %17 = arith.mulf %16, %15 : vector<16x1024xf32>
    %18 = arith.maximumf %15, %17 : vector<16x1024xf32>
    %19 = arith.truncf %18 : vector<16x1024xf32> to vector<16x1024xbf16>
    %c0_12 = arith.constant 0 : index
    %c0_13 = arith.constant 0 : index
    %20 = vector.load %arg6[%c0_12, %c0_13] : memref<1024x3072xbf16, #tpu.memory_space<vmem>>, vector<1024x768xbf16>
    %cst_14 = arith.constant dense<0.000000e+00> : vector<16x768xf32>
    %21 = tpu.matmul %19, %20, %cst_14 {dimension_numbers = #tpu.dot_dimension_numbers<[1], [0], [0], [1], [0, 0, 1, 1], [], []>} : vector<16x1024xbf16>, vector<1024x768xbf16>, vector<16x768xf32> -> vector<16x768xf32>
    %c0_15 = arith.constant 0 : index
    %c0_16 = arith.constant 0 : index
    %22 = vector.load %arg7[%c0_15, %c0_16] : memref<1x3072xf32, #tpu.memory_space<vmem>>, vector<1x768xf32>
    %23 = vector.broadcast %22 : vector<1x768xf32> to vector<16x768xf32>
    %24 = arith.addf %21, %23 : vector<16x768xf32>
    %25 = math.tanh %24 : vector<16x768xf32>
    %26 = arith.truncf %25 : vector<16x768xf32> to vector<16x768xbf16>
    %c0_17 = arith.constant 0 : index
    %c0_18 = arith.constant 0 : index
    %27 = vector.load %arg8[%c0_17, %c0_18] : memref<16x3072xbf16, #tpu.memory_space<vmem>>, vector<16x768xbf16>
    tpu.vector_store %arg8[%c0_17, %c0_18], %26 {strides = array<i32>} : memref<16x3072xbf16, #tpu.memory_space<vmem>>, vector<16x768xbf16>,
    %c0_19 = arith.constant 0 : index
    %c768 = arith.constant 768 : index
    %28 = vector.load %arg6[%c0_19, %c768] : memref<1024x3072xbf16, #tpu.memory_space<vmem>>, vector<1024x768xbf16>
    %cst_20 = arith.constant dense<0.000000e+00> : vector<16x768xf32>
    %29 = tpu.matmul %19, %28, %cst_20 {dimension_numbers = #tpu.dot_dimension_numbers<[1], [0], [0], [1], [0, 0, 1, 1], [], []>} : vector<16x1024xbf16>, vector<1024x768xbf16>, vector<16x768xf32> -> vector<16x768xf32>
    %c0_21 = arith.constant 0 : index
    %c768_22 = arith.constant 768 : index
    %30 = vector.load %arg7[%c0_21, %c768_22] : memref<1x3072xf32, #tpu.memory_space<vmem>>, vector<1x768xf32>
    %31 = vector.broadcast %30 : vector<1x768xf32> to vector<16x768xf32>
    %32 = arith.addf %29, %31 : vector<16x768xf32>
    %33 = math.tanh %32 : vector<16x768xf32>
    %34 = arith.truncf %33 : vector<16x768xf32> to vector<16x768xbf16>
    %c0_23 = arith.constant 0 : index
    %c768_24 = arith.constant 768 : index
    %35 = vector.load %arg8[%c0_23, %c768_24] : memref<16x3072xbf16, #tpu.memory_space<vmem>>, vector<16x768xbf16>
    tpu.vector_store %arg8[%c0_23, %c768_24], %34 {strides = array<i32>} : memref<16x3072xbf16, #tpu.memory_space<vmem>>, vector<16x768xbf16>,
    %c0_25 = arith.constant 0 : index
    %c1536 = arith.constant 1536 : index
    %36 = vector.load %arg6[%c0_25, %c1536] : memref<1024x3072xbf16, #tpu.memory_space<vmem>>, vector<1024x768xbf16>
    %cst_26 = arith.constant dense<0.000000e+00> : vector<16x768xf32>
    %37 = tpu.matmul %19, %36, %cst_26 {dimension_numbers = #tpu.dot_dimension_numbers<[1], [0], [0], [1], [0, 0, 1, 1], [], []>} : vector<16x1024xbf16>, vector<1024x768xbf16>, vector<16x768xf32> -> vector<16x768xf32>
    %c0_27 = arith.constant 0 : index
    %c1536_28 = arith.constant 1536 : index
    %38 = vector.load %arg7[%c0_27, %c1536_28] : memref<1x3072xf32, #tpu.memory_space<vmem>>, vector<1x768xf32>
    %39 = vector.broadcast %38 : vector<1x768xf32> to vector<16x768xf32>
    %40 = arith.addf %37, %39 : vector<16x768xf32>
    %41 = math.tanh %40 : vector<16x768xf32>
    %42 = arith.truncf %41 : vector<16x768xf32> to vector<16x768xbf16>
    %c0_29 = arith.constant 0 : index
    %c1536_30 = arith.constant 1536 : index
    %43 = vector.load %arg8[%c0_29, %c1536_30] : memref<16x3072xbf16, #tpu.memory_space<vmem>>, vector<16x768xbf16>
    tpu.vector_store %arg8[%c0_29, %c1536_30], %42 {strides = array<i32>} : memref<16x3072xbf16, #tpu.memory_space<vmem>>, vector<16x768xbf16>,
    %c0_31 = arith.constant 0 : index
    %c2304 = arith.constant 2304 : index
    %44 = vector.load %arg6[%c0_31, %c2304] : memref<1024x3072xbf16, #tpu.memory_space<vmem>>, vector<1024x768xbf16>
    %cst_32 = arith.constant dense<0.000000e+00> : vector<16x768xf32>
    %45 = tpu.matmul %19, %44, %cst_32 {dimension_numbers = #tpu.dot_dimension_numbers<[1], [0], [0], [1], [0, 0, 1, 1], [], []>} : vector<16x1024xbf16>, vector<1024x768xbf16>, vector<16x768xf32> -> vector<16x768xf32>
    %c0_33 = arith.constant 0 : index
    %c2304_34 = arith.constant 2304 : index
    %46 = vector.load %arg7[%c0_33, %c2304_34] : memref<1x3072xf32, #tpu.memory_space<vmem>>, vector<1x768xf32>
    %47 = vector.broadcast %46 : vector<1x768xf32> to vector<16x768xf32>
    %48 = arith.addf %45, %47 : vector<16x768xf32>
    %49 = math.tanh %48 : vector<16x768xf32>
    %50 = arith.truncf %49 : vector<16x768xf32> to vector<16x768xbf16>
    %c0_35 = arith.constant 0 : index
    %c2304_36 = arith.constant 2304 : index
    %51 = vector.load %arg8[%c0_35, %c2304_36] : memref<16x3072xbf16, #tpu.memory_space<vmem>>, vector<16x768xbf16>
    tpu.vector_store %arg8[%c0_35, %c2304_36], %50 {strides = array<i32>} : memref<16x3072xbf16, #tpu.memory_space<vmem>>, vector<16x768xbf16>,
    return
  }
  func.func @transform_0(%arg0: i32) -> (i32, i32) {
    %c0_i32 = arith.constant 0 : i32
    %c0_i32_0 = arith.constant 0 : i32
    return %arg0, %c0_i32 : i32, i32
  }
  func.func @transform_1(%arg0: i32) -> (i32, i32) {
    %c0_i32 = arith.constant 0 : i32
    %c0_i32_0 = arith.constant 0 : i32
    %c0_i32_1 = arith.constant 0 : i32
    return %c0_i32, %c0_i32_0 : i32, i32
  }
  func.func @transform_2(%arg0: i32) -> (i32, i32) {
    %c0_i32 = arith.constant 0 : i32
    %c0_i32_0 = arith.constant 0 : i32
    %c0_i32_1 = arith.constant 0 : i32
    return %c0_i32, %c0_i32_0 : i32, i32
  }
  func.func @transform_3(%arg0: i32) -> (i32, i32) {
    %c0_i32 = arith.constant 0 : i32
    %c0_i32_0 = arith.constant 0 : i32
    %c0_i32_1 = arith.constant 0 : i32
    return %c0_i32, %c0_i32_0 : i32, i32
  }
  func.func @transform_4(%arg0: i32) -> (i32, i32) {
    %c0_i32 = arith.constant 0 : i32
    %c0_i32_0 = arith.constant 0 : i32
    %c0_i32_1 = arith.constant 0 : i32
    return %c0_i32, %c0_i32_0 : i32, i32
  }
  func.func @transform_5(%arg0: i32) -> (i32, i32) {
    %c0_i32 = arith.constant 0 : i32
    %c0_i32_0 = arith.constant 0 : i32
    %c0_i32_1 = arith.constant 0 : i32
    return %c0_i32, %c0_i32_0 : i32, i32
  }
  func.func @transform_6(%arg0: i32) -> (i32, i32) {
    %c0_i32 = arith.constant 0 : i32
    %c0_i32_0 = arith.constant 0 : i32
    %c0_i32_1 = arith.constant 0 : i32
    return %c0_i32, %c0_i32_0 : i32, i32
  }
  func.func @transform_7(%arg0: i32) -> (i32, i32) {
    %c0_i32 = arith.constant 0 : i32
    %c0_i32_0 = arith.constant 0 : i32
    return %arg0, %c0_i32 : i32, i32
  }
}

</mosaic_0001>

<bundles_post_ra>
// kernel: tpu_custom_call.1
= control target key start
LH: loop header
LB: loop body
LE: loop exit
PB: predicated region body
PF: predicated region fallthrough
CT: control target
= control target key end

     0   :  { %12 = vsyncpa [#allocation3], 0  ;;  %s16889_s0 = inlined_call_operand.hbm [shape: f32[16,128], index: 0, kind: input, shape index: {}]   ;;  %s16890_s1 = inlined_call_operand.hbm [shape: bf16[128,512], index: 1, kind: input, shape index: {}]   ;;  %s16891_s2 = inlined_call_operand.hbm [shape: f32[1,512], index: 2, kind: input, shape index: {}]   ;;  %s16892_s3 = inlined_call_operand.hbm [shape: bf16[512,1024], index: 3, kind: input, shape index: {}]   ;;  %s16893_s4 = inlined_call_operand.hbm [shape: f32[1,1024], index: 4, kind: input, shape index: {}]   ;;  %s16894_s5 = inlined_call_operand.hbm [shape: bf16[1024,3072], index: 5, kind: input, shape index: {}]   ;;  %s16895_s6 = inlined_call_operand.hbm [shape: f32[1,3072], index: 6, kind: input, shape index: {}]   ;;  %s16896_s7 = inlined_call_operand.hbm [shape: bf16[16,3072], index: 7, kind: output, shape index: {}]  }
   0x1   :  { %13 = vsyncpa [#allocation6], 0 }
   0x2   :  { %14 = vsyncpa [#allocation9], 0 }
   0x3   :  { %15 = vsyncpa [#allocation12], 0 }
   0x4   :  { %16 = vsyncpa [#allocation4], 0  ;;  %s16492_s24 = smov [#allocation5]   ;;  %s16306_s28 = scalar_lea.hbm %s16890_s1, 4096 }
   0x5   :  { %s34_s25 = sshll.u32 %s16492_s24, 4  ;;  %p16307_p0 = scmp.ne.s32.totalorder %s16890_s1, %s16306_s28  ;;  %s35_s25 = int_to_ptr.vmem [resolvable:$true] %s34_s25 }
   0x6   :  { %p16310_p1 = scmp.lt.u32.totalorder %s16306_s28, %s16890_s1 }
   0x8   :  { %p16312_p2 = pnand %p16310_p1, %p16307_p0 }
   0xa   :  { %16315 = shalt.err (!%p16312_p2)
}
   0xb   :  { %s16316_s10 = scalar_lea.vmem %s35_s25, 4096  ;;  %p16321_p4 = scmp.lt.s32.totalorder %s35_s25, %s35_s25 }
   0xc   :  { %p16317_p3 = scmp.ne.s32.totalorder %s35_s25, %s16316_s10  ;;  %p16322_p5 = scmp.lt.s32.totalorder %s16316_s10, %s16316_s10 }
   0xe   :  { %p16323_p6 = por %p16322_p5, %p16321_p4 }
  0x10   :  { %p16324_p7 = pnand %p16323_p6, %p16317_p3 }
  0x12   :  { %16327 = shalt.err (!%p16324_p7)
}
  0x13   :  { %s16493_s11 = smov 256   ;;  %s16494_s12 = smov 16  }
  0x14   :  { %40 = dma.hbm_to_vmem [thread:$0]  %s16890_s1, 4096, %s35_s25, [#allocation6], %s16493_s11, %s16493_s11, %s16494_s12  }
  0x15   :  { %s16495_s15 = smov [#allocation8]   ;;  %s16328_s19 = scalar_lea.hbm %s16892_s3, 32768 }
  0x16   :  { %s56_s16 = sshll.u32 %s16495_s15, 4  ;;  %p16329_p8 = scmp.ne.s32.totalorder %s16892_s3, %s16328_s19  ;;  %s57_s16 = int_to_ptr.vmem [resolvable:$true] %s56_s16 }
  0x17   :  { %p16332_p9 = scmp.lt.u32.totalorder %s16328_s19, %s16892_s3 }
  0x19   :  { %p16334_p10 = pnand %p16332_p9, %p16329_p8 }
  0x1b   :  { %16337 = shalt.err (!%p16334_p10)
}
  0x1c   :  { %s16338_s24 = scalar_lea.vmem %s57_s16, 32768  ;;  %p16343_p12 = scmp.lt.s32.totalorder %s57_s16, %s57_s16 }
  0x1d   :  { %p16339_p11 = scmp.ne.s32.totalorder %s57_s16, %s16338_s24  ;;  %p16344_p13 = scmp.lt.s32.totalorder %s16338_s24, %s16338_s24 }
  0x1f   :  { %p16345_p0 = por %p16344_p13, %p16343_p12 }
  0x21   :  { %p16346_p1 = pnand %p16345_p0, %p16339_p11 }
  0x23   :  { %16349 = shalt.err (!%p16346_p1)
}
  0x24   :  { %s16496_s1 = smov 512   ;;  %s16497_s25 = smov 32  }
  0x25   :  { %62 = dma.hbm_to_vmem [thread:$0]  %s16892_s3, 32768, %s57_s16, [#allocation9], %s16496_s1, %s16496_s1, %s16497_s25  }
  0x26   :  { %s16498_s28 = smov [#allocation11]   ;;  %s16350_s9 = scalar_lea.hbm %s16894_s5, 196608 }
  0x27   :  { %s78_s29 = sshll.u32 %s16498_s28, 4  ;;  %p16351_p2 = scmp.ne.s32.totalorder %s16894_s5, %s16350_s9  ;;  %s79_s29 = int_to_ptr.vmem [resolvable:$true] %s78_s29 }
  0x28   :  { %p16354_p3 = scmp.lt.u32.totalorder %s16350_s9, %s16894_s5 }
  0x2a   :  { %p16356_p4 = pnand %p16354_p3, %p16351_p2 }
  0x2c   :  { %16359 = shalt.err (!%p16356_p4)
}
  0x2d   :  { %s16360_s14 = scalar_lea.vmem %s79_s29, 196608  ;;  %p16365_p6 = scmp.lt.s32.totalorder %s79_s29, %s79_s29 }
  0x2e   :  { %p16361_p5 = scmp.ne.s32.totalorder %s79_s29, %s16360_s14  ;;  %p16366_p7 = scmp.lt.s32.totalorder %s16360_s14, %s16360_s14 }
  0x30   :  { %p16367_p8 = por %p16366_p7, %p16365_p6 }
  0x32   :  { %p16368_p9 = pnand %p16367_p8, %p16361_p5 }
  0x34   :  { %16371 = shalt.err (!%p16368_p9)
}
  0x35   :  { %s16499_s3 = smov 1536   ;;  %s16500_s15 = smov 96  }
  0x36   :  { %84 = dma.hbm_to_vmem [thread:$0]  %s16894_s5, 196608, %s79_s29, [#allocation12], %s16499_s3, %s16499_s3, %s16500_s15  }
  0x37   :  { %s16501_s18 = smov [#allocation2]   ;;  %s16372_s22 = scalar_lea.hbm %s16889_s0, 256 }
  0x38   :  { %s22_s19 = sshll.u32 %s16501_s18, 4  ;;  %p16373_p10 = scmp.ne.s32.totalorder %s16889_s0, %s16372_s22  ;;  %s23_s19 = int_to_ptr.vmem [resolvable:$true] %s22_s19 }
  0x39   :  { %p16376_p11 = scmp.lt.u32.totalorder %s16372_s22, %s16889_s0 }
  0x3b   :  { %p16378_p12 = pnand %p16376_p11, %p16373_p10 }
  0x3d   :  { %16381 = shalt.err (!%p16378_p12)
}
  0x3e   :  { %s16382_s26 = scalar_lea.vmem %s23_s19, 256  ;;  %p16387_p0 = scmp.lt.s32.totalorder %s23_s19, %s23_s19 }
  0x3f   :  { %p16383_p13 = scmp.ne.s32.totalorder %s23_s19, %s16382_s26  ;;  %p16388_p1 = scmp.lt.s32.totalorder %s16382_s26, %s16382_s26 }
  0x41   :  { %p16389_p2 = por %p16388_p1, %p16387_p0 }
  0x43   :  { %p16390_p3 = pnand %p16389_p2, %p16383_p13 }
  0x45   :  { %16393 = shalt.err (!%p16390_p3)
}
  0x46   :  { %s16502_s5 = smov 128   ;;  %s16503_s27 = smov 8  }
  0x47   :  { %28 = dma.hbm_to_vmem [thread:$0]  %s16889_s0, 256, %s23_s19, [#allocation3], %s16502_s5, %s16502_s5, %s16503_s27  }
  0x48   :  { %s16504_s30 = smov [#allocation7]   ;;  %s16505_s9 = smov [#allocation10]  }
  0x49   :  { %s47_s8 = sshll.u32 %s16504_s30, 4  ;;  %s69_s10 = sshll.u32 %s16505_s9, 4  ;;  %s48_s8 = int_to_ptr.vmem [resolvable:$true] %s47_s8  ;;  %s70_s10 = int_to_ptr.vmem [resolvable:$true] %s69_s10 }
  0x4a   :  { %s16394_s13 = scalar_lea.hbm %s16891_s2, 64 }
  0x4b   :  { %p16395_p4 = scmp.ne.s32.totalorder %s16891_s2, %s16394_s13  ;;  %p16398_p5 = scmp.lt.u32.totalorder %s16394_s13, %s16891_s2 }
  0x4d   :  { %p16400_p6 = pnand %p16398_p5, %p16395_p4 }
  0x4f   :  { %16403 = shalt.err (!%p16400_p6)
}
  0x50   :  { %s16404_s0 = scalar_lea.vmem %s48_s8, 64  ;;  %p16409_p8 = scmp.lt.s32.totalorder %s48_s8, %s48_s8 }
  0x51   :  { %p16405_p7 = scmp.ne.s32.totalorder %s48_s8, %s16404_s0  ;;  %p16410_p9 = scmp.lt.s32.totalorder %s16404_s0, %s16404_s0 }
  0x53   :  { %p16411_p10 = por %p16410_p9, %p16409_p8 }
  0x55   :  { %p16412_p11 = pnand %p16411_p10, %p16405_p7 }
  0x57   :  { %16415 = shalt.err (!%p16412_p11)
}
  0x58   :  { %50 = dma.hbm_to_vmem [thread:$0]  %s16891_s2, 64, %s48_s8, [#allocation6]  }
  0x59   :  { %s16416_s23 = scalar_lea.hbm %s16893_s4, 128 }
  0x5a   :  { %p16417_p12 = scmp.ne.s32.totalorder %s16893_s4, %s16416_s23  ;;  %p16420_p13 = scmp.lt.u32.totalorder %s16416_s23, %s16893_s4 }
  0x5c   :  { %p16422_p0 = pnand %p16420_p13, %p16417_p12 }
  0x5e   :  { %16425 = shalt.err (!%p16422_p0)
}
  0x5f   :  { %s16426_s5 = scalar_lea.vmem %s70_s10, 128  ;;  %p16431_p2 = scmp.lt.s32.totalorder %s70_s10, %s70_s10 }
  0x60   :  { %p16427_p1 = scmp.ne.s32.totalorder %s70_s10, %s16426_s5  ;;  %p16432_p3 = scmp.lt.s32.totalorder %s16426_s5, %s16426_s5 }
  0x62   :  { %p16433_p4 = por %p16432_p3, %p16431_p2 }
  0x64   :  { %p16434_p5 = pnand %p16433_p4, %p16427_p1 }
  0x66   :  { %16437 = shalt.err (!%p16434_p5)
}
  0x67   :  { %72 = dma.hbm_to_vmem [thread:$0]  %s16893_s4, 128, %s70_s10, [#allocation9]  }
  0x68   :  { %s16506_s28 = smov [#allocation13]   ;;  %s16438_s9 = scalar_lea.hbm %s16895_s6, 384 }
  0x69   :  { %s91_s29 = sshll.u32 %s16506_s28, 4  ;;  %p16439_p6 = scmp.ne.s32.totalorder %s16895_s6, %s16438_s9  ;;  %s92_s29 = int_to_ptr.vmem [resolvable:$true] %s91_s29 }
  0x6a   :  { %p16442_p7 = scmp.lt.u32.totalorder %s16438_s9, %s16895_s6 }
  0x6c   :  { %p16444_p8 = pnand %p16442_p7, %p16439_p6 }
  0x6e   :  { %16447 = shalt.err (!%p16444_p8)
}
  0x6f   :  { %s16448_s16 = scalar_lea.vmem %s92_s29, 384  ;;  %p16453_p10 = scmp.lt.s32.totalorder %s92_s29, %s92_s29 }
  0x70   :  { %p16449_p9 = scmp.ne.s32.totalorder %s92_s29, %s16448_s16  ;;  %p16454_p11 = scmp.lt.s32.totalorder %s16448_s16, %s16448_s16 }
  0x72   :  { %p16455_p12 = por %p16454_p11, %p16453_p10 }
  0x74   :  { %p16456_p13 = pnand %p16455_p12, %p16449_p9 }
  0x76   :  { %16459 = shalt.err (!%p16456_p13)
}
  0x77   :  { %94 = dma.hbm_to_vmem [thread:$0]  %s16895_s6, 384, %s92_s29, [#allocation12]  }
  0x78   :  { %16482 = dma.done.wait [#allocation3], 256  }
  0x79   :  { %16483 = vsyncadd [#allocation3], 4294967040 }
  0x7a   :  { %16484 = dma.done.wait [#allocation6], 4160  }
  0x7b   :  { %16485 = vsyncadd [#allocation6], 4294963136 }
  0x7c   :  { %16486 = dma.done.wait [#allocation9], 32896  }
  0x7d   :  { %16487 = vsyncadd [#allocation9], 4294934400 }
  0x7e   :  { %16488 = dma.done.wait [#allocation12], 196992  }
  0x7f   :  { %16489 = vsyncadd [#allocation12], 4294770304  ;;  %v16507_v0 = vmov 0   ;;  %v16159_v1 = vld [vmem:[#allocation5 + $0x4] ss:$16 sps:$4 sm:$0xff]   ;;  %v118_v29 = vld [vmem:[#allocation2 + $0x8] sm:$0xff] }
  0x80   :  { %366 = vmatprep.mubr.bf16.mxu0 %v16507_v0  ;;  %409 = vmatprep.mubr.bf16.mxu1 %v16507_v0  ;;  %v16161_v2 = vld [vmem:[#allocation5] ss:$16 sps:$4 sm:$0xff]   ;;  %v16162_v3 = vld [vmem:[#allocation5 + $0x24] ss:$16 sps:$4 sm:$0xff]   ;;  %v16183_v10 = vld [vmem:[#allocation5 + $0xc] ss:$16 sps:$4 sm:$0xff]  }
  0x81   :  { %334 = vmatprep.subr.bf16.mxu0 %v16159_v1  ;;  %v16164_v4 = vld [vmem:[#allocation5 + $0x20] ss:$16 sps:$4 sm:$0xff]   ;;  %v16165_v5 = vld [vmem:[#allocation5 + $0x44] ss:$16 sps:$4 sm:$0xff]   ;;  %v16185_v11 = vld [vmem:[#allocation5 + $0x8] ss:$16 sps:$4 sm:$0xff]   ;;  %377 = vmatprep.subr.bf16.mxu1 %v16183_v10 }
  0x82   :  { %335 = vmatpush1.bf16.msra.mxu0 %v16161_v2  ;;  %v16167_v6 = vld [vmem:[#allocation5 + $0x40] ss:$16 sps:$4 sm:$0xff]   ;;  %v16168_v7 = vld [vmem:[#allocation5 + $0x64] ss:$16 sps:$4 sm:$0xff]   ;;  %v16186_v12 = vld [vmem:[#allocation5 + $0x2c] ss:$16 sps:$4 sm:$0xff]   ;;  %378 = vmatpush1.bf16.msra.mxu1 %v16185_v11 }
  0x83   :  { %336 = vmatprep.subr.bf16.mxu0 %v16162_v3  ;;  %v16170_v8 = vld [vmem:[#allocation5 + $0x60] ss:$16 sps:$4 sm:$0xff]   ;;  %v16171_v9 = vld [vmem:[#allocation5 + $0x84] ss:$16 sps:$4 sm:$0xff]   ;;  %v16188_v14 = vld [vmem:[#allocation5 + $0x28] ss:$16 sps:$4 sm:$0xff]   ;;  %379 = vmatprep.subr.bf16.mxu1 %v16186_v12 }
  0x84   :  { %v16173_v13 = vld [vmem:[#allocation5 + $0x80] ss:$16 sps:$4 sm:$0xff]   ;;  %v16174_v15 = vld [vmem:[#allocation5 + $0xa4] ss:$16 sps:$4 sm:$0xff]   ;;  %v16189_v16 = vld [vmem:[#allocation5 + $0x4c] ss:$16 sps:$4 sm:$0xff]  }
  0x85   :  { %v16176_v17 = vld [vmem:[#allocation5 + $0xa0] ss:$16 sps:$4 sm:$0xff]   ;;  %v16191_v18 = vld [vmem:[#allocation5 + $0x48] ss:$16 sps:$4 sm:$0xff]   ;;  %v16177_v19 = vld [vmem:[#allocation5 + $0xc4] ss:$16 sps:$4 sm:$0xff]  }
  0x86   :  { %337 = vmatpush1.bf16.msra.mxu0 %v16164_v4  ;;  %380 = vmatpush1.bf16.msra.mxu1 %v16188_v14  ;;  %v16192_v20 = vld [vmem:[#allocation5 + $0x6c] ss:$16 sps:$4 sm:$0xff]   ;;  %v16179_v21 = vld [vmem:[#allocation5 + $0xc0] ss:$16 sps:$4 sm:$0xff]   ;;  %v16194_v22 = vld [vmem:[#allocation5 + $0x68] ss:$16 sps:$4 sm:$0xff]  }
  0x87   :  { %338 = vmatprep.subr.bf16.mxu0 %v16165_v5  ;;  %381 = vmatprep.subr.bf16.mxu1 %v16189_v16  ;;  %v16180_v23 = vld [vmem:[#allocation5 + $0xe4] ss:$16 sps:$4 sm:$0xff]   ;;  %v16195_v24 = vld [vmem:[#allocation5 + $0x8c] ss:$16 sps:$4 sm:$0xff]   ;;  %v16182_v27 = vld [vmem:[#allocation5 + $0xe0] ss:$16 sps:$4 sm:$0xff]  }
  0x88   :  { %v440_v25 = vld [vmem:[#allocation8] sm:$0xff]  ;;  %v117_v28 = vld [vmem:[#allocation2] sm:$0xff]  ;;  %v16198_v31 = vld [vmem:[#allocation5 + $0xac] ss:$16 sps:$4 sm:$0xff]   ;;  %s16508_s6 = smov [#allocation14]  }
  0x89   :  { %v444_v26 = vld [vmem:[#allocation8 + $0x20] sm:$0xff]  ;;  %v119_v35 = vpack.c.bf16 %v118_v29, %v117_v28  ;;  %v16201_v38 = vld [vmem:[#allocation5 + $0xcc] ss:$16 sps:$4 sm:$0xff]   ;;  %s14031_s17 = sshll.u32 %s16508_s6, 4  ;;  %s14032_s17 = int_to_ptr.vmem [resolvable:$true] %s14031_s17 }
  0x8a   :  { %339 = vmatpush1.bf16.msra.mxu0 %v16167_v6  ;;  %382 = vmatpush1.bf16.msra.mxu1 %v16191_v18  ;;  %v16197_v30 = vld [vmem:[#allocation5 + $0x88] ss:$16 sps:$4 sm:$0xff]   ;;  %v14079_v32 = vcombine.high %v440_v25, %v444_v26  ;;  %v14078_v37 = vcombine.low %v440_v25, %v444_v26  ;;  %v16204_v44 = vld [vmem:[#allocation5 + $0xec] ss:$16 sps:$4 sm:$0xff]   ;;  %s16460_s18 = scalar_lea.vmem %s14032_s17, 3072  ;;  %p16465_p1 = scmp.lt.s32.totalorder %s14032_s17, %s14032_s17 }
  0x8b   :  { %340 = vmatprep.subr.bf16.mxu0 %v16168_v7  ;;  %383 = vmatprep.subr.bf16.mxu1 %v16192_v20  ;;  %v448_v33 = vld [vmem:[#allocation8 + $0x40] sm:$0xff]  ;;  %v441_v45 = vld [vmem:[#allocation8 + $0x8] sm:$0xff]  ;;  %p16461_p0 = scmp.ne.s32.totalorder %s14032_s17, %s16460_s18  ;;  %p16466_p2 = scmp.lt.s32.totalorder %s16460_s18, %s16460_s18 }
  0x8c   :  { %v452_v34 = vld [vmem:[#allocation8 + $0x60] sm:$0xff]  ;;  %v445_v47 = vld [vmem:[#allocation8 + $0x28] sm:$0xff] }
  0x8d   :  { %v16200_v36 = vld [vmem:[#allocation5 + $0xa8] ss:$16 sps:$4 sm:$0xff]   ;;  %v14087_v39 = vcombine.high %v448_v33, %v452_v34  ;;  %v14086_v43 = vcombine.low %v448_v33, %v452_v34  ;;  %v14081_v52 = vcombine.high %v441_v45, %v445_v47  ;;  %v449_v53 = vld [vmem:[#allocation8 + $0x48] sm:$0xff]  ;;  %v14080_v58 = vcombine.low %v441_v45, %v445_v47  ;;  %p16467_p3 = por %p16466_p2, %p16465_p1 }
  0x8e   :  { %341 = vmatpush1.bf16.msra.mxu0 %v16170_v8  ;;  %384 = vmatpush1.bf16.msra.mxu1 %v16194_v22  ;;  %v456_v40 = vld [vmem:[#allocation8 + $0x80] sm:$0xff]  ;;  %v453_v55 = vld [vmem:[#allocation8 + $0x68] sm:$0xff] }
  0x8f   :  { %342 = vmatprep.subr.bf16.mxu0 %v16171_v9  ;;  %385 = vmatprep.subr.bf16.mxu1 %v16195_v24  ;;  %v460_v41 = vld [vmem:[#allocation8 + $0xa0] sm:$0xff]  ;;  %v14089_v60 = vcombine.high %v449_v53, %v453_v55  ;;  %v457_v61 = vld [vmem:[#allocation8 + $0x88] sm:$0xff]  ;;  %v14088_v2 = vcombine.low %v449_v53, %v453_v55  ;;  %p16468_p4 = pnand %p16467_p3, %p16461_p0 }
  0x90   :  { %v16203_v42 = vld [vmem:[#allocation5 + $0xc8] ss:$16 sps:$4 sm:$0xff]   ;;  %v14095_v46 = vcombine.high %v456_v40, %v460_v41  ;;  %v14094_v51 = vcombine.low %v456_v40, %v460_v41  ;;  %v461_v63 = vld [vmem:[#allocation8 + $0xa8] sm:$0xff] }
  0x91   :  { %v464_v48 = vld [vmem:[#allocation8 + $0xc0] sm:$0xff]  ;;  %v14097_v4 = vcombine.high %v457_v61, %v461_v63  ;;  %v465_v5 = vld [vmem:[#allocation8 + $0xc8] sm:$0xff]  ;;  %v14096_v10 = vcombine.low %v457_v61, %v461_v63 }
  0x92   :  { %343 = vmatpush1.bf16.msra.mxu0 %v16173_v13  ;;  %386 = vmatpush1.bf16.msra.mxu1 %v16197_v30  ;;  %v468_v49 = vld [vmem:[#allocation8 + $0xe0] sm:$0xff]  ;;  %v469_v7 = vld [vmem:[#allocation8 + $0xe8] sm:$0xff] }
  0x93   :  { %344 = vmatprep.subr.bf16.mxu0 %v16174_v15  ;;  %387 = vmatprep.subr.bf16.mxu1 %v16198_v31  ;;  %v16206_v50 = vld [vmem:[#allocation5 + $0xe8] ss:$16 sps:$4 sm:$0xff]   ;;  %v14103_v54 = vcombine.high %v464_v48, %v468_v49  ;;  %v14102_v59 = vcombine.low %v464_v48, %v468_v49  ;;  %v14105_v12 = vcombine.high %v465_v5, %v469_v7  ;;  %v473_v13 = vld [vmem:[#allocation8 + $0x108] sm:$0xff] }
  0x94   :  { %v472_v56 = vld [vmem:[#allocation8 + $0x100] sm:$0xff]  ;;  %v477_v15 = vld [vmem:[#allocation8 + $0x128] sm:$0xff]  ;;  %v14104_v18 = vcombine.low %v465_v5, %v469_v7 }
  0x95   :  { %v476_v57 = vld [vmem:[#allocation8 + $0x120] sm:$0xff]  ;;  %v14113_v20 = vcombine.high %v473_v13, %v477_v15  ;;  %v14112_v26 = vcombine.low %v473_v13, %v477_v15  ;;  %v489_v29 = vld [vmem:[#allocation8 + $0x188] sm:$0xff] }
  0x96   :  { %345 = vmatpush1.bf16.msra.mxu0 %v16176_v17  ;;  %388 = vmatpush1.bf16.msra.mxu1 %v16200_v36  ;;  %v14111_v62 = vcombine.high %v472_v56, %v476_v57  ;;  %v480_v0 = vld [vmem:[#allocation8 + $0x140] sm:$0xff]  ;;  %v14110_v3 = vcombine.low %v472_v56, %v476_v57  ;;  %v493_v31 = vld [vmem:[#allocation8 + $0x1a8] sm:$0xff] }
  0x97   :  { %346 = vmatprep.subr.bf16.mxu0 %v16177_v19  ;;  %389 = vmatprep.subr.bf16.mxu1 %v16201_v38  ;;  %v484_v1 = vld [vmem:[#allocation8 + $0x160] sm:$0xff]  ;;  %v14129_v36 = vcombine.high %v489_v29, %v493_v31  ;;  %v505_v45 = vld [vmem:[#allocation8 + $0x208] sm:$0xff] }
  0x98   :  { %v14119_v6 = vcombine.high %v480_v0, %v484_v1  ;;  %v488_v8 = vld [vmem:[#allocation8 + $0x180] sm:$0xff]  ;;  %v14118_v11 = vcombine.low %v480_v0, %v484_v1  ;;  %v509_v47 = vld [vmem:[#allocation8 + $0x228] sm:$0xff] }
  0x99   :  { %v492_v9 = vld [vmem:[#allocation8 + $0x1a0] sm:$0xff]  ;;  %v513_v53 = vld [vmem:[#allocation8 + $0x248] sm:$0xff] }
  0x9a   :  { %347 = vmatpush1.bf16.msra.mxu0 %v16179_v21  ;;  %390 = vmatpush1.bf16.msra.mxu1 %v16203_v42  ;;  %v14127_v14 = vcombine.high %v488_v8, %v492_v9  ;;  %v496_v16 = vld [vmem:[#allocation8 + $0x1c0] sm:$0xff]  ;;  %v14126_v19 = vcombine.low %v488_v8, %v492_v9  ;;  %v481_v21 = vld [vmem:[#allocation8 + $0x148] sm:$0xff]  ;;  %v14128_v42 = vcombine.low %v489_v29, %v493_v31 }
  0x9b   :  { %348 = vmatprep.subr.bf16.mxu0 %v16180_v23  ;;  %391 = vmatprep.subr.bf16.mxu1 %v16204_v44  ;;  %v500_v17 = vld [vmem:[#allocation8 + $0x1e0] sm:$0xff]  ;;  %v485_v23 = vld [vmem:[#allocation8 + $0x168] sm:$0xff] }
  0x9c   :  { %v14135_v22 = vcombine.high %v496_v16, %v500_v17  ;;  %v504_v24 = vld [vmem:[#allocation8 + $0x200] sm:$0xff]  ;;  %v14121_v28 = vcombine.high %v481_v21, %v485_v23  ;;  %v14120_v34 = vcombine.low %v481_v21, %v485_v23  ;;  %v517_v55 = vld [vmem:[#allocation8 + $0x268] sm:$0xff] }
  0x9d   :  { %v508_v25 = vld [vmem:[#allocation8 + $0x220] sm:$0xff]  ;;  %v525_v63 = vld [vmem:[#allocation8 + $0x2a8] sm:$0xff]  ;;  %v14152_v0 = vcombine.low %v513_v53, %v517_v55 }
  0x9e   :  { %349 = vmatpush1.bf16.msra.mxu0 %v16182_v27  ;;  %392 = vmatpush1.bf16.msra.mxu1 %v16206_v50  ;;  %v14134_v27 = vcombine.low %v496_v16, %v500_v17  ;;  %v14143_v30 = vcombine.high %v504_v24, %v508_v25  ;;  %v516_v33 = vld [vmem:[#allocation8 + $0x260] sm:$0xff]  ;;  %v537_v7 = vld [vmem:[#allocation8 + $0x308] sm:$0xff] }
  0x9f   :  { %2018 = vmatprep.subr.bf16.mxu0 %v14079_v32  ;;  %2104 = vmatprep.subr.bf16.mxu1 %v14081_v52  ;;  %v512_v32 = vld [vmem:[#allocation8 + $0x240] sm:$0xff]  ;;  %v14145_v52 = vcombine.high %v505_v45, %v509_v47  ;;  %v541_v8 = vld [vmem:[#allocation8 + $0x328] sm:$0xff] }
  0xa0   :  { %v14151_v38 = vcombine.high %v512_v32, %v516_v33  ;;  %v520_v40 = vld [vmem:[#allocation8 + $0x280] sm:$0xff]  ;;  %v549_v16 = vld [vmem:[#allocation8 + $0x368] sm:$0xff] }
  0xa1   :  { %367 = vmatmul.mubr.bf16.vlgmr.msra.gmra.mrb[0].mxu0 %v119_v35  ;;  %410 = vmatmul.mubr.bf16.vlgmr.msra.gmra.mrb[0].mxu1 %v119_v35  ;;  %v14142_v35 = vcombine.low %v504_v24, %v508_v25  ;;  %v524_v41 = vld [vmem:[#allocation8 + $0x2a0] sm:$0xff]  ;;  %v557_v24 = vld [vmem:[#allocation8 + $0x3a8] sm:$0xff] }
  0xa2   :  { %2019 = vmatpush1.bf16.msra.mxu0 %v14078_v37  ;;  %2105 = vmatpush1.bf16.msra.mxu1 %v14080_v58  ;;  %v497_v37 = vld [vmem:[#allocation8 + $0x1c8] sm:$0xff]  ;;  %v528_v48 = vld [vmem:[#allocation8 + $0x2c0] sm:$0xff]  ;;  %v14144_v58 = vcombine.low %v505_v45, %v509_v47  ;;  %v152_v47 = vld [vmem:[#allocation7] sm:$0xf] }
  0xa3   :  { %2020 = vmatprep.subr.bf16.mxu0 %v14087_v39  ;;  %2106 = vmatprep.subr.bf16.mxu1 %v14089_v60  ;;  %v501_v39 = vld [vmem:[#allocation8 + $0x1e8] sm:$0xff]  ;;  %v532_v49 = vld [vmem:[#allocation8 + $0x2e0] sm:$0xff]  ;;  %v14153_v60 = vcombine.high %v513_v53, %v517_v55 }
  0xa4   :  { %v14137_v44 = vcombine.high %v497_v37, %v501_v39  ;;  %v14136_v50 = vcombine.low %v497_v37, %v501_v39  ;;  %v536_v56 = vld [vmem:[#allocation8 + $0x300] sm:$0xff] }
  0xa5   :  { %v540_v57 = vld [vmem:[#allocation8 + $0x320] sm:$0xff] }
  0xa6   :  { %2021 = vmatpush1.bf16.msra.mxu0 %v14086_v43  ;;  %2107 = vmatpush1.bf16.msra.mxu1 %v14088_v2  ;;  %v14150_v43 = vcombine.low %v512_v32, %v516_v33  ;;  %v14175_v61 = vcombine.high %v536_v56, %v540_v57  ;;  %v14174_v1 = vcombine.low %v536_v56, %v540_v57  ;;  %v548_v13 = vld [vmem:[#allocation8 + $0x360] sm:$0xff]  ;;  %v565_v32 = vld [vmem:[#allocation8 + $0x3e8] sm:$0xff] }
  0xa7   :  { %2022 = vmatprep.subr.bf16.mxu0 %v14095_v46  ;;  %2108 = vmatprep.subr.bf16.mxu1 %v14097_v4  ;;  %v14159_v46 = vcombine.high %v520_v40, %v524_v41  ;;  %v533_v4 = vld [vmem:[#allocation8 + $0x2e8] sm:$0xff]  ;;  %v556_v21 = vld [vmem:[#allocation8 + $0x3a0] sm:$0xff] }
  0xa8   :  { %v564_v29 = vld [vmem:[#allocation8 + $0x3e0] sm:$0xff] }
  0xa9   :  { %v572_v37 = vld [vmem:[#allocation8 + $0x420] sm:$0xff] }
  0xaa   :  { %2023 = vmatpush1.bf16.msra.mxu0 %v14094_v51  ;;  %2109 = vmatpush1.bf16.msra.mxu1 %v14096_v10  ;;  %v14158_v51 = vcombine.low %v520_v40, %v524_v41  ;;  %v14177_v10 = vcombine.high %v537_v7, %v541_v8  ;;  %v573_v40 = vld [vmem:[#allocation8 + $0x428] sm:$0xff] }
  0xab   :  { %2024 = vmatprep.subr.bf16.mxu0 %v14103_v54  ;;  %2110 = vmatprep.subr.bf16.mxu1 %v14105_v12  ;;  %v14167_v54 = vcombine.high %v528_v48, %v532_v49  ;;  %v544_v12 = vld [vmem:[#allocation8 + $0x340] sm:$0xff] }
  0xac   :  { %v14183_v15 = vcombine.high %v544_v12, %v548_v13  ;;  %v14182_v17 = vcombine.low %v544_v12, %v548_v13 }
  0xae   :  { %2025 = vmatpush1.bf16.msra.mxu0 %v14102_v59  ;;  %2111 = vmatpush1.bf16.msra.mxu1 %v14104_v18  ;;  %v14166_v59 = vcombine.low %v528_v48, %v532_v49 }
  0xaf   :  { %2026 = vmatprep.subr.bf16.mxu0 %v14111_v62  ;;  %2112 = vmatprep.subr.bf16.mxu1 %v14113_v20  ;;  %v521_v62 = vld [vmem:[#allocation8 + $0x288] sm:$0xff]  ;;  %v552_v20 = vld [vmem:[#allocation8 + $0x380] sm:$0xff] }
  0xb0   :  { %v14161_v2 = vcombine.high %v521_v62, %v525_v63  ;;  %v14160_v5 = vcombine.low %v521_v62, %v525_v63  ;;  %v14191_v23 = vcombine.high %v552_v20, %v556_v21  ;;  %v14190_v25 = vcombine.low %v552_v20, %v556_v21 }
  0xb2   :  { %2027 = vmatpush1.bf16.msra.mxu0 %v14110_v3  ;;  %2113 = vmatpush1.bf16.msra.mxu1 %v14112_v26  ;;  %v529_v3 = vld [vmem:[#allocation8 + $0x2c8] sm:$0xff] }
  0xb3   :  { %2028 = vmatprep.subr.bf16.mxu0 %v14119_v6  ;;  %2114 = vmatprep.subr.bf16.mxu1 %v14121_v28  ;;  %v14169_v6 = vcombine.high %v529_v3, %v533_v4  ;;  %v14168_v9 = vcombine.low %v529_v3, %v533_v4  ;;  %v560_v28 = vld [vmem:[#allocation8 + $0x3c0] sm:$0xff] }
  0xb4   :  { %v14199_v31 = vcombine.high %v560_v28, %v564_v29  ;;  %v14198_v33 = vcombine.low %v560_v28, %v564_v29  ;;  %v576_v3 = vld [vmem:[#allocation8 + $0x440] sm:$0xff] }
  0xb5   :  { %v592_v28 = vld [vmem:[#allocation8 + $0x4c0] sm:$0xff] }
  0xb6   :  { %2029 = vmatpush1.bf16.msra.mxu0 %v14118_v11  ;;  %2115 = vmatpush1.bf16.msra.mxu1 %v14120_v34  ;;  %v14176_v11 = vcombine.low %v537_v7, %v541_v8  ;;  %v577_v7 = vld [vmem:[#allocation8 + $0x448] sm:$0xff] }
  0xb7   :  { %2030 = vmatprep.subr.bf16.mxu0 %v14127_v14  ;;  %2116 = vmatprep.subr.bf16.mxu1 %v14129_v36  ;;  %v545_v14 = vld [vmem:[#allocation8 + $0x348] sm:$0xff]  ;;  %v568_v36 = vld [vmem:[#allocation8 + $0x400] sm:$0xff] }
  0xb8   :  { %v14184_v18 = vcombine.low %v545_v14, %v549_v16  ;;  %v14207_v39 = vcombine.high %v568_v36, %v572_v37  ;;  %v14206_v41 = vcombine.low %v568_v36, %v572_v37  ;;  %v581_v8 = vld [vmem:[#allocation8 + $0x468] sm:$0xff] }
  0xba   :  { %2031 = vmatpush1.bf16.msra.mxu0 %v14126_v19  ;;  %2117 = vmatpush1.bf16.msra.mxu1 %v14128_v42  ;;  %v14185_v19 = vcombine.high %v545_v14, %v549_v16  ;;  %v14217_v14 = vcombine.high %v577_v7, %v581_v8  ;;  %v588_v16 = vld [vmem:[#allocation8 + $0x4a0] sm:$0xff] }
  0xbb   :  { %2032 = vmatprep.subr.bf16.mxu0 %v14135_v22  ;;  %2118 = vmatprep.subr.bf16.mxu1 %v14137_v44  ;;  %v553_v22 = vld [vmem:[#allocation8 + $0x388] sm:$0xff]  ;;  %v154_v44 = vlaneseq }
  0xbc   :  { %v14192_v26 = vcombine.low %v553_v22, %v557_v24 }
  0xbd   :  { %v16636_v45 = vshrl.u32 %v154_v44, 7 }
  0xbe   :  { %2033 = vmatpush1.bf16.msra.mxu0 %v14134_v27  ;;  %2119 = vmatpush1.bf16.msra.mxu1 %v14136_v50  ;;  %v14193_v27 = vcombine.high %v553_v22, %v557_v24 }
  0xbf   :  { %2034 = vmatprep.subr.bf16.mxu0 %v14143_v30  ;;  %2120 = vmatprep.subr.bf16.mxu1 %v14145_v52  ;;  %v561_v30 = vld [vmem:[#allocation8 + $0x3c8] sm:$0xff]  ;;  %v16642_v48 = vsub.s32 1, %v16636_v45  ;;  %v16647_v62 = vsub.s32 2, %v16636_v45 }
  0xc0   :  { %v14200_v34 = vcombine.low %v561_v30, %v565_v32 }
  0xc1   :  { %v161_v50 = vrot.slane %v152_v47, %v16642_v48 }
  0xc2   :  { %2035 = vmatpush1.bf16.msra.mxu0 %v14142_v35  ;;  %2121 = vmatpush1.bf16.msra.mxu1 %v14144_v58  ;;  %v14201_v35 = vcombine.high %v561_v30, %v565_v32  ;;  %v596_v32 = vld [vmem:[#allocation8 + $0x4e0] sm:$0xff] }
  0xc3   :  { %2036 = vmatprep.subr.bf16.mxu0 %v14151_v38  ;;  %2122 = vmatprep.subr.bf16.mxu1 %v14153_v60  ;;  %v569_v38 = vld [vmem:[#allocation8 + $0x408] sm:$0xff] }
  0xc4   :  { %v14208_v42 = vcombine.low %v569_v38, %v573_v40 }
  0xc6   :  { %2037 = vmatpush1.bf16.msra.mxu0 %v14150_v43  ;;  %2123 = vmatpush1.bf16.msra.mxu1 %v14152_v0  ;;  %v14209_v43 = vcombine.high %v569_v38, %v573_v40  ;;  %v16650_v0 = vsub.s32 3, %v16636_v45 }
  0xc7   :  { %2038 = vmatprep.subr.bf16.mxu0 %v14159_v46  ;;  %2124 = vmatprep.subr.bf16.mxu1 %v14161_v2  ;;  %v16639_v46 = vsub.s32 0, %v16636_v45 }
  0xc8   :  { %v169_v12 = vrot.slane %v152_v47, %v16650_v0 }
  0xc9   :  { %v157_v49 = vrot.slane %v152_v47, %v16639_v46 }
  0xca   :  { %2039 = vmatpush1.bf16.msra.mxu0 %v14158_v51  ;;  %2125 = vmatpush1.bf16.msra.mxu1 %v14160_v5 }
  0xcb   :  { %2040 = vmatprep.subr.bf16.mxu0 %v14167_v54  ;;  %2126 = vmatprep.subr.bf16.mxu1 %v14169_v6  ;;  %v580_v6 = vld [vmem:[#allocation8 + $0x460] sm:$0xff] }
  0xcc   :  { %v14215_v13 = vcombine.high %v576_v3, %v580_v6  ;;  %v14214_v22 = vcombine.low %v576_v3, %v580_v6  ;;  %v616_v6 = vld [vmem:[#allocation8 + $0x580] sm:$0xff] }
  0xce   :  { %2041 = vmatpush1.bf16.msra.mxu0 %v14166_v59  ;;  %2127 = vmatpush1.bf16.msra.mxu1 %v14168_v9 }
  0xcf   :  { %2042 = vmatprep.subr.bf16.mxu0 %v14175_v61  ;;  %2128 = vmatprep.subr.bf16.mxu1 %v14177_v10  ;;  %v165_v10 = vrot.slane %v152_v47, %v16647_v62  ;;  %v600_v47 = vld [vmem:[#allocation8 + $0x500] sm:$0xff] }
  0xd2   :  { %2043 = vmatpush1.bf16.msra.mxu0 %v14174_v1  ;;  %2129 = vmatpush1.bf16.msra.mxu1 %v14176_v11 }
  0xd3   :  { %2044 = vmatprep.subr.bf16.mxu0 %v14183_v15  ;;  %2130 = vmatprep.subr.bf16.mxu1 %v14185_v19  ;;  %v584_v15 = vld [vmem:[#allocation8 + $0x480] sm:$0xff] }
  0xd6   :  { %2045 = vmatpush1.bf16.msra.mxu0 %v14182_v17  ;;  %2131 = vmatpush1.bf16.msra.mxu1 %v14184_v18  ;;  %v585_v17 = vld [vmem:[#allocation8 + $0x488] sm:$0xff] }
  0xd7   :  { %2046 = vmatprep.subr.bf16.mxu0 %v14191_v23  ;;  %2132 = vmatprep.subr.bf16.mxu1 %v14193_v27  ;;  %v589_v18 = vld [vmem:[#allocation8 + $0x4a8] sm:$0xff]  ;;  %v14216_v23 = vcombine.low %v577_v7, %v581_v8  ;;  %v620_v7 = vld [vmem:[#allocation8 + $0x5a0] sm:$0xff] }
  0xd8   :  { %v14225_v27 = vcombine.high %v585_v17, %v589_v18  ;;  %v14224_v40 = vcombine.low %v585_v17, %v589_v18  ;;  %v617_v8 = vld [vmem:[#allocation8 + $0x588] sm:$0xff]  ;;  %v628_v17 = vld [vmem:[#allocation8 + $0x5e0] sm:$0xff] }
  0xd9   :  { %v625_v18 = vld [vmem:[#allocation8 + $0x5c8] sm:$0xff] }
  0xda   :  { %2047 = vmatpush1.bf16.msra.mxu0 %v14190_v25  ;;  %2133 = vmatpush1.bf16.msra.mxu1 %v14192_v26  ;;  %v14223_v26 = vcombine.high %v584_v15, %v588_v16 }
  0xdb   :  { %2048 = vmatprep.subr.bf16.mxu0 %v14199_v31  ;;  %2134 = vmatprep.subr.bf16.mxu1 %v14201_v35 }
  0xde   :  { %2049 = vmatpush1.bf16.msra.mxu0 %v14198_v33  ;;  %2135 = vmatpush1.bf16.msra.mxu1 %v14200_v34  ;;  %v593_v33 = vld [vmem:[#allocation8 + $0x4c8] sm:$0xff] }
  0xdf   :  { %2061 = vmatprep.subr.bf16.mxu0 %v14207_v39  ;;  %2147 = vmatprep.subr.bf16.mxu1 %v14209_v43  ;;  %v597_v34 = vld [vmem:[#allocation8 + $0x4e8] sm:$0xff]  ;;  %v14222_v39 = vcombine.low %v584_v15, %v588_v16  ;;  %v14231_v43 = vcombine.high %v592_v28, %v596_v32  ;;  %v624_v16 = vld [vmem:[#allocation8 + $0x5c0] sm:$0xff] }
  0xe0   :  { %v14233_v44 = vcombine.high %v593_v33, %v597_v34 }
 0x174   :  { %v368_v51 = vpop.f32.mrb[0].mxu0  ;;  %v411_v19 = vpop.f32.mrb[0].mxu1 }
 0x175   :  { %v369_v52 = vadd.f32 %v368_v51, %v157_v49  ;;  %v370_v53 = vpop.f32.mrb[1].mxu0  ;;  %v412_v20 = vadd.f32 %v411_v19, %v165_v10  ;;  %v413_v21 = vpop.f32.mrb[1].mxu1  ;;  %v601_v51 = vld [vmem:[#allocation8 + $0x508] sm:$0xff] }
 0x176   :  { %v371_v54 = vadd.f32 %v370_v53, %v161_v50  ;;  %v372_v55 = vpop.f32.mrb[2].mxu0  ;;  %v414_v24 = vadd.f32 %v413_v21, %v169_v12  ;;  %v415_v25 = vpop.f32.mrb[2].mxu1  ;;  %v629_v19 = vld [vmem:[#allocation8 + $0x5e8] sm:$0xff] }
 0x177   :  { %v420_v56 = vmul.f32 0.2, %v369_v52  ;;  %v373_v57 = vadd.f32 %v372_v55, %v157_v49  ;;  %v374_v58 = vpop.f32.mrb[3].mxu0  ;;  %v422_v29 = vmul.f32 0.2, %v412_v20  ;;  %v416_v30 = vadd.f32 %v415_v25, %v165_v10  ;;  %v417_v31 = vpop.f32.mrb[3].mxu1 }
 0x178   :  { %v421_v59 = vmul.f32 0.2, %v371_v54  ;;  %v375_v60 = vadd.f32 %v374_v58, %v161_v50  ;;  %v423_v35 = vmul.f32 0.2, %v414_v24  ;;  %v418_v36 = vadd.f32 %v417_v31, %v169_v12  ;;  %v604_v50 = vld [vmem:[#allocation8 + $0x520] sm:$0xff]  ;;  %v621_v10 = vld [vmem:[#allocation8 + $0x5a8] sm:$0xff] }
 0x179   :  { %v424_v61 = vmul.f32 0.2, %v373_v57  ;;  %v428_v1 = vmax.f32 %v369_v52, %v420_v56  ;;  %v430_v37 = vmax.f32 %v412_v20, %v422_v29  ;;  %v426_v38 = vmul.f32 0.2, %v416_v30  ;;  %v605_v52 = vld [vmem:[#allocation8 + $0x528] sm:$0xff]  ;;  %v636_v25 = vld [vmem:[#allocation8 + $0x620] sm:$0xff] }
 0x17a   :  { %v425_v63 = vmul.f32 0.2, %v375_v60  ;;  %v429_v4 = vmax.f32 %v371_v54, %v421_v59  ;;  %v14230_v55 = vcombine.low %v592_v28, %v596_v32  ;;  %v14232_v56 = vcombine.low %v593_v33, %v597_v34  ;;  %v640_v32 = vld [vmem:[#allocation8 + $0x640] sm:$0xff]  ;;  %v641_v34 = vld [vmem:[#allocation8 + $0x648] sm:$0xff] }
 0x17b   :  { %v432_v2 = vmax.f32 %v373_v57, %v424_v61  ;;  %v434_v49 = vmax.f32 %v416_v30, %v426_v38  ;;  %v14239_v58 = vcombine.high %v600_v47, %v604_v50  ;;  %v14241_v59 = vcombine.high %v601_v51, %v605_v52  ;;  %v612_v61 = vld [vmem:[#allocation8 + $0x560] sm:$0xff] }
 0x17c   :  { %v433_v5 = vmax.f32 %v375_v60, %v425_v63  ;;  %v608_v60 = vld [vmem:[#allocation8 + $0x540] sm:$0xff]  ;;  %v609_v63 = vld [vmem:[#allocation8 + $0x548] sm:$0xff]  ;;  %v14240_v3 = vcombine.low %v601_v51, %v605_v52  ;;  %v14257_v15 = vcombine.high %v617_v8, %v621_v10  ;;  %v14254_v20 = vcombine.low %v616_v6, %v620_v7 }
 0x17d   :  { %v16652_v9 = vpack.c.bf16 %v432_v2, %v428_v1  ;;  %v16662_v54 = vpack.c.bf16 %v434_v49, %v430_v37  ;;  %v613_v1 = vld [vmem:[#allocation8 + $0x568] sm:$0xff]  ;;  %v14238_v2 = vcombine.low %v600_v47, %v604_v50  ;;  %v14246_v12 = vcombine.low %v608_v60, %v612_v61  ;;  %v644_v33 = vld [vmem:[#allocation8 + $0x660] sm:$0xff] }
 0x17e   :  { %v16655_v11 = vpack.c.bf16 %v433_v5, %v429_v4  ;;  %v14247_v4 = vcombine.high %v608_v60, %v612_v61  ;;  %v14249_v5 = vcombine.high %v609_v63, %v613_v1  ;;  %v14256_v21 = vcombine.low %v617_v8, %v621_v10  ;;  %v656_v51 = vld [vmem:[#allocation8 + $0x6c0] sm:$0xff]  ;;  %v673_v10 = vld [vmem:[#allocation8 + $0x748] sm:$0xff] }
 0x17f   :  { %v14262_v28 = vcombine.low %v624_v16, %v628_v17  ;;  %v14264_v29 = vcombine.low %v625_v18, %v629_v19  ;;  %v14279_v38 = vcombine.high %v640_v32, %v644_v33  ;;  %v660_v52 = vld [vmem:[#allocation8 + $0x6e0] sm:$0xff] }
 0x180   :  { %2050 = vmatprep.mubr.bf16.mxu0 %v16655_v11  ;;  %2136 = vmatprep.mubr.bf16.mxu1 %v16655_v11  ;;  %v664_v61 = vld [vmem:[#allocation8 + $0x700] sm:$0xff] }
 0x181   :  { %2051 = vmatmul.mubr.bf16.vlgmr.msra.gmra.mrb[4].mxu0 %v16652_v9  ;;  %2137 = vmatmul.mubr.bf16.vlgmr.msra.gmra.mrb[4].mxu1 %v16652_v9  ;;  %v676_v8 = vld [vmem:[#allocation8 + $0x760] sm:$0xff] }
 0x182   :  { %2062 = vmatpush1.bf16.msra.mxu0 %v14206_v41  ;;  %2148 = vmatpush1.bf16.msra.mxu1 %v14208_v42  ;;  %v431_v41 = vmax.f32 %v414_v24, %v423_v35  ;;  %v427_v42 = vmul.f32 0.2, %v418_v36  ;;  %v632_v24 = vld [vmem:[#allocation8 + $0x600] sm:$0xff]  ;;  %v645_v35 = vld [vmem:[#allocation8 + $0x668] sm:$0xff] }
 0x183   :  { %2063 = vmatprep.subr.bf16.mxu0 %v14215_v13  ;;  %2149 = vmatprep.subr.bf16.mxu1 %v14217_v14  ;;  %v14248_v13 = vcombine.low %v609_v63, %v613_v1  ;;  %v14255_v14 = vcombine.high %v616_v6, %v620_v7  ;;  %v14271_v30 = vcombine.high %v632_v24, %v636_v25  ;;  %v668_v63 = vld [vmem:[#allocation8 + $0x720] sm:$0xff]  ;;  %v665_v1 = vld [vmem:[#allocation8 + $0x708] sm:$0xff] }
 0x184   :  { %v435_v53 = vmax.f32 %v418_v36, %v427_v42  ;;  %v14270_v36 = vcombine.low %v632_v24, %v636_v25  ;;  %v649_v42 = vld [vmem:[#allocation8 + $0x688] sm:$0xff]  ;;  %v14280_v47 = vcombine.low %v641_v34, %v645_v35  ;;  %v672_v7 = vld [vmem:[#allocation8 + $0x740] sm:$0xff] }
 0x185   :  { %v688_v25 = vld [vmem:[#allocation8 + $0x7c0] sm:$0xff] }
 0x186   :  { %2064 = vmatpush1.bf16.msra.mxu0 %v14214_v22  ;;  %2150 = vmatpush1.bf16.msra.mxu1 %v14216_v23  ;;  %v16664_v57 = vpack.c.bf16 %v435_v53, %v431_v41  ;;  %v14263_v22 = vcombine.high %v624_v16, %v628_v17  ;;  %v14265_v23 = vcombine.high %v625_v18, %v629_v19  ;;  %v652_v41 = vld [vmem:[#allocation8 + $0x6a0] sm:$0xff]  ;;  %v657_v53 = vld [vmem:[#allocation8 + $0x6c8] sm:$0xff] }
 0x187   :  { %2065 = vmatprep.subr.bf16.mxu0 %v14223_v26  ;;  %2151 = vmatprep.subr.bf16.mxu1 %v14225_v27  ;;  %v633_v26 = vld [vmem:[#allocation8 + $0x608] sm:$0xff]  ;;  %v680_v17 = vld [vmem:[#allocation8 + $0x780] sm:$0xff] }
 0x188   :  { %2093 = vmatprep.mubr.bf16.mxu0 %v16664_v57  ;;  %2179 = vmatprep.mubr.bf16.mxu1 %v16664_v57  ;;  %v637_v27 = vld [vmem:[#allocation8 + $0x628] sm:$0xff]  ;;  %v684_v18 = vld [vmem:[#allocation8 + $0x7a0] sm:$0xff] }
 0x189   :  { %v14273_v31 = vcombine.high %v633_v26, %v637_v27  ;;  %v14272_v37 = vcombine.low %v633_v26, %v637_v27  ;;  %v681_v19 = vld [vmem:[#allocation8 + $0x788] sm:$0xff]  ;;  %v692_v26 = vld [vmem:[#allocation8 + $0x7e0] sm:$0xff] }
 0x18a   :  { %2066 = vmatpush1.bf16.msra.mxu0 %v14222_v39  ;;  %2152 = vmatpush1.bf16.msra.mxu1 %v14224_v40  ;;  %v14281_v39 = vcombine.high %v641_v34, %v645_v35  ;;  %v648_v40 = vld [vmem:[#allocation8 + $0x680] sm:$0xff]  ;;  %v689_v27 = vld [vmem:[#allocation8 + $0x7c8] sm:$0xff]  ;;  %v446_v34 = vld [vmem:[#allocation8 + $0x30] sm:$0xff] }
 0x18b   :  { %2067 = vmatprep.subr.bf16.mxu0 %v14231_v43  ;;  %2153 = vmatprep.subr.bf16.mxu1 %v14233_v44  ;;  %v653_v43 = vld [vmem:[#allocation8 + $0x6a8] sm:$0xff]  ;;  %v14278_v44 = vcombine.low %v640_v32, %v644_v33  ;;  %v14287_v49 = vcombine.high %v648_v40, %v652_v41  ;;  %v442_v33 = vld [vmem:[#allocation8 + $0x10] sm:$0xff]  ;;  %v443_v35 = vld [vmem:[#allocation8 + $0x18] sm:$0xff] }
 0x18c   :  { %v14289_v50 = vcombine.high %v649_v42, %v653_v43 }
 0x18e   :  { %2068 = vmatpush1.bf16.msra.mxu0 %v14230_v55  ;;  %2154 = vmatpush1.bf16.msra.mxu1 %v14232_v56  ;;  %v661_v55 = vld [vmem:[#allocation8 + $0x6e8] sm:$0xff]  ;;  %v14286_v56 = vcombine.low %v648_v40, %v652_v41  ;;  %v450_v41 = vld [vmem:[#allocation8 + $0x50] sm:$0xff] }
 0x18f   :  { %2069 = vmatprep.subr.bf16.mxu0 %v14239_v58  ;;  %2155 = vmatprep.subr.bf16.mxu1 %v14241_v59  ;;  %v14288_v58 = vcombine.low %v649_v42, %v653_v43  ;;  %v14295_v59 = vcombine.high %v656_v51, %v660_v52  ;;  %v14297_v60 = vcombine.high %v657_v53, %v661_v55  ;;  %v454_v42 = vld [vmem:[#allocation8 + $0x70] sm:$0xff]  ;;  %v451_v43 = vld [vmem:[#allocation8 + $0x58] sm:$0xff] }
 0x192   :  { %2070 = vmatpush1.bf16.msra.mxu0 %v14238_v2  ;;  %2156 = vmatpush1.bf16.msra.mxu1 %v14240_v3  ;;  %v669_v2 = vld [vmem:[#allocation8 + $0x728] sm:$0xff]  ;;  %v14294_v3 = vcombine.low %v656_v51, %v660_v52  ;;  %v458_v52 = vld [vmem:[#allocation8 + $0x90] sm:$0xff] }
 0x193   :  { %2071 = vmatprep.subr.bf16.mxu0 %v14247_v4  ;;  %2157 = vmatprep.subr.bf16.mxu1 %v14249_v5  ;;  %v14296_v4 = vcombine.low %v657_v53, %v661_v55  ;;  %v14303_v5 = vcombine.high %v664_v61, %v668_v63  ;;  %v14305_v6 = vcombine.high %v665_v1, %v669_v2  ;;  %v462_v53 = vld [vmem:[#allocation8 + $0xb0] sm:$0xff]  ;;  %v459_v55 = vld [vmem:[#allocation8 + $0x98] sm:$0xff] }
 0x196   :  { %2072 = vmatpush1.bf16.msra.mxu0 %v14246_v12  ;;  %2158 = vmatpush1.bf16.msra.mxu1 %v14248_v13  ;;  %v677_v12 = vld [vmem:[#allocation8 + $0x768] sm:$0xff]  ;;  %v14302_v13 = vcombine.low %v664_v61, %v668_v63  ;;  %v466_v63 = vld [vmem:[#allocation8 + $0xd0] sm:$0xff] }
 0x197   :  { %2073 = vmatprep.subr.bf16.mxu0 %v14255_v14  ;;  %2159 = vmatprep.subr.bf16.mxu1 %v14257_v15  ;;  %v14304_v14 = vcombine.low %v665_v1, %v669_v2  ;;  %v14311_v15 = vcombine.high %v672_v7, %v676_v8  ;;  %v14313_v16 = vcombine.high %v673_v10, %v677_v12  ;;  %v470_v1 = vld [vmem:[#allocation8 + $0xf0] sm:$0xff]  ;;  %v467_v2 = vld [vmem:[#allocation8 + $0xd8] sm:$0xff] }
 0x19a   :  { %2074 = vmatpush1.bf16.msra.mxu0 %v14254_v20  ;;  %2160 = vmatpush1.bf16.msra.mxu1 %v14256_v21  ;;  %v685_v20 = vld [vmem:[#allocation8 + $0x7a8] sm:$0xff]  ;;  %v14310_v21 = vcombine.low %v672_v7, %v676_v8  ;;  %v474_v8 = vld [vmem:[#allocation8 + $0x110] sm:$0xff] }
 0x19b   :  { %2075 = vmatprep.subr.bf16.mxu0 %v14263_v22  ;;  %2161 = vmatprep.subr.bf16.mxu1 %v14265_v23  ;;  %v14312_v22 = vcombine.low %v673_v10, %v677_v12  ;;  %v14319_v23 = vcombine.high %v680_v17, %v684_v18  ;;  %v14321_v24 = vcombine.high %v681_v19, %v685_v20  ;;  %v478_v10 = vld [vmem:[#allocation8 + $0x130] sm:$0xff]  ;;  %v479_v12 = vld [vmem:[#allocation8 + $0x138] sm:$0xff] }
 0x19e   :  { %2076 = vmatpush1.bf16.msra.mxu0 %v14262_v28  ;;  %2162 = vmatpush1.bf16.msra.mxu1 %v14264_v29  ;;  %v693_v28 = vld [vmem:[#allocation8 + $0x7e8] sm:$0xff]  ;;  %v14318_v29 = vcombine.low %v680_v17, %v684_v18  ;;  %v482_v17 = vld [vmem:[#allocation8 + $0x150] sm:$0xff] }
 0x19f   :  { %2077 = vmatprep.subr.bf16.mxu0 %v14271_v30  ;;  %2163 = vmatprep.subr.bf16.mxu1 %v14273_v31  ;;  %v14320_v30 = vcombine.low %v681_v19, %v685_v20  ;;  %v14327_v31 = vcombine.high %v688_v25, %v692_v26  ;;  %v14329_v32 = vcombine.high %v689_v27, %v693_v28  ;;  %v486_v18 = vld [vmem:[#allocation8 + $0x170] sm:$0xff]  ;;  %v483_v19 = vld [vmem:[#allocation8 + $0x158] sm:$0xff] }
 0x1a0   :  { %v487_v20 = vld [vmem:[#allocation8 + $0x178] sm:$0xff] }
 0x1a2   :  { %2078 = vmatpush1.bf16.msra.mxu0 %v14270_v36  ;;  %2164 = vmatpush1.bf16.msra.mxu1 %v14272_v37  ;;  %v447_v36 = vld [vmem:[#allocation8 + $0x38] sm:$0xff]  ;;  %v14326_v37 = vcombine.low %v688_v25, %v692_v26  ;;  %v490_v25 = vld [vmem:[#allocation8 + $0x190] sm:$0xff] }
 0x1a3   :  { %2079 = vmatprep.subr.bf16.mxu0 %v14279_v38  ;;  %2165 = vmatprep.subr.bf16.mxu1 %v14281_v39  ;;  %v14328_v38 = vcombine.low %v689_v27, %v693_v28  ;;  %v14083_v39 = vcombine.high %v442_v33, %v446_v34  ;;  %v14085_v40 = vcombine.high %v443_v35, %v447_v36  ;;  %v494_v26 = vld [vmem:[#allocation8 + $0x1b0] sm:$0xff]  ;;  %v491_v27 = vld [vmem:[#allocation8 + $0x198] sm:$0xff] }
 0x1a4   :  { %v495_v28 = vld [vmem:[#allocation8 + $0x1b8] sm:$0xff] }
 0x1a6   :  { %2080 = vmatpush1.bf16.msra.mxu0 %v14278_v44  ;;  %2166 = vmatpush1.bf16.msra.mxu1 %v14280_v47  ;;  %v455_v44 = vld [vmem:[#allocation8 + $0x78] sm:$0xff]  ;;  %v14082_v47 = vcombine.low %v442_v33, %v446_v34  ;;  %v498_v33 = vld [vmem:[#allocation8 + $0x1d0] sm:$0xff] }
 0x1a7   :  { %2081 = vmatprep.subr.bf16.mxu0 %v14287_v49  ;;  %2167 = vmatprep.subr.bf16.mxu1 %v14289_v50  ;;  %v14084_v49 = vcombine.low %v443_v35, %v447_v36  ;;  %v14091_v50 = vcombine.high %v450_v41, %v454_v42  ;;  %v14093_v51 = vcombine.high %v451_v43, %v455_v44  ;;  %v502_v34 = vld [vmem:[#allocation8 + $0x1f0] sm:$0xff]  ;;  %v499_v35 = vld [vmem:[#allocation8 + $0x1d8] sm:$0xff] }
 0x1a8   :  { %v503_v36 = vld [vmem:[#allocation8 + $0x1f8] sm:$0xff] }
 0x1aa   :  { %2082 = vmatpush1.bf16.msra.mxu0 %v14286_v56  ;;  %2168 = vmatpush1.bf16.msra.mxu1 %v14288_v58  ;;  %v463_v56 = vld [vmem:[#allocation8 + $0xb8] sm:$0xff]  ;;  %v14090_v58 = vcombine.low %v450_v41, %v454_v42  ;;  %v506_v41 = vld [vmem:[#allocation8 + $0x210] sm:$0xff] }
 0x1ab   :  { %2083 = vmatprep.subr.bf16.mxu0 %v14295_v59  ;;  %2169 = vmatprep.subr.bf16.mxu1 %v14297_v60  ;;  %v14092_v59 = vcombine.low %v451_v43, %v455_v44  ;;  %v14099_v60 = vcombine.high %v458_v52, %v462_v53  ;;  %v14101_v61 = vcombine.high %v459_v55, %v463_v56  ;;  %v510_v42 = vld [vmem:[#allocation8 + $0x230] sm:$0xff]  ;;  %v507_v43 = vld [vmem:[#allocation8 + $0x218] sm:$0xff] }
 0x1ac   :  { %v511_v44 = vld [vmem:[#allocation8 + $0x238] sm:$0xff] }
 0x1ae   :  { %2084 = vmatpush1.bf16.msra.mxu0 %v14294_v3  ;;  %2170 = vmatpush1.bf16.msra.mxu1 %v14296_v4  ;;  %v471_v3 = vld [vmem:[#allocation8 + $0xf8] sm:$0xff]  ;;  %v14098_v4 = vcombine.low %v458_v52, %v462_v53  ;;  %v514_v52 = vld [vmem:[#allocation8 + $0x250] sm:$0xff] }
 0x1af   :  { %2085 = vmatprep.subr.bf16.mxu0 %v14303_v5  ;;  %2171 = vmatprep.subr.bf16.mxu1 %v14305_v6  ;;  %v14100_v5 = vcombine.low %v459_v55, %v463_v56  ;;  %v14107_v6 = vcombine.high %v466_v63, %v470_v1  ;;  %v14109_v7 = vcombine.high %v467_v2, %v471_v3  ;;  %v518_v53 = vld [vmem:[#allocation8 + $0x270] sm:$0xff]  ;;  %v515_v55 = vld [vmem:[#allocation8 + $0x258] sm:$0xff] }
 0x1b0   :  { %v519_v56 = vld [vmem:[#allocation8 + $0x278] sm:$0xff] }
 0x1b2   :  { %2086 = vmatpush1.bf16.msra.mxu0 %v14302_v13  ;;  %2172 = vmatpush1.bf16.msra.mxu1 %v14304_v14  ;;  %v14106_v13 = vcombine.low %v466_v63, %v470_v1  ;;  %v14108_v14 = vcombine.low %v467_v2, %v471_v3  ;;  %v522_v63 = vld [vmem:[#allocation8 + $0x290] sm:$0xff]  ;;  %v523_v2 = vld [vmem:[#allocation8 + $0x298] sm:$0xff] }
 0x1b3   :  { %2087 = vmatprep.subr.bf16.mxu0 %v14311_v15  ;;  %2173 = vmatprep.subr.bf16.mxu1 %v14313_v16  ;;  %v14115_v15 = vcombine.high %v474_v8, %v478_v10  ;;  %v526_v1 = vld [vmem:[#allocation8 + $0x2b0] sm:$0xff]  ;;  %v527_v3 = vld [vmem:[#allocation8 + $0x2b8] sm:$0xff] }
 0x1b6   :  { %2088 = vmatpush1.bf16.msra.mxu0 %v14310_v21  ;;  %2174 = vmatpush1.bf16.msra.mxu1 %v14312_v22  ;;  %v14114_v21 = vcombine.low %v474_v8, %v478_v10  ;;  %v530_v8 = vld [vmem:[#allocation8 + $0x2d0] sm:$0xff] }
 0x1b7   :  { %2089 = vmatprep.subr.bf16.mxu0 %v14319_v23  ;;  %2175 = vmatprep.subr.bf16.mxu1 %v14321_v24  ;;  %v14123_v23 = vcombine.high %v482_v17, %v486_v18  ;;  %v14125_v24 = vcombine.high %v483_v19, %v487_v20  ;;  %v534_v10 = vld [vmem:[#allocation8 + $0x2f0] sm:$0xff] }
 0x1ba   :  { %2090 = vmatpush1.bf16.msra.mxu0 %v14318_v29  ;;  %2176 = vmatpush1.bf16.msra.mxu1 %v14320_v30  ;;  %v14122_v29 = vcombine.low %v482_v17, %v486_v18  ;;  %v14124_v30 = vcombine.low %v483_v19, %v487_v20  ;;  %v538_v17 = vld [vmem:[#allocation8 + $0x310] sm:$0xff]  ;;  %v539_v19 = vld [vmem:[#allocation8 + $0x318] sm:$0xff] }
 0x1bb   :  { %2091 = vmatprep.subr.bf16.mxu0 %v14327_v31  ;;  %2177 = vmatprep.subr.bf16.mxu1 %v14329_v32  ;;  %v14131_v31 = vcombine.high %v490_v25, %v494_v26  ;;  %v14133_v32 = vcombine.high %v491_v27, %v495_v28  ;;  %v542_v18 = vld [vmem:[#allocation8 + $0x330] sm:$0xff]  ;;  %v543_v20 = vld [vmem:[#allocation8 + $0x338] sm:$0xff] }
 0x1be   :  { %2092 = vmatpush1.bf16.msra.mxu0 %v14326_v37  ;;  %2178 = vmatpush1.bf16.msra.mxu1 %v14328_v38  ;;  %v14130_v37 = vcombine.low %v490_v25, %v494_v26  ;;  %v14132_v38 = vcombine.low %v491_v27, %v495_v28  ;;  %v546_v25 = vld [vmem:[#allocation8 + $0x350] sm:$0xff]  ;;  %v547_v27 = vld [vmem:[#allocation8 + $0x358] sm:$0xff] }
 0x1bf   :  { %2190 = vmatprep.subr.bf16.mxu0 %v14083_v39  ;;  %2276 = vmatprep.subr.bf16.mxu1 %v14085_v40  ;;  %v14139_v39 = vcombine.high %v498_v33, %v502_v34  ;;  %v14141_v40 = vcombine.high %v499_v35, %v503_v36  ;;  %v550_v26 = vld [vmem:[#allocation8 + $0x370] sm:$0xff]  ;;  %v551_v28 = vld [vmem:[#allocation8 + $0x378] sm:$0xff] }
 0x1c1   :  { %2094 = vmatmul.mubr.bf16.vlgmr.msra.gmra.mrb[4].mxu0 %v16662_v54  ;;  %2180 = vmatmul.mubr.bf16.vlgmr.msra.gmra.mrb[4].mxu1 %v16662_v54 }
 0x1c2   :  { %2191 = vmatpush1.bf16.msra.mxu0 %v14082_v47  ;;  %2222 = vmatprep.mubr.bf16.mxu0 %v16655_v11  ;;  %v14138_v47 = vcombine.low %v498_v33, %v502_v34  ;;  %v554_v33 = vld [vmem:[#allocation8 + $0x390] sm:$0xff] }
 0x1c3   :  { %2277 = vmatpush1.bf16.msra.mxu1 %v14084_v49  ;;  %2308 = vmatprep.mubr.bf16.mxu1 %v16655_v11  ;;  %v475_v11 = vld [vmem:[#allocation8 + $0x118] sm:$0xff]  ;;  %v14140_v49 = vcombine.low %v499_v35, %v503_v36  ;;  %v558_v34 = vld [vmem:[#allocation8 + $0x3b0] sm:$0xff] }
 0x1c4   :  { %2192 = vmatprep.subr.bf16.mxu0 %v14091_v50  ;;  %2278 = vmatprep.subr.bf16.mxu1 %v14093_v51  ;;  %v14117_v16 = vcombine.high %v475_v11, %v479_v12  ;;  %v14116_v22 = vcombine.low %v475_v11, %v479_v12  ;;  %v14147_v50 = vcombine.high %v506_v41, %v510_v42  ;;  %v531_v11 = vld [vmem:[#allocation8 + $0x2d8] sm:$0xff] }
 0x1c5   :  { %v14149_v51 = vcombine.high %v507_v43, %v511_v44  ;;  %v535_v12 = vld [vmem:[#allocation8 + $0x2f8] sm:$0xff] }
 0x1c6   :  { %2193 = vmatpush1.bf16.msra.mxu0 %v14090_v58  ;;  %v14146_v58 = vcombine.low %v506_v41, %v510_v42  ;;  %v555_v35 = vld [vmem:[#allocation8 + $0x398] sm:$0xff]  ;;  %v562_v41 = vld [vmem:[#allocation8 + $0x3d0] sm:$0xff] }
 0x1c7   :  { %2279 = vmatpush1.bf16.msra.mxu1 %v14092_v59  ;;  %2194 = vmatprep.subr.bf16.mxu0 %v14099_v60  ;;  %v14148_v59 = vcombine.low %v507_v43, %v511_v44  ;;  %v14155_v60 = vcombine.high %v514_v52, %v518_v53  ;;  %v559_v36 = vld [vmem:[#allocation8 + $0x3b8] sm:$0xff]  ;;  %v566_v42 = vld [vmem:[#allocation8 + $0x3f0] sm:$0xff] }
 0x1c8   :  { %2280 = vmatprep.subr.bf16.mxu1 %v14101_v61  ;;  %v14157_v61 = vcombine.high %v515_v55, %v519_v56  ;;  %v563_v43 = vld [vmem:[#allocation8 + $0x3d8] sm:$0xff] }
 0x1c9   :  { %v567_v44 = vld [vmem:[#allocation8 + $0x3f8] sm:$0xff] }
 0x1ca   :  { %2195 = vmatpush1.bf16.msra.mxu0 %v14098_v4  ;;  %v14154_v4 = vcombine.low %v514_v52, %v518_v53  ;;  %v570_v52 = vld [vmem:[#allocation8 + $0x410] sm:$0xff] }
 0x1cb   :  { %2281 = vmatpush1.bf16.msra.mxu1 %v14100_v5  ;;  %2196 = vmatprep.subr.bf16.mxu0 %v14107_v6  ;;  %v14156_v5 = vcombine.low %v515_v55, %v519_v56  ;;  %v14163_v6 = vcombine.high %v522_v63, %v526_v1  ;;  %v574_v53 = vld [vmem:[#allocation8 + $0x430] sm:$0xff]  ;;  %v571_v55 = vld [vmem:[#allocation8 + $0x418] sm:$0xff] }
 0x1cc   :  { %2282 = vmatprep.subr.bf16.mxu1 %v14109_v7  ;;  %v14165_v7 = vcombine.high %v523_v2, %v527_v3  ;;  %v575_v56 = vld [vmem:[#allocation8 + $0x438] sm:$0xff] }
 0x1ce   :  { %2197 = vmatpush1.bf16.msra.mxu0 %v14106_v13  ;;  %v14162_v13 = vcombine.low %v522_v63, %v526_v1  ;;  %v578_v63 = vld [vmem:[#allocation8 + $0x450] sm:$0xff] }
 0x1cf   :  { %2283 = vmatpush1.bf16.msra.mxu1 %v14108_v14  ;;  %2198 = vmatprep.subr.bf16.mxu0 %v14115_v15  ;;  %v14164_v14 = vcombine.low %v523_v2, %v527_v3  ;;  %v14171_v15 = vcombine.high %v530_v8, %v534_v10  ;;  %v582_v1 = vld [vmem:[#allocation8 + $0x470] sm:$0xff]  ;;  %v14210_v2 = vcombine.low %v570_v52, %v574_v53  ;;  %v579_v3 = vld [vmem:[#allocation8 + $0x458] sm:$0xff] }
 0x1d0   :  { %2284 = vmatprep.subr.bf16.mxu1 %v14117_v16  ;;  %v14173_v16 = vcombine.high %v531_v11, %v535_v12 }
 0x1d2   :  { %2199 = vmatpush1.bf16.msra.mxu0 %v14114_v21  ;;  %v14170_v21 = vcombine.low %v530_v8, %v534_v10  ;;  %v590_v8 = vld [vmem:[#allocation8 + $0x4b0] sm:$0xff] }
 0x1d3   :  { %2285 = vmatpush1.bf16.msra.mxu1 %v14116_v22  ;;  %2200 = vmatprep.subr.bf16.mxu0 %v14123_v23  ;;  %v14172_v22 = vcombine.low %v531_v11, %v535_v12  ;;  %v14179_v23 = vcombine.high %v538_v17, %v542_v18  ;;  %v587_v11 = vld [vmem:[#allocation8 + $0x498] sm:$0xff] }
 0x1d4   :  { %2286 = vmatprep.subr.bf16.mxu1 %v14125_v24  ;;  %v14181_v24 = vcombine.high %v539_v19, %v543_v20  ;;  %v591_v12 = vld [vmem:[#allocation8 + $0x4b8] sm:$0xff] }
 0x1d6   :  { %2201 = vmatpush1.bf16.msra.mxu0 %v14122_v29  ;;  %v14178_v29 = vcombine.low %v538_v17, %v542_v18  ;;  %v594_v17 = vld [vmem:[#allocation8 + $0x4d0] sm:$0xff] }
 0x1d7   :  { %2287 = vmatpush1.bf16.msra.mxu1 %v14124_v30  ;;  %2202 = vmatprep.subr.bf16.mxu0 %v14131_v31  ;;  %v14180_v30 = vcombine.low %v539_v19, %v543_v20  ;;  %v14187_v31 = vcombine.high %v546_v25, %v550_v26  ;;  %v598_v18 = vld [vmem:[#allocation8 + $0x4f0] sm:$0xff]  ;;  %v595_v19 = vld [vmem:[#allocation8 + $0x4d8] sm:$0xff] }
 0x1d8   :  { %2288 = vmatprep.subr.bf16.mxu1 %v14133_v32  ;;  %v14189_v32 = vcombine.high %v547_v27, %v551_v28  ;;  %v599_v20 = vld [vmem:[#allocation8 + $0x4f8] sm:$0xff] }
 0x1da   :  { %2203 = vmatpush1.bf16.msra.mxu0 %v14130_v37  ;;  %v14186_v37 = vcombine.low %v546_v25, %v550_v26  ;;  %v606_v25 = vld [vmem:[#allocation8 + $0x530] sm:$0xff]  ;;  %v603_v26 = vld [vmem:[#allocation8 + $0x518] sm:$0xff] }
 0x1db   :  { %2289 = vmatpush1.bf16.msra.mxu1 %v14132_v38  ;;  %2204 = vmatprep.subr.bf16.mxu0 %v14139_v39  ;;  %v14188_v38 = vcombine.low %v547_v27, %v551_v28  ;;  %v14195_v39 = vcombine.high %v554_v33, %v558_v34  ;;  %v607_v27 = vld [vmem:[#allocation8 + $0x538] sm:$0xff]  ;;  %v14236_v28 = vcombine.low %v595_v19, %v599_v20 }
 0x1dc   :  { %2290 = vmatprep.subr.bf16.mxu1 %v14141_v40  ;;  %v14197_v40 = vcombine.high %v555_v35, %v559_v36 }
 0x1de   :  { %2205 = vmatpush1.bf16.msra.mxu0 %v14138_v47  ;;  %v14194_v47 = vcombine.low %v554_v33, %v558_v34  ;;  %v611_v33 = vld [vmem:[#allocation8 + $0x558] sm:$0xff] }
 0x1df   :  { %2291 = vmatpush1.bf16.msra.mxu1 %v14140_v49  ;;  %2206 = vmatprep.subr.bf16.mxu0 %v14147_v50  ;;  %v14196_v49 = vcombine.low %v555_v35, %v559_v36  ;;  %v14203_v50 = vcombine.high %v562_v41, %v566_v42  ;;  %v615_v34 = vld [vmem:[#allocation8 + $0x578] sm:$0xff]  ;;  %v14244_v36 = vcombine.low %v603_v26, %v607_v27 }
 0x1e0   :  { %2292 = vmatprep.subr.bf16.mxu1 %v14149_v51  ;;  %v14205_v51 = vcombine.high %v563_v43, %v567_v44 }
 0x1e2   :  { %2207 = vmatpush1.bf16.msra.mxu0 %v14146_v58  ;;  %v14202_v58 = vcombine.low %v562_v41, %v566_v42  ;;  %v619_v41 = vld [vmem:[#allocation8 + $0x598] sm:$0xff] }
 0x1e3   :  { %2293 = vmatpush1.bf16.msra.mxu1 %v14148_v59  ;;  %2208 = vmatprep.subr.bf16.mxu0 %v14155_v60  ;;  %v14204_v59 = vcombine.low %v563_v43, %v567_v44  ;;  %v14211_v60 = vcombine.high %v570_v52, %v574_v53  ;;  %v623_v42 = vld [vmem:[#allocation8 + $0x5b8] sm:$0xff]  ;;  %v14252_v44 = vcombine.low %v611_v33, %v615_v34 }
 0x1e4   :  { %2294 = vmatprep.subr.bf16.mxu1 %v14157_v61  ;;  %v14213_v61 = vcombine.high %v571_v55, %v575_v56  ;;  %v627_v52 = vld [vmem:[#allocation8 + $0x5d8] sm:$0xff] }
 0x1e5   :  { %v631_v53 = vld [vmem:[#allocation8 + $0x5f8] sm:$0xff] }
 0x1e6   :  { %2209 = vmatpush1.bf16.msra.mxu0 %v14154_v4  ;;  %v583_v4 = vld [vmem:[#allocation8 + $0x478] sm:$0xff] }
 0x1e7   :  { %2295 = vmatpush1.bf16.msra.mxu1 %v14156_v5  ;;  %2210 = vmatprep.subr.bf16.mxu0 %v14163_v6  ;;  %v14212_v5 = vcombine.low %v571_v55, %v575_v56  ;;  %v14219_v6 = vcombine.high %v578_v63, %v582_v1  ;;  %v14221_v10 = vcombine.high %v579_v3, %v583_v4 }
 0x1e8   :  { %2296 = vmatprep.subr.bf16.mxu1 %v14165_v7  ;;  %v586_v7 = vld [vmem:[#allocation8 + $0x490] sm:$0xff]  ;;  %v14260_v56 = vcombine.low %v619_v41, %v623_v42 }
 0x1ea   :  { %2211 = vmatpush1.bf16.msra.mxu0 %v14162_v13  ;;  %v14218_v13 = vcombine.low %v578_v63, %v582_v1  ;;  %v635_v63 = vld [vmem:[#allocation8 + $0x618] sm:$0xff] }
 0x1eb   :  { %2297 = vmatpush1.bf16.msra.mxu1 %v14164_v14  ;;  %2212 = vmatprep.subr.bf16.mxu0 %v14171_v15  ;;  %v14220_v14 = vcombine.low %v579_v3, %v583_v4  ;;  %v14227_v15 = vcombine.high %v586_v7, %v590_v8  ;;  %v639_v1 = vld [vmem:[#allocation8 + $0x638] sm:$0xff]  ;;  %v14268_v3 = vcombine.low %v627_v52, %v631_v53 }
 0x1ec   :  { %2298 = vmatprep.subr.bf16.mxu1 %v14173_v16  ;;  %v14229_v16 = vcombine.high %v587_v11, %v591_v12 }
 0x1ee   :  { %2213 = vmatpush1.bf16.msra.mxu0 %v14170_v21  ;;  %v14226_v21 = vcombine.low %v586_v7, %v590_v8  ;;  %v646_v7 = vld [vmem:[#allocation8 + $0x670] sm:$0xff]  ;;  %v643_v8 = vld [vmem:[#allocation8 + $0x658] sm:$0xff] }
 0x1ef   :  { %2299 = vmatpush1.bf16.msra.mxu1 %v14172_v22  ;;  %2214 = vmatprep.subr.bf16.mxu0 %v14179_v23  ;;  %v14235_v22 = vcombine.high %v594_v17, %v598_v18  ;;  %v14237_v23 = vcombine.high %v595_v19, %v599_v20 }
 0x1f0   :  { %2300 = vmatprep.subr.bf16.mxu1 %v14181_v24  ;;  %v602_v24 = vld [vmem:[#allocation8 + $0x510] sm:$0xff] }
 0x1f1   :  { %v14242_v35 = vcombine.low %v602_v24, %v606_v25 }
 0x1f2   :  { %2215 = vmatpush1.bf16.msra.mxu0 %v14178_v29  ;;  %v14243_v29 = vcombine.high %v602_v24, %v606_v25  ;;  %v659_v24 = vld [vmem:[#allocation8 + $0x6d8] sm:$0xff] }
 0x1f3   :  { %2301 = vmatpush1.bf16.msra.mxu1 %v14180_v30  ;;  %2216 = vmatprep.subr.bf16.mxu0 %v14187_v31  ;;  %v14245_v30 = vcombine.high %v603_v26, %v607_v27  ;;  %v610_v31 = vld [vmem:[#allocation8 + $0x550] sm:$0xff]  ;;  %v663_v25 = vld [vmem:[#allocation8 + $0x6f8] sm:$0xff] }
 0x1f4   :  { %2302 = vmatprep.subr.bf16.mxu1 %v14189_v32  ;;  %v614_v32 = vld [vmem:[#allocation8 + $0x570] sm:$0xff] }
 0x1f5   :  { %v14250_v43 = vcombine.low %v610_v31, %v614_v32 }
 0x1f6   :  { %2217 = vmatpush1.bf16.msra.mxu0 %v14186_v37  ;;  %v14251_v37 = vcombine.high %v610_v31, %v614_v32  ;;  %v667_v31 = vld [vmem:[#allocation8 + $0x718] sm:$0xff] }
 0x1f7   :  { %2303 = vmatpush1.bf16.msra.mxu1 %v14188_v38  ;;  %2218 = vmatprep.subr.bf16.mxu0 %v14195_v39  ;;  %v14253_v38 = vcombine.high %v611_v33, %v615_v34  ;;  %v618_v39 = vld [vmem:[#allocation8 + $0x590] sm:$0xff]  ;;  %v671_v32 = vld [vmem:[#allocation8 + $0x738] sm:$0xff]  ;;  %v14300_v34 = vcombine.low %v659_v24, %v663_v25 }
 0x1f8   :  { %2304 = vmatprep.subr.bf16.mxu1 %v14197_v40  ;;  %v622_v40 = vld [vmem:[#allocation8 + $0x5b0] sm:$0xff] }
 0x1f9   :  { %v14258_v55 = vcombine.low %v618_v39, %v622_v40 }
 0x1fa   :  { %2219 = vmatpush1.bf16.msra.mxu0 %v14194_v47  ;;  %v14259_v47 = vcombine.high %v618_v39, %v622_v40  ;;  %v675_v39 = vld [vmem:[#allocation8 + $0x758] sm:$0xff] }
 0x1fb   :  { %2305 = vmatpush1.bf16.msra.mxu1 %v14196_v49  ;;  %2220 = vmatprep.subr.bf16.mxu0 %v14203_v50  ;;  %v14261_v49 = vcombine.high %v619_v41, %v623_v42  ;;  %v626_v50 = vld [vmem:[#allocation8 + $0x5d0] sm:$0xff]  ;;  %v679_v40 = vld [vmem:[#allocation8 + $0x778] sm:$0xff]  ;;  %v14308_v42 = vcombine.low %v667_v31, %v671_v32 }
 0x1fc   :  { %2306 = vmatprep.subr.bf16.mxu1 %v14205_v51  ;;  %v630_v51 = vld [vmem:[#allocation8 + $0x5f0] sm:$0xff] }
 0x1fe   :  { %2221 = vmatpush1.bf16.msra.mxu0 %v14202_v58  ;;  %v14267_v58 = vcombine.high %v626_v50, %v630_v51 }
 0x1ff   :  { %2307 = vmatpush1.bf16.msra.mxu1 %v14204_v59  ;;  %2233 = vmatprep.subr.bf16.mxu0 %v14211_v60  ;;  %v14269_v59 = vcombine.high %v627_v52, %v631_v53  ;;  %v634_v60 = vld [vmem:[#allocation8 + $0x610] sm:$0xff]  ;;  %v14316_v53 = vcombine.low %v675_v39, %v679_v40 }
 0x200   :  { %2319 = vmatprep.subr.bf16.mxu1 %v14213_v61  ;;  %v638_v61 = vld [vmem:[#allocation8 + $0x630] sm:$0xff] }
 0x201   :  { %2223 = vmatmul.mubr.bf16.vlgmr.msra.gmra.mrb[8].mxu0 %v16652_v9  ;;  %v14275_v4 = vcombine.high %v634_v60, %v638_v61 }
 0x202   :  { %2309 = vmatmul.mubr.bf16.vlgmr.msra.gmra.mrb[8].mxu1 %v16652_v9  ;;  %2234 = vmatpush1.bf16.msra.mxu0 %v14210_v2  ;;  %v14228_v9 = vcombine.low %v587_v11, %v591_v12  ;;  %v14266_v2 = vcombine.low %v626_v50, %v630_v51  ;;  %v14274_v11 = vcombine.low %v634_v60, %v638_v61  ;;  %v683_v50 = vld [vmem:[#allocation8 + $0x798] sm:$0xff] }
 0x203   :  { %2265 = vmatprep.mubr.bf16.mxu0 %v16664_v57  ;;  %2320 = vmatpush1.bf16.msra.mxu1 %v14212_v5  ;;  %v14277_v5 = vcombine.high %v635_v63, %v639_v1  ;;  %v14276_v12 = vcombine.low %v635_v63, %v639_v1  ;;  %v687_v51 = vld [vmem:[#allocation8 + $0x7b8] sm:$0xff] }
 0x204   :  { %2351 = vmatprep.mubr.bf16.mxu1 %v16664_v57  ;;  %2235 = vmatprep.subr.bf16.mxu0 %v14219_v6  ;;  %v14234_v57 = vcombine.low %v594_v17, %v598_v18  ;;  %v642_v6 = vld [vmem:[#allocation8 + $0x650] sm:$0xff]  ;;  %v651_v17 = vld [vmem:[#allocation8 + $0x698] sm:$0xff]  ;;  %v14324_v1 = vcombine.low %v683_v50, %v687_v51 }
 0x205   :  { %2321 = vmatprep.subr.bf16.mxu1 %v14221_v10  ;;  %v647_v10 = vld [vmem:[#allocation8 + $0x678] sm:$0xff]  ;;  %v14282_v19 = vcombine.low %v642_v6, %v646_v7 }
 0x206   :  { %2236 = vmatpush1.bf16.msra.mxu0 %v14218_v13  ;;  %v14283_v13 = vcombine.high %v642_v6, %v646_v7  ;;  %v655_v18 = vld [vmem:[#allocation8 + $0x6b8] sm:$0xff]  ;;  %v14284_v20 = vcombine.low %v643_v8, %v647_v10  ;;  %v2403_v6 = vld [vmem:[#allocation11 + $0x8] sm:$0xff] }
 0x207   :  { %2322 = vmatpush1.bf16.msra.mxu1 %v14220_v14  ;;  %2237 = vmatprep.subr.bf16.mxu0 %v14227_v15  ;;  %v14285_v14 = vcombine.high %v643_v8, %v647_v10  ;;  %v650_v15 = vld [vmem:[#allocation8 + $0x690] sm:$0xff]  ;;  %v14292_v27 = vcombine.low %v651_v17, %v655_v18  ;;  %v691_v60 = vld [vmem:[#allocation8 + $0x7d8] sm:$0xff] }
 0x208   :  { %2323 = vmatprep.subr.bf16.mxu1 %v14229_v16  ;;  %v654_v16 = vld [vmem:[#allocation8 + $0x6b0] sm:$0xff]  ;;  %v695_v61 = vld [vmem:[#allocation8 + $0x7f8] sm:$0xff] }
 0x209   :  { %v14290_v26 = vcombine.low %v650_v15, %v654_v16  ;;  %v2406_v7 = vld [vmem:[#allocation11 + $0x68] sm:$0xff]  ;;  %v14332_v10 = vcombine.low %v691_v60, %v695_v61 }
 0x20a   :  { %2238 = vmatpush1.bf16.msra.mxu0 %v14226_v21  ;;  %v14291_v21 = vcombine.high %v650_v15, %v654_v16  ;;  %v2409_v15 = vld [vmem:[#allocation11 + $0xc8] sm:$0xff] }
 0x20b   :  { %2324 = vmatpush1.bf16.msra.mxu1 %v14228_v9  ;;  %2239 = vmatprep.subr.bf16.mxu0 %v14235_v22  ;;  %v14293_v9 = vcombine.high %v651_v17, %v655_v18  ;;  %v658_v22 = vld [vmem:[#allocation8 + $0x6d0] sm:$0xff]  ;;  %v14336_v18 = vcombine.low %v2403_v6, %v2406_v7 }
 0x20c   :  { %2325 = vmatprep.subr.bf16.mxu1 %v14237_v23  ;;  %v662_v23 = vld [vmem:[#allocation8 + $0x6f0] sm:$0xff] }
 0x20d   :  { %v14298_v33 = vcombine.low %v658_v22, %v662_v23  ;;  %v2412_v16 = vld [vmem:[#allocation11 + $0x128] sm:$0xff] }
 0x20e   :  { %2240 = vmatpush1.bf16.msra.mxu0 %v14234_v57  ;;  %v14299_v57 = vcombine.high %v658_v22, %v662_v23  ;;  %v2415_v22 = vld [vmem:[#allocation11 + $0x188] sm:$0xff] }
 0x20f   :  { %2326 = vmatpush1.bf16.msra.mxu1 %v14236_v28  ;;  %2241 = vmatprep.subr.bf16.mxu0 %v14243_v29  ;;  %v14301_v28 = vcombine.high %v659_v24, %v663_v25  ;;  %v666_v29 = vld [vmem:[#allocation8 + $0x710] sm:$0xff]  ;;  %v14342_v25 = vcombine.low %v2409_v15, %v2412_v16 }
 0x210   :  { %2327 = vmatprep.subr.bf16.mxu1 %v14245_v30  ;;  %v670_v30 = vld [vmem:[#allocation8 + $0x730] sm:$0xff] }
 0x211   :  { %v14306_v41 = vcombine.low %v666_v29, %v670_v30  ;;  %v2418_v23 = vld [vmem:[#allocation11 + $0x1e8] sm:$0xff] }
 0x212   :  { %2242 = vmatpush1.bf16.msra.mxu0 %v14242_v35  ;;  %v14307_v35 = vcombine.high %v666_v29, %v670_v30  ;;  %v2421_v29 = vld [vmem:[#allocation11 + $0x248] sm:$0xff] }
 0x213   :  { %2328 = vmatpush1.bf16.msra.mxu1 %v14244_v36  ;;  %2243 = vmatprep.subr.bf16.mxu0 %v14251_v37  ;;  %v14309_v36 = vcombine.high %v667_v31, %v671_v32  ;;  %v674_v37 = vld [vmem:[#allocation8 + $0x750] sm:$0xff]  ;;  %v14348_v32 = vcombine.low %v2415_v22, %v2418_v23 }
 0x214   :  { %2329 = vmatprep.subr.bf16.mxu1 %v14253_v38  ;;  %v678_v38 = vld [vmem:[#allocation8 + $0x770] sm:$0xff] }
 0x215   :  { %v14314_v52 = vcombine.low %v674_v37, %v678_v38  ;;  %v2424_v30 = vld [vmem:[#allocation11 + $0x2a8] sm:$0xff] }
 0x216   :  { %2244 = vmatpush1.bf16.msra.mxu0 %v14250_v43  ;;  %v14315_v43 = vcombine.high %v674_v37, %v678_v38  ;;  %v2430_v37 = vld [vmem:[#allocation11 + $0x368] sm:$0xff] }
 0x217   :  { %2330 = vmatpush1.bf16.msra.mxu1 %v14252_v44  ;;  %2245 = vmatprep.subr.bf16.mxu0 %v14259_v47  ;;  %v14317_v44 = vcombine.high %v675_v39, %v679_v40  ;;  %v682_v47 = vld [vmem:[#allocation8 + $0x790] sm:$0xff]  ;;  %v14354_v39 = vcombine.low %v2421_v29, %v2424_v30 }
 0x218   :  { %2331 = vmatprep.subr.bf16.mxu1 %v14261_v49  ;;  %v686_v49 = vld [vmem:[#allocation8 + $0x7b0] sm:$0xff] }
 0x219   :  { %v14322_v63 = vcombine.low %v682_v47, %v686_v49 }
 0x21a   :  { %2246 = vmatpush1.bf16.msra.mxu0 %v14258_v55  ;;  %v14323_v55 = vcombine.high %v682_v47, %v686_v49  ;;  %v2436_v47 = vld [vmem:[#allocation11 + $0x428] sm:$0xff] }
 0x21b   :  { %2332 = vmatpush1.bf16.msra.mxu1 %v14260_v56  ;;  %2247 = vmatprep.subr.bf16.mxu0 %v14267_v58  ;;  %v14325_v56 = vcombine.high %v683_v50, %v687_v51  ;;  %v690_v58 = vld [vmem:[#allocation8 + $0x7d0] sm:$0xff] }
 0x21c   :  { %2333 = vmatprep.subr.bf16.mxu1 %v14269_v59  ;;  %v694_v59 = vld [vmem:[#allocation8 + $0x7f0] sm:$0xff] }
 0x21d   :  { %v14330_v8 = vcombine.low %v690_v58, %v694_v59 }
 0x21e   :  { %2248 = vmatpush1.bf16.msra.mxu0 %v14266_v2  ;;  %v14331_v2 = vcombine.high %v690_v58, %v694_v59  ;;  %v2442_v58 = vld [vmem:[#allocation11 + $0x4e8] sm:$0xff] }
 0x21f   :  { %2334 = vmatpush1.bf16.msra.mxu1 %v14268_v3  ;;  %2249 = vmatprep.subr.bf16.mxu0 %v14275_v4  ;;  %v14333_v3 = vcombine.high %v691_v60, %v695_v61  ;;  %v2402_v4 = vld [vmem:[#allocation11] sm:$0xff] }
 0x220   :  { %2335 = vmatprep.subr.bf16.mxu1 %v14277_v5  ;;  %v2405_v5 = vld [vmem:[#allocation11 + $0x60] sm:$0xff] }
 0x221   :  { %v14334_v17 = vcombine.low %v2402_v4, %v2405_v5 }
 0x222   :  { %2250 = vmatpush1.bf16.msra.mxu0 %v14274_v11  ;;  %v14335_v11 = vcombine.high %v2402_v4, %v2405_v5  ;;  %v2448_v4 = vld [vmem:[#allocation11 + $0x5a8] sm:$0xff] }
 0x223   :  { %2336 = vmatpush1.bf16.msra.mxu1 %v14276_v12  ;;  %2251 = vmatprep.subr.bf16.mxu0 %v14283_v13  ;;  %v14337_v12 = vcombine.high %v2403_v6, %v2406_v7  ;;  %v2408_v13 = vld [vmem:[#allocation11 + $0xc0] sm:$0xff] }
 0x224   :  { %2337 = vmatprep.subr.bf16.mxu1 %v14285_v14  ;;  %v2411_v14 = vld [vmem:[#allocation11 + $0x120] sm:$0xff] }
 0x225   :  { %v14340_v24 = vcombine.low %v2408_v13, %v2411_v14 }
 0x226   :  { %2252 = vmatpush1.bf16.msra.mxu0 %v14282_v19  ;;  %v14341_v19 = vcombine.high %v2408_v13, %v2411_v14  ;;  %v2454_v13 = vld [vmem:[#allocation11 + $0x668] sm:$0xff] }
 0x227   :  { %2338 = vmatpush1.bf16.msra.mxu1 %v14284_v20  ;;  %2253 = vmatprep.subr.bf16.mxu0 %v14291_v21  ;;  %v14343_v20 = vcombine.high %v2409_v15, %v2412_v16  ;;  %v2414_v21 = vld [vmem:[#allocation11 + $0x180] sm:$0xff] }
 0x228   :  { %2339 = vmatprep.subr.bf16.mxu1 %v14293_v9  ;;  %v2417_v9 = vld [vmem:[#allocation11 + $0x1e0] sm:$0xff] }
 0x229   :  { %v14346_v31 = vcombine.low %v2414_v21, %v2417_v9 }
 0x22a   :  { %2254 = vmatpush1.bf16.msra.mxu0 %v14290_v26  ;;  %v14347_v26 = vcombine.high %v2414_v21, %v2417_v9  ;;  %v2460_v21 = vld [vmem:[#allocation11 + $0x728] sm:$0xff] }
 0x22b   :  { %2340 = vmatpush1.bf16.msra.mxu1 %v14292_v27  ;;  %2255 = vmatprep.subr.bf16.mxu0 %v14299_v57  ;;  %v14349_v27 = vcombine.high %v2415_v22, %v2418_v23  ;;  %v2420_v57 = vld [vmem:[#allocation11 + $0x240] sm:$0xff] }
 0x22c   :  { %2341 = vmatprep.subr.bf16.mxu1 %v14301_v28  ;;  %v2423_v28 = vld [vmem:[#allocation11 + $0x2a0] sm:$0xff] }
 0x22d   :  { %v14352_v38 = vcombine.low %v2420_v57, %v2423_v28 }
 0x22e   :  { %2256 = vmatpush1.bf16.msra.mxu0 %v14298_v33  ;;  %v14353_v33 = vcombine.high %v2420_v57, %v2423_v28  ;;  %v2466_v57 = vld [vmem:[#allocation11 + $0x7e8] sm:$0xff] }
 0x22f   :  { %2342 = vmatpush1.bf16.msra.mxu1 %v14300_v34  ;;  %2257 = vmatprep.subr.bf16.mxu0 %v14307_v35  ;;  %v2426_v34 = vld [vmem:[#allocation11 + $0x300] sm:$0xff] }
 0x230   :  { %2343 = vmatprep.subr.bf16.mxu1 %v14309_v36  ;;  %v2429_v35 = vld [vmem:[#allocation11 + $0x360] sm:$0xff]  ;;  %v2427_v36 = vld [vmem:[#allocation11 + $0x308] sm:$0xff] }
 0x231   :  { %v14359_v40 = vcombine.high %v2426_v34, %v2429_v35  ;;  %v14358_v49 = vcombine.low %v2426_v34, %v2429_v35  ;;  %v14360_v50 = vcombine.low %v2427_v36, %v2430_v37  ;;  %v2472_v34 = vld [vmem:[#allocation11 + $0x8a8] sm:$0xff] }
 0x232   :  { %2258 = vmatpush1.bf16.msra.mxu0 %v14306_v41  ;;  %v14361_v41 = vcombine.high %v2427_v36, %v2430_v37 }
 0x233   :  { %2344 = vmatpush1.bf16.msra.mxu1 %v14308_v42  ;;  %2259 = vmatprep.subr.bf16.mxu0 %v14315_v43  ;;  %v2432_v42 = vld [vmem:[#allocation11 + $0x3c0] sm:$0xff] }
 0x234   :  { %2345 = vmatprep.subr.bf16.mxu1 %v14317_v44  ;;  %v2435_v43 = vld [vmem:[#allocation11 + $0x420] sm:$0xff]  ;;  %v2433_v44 = vld [vmem:[#allocation11 + $0x3c8] sm:$0xff] }
 0x235   :  { %v14365_v51 = vcombine.high %v2432_v42, %v2435_v43  ;;  %v14364_v59 = vcombine.low %v2432_v42, %v2435_v43  ;;  %v14366_v60 = vcombine.low %v2433_v44, %v2436_v47  ;;  %v2478_v42 = vld [vmem:[#allocation11 + $0x968] sm:$0xff] }
 0x236   :  { %2260 = vmatpush1.bf16.msra.mxu0 %v14314_v52  ;;  %v14367_v52 = vcombine.high %v2433_v44, %v2436_v47 }
 0x237   :  { %2346 = vmatpush1.bf16.msra.mxu1 %v14316_v53  ;;  %2261 = vmatprep.subr.bf16.mxu0 %v14323_v55  ;;  %v2438_v53 = vld [vmem:[#allocation11 + $0x480] sm:$0xff] }
 0x238   :  { %2347 = vmatprep.subr.bf16.mxu1 %v14325_v56  ;;  %v2441_v55 = vld [vmem:[#allocation11 + $0x4e0] sm:$0xff]  ;;  %v2439_v56 = vld [vmem:[#allocation11 + $0x488] sm:$0xff] }
 0x239   :  { %v14371_v61 = vcombine.high %v2438_v53, %v2441_v55  ;;  %v14370_v5 = vcombine.low %v2438_v53, %v2441_v55  ;;  %v14372_v6 = vcombine.low %v2439_v56, %v2442_v58  ;;  %v2484_v53 = vld [vmem:[#allocation11 + $0xa28] sm:$0xff] }
 0x23a   :  { %2262 = vmatpush1.bf16.msra.mxu0 %v14322_v63  ;;  %v14373_v63 = vcombine.high %v2439_v56, %v2442_v58 }
 0x23b   :  { %2348 = vmatpush1.bf16.msra.mxu1 %v14324_v1  ;;  %2263 = vmatprep.subr.bf16.mxu0 %v14331_v2  ;;  %v2444_v1 = vld [vmem:[#allocation11 + $0x540] sm:$0xff] }
 0x23c   :  { %2349 = vmatprep.subr.bf16.mxu1 %v14333_v3  ;;  %v2447_v2 = vld [vmem:[#allocation11 + $0x5a0] sm:$0xff]  ;;  %v2445_v3 = vld [vmem:[#allocation11 + $0x548] sm:$0xff] }
 0x23d   :  { %v14377_v7 = vcombine.high %v2444_v1, %v2447_v2  ;;  %v14376_v14 = vcombine.low %v2444_v1, %v2447_v2  ;;  %v14378_v15 = vcombine.low %v2445_v3, %v2448_v4  ;;  %v2490_v1 = vld [vmem:[#allocation11 + $0xae8] sm:$0xff] }
 0x23e   :  { %2264 = vmatpush1.bf16.msra.mxu0 %v14330_v8  ;;  %v14379_v8 = vcombine.high %v2445_v3, %v2448_v4 }
 0x23f   :  { %2350 = vmatpush1.bf16.msra.mxu1 %v14332_v10  ;;  %4738 = vmatprep.subr.bf16.mxu0 %v14335_v11  ;;  %v2450_v10 = vld [vmem:[#allocation11 + $0x600] sm:$0xff] }
 0x240   :  { %4910 = vmatprep.subr.bf16.mxu1 %v14337_v12  ;;  %v2453_v11 = vld [vmem:[#allocation11 + $0x660] sm:$0xff]  ;;  %v2451_v12 = vld [vmem:[#allocation11 + $0x608] sm:$0xff] }
 0x241   :  { %2266 = vmatmul.mubr.bf16.vlgmr.msra.gmra.mrb[8].mxu0 %v16662_v54  ;;  %v14383_v16 = vcombine.high %v2450_v10, %v2453_v11  ;;  %v14382_v9 = vcombine.low %v2450_v10, %v2453_v11  ;;  %v14384_v22 = vcombine.low %v2451_v12, %v2454_v13  ;;  %v2496_v10 = vld [vmem:[#allocation11 + $0xba8] sm:$0xff] }
 0x242   :  { %2352 = vmatmul.mubr.bf16.vlgmr.msra.gmra.mrb[8].mxu1 %v16662_v54  ;;  %4739 = vmatpush1.bf16.msra.mxu0 %v14334_v17  ;;  %v14355_v54 = vcombine.high %v2421_v29, %v2424_v30  ;;  %v14385_v17 = vcombine.high %v2451_v12, %v2454_v13 }
 0x243   :  { %4911 = vmatpush1.bf16.msra.mxu1 %v14336_v18  ;;  %4740 = vmatprep.subr.bf16.mxu0 %v14341_v19  ;;  %v2456_v18 = vld [vmem:[#allocation11 + $0x6c0] sm:$0xff] }
 0x244   :  { %4912 = vmatprep.subr.bf16.mxu1 %v14343_v20  ;;  %v2459_v19 = vld [vmem:[#allocation11 + $0x720] sm:$0xff]  ;;  %v2457_v20 = vld [vmem:[#allocation11 + $0x6c8] sm:$0xff] }
 0x245   :  { %v14389_v23 = vcombine.high %v2456_v18, %v2459_v19  ;;  %v14388_v28 = vcombine.low %v2456_v18, %v2459_v19  ;;  %v14390_v29 = vcombine.low %v2457_v20, %v2460_v21  ;;  %v16684_v18 = vld [vmem:[#allocation11 + $0xc68] sm:$0xff] }
 0x246   :  { %4741 = vmatpush1.bf16.msra.mxu0 %v14340_v24  ;;  %v14391_v24 = vcombine.high %v2457_v20, %v2460_v21 }
 0x247   :  { %4913 = vmatpush1.bf16.msra.mxu1 %v14342_v25  ;;  %4742 = vmatprep.subr.bf16.mxu0 %v14347_v26  ;;  %v2462_v25 = vld [vmem:[#allocation11 + $0x780] sm:$0xff] }
 0x248   :  { %4914 = vmatprep.subr.bf16.mxu1 %v14349_v27  ;;  %v2465_v26 = vld [vmem:[#allocation11 + $0x7e0] sm:$0xff]  ;;  %v2463_v27 = vld [vmem:[#allocation11 + $0x788] sm:$0xff] }
 0x249   :  { %v14395_v30 = vcombine.high %v2462_v25, %v2465_v26  ;;  %v14394_v35 = vcombine.low %v2462_v25, %v2465_v26  ;;  %v14396_v36 = vcombine.low %v2463_v27, %v2466_v57 }
 0x24a   :  { %4743 = vmatpush1.bf16.msra.mxu0 %v14346_v31  ;;  %v14397_v31 = vcombine.high %v2463_v27, %v2466_v57 }
 0x24b   :  { %4915 = vmatpush1.bf16.msra.mxu1 %v14348_v32  ;;  %4744 = vmatprep.subr.bf16.mxu0 %v14353_v33  ;;  %v2468_v32 = vld [vmem:[#allocation11 + $0x840] sm:$0xff] }
 0x24c   :  { %4916 = vmatprep.subr.bf16.mxu1 %v14355_v54  ;;  %v2471_v33 = vld [vmem:[#allocation11 + $0x8a0] sm:$0xff]  ;;  %v2469_v54 = vld [vmem:[#allocation11 + $0x848] sm:$0xff] }
 0x24d   :  { %v14401_v37 = vcombine.high %v2468_v32, %v2471_v33  ;;  %v14400_v43 = vcombine.low %v2468_v32, %v2471_v33  ;;  %v14402_v44 = vcombine.low %v2469_v54, %v2472_v34 }
 0x24e   :  { %4745 = vmatpush1.bf16.msra.mxu0 %v14352_v38  ;;  %v14403_v38 = vcombine.high %v2469_v54, %v2472_v34 }
 0x24f   :  { %4917 = vmatpush1.bf16.msra.mxu1 %v14354_v39  ;;  %4746 = vmatprep.subr.bf16.mxu0 %v14359_v40  ;;  %v2474_v39 = vld [vmem:[#allocation11 + $0x900] sm:$0xff] }
 0x250   :  { %4918 = vmatprep.subr.bf16.mxu1 %v14361_v41  ;;  %v2477_v40 = vld [vmem:[#allocation11 + $0x960] sm:$0xff]  ;;  %v2475_v41 = vld [vmem:[#allocation11 + $0x908] sm:$0xff] }
 0x251   :  { %v14407_v47 = vcombine.high %v2474_v39, %v2477_v40  ;;  %v14406_v55 = vcombine.low %v2474_v39, %v2477_v40  ;;  %v14408_v56 = vcombine.low %v2475_v41, %v2478_v42 }
 0x252   :  { %4747 = vmatpush1.bf16.msra.mxu0 %v14358_v49  ;;  %v14409_v49 = vcombine.high %v2475_v41, %v2478_v42 }
 0x253   :  { %4919 = vmatpush1.bf16.msra.mxu1 %v14360_v50  ;;  %4748 = vmatprep.subr.bf16.mxu0 %v14365_v51  ;;  %v2480_v50 = vld [vmem:[#allocation11 + $0x9c0] sm:$0xff] }
 0x254   :  { %4920 = vmatprep.subr.bf16.mxu1 %v14367_v52  ;;  %v2483_v51 = vld [vmem:[#allocation11 + $0xa20] sm:$0xff]  ;;  %v2481_v52 = vld [vmem:[#allocation11 + $0x9c8] sm:$0xff] }
 0x255   :  { %v14413_v58 = vcombine.high %v2480_v50, %v2483_v51  ;;  %v14412_v2 = vcombine.low %v2480_v50, %v2483_v51  ;;  %v14414_v3 = vcombine.low %v2481_v52, %v2484_v53 }
 0x256   :  { %4749 = vmatpush1.bf16.msra.mxu0 %v14364_v59  ;;  %v14415_v59 = vcombine.high %v2481_v52, %v2484_v53 }
 0x257   :  { %4921 = vmatpush1.bf16.msra.mxu1 %v14366_v60  ;;  %4750 = vmatprep.subr.bf16.mxu0 %v14371_v61  ;;  %v2486_v60 = vld [vmem:[#allocation11 + $0xa80] sm:$0xff] }
 0x258   :  { %4922 = vmatprep.subr.bf16.mxu1 %v14373_v63  ;;  %v2489_v61 = vld [vmem:[#allocation11 + $0xae0] sm:$0xff]  ;;  %v2487_v63 = vld [vmem:[#allocation11 + $0xa88] sm:$0xff] }
 0x259   :  { %v14419_v4 = vcombine.high %v2486_v60, %v2489_v61  ;;  %v14418_v11 = vcombine.low %v2486_v60, %v2489_v61  ;;  %v14420_v12 = vcombine.low %v2487_v63, %v2490_v1 }
 0x25a   :  { %4751 = vmatpush1.bf16.msra.mxu0 %v14370_v5  ;;  %v14421_v5 = vcombine.high %v2487_v63, %v2490_v1  ;;  %v2504_v63 = vld [vmem:[#allocation11 + $0xcc0] sm:$0xff] }
 0x25b   :  { %4923 = vmatpush1.bf16.msra.mxu1 %v14372_v6  ;;  %4752 = vmatprep.subr.bf16.mxu0 %v14377_v7  ;;  %v2492_v6 = vld [vmem:[#allocation11 + $0xb40] sm:$0xff] }
 0x25c   :  { %4924 = vmatprep.subr.bf16.mxu1 %v14379_v8  ;;  %v2495_v7 = vld [vmem:[#allocation11 + $0xba0] sm:$0xff]  ;;  %v2493_v8 = vld [vmem:[#allocation11 + $0xb48] sm:$0xff] }
 0x25d   :  { %v14425_v13 = vcombine.high %v2492_v6, %v2495_v7  ;;  %v14424_v19 = vcombine.low %v2492_v6, %v2495_v7  ;;  %v14426_v20 = vcombine.low %v2493_v8, %v2496_v10 }
 0x25e   :  { %4753 = vmatpush1.bf16.msra.mxu0 %v14376_v14  ;;  %v14427_v14 = vcombine.high %v2493_v8, %v2496_v10 }
 0x25f   :  { %4925 = vmatpush1.bf16.msra.mxu1 %v14378_v15  ;;  %4754 = vmatprep.subr.bf16.mxu0 %v14383_v16  ;;  %v16678_v15 = vld [vmem:[#allocation11 + $0xc00] sm:$0xff] }
 0x260   :  { %4926 = vmatprep.subr.bf16.mxu1 %v14385_v17  ;;  %v16680_v16 = vld [vmem:[#allocation11 + $0xc60] sm:$0xff]  ;;  %v16682_v17 = vld [vmem:[#allocation11 + $0xc08] sm:$0xff] }
 0x261   :  { %v14431_v21 = vcombine.high %v16678_v15, %v16680_v16  ;;  %v14430_v8 = vcombine.low %v16678_v15, %v16680_v16  ;;  %v14432_v10 = vcombine.low %v16682_v17, %v16684_v18 }
 0x262   :  { %4755 = vmatpush1.bf16.msra.mxu0 %v14382_v9  ;;  %v14433_v9 = vcombine.high %v16682_v17, %v16684_v18 }
 0x263   :  { %4927 = vmatpush1.bf16.msra.mxu1 %v14384_v22  ;;  %4756 = vmatprep.subr.bf16.mxu0 %v14389_v23  ;;  %v16690_v22 = vld [vmem:[#allocation10] sm:$0xff] }
 0x264   :  { %4928 = vmatprep.subr.bf16.mxu1 %v14391_v24  ;;  %v701_v23 = vrot.slane %v16690_v22, %v16639_v46  ;;  %v709_v24 = vrot.slane %v16690_v22, %v16647_v62  ;;  %v705_v25 = vrot.slane %v16690_v22, %v16642_v48  ;;  %v713_v26 = vrot.slane %v16690_v22, %v16650_v0 }
 0x266   :  { %4757 = vmatpush1.bf16.msra.mxu0 %v14388_v28 }
 0x267   :  { %4929 = vmatpush1.bf16.msra.mxu1 %v14390_v29  ;;  %4758 = vmatprep.subr.bf16.mxu0 %v14395_v30 }
 0x268   :  { %4930 = vmatprep.subr.bf16.mxu1 %v14397_v31 }
 0x26a   :  { %4759 = vmatpush1.bf16.msra.mxu0 %v14394_v35 }
 0x26b   :  { %4931 = vmatpush1.bf16.msra.mxu1 %v14396_v36  ;;  %4760 = vmatprep.subr.bf16.mxu0 %v14401_v37 }
 0x26c   :  { %4932 = vmatprep.subr.bf16.mxu1 %v14403_v38 }
 0x26e   :  { %4761 = vmatpush1.bf16.msra.mxu0 %v14400_v43 }
 0x26f   :  { %4933 = vmatpush1.bf16.msra.mxu1 %v14402_v44  ;;  %4762 = vmatprep.subr.bf16.mxu0 %v14407_v47 }
 0x270   :  { %4934 = vmatprep.subr.bf16.mxu1 %v14409_v49 }
 0x272   :  { %4763 = vmatpush1.bf16.msra.mxu0 %v14406_v55 }
 0x273   :  { %4935 = vmatpush1.bf16.msra.mxu1 %v14408_v56  ;;  %4764 = vmatprep.subr.bf16.mxu0 %v14413_v58 }
 0x274   :  { %4936 = vmatprep.subr.bf16.mxu1 %v14415_v59 }
 0x276   :  { %4765 = vmatpush1.bf16.msra.mxu0 %v14412_v2 }
 0x277   :  { %4937 = vmatpush1.bf16.msra.mxu1 %v14414_v3  ;;  %4766 = vmatprep.subr.bf16.mxu0 %v14419_v4  ;;  %v2507_v3 = vld [vmem:[#allocation11 + $0xd20] sm:$0xff]  ;;  %v2505_v4 = vld [vmem:[#allocation11 + $0xcc8] sm:$0xff] }
 0x278   :  { %4938 = vmatprep.subr.bf16.mxu1 %v14421_v5  ;;  %v2508_v5 = vld [vmem:[#allocation11 + $0xd28] sm:$0xff]  ;;  %v14436_v15 = vcombine.low %v2504_v63, %v2507_v3 }
 0x279   :  { %v14438_v16 = vcombine.low %v2505_v4, %v2508_v5 }
 0x27a   :  { %4767 = vmatpush1.bf16.msra.mxu0 %v14418_v11  ;;  %v2510_v11 = vld [vmem:[#allocation11 + $0xd80] sm:$0xff] }
 0x27b   :  { %4939 = vmatpush1.bf16.msra.mxu1 %v14420_v12  ;;  %4768 = vmatprep.subr.bf16.mxu0 %v14425_v13  ;;  %v14437_v12 = vcombine.high %v2504_v63, %v2507_v3  ;;  %v14439_v13 = vcombine.high %v2505_v4, %v2508_v5  ;;  %v2546_v4 = vld [vmem:[#allocation11 + $0x1200] sm:$0xff] }
 0x27c   :  { %4940 = vmatprep.subr.bf16.mxu1 %v14427_v14  ;;  %v2513_v14 = vld [vmem:[#allocation11 + $0xde0] sm:$0xff] }
 0x27d   :  { %v14443_v17 = vcombine.high %v2510_v11, %v2513_v14  ;;  %v2549_v5 = vld [vmem:[#allocation11 + $0x1260] sm:$0xff] }
 0x27e   :  { %4769 = vmatpush1.bf16.msra.mxu0 %v14424_v19  ;;  %v2511_v19 = vld [vmem:[#allocation11 + $0xd88] sm:$0xff] }
 0x27f   :  { %4941 = vmatpush1.bf16.msra.mxu1 %v14426_v20  ;;  %4781 = vmatprep.subr.bf16.mxu0 %v14431_v21  ;;  %v2514_v20 = vld [vmem:[#allocation11 + $0xde8] sm:$0xff]  ;;  %v2516_v21 = vld [vmem:[#allocation11 + $0xe40] sm:$0xff] }
 0x280   :  { %4953 = vmatprep.subr.bf16.mxu1 %v14433_v9  ;;  %v14445_v18 = vcombine.high %v2511_v19, %v2514_v20  ;;  %v2519_v9 = vld [vmem:[#allocation11 + $0xea0] sm:$0xff] }
 0x294   :  { %v2095_v27 = vpop.f32.mrb[4].mxu0  ;;  %v2181_v57 = vpop.f32.mrb[4].mxu1 }
 0x295   :  { %v15918_v28 = vadd.f32 %v2095_v27, %v701_v23  ;;  %v15922_v29 = vadd.f32 %v2181_v57, %v709_v24  ;;  %v2097_v30 = vpop.f32.mrb[5].mxu0  ;;  %v2183_v31 = vpop.f32.mrb[5].mxu1  ;;  %v14449_v27 = vcombine.high %v2516_v21, %v2519_v9 }
 0x296   :  { %v15919_v32 = vadd.f32 %v2097_v30, %v705_v25  ;;  %v15923_v33 = vadd.f32 %v2183_v31, %v713_v26  ;;  %v2099_v54 = vpop.f32.mrb[6].mxu0  ;;  %v2185_v34 = vpop.f32.mrb[6].mxu1  ;;  %v2523_v30 = vld [vmem:[#allocation11 + $0xf08] sm:$0xff] }
 0x297   :  { %v2362_v35 = vmul.f32 0.2, %v15918_v28  ;;  %v2364_v36 = vmul.f32 0.2, %v15922_v29  ;;  %v15920_v37 = vadd.f32 %v2099_v54, %v701_v23  ;;  %v15924_v38 = vadd.f32 %v2185_v34, %v709_v24  ;;  %v2101_v39 = vpop.f32.mrb[7].mxu0  ;;  %v2187_v40 = vpop.f32.mrb[7].mxu1 }
 0x298   :  { %v2363_v41 = vmul.f32 0.2, %v15919_v32  ;;  %v2365_v42 = vmul.f32 0.2, %v15923_v33  ;;  %v15921_v43 = vadd.f32 %v2101_v39, %v705_v25  ;;  %v15925_v44 = vadd.f32 %v2187_v40, %v713_v26  ;;  %v2517_v23 = vld [vmem:[#allocation11 + $0xe48] sm:$0xff] }
 0x299   :  { %v2370_v47 = vmul.f32 0.2, %v15920_v37  ;;  %v2372_v49 = vmul.f32 0.2, %v15924_v38  ;;  %v2378_v52 = vmax.f32 %v15918_v28, %v2362_v35  ;;  %v2380_v53 = vmax.f32 %v15922_v29, %v2364_v36  ;;  %v2520_v24 = vld [vmem:[#allocation11 + $0xea8] sm:$0xff]  ;;  %v2522_v28 = vld [vmem:[#allocation11 + $0xf00] sm:$0xff] }
 0x29a   :  { %v2371_v50 = vmul.f32 0.2, %v15921_v43  ;;  %v2373_v51 = vmul.f32 0.2, %v15925_v44  ;;  %v2379_v58 = vmax.f32 %v15919_v32, %v2363_v41  ;;  %v2381_v59 = vmax.f32 %v15923_v33, %v2365_v42  ;;  %v2525_v29 = vld [vmem:[#allocation11 + $0xf60] sm:$0xff]  ;;  %v2526_v31 = vld [vmem:[#allocation11 + $0xf68] sm:$0xff] }
 0x29b   :  { %v2386_v55 = vmax.f32 %v15920_v37, %v2370_v47  ;;  %v2388_v56 = vmax.f32 %v15924_v38, %v2372_v49  ;;  %v14442_v25 = vcombine.low %v2510_v11, %v2513_v14  ;;  %v14444_v26 = vcombine.low %v2511_v19, %v2514_v20  ;;  %v2528_v35 = vld [vmem:[#allocation11 + $0xfc0] sm:$0xff]  ;;  %v2529_v37 = vld [vmem:[#allocation11 + $0xfc8] sm:$0xff] }
 0x29c   :  { %v2387_v60 = vmax.f32 %v15921_v43, %v2371_v50  ;;  %v2389_v61 = vmax.f32 %v15925_v44, %v2373_v51  ;;  %v14451_v57 = vcombine.high %v2517_v23, %v2520_v24  ;;  %v14448_v32 = vcombine.low %v2516_v21, %v2519_v9  ;;  %v2531_v36 = vld [vmem:[#allocation11 + $0x1020] sm:$0xff]  ;;  %v2532_v38 = vld [vmem:[#allocation11 + $0x1028] sm:$0xff] }
 0x29d   :  { %v16700_v1 = vpack.c.bf16 %v2386_v55, %v2378_v52  ;;  %v16702_v2 = vpack.c.bf16 %v2388_v56, %v2380_v53  ;;  %v14450_v33 = vcombine.low %v2517_v23, %v2520_v24  ;;  %v14455_v54 = vcombine.high %v2522_v28, %v2525_v29  ;;  %v2534_v43 = vld [vmem:[#allocation11 + $0x1080] sm:$0xff]  ;;  %v2535_v47 = vld [vmem:[#allocation11 + $0x1088] sm:$0xff] }
 0x29e   :  { %v16704_v6 = vpack.c.bf16 %v2387_v60, %v2379_v58  ;;  %v16706_v7 = vpack.c.bf16 %v2389_v61, %v2381_v59  ;;  %v14457_v34 = vcombine.high %v2523_v30, %v2526_v31  ;;  %v14454_v39 = vcombine.low %v2522_v28, %v2525_v29  ;;  %v2537_v44 = vld [vmem:[#allocation11 + $0x10e0] sm:$0xff]  ;;  %v2538_v49 = vld [vmem:[#allocation11 + $0x10e8] sm:$0xff] }
 0x29f   :  { %v14456_v40 = vcombine.low %v2523_v30, %v2526_v31  ;;  %v14461_v41 = vcombine.high %v2528_v35, %v2531_v36  ;;  %v14463_v42 = vcombine.high %v2529_v37, %v2532_v38  ;;  %v14460_v50 = vcombine.low %v2528_v35, %v2531_v36  ;;  %v2540_v55 = vld [vmem:[#allocation11 + $0x1140] sm:$0xff]  ;;  %v2541_v58 = vld [vmem:[#allocation11 + $0x1148] sm:$0xff] }
 0x2a0   :  { %4770 = vmatprep.mubr.bf16.mxu0 %v16704_v6  ;;  %4942 = vmatprep.mubr.bf16.mxu1 %v16704_v6  ;;  %v14462_v51 = vcombine.low %v2529_v37, %v2532_v38  ;;  %v14467_v52 = vcombine.high %v2534_v43, %v2537_v44  ;;  %v14469_v53 = vcombine.high %v2535_v47, %v2538_v49  ;;  %v2543_v56 = vld [vmem:[#allocation11 + $0x11a0] sm:$0xff]  ;;  %v2544_v59 = vld [vmem:[#allocation11 + $0x11a8] sm:$0xff] }
 0x2a1   :  { %4771 = vmatmul.mubr.bf16.vlgmr.msra.gmra.mrb[12].mxu0 %v16700_v1  ;;  %4943 = vmatmul.mubr.bf16.vlgmr.msra.gmra.mrb[12].mxu1 %v16700_v1  ;;  %v14466_v60 = vcombine.low %v2534_v43, %v2537_v44  ;;  %v14468_v61 = vcombine.low %v2535_v47, %v2538_v49  ;;  %v14473_v63 = vcombine.high %v2540_v55, %v2543_v56  ;;  %v2552_v19 = vld [vmem:[#allocation11 + $0x12c0] sm:$0xff] }
 0x2a2   :  { %4782 = vmatpush1.bf16.msra.mxu0 %v14430_v8  ;;  %4954 = vmatpush1.bf16.msra.mxu1 %v14432_v10  ;;  %v14475_v3 = vcombine.high %v2541_v58, %v2544_v59  ;;  %v2547_v8 = vld [vmem:[#allocation11 + $0x1208] sm:$0xff]  ;;  %v14472_v11 = vcombine.low %v2540_v55, %v2543_v56  ;;  %v2555_v20 = vld [vmem:[#allocation11 + $0x1320] sm:$0xff] }
 0x2a3   :  { %4813 = vmatprep.mubr.bf16.mxu0 %v16706_v7  ;;  %4985 = vmatprep.mubr.bf16.mxu1 %v16706_v7  ;;  %v2550_v10 = vld [vmem:[#allocation11 + $0x1268] sm:$0xff]  ;;  %v14485_v21 = vcombine.high %v2552_v19, %v2555_v20  ;;  %v2558_v23 = vld [vmem:[#allocation11 + $0x1380] sm:$0xff] }
 0x2a4   :  { %4783 = vmatprep.subr.bf16.mxu0 %v14437_v12  ;;  %4955 = vmatprep.subr.bf16.mxu1 %v14439_v13  ;;  %v14474_v12 = vcombine.low %v2541_v58, %v2544_v59  ;;  %v14479_v13 = vcombine.high %v2546_v4, %v2549_v5  ;;  %v14481_v14 = vcombine.high %v2547_v8, %v2550_v10  ;;  %v2561_v24 = vld [vmem:[#allocation11 + $0x13e0] sm:$0xff] }
 0x2a5   :  { %v14491_v28 = vcombine.high %v2558_v23, %v2561_v24  ;;  %v2564_v30 = vld [vmem:[#allocation11 + $0x1440] sm:$0xff] }
 0x2a6   :  { %4784 = vmatpush1.bf16.msra.mxu0 %v14436_v15  ;;  %4956 = vmatpush1.bf16.msra.mxu1 %v14438_v16  ;;  %v2553_v15 = vld [vmem:[#allocation11 + $0x12c8] sm:$0xff]  ;;  %v2567_v31 = vld [vmem:[#allocation11 + $0x14a0] sm:$0xff] }
 0x2a7   :  { %4785 = vmatprep.subr.bf16.mxu0 %v14443_v17  ;;  %4957 = vmatprep.subr.bf16.mxu1 %v14445_v18  ;;  %v2556_v16 = vld [vmem:[#allocation11 + $0x1328] sm:$0xff]  ;;  %v14478_v17 = vcombine.low %v2546_v4, %v2549_v5  ;;  %v14480_v18 = vcombine.low %v2547_v8, %v2550_v10  ;;  %v14497_v35 = vcombine.high %v2564_v30, %v2567_v31  ;;  %v2570_v37 = vld [vmem:[#allocation11 + $0x1500] sm:$0xff] }
 0x2a8   :  { %v14487_v9 = vcombine.high %v2553_v15, %v2556_v16  ;;  %v2573_v38 = vld [vmem:[#allocation11 + $0x1560] sm:$0xff] }
 0x2a9   :  { %v14503_v43 = vcombine.high %v2570_v37, %v2573_v38  ;;  %v2576_v47 = vld [vmem:[#allocation11 + $0x15c0] sm:$0xff] }
 0x2aa   :  { %4786 = vmatpush1.bf16.msra.mxu0 %v14442_v25  ;;  %4958 = vmatpush1.bf16.msra.mxu1 %v14444_v26  ;;  %v2559_v25 = vld [vmem:[#allocation11 + $0x1388] sm:$0xff]  ;;  %v2579_v49 = vld [vmem:[#allocation11 + $0x1620] sm:$0xff] }
 0x2ab   :  { %4787 = vmatprep.subr.bf16.mxu0 %v14449_v27  ;;  %4959 = vmatprep.subr.bf16.mxu1 %v14451_v57  ;;  %v2562_v26 = vld [vmem:[#allocation11 + $0x13e8] sm:$0xff]  ;;  %v14484_v27 = vcombine.low %v2552_v19, %v2555_v20  ;;  %v14486_v57 = vcombine.low %v2553_v15, %v2556_v16  ;;  %v14509_v55 = vcombine.high %v2576_v47, %v2579_v49  ;;  %v2582_v58 = vld [vmem:[#allocation11 + $0x1680] sm:$0xff] }
 0x2ac   :  { %v14493_v29 = vcombine.high %v2559_v25, %v2562_v26  ;;  %v2585_v59 = vld [vmem:[#allocation11 + $0x16e0] sm:$0xff] }
 0x2ad   :  { %v14515_v4 = vcombine.high %v2582_v58, %v2585_v59  ;;  %v2588_v8 = vld [vmem:[#allocation11 + $0x1740] sm:$0xff] }
 0x2ae   :  { %4788 = vmatpush1.bf16.msra.mxu0 %v14448_v32  ;;  %4960 = vmatpush1.bf16.msra.mxu1 %v14450_v33  ;;  %v2565_v32 = vld [vmem:[#allocation11 + $0x1448] sm:$0xff]  ;;  %v2591_v10 = vld [vmem:[#allocation11 + $0x17a0] sm:$0xff] }
 0x2af   :  { %4789 = vmatprep.subr.bf16.mxu0 %v14455_v54  ;;  %4961 = vmatprep.subr.bf16.mxu1 %v14457_v34  ;;  %v2568_v33 = vld [vmem:[#allocation11 + $0x14a8] sm:$0xff]  ;;  %v14490_v54 = vcombine.low %v2558_v23, %v2561_v24  ;;  %v14492_v34 = vcombine.low %v2559_v25, %v2562_v26  ;;  %v14521_v19 = vcombine.high %v2588_v8, %v2591_v10  ;;  %v2594_v15 = vld [vmem:[#allocation11 + $0x1800] sm:$0xff] }
 0x2b0   :  { %v14499_v36 = vcombine.high %v2565_v32, %v2568_v33  ;;  %v2597_v16 = vld [vmem:[#allocation11 + $0x1860] sm:$0xff] }
 0x2b1   :  { %v14527_v23 = vcombine.high %v2594_v15, %v2597_v16  ;;  %v2600_v25 = vld [vmem:[#allocation11 + $0x18c0] sm:$0xff] }
 0x2b2   :  { %4790 = vmatpush1.bf16.msra.mxu0 %v14454_v39  ;;  %4962 = vmatpush1.bf16.msra.mxu1 %v14456_v40  ;;  %v2571_v39 = vld [vmem:[#allocation11 + $0x1508] sm:$0xff]  ;;  %v2603_v26 = vld [vmem:[#allocation11 + $0x1920] sm:$0xff] }
 0x2b3   :  { %4791 = vmatprep.subr.bf16.mxu0 %v14461_v41  ;;  %4963 = vmatprep.subr.bf16.mxu1 %v14463_v42  ;;  %v2574_v40 = vld [vmem:[#allocation11 + $0x1568] sm:$0xff]  ;;  %v14496_v41 = vcombine.low %v2564_v30, %v2567_v31  ;;  %v14498_v42 = vcombine.low %v2565_v32, %v2568_v33  ;;  %v14533_v30 = vcombine.high %v2600_v25, %v2603_v26  ;;  %v2606_v32 = vld [vmem:[#allocation11 + $0x1980] sm:$0xff] }
 0x2b4   :  { %v14505_v44 = vcombine.high %v2571_v39, %v2574_v40  ;;  %v2609_v33 = vld [vmem:[#allocation11 + $0x19e0] sm:$0xff] }
 0x2b6   :  { %4792 = vmatpush1.bf16.msra.mxu0 %v14460_v50  ;;  %4964 = vmatpush1.bf16.msra.mxu1 %v14462_v51  ;;  %v2577_v50 = vld [vmem:[#allocation11 + $0x15c8] sm:$0xff] }
 0x2b7   :  { %4793 = vmatprep.subr.bf16.mxu0 %v14467_v52  ;;  %4965 = vmatprep.subr.bf16.mxu1 %v14469_v53  ;;  %v2580_v51 = vld [vmem:[#allocation11 + $0x1628] sm:$0xff]  ;;  %v14502_v52 = vcombine.low %v2570_v37, %v2573_v38  ;;  %v14504_v53 = vcombine.low %v2571_v39, %v2574_v40  ;;  %v14539_v37 = vcombine.high %v2606_v32, %v2609_v33  ;;  %v2612_v39 = vld [vmem:[#allocation11 + $0x1a40] sm:$0xff] }
 0x2b8   :  { %v14511_v56 = vcombine.high %v2577_v50, %v2580_v51  ;;  %v2615_v40 = vld [vmem:[#allocation11 + $0x1aa0] sm:$0xff] }
 0x2ba   :  { %4794 = vmatpush1.bf16.msra.mxu0 %v14466_v60  ;;  %4966 = vmatpush1.bf16.msra.mxu1 %v14468_v61  ;;  %v2583_v60 = vld [vmem:[#allocation11 + $0x1688] sm:$0xff] }
 0x2bb   :  { %4795 = vmatprep.subr.bf16.mxu0 %v14473_v63  ;;  %4967 = vmatprep.subr.bf16.mxu1 %v14475_v3  ;;  %v2586_v61 = vld [vmem:[#allocation11 + $0x16e8] sm:$0xff]  ;;  %v14508_v63 = vcombine.low %v2576_v47, %v2579_v49  ;;  %v14510_v3 = vcombine.low %v2577_v50, %v2580_v51  ;;  %v14545_v47 = vcombine.high %v2612_v39, %v2615_v40  ;;  %v2618_v50 = vld [vmem:[#allocation11 + $0x1b00] sm:$0xff] }
 0x2bc   :  { %v14517_v5 = vcombine.high %v2583_v60, %v2586_v61  ;;  %v2621_v51 = vld [vmem:[#allocation11 + $0x1b60] sm:$0xff] }
 0x2be   :  { %4796 = vmatpush1.bf16.msra.mxu0 %v14472_v11  ;;  %4968 = vmatpush1.bf16.msra.mxu1 %v14474_v12  ;;  %v2589_v11 = vld [vmem:[#allocation11 + $0x1748] sm:$0xff] }
 0x2bf   :  { %4797 = vmatprep.subr.bf16.mxu0 %v14479_v13  ;;  %4969 = vmatprep.subr.bf16.mxu1 %v14481_v14  ;;  %v2592_v12 = vld [vmem:[#allocation11 + $0x17a8] sm:$0xff]  ;;  %v14514_v13 = vcombine.low %v2582_v58, %v2585_v59  ;;  %v14516_v14 = vcombine.low %v2583_v60, %v2586_v61  ;;  %v14551_v58 = vcombine.high %v2618_v50, %v2621_v51  ;;  %v2624_v60 = vld [vmem:[#allocation11 + $0x1bc0] sm:$0xff] }
 0x2c0   :  { %v14523_v20 = vcombine.high %v2589_v11, %v2592_v12  ;;  %v2627_v61 = vld [vmem:[#allocation11 + $0x1c20] sm:$0xff] }
 0x2c2   :  { %4798 = vmatpush1.bf16.msra.mxu0 %v14478_v17  ;;  %4970 = vmatpush1.bf16.msra.mxu1 %v14480_v18  ;;  %v2595_v17 = vld [vmem:[#allocation11 + $0x1808] sm:$0xff] }
 0x2c3   :  { %4799 = vmatprep.subr.bf16.mxu0 %v14485_v21  ;;  %4971 = vmatprep.subr.bf16.mxu1 %v14487_v9  ;;  %v2598_v18 = vld [vmem:[#allocation11 + $0x1868] sm:$0xff]  ;;  %v14520_v21 = vcombine.low %v2588_v8, %v2591_v10  ;;  %v14522_v9 = vcombine.low %v2589_v11, %v2592_v12  ;;  %v14557_v8 = vcombine.high %v2624_v60, %v2627_v61  ;;  %v2630_v11 = vld [vmem:[#allocation11 + $0x1c80] sm:$0xff] }
 0x2c4   :  { %v14529_v24 = vcombine.high %v2595_v17, %v2598_v18  ;;  %v2633_v12 = vld [vmem:[#allocation11 + $0x1ce0] sm:$0xff] }
 0x2c6   :  { %4800 = vmatpush1.bf16.msra.mxu0 %v14484_v27  ;;  %4972 = vmatpush1.bf16.msra.mxu1 %v14486_v57  ;;  %v2601_v27 = vld [vmem:[#allocation11 + $0x18c8] sm:$0xff] }
 0x2c7   :  { %4801 = vmatprep.subr.bf16.mxu0 %v14491_v28  ;;  %4973 = vmatprep.subr.bf16.mxu1 %v14493_v29  ;;  %v2604_v57 = vld [vmem:[#allocation11 + $0x1928] sm:$0xff]  ;;  %v14526_v28 = vcombine.low %v2594_v15, %v2597_v16  ;;  %v14528_v29 = vcombine.low %v2595_v17, %v2598_v18  ;;  %v14563_v15 = vcombine.high %v2630_v11, %v2633_v12  ;;  %v2636_v17 = vld [vmem:[#allocation11 + $0x1d40] sm:$0xff] }
 0x2c8   :  { %v14535_v31 = vcombine.high %v2601_v27, %v2604_v57  ;;  %v2639_v18 = vld [vmem:[#allocation11 + $0x1da0] sm:$0xff] }
 0x2ca   :  { %4802 = vmatpush1.bf16.msra.mxu0 %v14490_v54  ;;  %4974 = vmatpush1.bf16.msra.mxu1 %v14492_v34  ;;  %v2607_v54 = vld [vmem:[#allocation11 + $0x1988] sm:$0xff] }
 0x2cb   :  { %4803 = vmatprep.subr.bf16.mxu0 %v14497_v35  ;;  %4975 = vmatprep.subr.bf16.mxu1 %v14499_v36  ;;  %v2610_v34 = vld [vmem:[#allocation11 + $0x19e8] sm:$0xff]  ;;  %v14532_v35 = vcombine.low %v2600_v25, %v2603_v26  ;;  %v14534_v36 = vcombine.low %v2601_v27, %v2604_v57  ;;  %v14569_v25 = vcombine.high %v2636_v17, %v2639_v18  ;;  %v2642_v27 = vld [vmem:[#allocation11 + $0x1e00] sm:$0xff] }
 0x2cc   :  { %v14541_v38 = vcombine.high %v2607_v54, %v2610_v34  ;;  %v2645_v57 = vld [vmem:[#allocation11 + $0x1e60] sm:$0xff] }
 0x2ce   :  { %4804 = vmatpush1.bf16.msra.mxu0 %v14496_v41  ;;  %4976 = vmatpush1.bf16.msra.mxu1 %v14498_v42  ;;  %v2613_v41 = vld [vmem:[#allocation11 + $0x1a48] sm:$0xff] }
 0x2cf   :  { %4805 = vmatprep.subr.bf16.mxu0 %v14503_v43  ;;  %4977 = vmatprep.subr.bf16.mxu1 %v14505_v44  ;;  %v2616_v42 = vld [vmem:[#allocation11 + $0x1aa8] sm:$0xff]  ;;  %v14538_v43 = vcombine.low %v2606_v32, %v2609_v33  ;;  %v14540_v44 = vcombine.low %v2607_v54, %v2610_v34  ;;  %v14575_v32 = vcombine.high %v2642_v27, %v2645_v57  ;;  %v2648_v54 = vld [vmem:[#allocation11 + $0x1ec0] sm:$0xff] }
 0x2d0   :  { %v14547_v49 = vcombine.high %v2613_v41, %v2616_v42  ;;  %v2651_v34 = vld [vmem:[#allocation11 + $0x1f20] sm:$0xff] }
 0x2d2   :  { %4806 = vmatpush1.bf16.msra.mxu0 %v14502_v52  ;;  %4978 = vmatpush1.bf16.msra.mxu1 %v14504_v53  ;;  %v2619_v52 = vld [vmem:[#allocation11 + $0x1b08] sm:$0xff] }
 0x2d3   :  { %4807 = vmatprep.subr.bf16.mxu0 %v14509_v55  ;;  %4979 = vmatprep.subr.bf16.mxu1 %v14511_v56  ;;  %v2622_v53 = vld [vmem:[#allocation11 + $0x1b68] sm:$0xff]  ;;  %v14544_v55 = vcombine.low %v2612_v39, %v2615_v40  ;;  %v14546_v56 = vcombine.low %v2613_v41, %v2616_v42  ;;  %v14581_v39 = vcombine.high %v2648_v54, %v2651_v34  ;;  %v2654_v41 = vld [vmem:[#allocation11 + $0x1f80] sm:$0xff] }
 0x2d4   :  { %v14553_v59 = vcombine.high %v2619_v52, %v2622_v53  ;;  %v2657_v42 = vld [vmem:[#allocation11 + $0x1fe0] sm:$0xff] }
 0x2d6   :  { %4808 = vmatpush1.bf16.msra.mxu0 %v14508_v63  ;;  %4980 = vmatpush1.bf16.msra.mxu1 %v14510_v3  ;;  %v2625_v63 = vld [vmem:[#allocation11 + $0x1bc8] sm:$0xff] }
 0x2d7   :  { %4809 = vmatprep.subr.bf16.mxu0 %v14515_v4  ;;  %4981 = vmatprep.subr.bf16.mxu1 %v14517_v5  ;;  %v2628_v3 = vld [vmem:[#allocation11 + $0x1c28] sm:$0xff]  ;;  %v14550_v4 = vcombine.low %v2618_v50, %v2621_v51  ;;  %v14552_v5 = vcombine.low %v2619_v52, %v2622_v53  ;;  %v14587_v50 = vcombine.high %v2654_v41, %v2657_v42  ;;  %v2660_v52 = vld [vmem:[#allocation11 + $0x2040] sm:$0xff] }
 0x2d8   :  { %v14559_v10 = vcombine.high %v2625_v63, %v2628_v3  ;;  %v2663_v53 = vld [vmem:[#allocation11 + $0x20a0] sm:$0xff] }
 0x2da   :  { %4810 = vmatpush1.bf16.msra.mxu0 %v14514_v13  ;;  %4982 = vmatpush1.bf16.msra.mxu1 %v14516_v14  ;;  %v2631_v13 = vld [vmem:[#allocation11 + $0x1c88] sm:$0xff] }
 0x2db   :  { %4811 = vmatprep.subr.bf16.mxu0 %v14521_v19  ;;  %4983 = vmatprep.subr.bf16.mxu1 %v14523_v20  ;;  %v2634_v14 = vld [vmem:[#allocation11 + $0x1ce8] sm:$0xff]  ;;  %v14556_v19 = vcombine.low %v2624_v60, %v2627_v61  ;;  %v14558_v20 = vcombine.low %v2625_v63, %v2628_v3  ;;  %v14593_v60 = vcombine.high %v2660_v52, %v2663_v53  ;;  %v2666_v63 = vld [vmem:[#allocation11 + $0x2100] sm:$0xff] }
 0x2dc   :  { %v14565_v16 = vcombine.high %v2631_v13, %v2634_v14  ;;  %v2669_v3 = vld [vmem:[#allocation11 + $0x2160] sm:$0xff] }
 0x2de   :  { %4812 = vmatpush1.bf16.msra.mxu0 %v14520_v21  ;;  %4984 = vmatpush1.bf16.msra.mxu1 %v14522_v9  ;;  %v2637_v21 = vld [vmem:[#allocation11 + $0x1d48] sm:$0xff] }
 0x2df   :  { %4824 = vmatprep.subr.bf16.mxu0 %v14527_v23  ;;  %4996 = vmatprep.subr.bf16.mxu1 %v14529_v24  ;;  %v2640_v9 = vld [vmem:[#allocation11 + $0x1da8] sm:$0xff]  ;;  %v14562_v23 = vcombine.low %v2630_v11, %v2633_v12  ;;  %v14564_v24 = vcombine.low %v2631_v13, %v2634_v14  ;;  %v14599_v11 = vcombine.high %v2666_v63, %v2669_v3  ;;  %v2672_v13 = vld [vmem:[#allocation11 + $0x21c0] sm:$0xff] }
 0x2e0   :  { %v14571_v26 = vcombine.high %v2637_v21, %v2640_v9  ;;  %v2675_v14 = vld [vmem:[#allocation11 + $0x2220] sm:$0xff] }
 0x2e1   :  { %4814 = vmatmul.mubr.bf16.vlgmr.msra.gmra.mrb[12].mxu0 %v16702_v2  ;;  %4986 = vmatmul.mubr.bf16.vlgmr.msra.gmra.mrb[12].mxu1 %v16702_v2 }
 0x2e2   :  { %4825 = vmatpush1.bf16.msra.mxu0 %v14526_v28  ;;  %4997 = vmatpush1.bf16.msra.mxu1 %v14528_v29  ;;  %v2643_v28 = vld [vmem:[#allocation11 + $0x1e08] sm:$0xff] }
 0x2e3   :  { %4826 = vmatprep.subr.bf16.mxu0 %v14533_v30  ;;  %4998 = vmatprep.subr.bf16.mxu1 %v14535_v31  ;;  %v2646_v29 = vld [vmem:[#allocation11 + $0x1e68] sm:$0xff]  ;;  %v14568_v30 = vcombine.low %v2636_v17, %v2639_v18  ;;  %v14570_v31 = vcombine.low %v2637_v21, %v2640_v9  ;;  %v14598_v17 = vcombine.low %v2666_v63, %v2669_v3  ;;  %v16725_v21 = vsub.s32 5, %v16636_v45 }
 0x2e4   :  { %v14577_v33 = vcombine.high %v2643_v28, %v2646_v29  ;;  %v14605_v9 = vcombine.high %v2672_v13, %v2675_v14 }
 0x2e6   :  { %4827 = vmatpush1.bf16.msra.mxu0 %v14532_v35  ;;  %4999 = vmatpush1.bf16.msra.mxu1 %v14534_v36  ;;  %v2649_v35 = vld [vmem:[#allocation11 + $0x1ec8] sm:$0xff] }
 0x2e7   :  { %4828 = vmatprep.subr.bf16.mxu0 %v14539_v37  ;;  %5000 = vmatprep.subr.bf16.mxu1 %v14541_v38  ;;  %v2652_v36 = vld [vmem:[#allocation11 + $0x1f28] sm:$0xff]  ;;  %v14574_v37 = vcombine.low %v2642_v27, %v2645_v57  ;;  %v14576_v38 = vcombine.low %v2643_v28, %v2646_v29 }
 0x2e8   :  { %v14583_v40 = vcombine.high %v2649_v35, %v2652_v36  ;;  %v2679_v27 = vld [vmem:[#allocation11 + $0x2288] sm:$0xff] }
 0x2e9   :  { %v2682_v57 = vld [vmem:[#allocation11 + $0x22e8] sm:$0xff] }
 0x2ea   :  { %4829 = vmatpush1.bf16.msra.mxu0 %v14538_v43  ;;  %5001 = vmatpush1.bf16.msra.mxu1 %v14540_v44  ;;  %v2655_v43 = vld [vmem:[#allocation11 + $0x1f88] sm:$0xff] }
 0x2eb   :  { %4830 = vmatprep.subr.bf16.mxu0 %v14545_v47  ;;  %5002 = vmatprep.subr.bf16.mxu1 %v14547_v49  ;;  %v2658_v44 = vld [vmem:[#allocation11 + $0x1fe8] sm:$0xff]  ;;  %v14580_v47 = vcombine.low %v2648_v54, %v2651_v34  ;;  %v14582_v49 = vcombine.low %v2649_v35, %v2652_v36  ;;  %v14613_v54 = vcombine.high %v2679_v27, %v2682_v57  ;;  %v16734_v34 = vld [vmem:[#allocation11 + $0x2340] sm:$0xff] }
 0x2ec   :  { %v14589_v51 = vcombine.high %v2655_v43, %v2658_v44  ;;  %v16736_v35 = vld [vmem:[#allocation11 + $0x23a0] sm:$0xff] }
 0x2ee   :  { %4831 = vmatpush1.bf16.msra.mxu0 %v14544_v55  ;;  %5003 = vmatpush1.bf16.msra.mxu1 %v14546_v56  ;;  %v2661_v55 = vld [vmem:[#allocation11 + $0x2048] sm:$0xff] }
 0x2ef   :  { %4832 = vmatprep.subr.bf16.mxu0 %v14551_v58  ;;  %5004 = vmatprep.subr.bf16.mxu1 %v14553_v59  ;;  %v2664_v56 = vld [vmem:[#allocation11 + $0x20a8] sm:$0xff]  ;;  %v14586_v58 = vcombine.low %v2654_v41, %v2657_v42  ;;  %v14588_v59 = vcombine.low %v2655_v43, %v2658_v44  ;;  %v14612_v43 = vcombine.low %v2679_v27, %v2682_v57 }
 0x2f0   :  { %v14595_v61 = vcombine.high %v2661_v55, %v2664_v56 }
 0x2f2   :  { %4833 = vmatpush1.bf16.msra.mxu0 %v14550_v4  ;;  %5005 = vmatpush1.bf16.msra.mxu1 %v14552_v5  ;;  %v2667_v4 = vld [vmem:[#allocation11 + $0x2108] sm:$0xff] }
 0x2f3   :  { %4834 = vmatprep.subr.bf16.mxu0 %v14557_v8  ;;  %5006 = vmatprep.subr.bf16.mxu1 %v14559_v10  ;;  %v2670_v5 = vld [vmem:[#allocation11 + $0x2168] sm:$0xff]  ;;  %v14592_v8 = vcombine.low %v2660_v52, %v2663_v53  ;;  %v14594_v10 = vcombine.low %v2661_v55, %v2664_v56 }
 0x2f4   :  { %v14601_v12 = vcombine.high %v2667_v4, %v2670_v5  ;;  %v14600_v18 = vcombine.low %v2667_v4, %v2670_v5 }
 0x2f6   :  { %4835 = vmatpush1.bf16.msra.mxu0 %v14556_v19  ;;  %5007 = vmatpush1.bf16.msra.mxu1 %v14558_v20  ;;  %v2673_v19 = vld [vmem:[#allocation11 + $0x21c8] sm:$0xff] }
 0x2f7   :  { %4836 = vmatprep.subr.bf16.mxu0 %v14563_v15  ;;  %5008 = vmatprep.subr.bf16.mxu1 %v14565_v16  ;;  %v2676_v20 = vld [vmem:[#allocation11 + $0x2228] sm:$0xff]  ;;  %v16721_v15 = vsub.s32 4, %v16636_v45  ;;  %v724_v16 = vsub.s32 6, %v16636_v45 }
 0x2f9   :  { %v717_v28 = vrot.slane %v16690_v22, %v16721_v15  ;;  %v725_v29 = vrot.slane %v16690_v22, %v724_v16 }
 0x2fa   :  { %4837 = vmatpush1.bf16.msra.mxu0 %v14562_v23  ;;  %5009 = vmatpush1.bf16.msra.mxu1 %v14564_v24  ;;  %v14607_v23 = vcombine.high %v2673_v19, %v2676_v20  ;;  %v728_v24 = vsub.s32 7, %v16636_v45 }
 0x2fb   :  { %4838 = vmatprep.subr.bf16.mxu0 %v14569_v25  ;;  %5010 = vmatprep.subr.bf16.mxu1 %v14571_v26  ;;  %v2678_v25 = vld [vmem:[#allocation11 + $0x2280] sm:$0xff] }
 0x2fc   :  { %v2681_v26 = vld [vmem:[#allocation11 + $0x22e0] sm:$0xff]  ;;  %v729_v45 = vrot.slane %v16690_v22, %v728_v24 }
 0x2fd   :  { %v14610_v42 = vcombine.low %v2678_v25, %v2681_v26 }
 0x2fe   :  { %4839 = vmatpush1.bf16.msra.mxu0 %v14568_v30  ;;  %5011 = vmatpush1.bf16.msra.mxu1 %v14570_v31  ;;  %v14604_v30 = vcombine.low %v2672_v13, %v2675_v14  ;;  %v14606_v31 = vcombine.low %v2673_v19, %v2676_v20  ;;  %v14616_v14 = vcombine.low %v16734_v34, %v16736_v35 }
 0x2ff   :  { %4840 = vmatprep.subr.bf16.mxu0 %v14575_v32  ;;  %5012 = vmatprep.subr.bf16.mxu1 %v14577_v33  ;;  %v721_v32 = vrot.slane %v16690_v22, %v16725_v21  ;;  %v14611_v33 = vcombine.high %v2678_v25, %v2681_v26 }
 0x302   :  { %4841 = vmatpush1.bf16.msra.mxu0 %v14574_v37  ;;  %5013 = vmatpush1.bf16.msra.mxu1 %v14576_v38  ;;  %v2685_v37 = vld [vmem:[#allocation11 + $0x2348] sm:$0xff] }
 0x303   :  { %4842 = vmatprep.subr.bf16.mxu0 %v14581_v39  ;;  %5014 = vmatprep.subr.bf16.mxu1 %v14583_v40  ;;  %v2688_v38 = vld [vmem:[#allocation11 + $0x23a8] sm:$0xff] }
 0x304   :  { %v14618_v16 = vcombine.low %v2685_v37, %v2688_v38 }
 0x306   :  { %4843 = vmatpush1.bf16.msra.mxu0 %v14580_v47  ;;  %5015 = vmatpush1.bf16.msra.mxu1 %v14582_v49 }
 0x307   :  { %4844 = vmatprep.subr.bf16.mxu0 %v14587_v50  ;;  %5016 = vmatprep.subr.bf16.mxu1 %v14589_v51  ;;  %v14617_v50 = vcombine.high %v16734_v34, %v16736_v35  ;;  %v16740_v51 = vld [vmem:[#allocation11 + $0x2400] sm:$0xff] }
 0x30a   :  { %4845 = vmatpush1.bf16.msra.mxu0 %v14586_v58  ;;  %5017 = vmatpush1.bf16.msra.mxu1 %v14588_v59  ;;  %v14619_v59 = vcombine.high %v2685_v37, %v2688_v38  ;;  %v2702_v38 = vld [vmem:[#allocation11 + $0x2580] sm:$0xff] }
 0x30b   :  { %4846 = vmatprep.subr.bf16.mxu0 %v14593_v60  ;;  %5018 = vmatprep.subr.bf16.mxu1 %v14595_v61  ;;  %v2693_v60 = vld [vmem:[#allocation11 + $0x2460] sm:$0xff]  ;;  %v2691_v61 = vld [vmem:[#allocation11 + $0x2408] sm:$0xff] }
 0x30e   :  { %4847 = vmatpush1.bf16.msra.mxu0 %v14592_v8  ;;  %5019 = vmatpush1.bf16.msra.mxu1 %v14594_v10  ;;  %v2694_v10 = vld [vmem:[#allocation11 + $0x2468] sm:$0xff] }
 0x30f   :  { %4848 = vmatprep.subr.bf16.mxu0 %v14599_v11  ;;  %5020 = vmatprep.subr.bf16.mxu1 %v14601_v12  ;;  %v14625_v24 = vcombine.high %v2691_v61, %v2694_v10 }
 0x312   :  { %4849 = vmatpush1.bf16.msra.mxu0 %v14598_v17  ;;  %5021 = vmatpush1.bf16.msra.mxu1 %v14600_v18  ;;  %v14623_v17 = vcombine.high %v16740_v51, %v2693_v60 }
 0x313   :  { %4850 = vmatprep.subr.bf16.mxu0 %v14605_v9  ;;  %5022 = vmatprep.subr.bf16.mxu1 %v14607_v23 }
 0x314   :  { %v2267_v36 = vpop.f32.mrb[8].mxu0 }
 0x315   :  { %v15926_v39 = vadd.f32 %v2267_v36, %v717_v28  ;;  %v2353_v40 = vpop.f32.mrb[8].mxu1  ;;  %v2269_v41 = vpop.f32.mrb[9].mxu0  ;;  %v14624_v36 = vcombine.low %v2691_v61, %v2694_v10  ;;  %v2717_v61 = vld [vmem:[#allocation11 + $0x2760] sm:$0xff] }
 0x316   :  { %v15930_v44 = vadd.f32 %v2353_v40, %v725_v29  ;;  %v15927_v47 = vadd.f32 %v2269_v41, %v721_v32  ;;  %v2355_v49 = vpop.f32.mrb[9].mxu1  ;;  %4851 = vmatpush1.bf16.msra.mxu0 %v14604_v30  ;;  %5023 = vmatpush1.bf16.msra.mxu1 %v14606_v31  ;;  %v2271_v22 = vpop.f32.mrb[10].mxu0  ;;  %v2705_v41 = vld [vmem:[#allocation11 + $0x25e0] sm:$0xff] }
 0x317   :  { %v2366_v52 = vmul.f32 0.2, %v15926_v39  ;;  %v15931_v53 = vadd.f32 %v2355_v49, %v729_v45  ;;  %v15928_v55 = vadd.f32 %v2271_v22, %v717_v28  ;;  %v2357_v56 = vpop.f32.mrb[10].mxu1  ;;  %v2273_v58 = vpop.f32.mrb[11].mxu0  ;;  %4852 = vmatprep.subr.bf16.mxu0 %v14611_v33  ;;  %5024 = vmatprep.subr.bf16.mxu1 %v14613_v54  ;;  %v2696_v28 = vld [vmem:[#allocation11 + $0x24c0] sm:$0xff]  ;;  %v2697_v33 = vld [vmem:[#allocation11 + $0x24c8] sm:$0xff]  ;;  %v14635_v49 = vcombine.high %v2702_v38, %v2705_v41 }
 0x318   :  { %v2368_v63 = vmul.f32 0.2, %v15930_v44  ;;  %v2367_v3 = vmul.f32 0.2, %v15927_v47  ;;  %v15932_v4 = vadd.f32 %v2357_v56, %v725_v29  ;;  %v15929_v5 = vadd.f32 %v2273_v58, %v721_v32  ;;  %v2359_v8 = vpop.f32.mrb[11].mxu1  ;;  %v2700_v54 = vld [vmem:[#allocation11 + $0x2528] sm:$0xff] }
 0x319   :  { %v2369_v11 = vmul.f32 0.2, %v15931_v53  ;;  %v2374_v12 = vmul.f32 0.2, %v15928_v55  ;;  %v15933_v13 = vadd.f32 %v2359_v8, %v729_v45  ;;  %v2382_v18 = vmax.f32 %v15926_v39, %v2366_v52  ;;  %v2699_v45 = vld [vmem:[#allocation11 + $0x2520] sm:$0xff]  ;;  %v2709_v52 = vld [vmem:[#allocation11 + $0x2648] sm:$0xff] }
 0x31a   :  { %v2376_v19 = vmul.f32 0.2, %v15932_v4  ;;  %v2375_v20 = vmul.f32 0.2, %v15929_v5  ;;  %4853 = vmatpush1.bf16.msra.mxu0 %v14610_v42  ;;  %5025 = vmatpush1.bf16.msra.mxu1 %v14612_v43  ;;  %v2384_v25 = vmax.f32 %v15930_v44, %v2368_v63  ;;  %v2383_v26 = vmax.f32 %v15927_v47, %v2367_v3  ;;  %v2703_v42 = vld [vmem:[#allocation11 + $0x2588] sm:$0xff] }
 0x31b   :  { %v2390_v9 = vmax.f32 %v15928_v55, %v2374_v12  ;;  %v2377_v23 = vmul.f32 0.2, %v15933_v13  ;;  %4854 = vmatprep.subr.bf16.mxu0 %v14617_v50  ;;  %5026 = vmatprep.subr.bf16.mxu1 %v14619_v59  ;;  %v2385_v29 = vmax.f32 %v15931_v53, %v2369_v11  ;;  %v14622_v32 = vcombine.low %v16740_v51, %v2693_v60  ;;  %v2706_v43 = vld [vmem:[#allocation11 + $0x25e8] sm:$0xff]  ;;  %v2708_v50 = vld [vmem:[#allocation11 + $0x2640] sm:$0xff] }
 0x31c   :  { %v2392_v27 = vmax.f32 %v15932_v4, %v2376_v19  ;;  %v2391_v57 = vmax.f32 %v15929_v5, %v2375_v20  ;;  %v14629_v39 = vcombine.high %v2696_v28, %v2699_v45  ;;  %v14631_v40 = vcombine.high %v2697_v33, %v2700_v54  ;;  %v2711_v51 = vld [vmem:[#allocation11 + $0x26a0] sm:$0xff]  ;;  %v2712_v53 = vld [vmem:[#allocation11 + $0x26a8] sm:$0xff] }
 0x31d   :  { %v16745_v30 = vpack.c.bf16 %v2390_v9, %v2382_v18  ;;  %v2393_v31 = vmax.f32 %v15933_v13, %v2377_v23  ;;  %v14628_v44 = vcombine.low %v2696_v28, %v2699_v45  ;;  %v14630_v47 = vcombine.low %v2697_v33, %v2700_v54  ;;  %v2714_v60 = vld [vmem:[#allocation11 + $0x2700] sm:$0xff]  ;;  %v2715_v63 = vld [vmem:[#allocation11 + $0x2708] sm:$0xff] }
 0x31e   :  { %v16748_v34 = vpack.c.bf16 %v2392_v27, %v2384_v25  ;;  %v16750_v35 = vpack.c.bf16 %v2391_v57, %v2383_v26  ;;  %4855 = vmatpush1.bf16.msra.mxu0 %v14616_v14  ;;  %5027 = vmatpush1.bf16.msra.mxu1 %v14618_v16  ;;  %v14637_v22 = vcombine.high %v2703_v42, %v2706_v43  ;;  %v2718_v3 = vld [vmem:[#allocation11 + $0x2768] sm:$0xff]  ;;  %v2720_v11 = vld [vmem:[#allocation11 + $0x27c0] sm:$0xff] }
 0x31f   :  { %v16752_v37 = vpack.c.bf16 %v2393_v31, %v2385_v29  ;;  %4867 = vmatprep.subr.bf16.mxu0 %v14623_v17  ;;  %5039 = vmatprep.subr.bf16.mxu1 %v14625_v24  ;;  %v14634_v55 = vcombine.low %v2702_v38, %v2705_v41  ;;  %v14636_v56 = vcombine.low %v2703_v42, %v2706_v43  ;;  %v2723_v12 = vld [vmem:[#allocation11 + $0x2820] sm:$0xff]  ;;  %v2721_v13 = vld [vmem:[#allocation11 + $0x27c8] sm:$0xff] }
 0x320   :  { %4856 = vmatprep.mubr.bf16.mxu0 %v16750_v35  ;;  %5028 = vmatprep.mubr.bf16.mxu1 %v16750_v35  ;;  %v14641_v58 = vcombine.high %v2708_v50, %v2711_v51  ;;  %v14643_v59 = vcombine.high %v2709_v52, %v2712_v53  ;;  %v14640_v4 = vcombine.low %v2708_v50, %v2711_v51  ;;  %v2724_v14 = vld [vmem:[#allocation11 + $0x2828] sm:$0xff]  ;;  %v2726_v18 = vld [vmem:[#allocation11 + $0x2880] sm:$0xff] }
 0x321   :  { %4857 = vmatmul.mubr.bf16.vlgmr.msra.gmra.mrb[12].mxu0 %v16745_v30  ;;  %5029 = vmatmul.mubr.bf16.vlgmr.msra.gmra.mrb[12].mxu1 %v16745_v30  ;;  %v14642_v5 = vcombine.low %v2709_v52, %v2712_v53  ;;  %v14647_v8 = vcombine.high %v2714_v60, %v2717_v61  ;;  %v14649_v10 = vcombine.high %v2715_v63, %v2718_v3  ;;  %v2729_v9 = vld [vmem:[#allocation11 + $0x28e0] sm:$0xff]  ;;  %v2727_v23 = vld [vmem:[#allocation11 + $0x2888] sm:$0xff] }
 0x322   :  { %4868 = vmatpush1.bf16.msra.mxu0 %v14622_v32  ;;  %5040 = vmatpush1.bf16.msra.mxu1 %v14624_v36  ;;  %v14646_v19 = vcombine.low %v2714_v60, %v2717_v61  ;;  %v14648_v20 = vcombine.low %v2715_v63, %v2718_v3  ;;  %v14653_v16 = vcombine.high %v2720_v11, %v2723_v12  ;;  %v2730_v24 = vld [vmem:[#allocation11 + $0x28e8] sm:$0xff]  ;;  %v2732_v28 = vld [vmem:[#allocation11 + $0x2940] sm:$0xff] }
 0x323   :  { %4899 = vmatprep.mubr.bf16.mxu0 %v16752_v37  ;;  %5071 = vmatprep.mubr.bf16.mxu1 %v16752_v37  ;;  %v14655_v17 = vcombine.high %v2721_v13, %v2724_v14  ;;  %v14652_v25 = vcombine.low %v2720_v11, %v2723_v12  ;;  %v14654_v26 = vcombine.low %v2721_v13, %v2724_v14  ;;  %v2735_v29 = vld [vmem:[#allocation11 + $0x29a0] sm:$0xff]  ;;  %v2733_v31 = vld [vmem:[#allocation11 + $0x2948] sm:$0xff] }
 0x324   :  { %4869 = vmatprep.subr.bf16.mxu0 %v14629_v39  ;;  %5041 = vmatprep.subr.bf16.mxu1 %v14631_v40  ;;  %v14659_v27 = vcombine.high %v2726_v18, %v2729_v9  ;;  %v14661_v57 = vcombine.high %v2727_v23, %v2730_v24  ;;  %v2736_v32 = vld [vmem:[#allocation11 + $0x29a8] sm:$0xff]  ;;  %v14658_v45 = vcombine.low %v2726_v18, %v2729_v9  ;;  %v2738_v38 = vld [vmem:[#allocation11 + $0x2a00] sm:$0xff] }
 0x325   :  { %v14660_v33 = vcombine.low %v2727_v23, %v2730_v24  ;;  %v14665_v54 = vcombine.high %v2732_v28, %v2735_v29  ;;  %v14667_v36 = vcombine.high %v2733_v31, %v2736_v32  ;;  %v2741_v39 = vld [vmem:[#allocation11 + $0x2a60] sm:$0xff]  ;;  %v2739_v40 = vld [vmem:[#allocation11 + $0x2a08] sm:$0xff]  ;;  %v14664_v42 = vcombine.low %v2732_v28, %v2735_v29 }
 0x326   :  { %4870 = vmatpush1.bf16.msra.mxu0 %v14628_v44  ;;  %5042 = vmatpush1.bf16.msra.mxu1 %v14630_v47  ;;  %v2742_v41 = vld [vmem:[#allocation11 + $0x2a68] sm:$0xff]  ;;  %v14666_v43 = vcombine.low %v2733_v31, %v2736_v32  ;;  %v14671_v44 = vcombine.high %v2738_v38, %v2741_v39  ;;  %v14670_v52 = vcombine.low %v2738_v38, %v2741_v39 }
 0x327   :  { %4871 = vmatprep.subr.bf16.mxu0 %v14635_v49  ;;  %5043 = vmatprep.subr.bf16.mxu1 %v14637_v22  ;;  %v14673_v47 = vcombine.high %v2739_v40, %v2742_v41  ;;  %v2744_v49 = vld [vmem:[#allocation11 + $0x2ac0] sm:$0xff]  ;;  %v2745_v50 = vld [vmem:[#allocation11 + $0x2ac8] sm:$0xff]  ;;  %v14672_v53 = vcombine.low %v2739_v40, %v2742_v41 }
 0x328   :  { %v2747_v22 = vld [vmem:[#allocation11 + $0x2b20] sm:$0xff]  ;;  %v2748_v51 = vld [vmem:[#allocation11 + $0x2b28] sm:$0xff] }
 0x329   :  { %v2751_v60 = vld [vmem:[#allocation11 + $0x2b88] sm:$0xff]  ;;  %v14676_v63 = vcombine.low %v2744_v49, %v2747_v22  ;;  %v14678_v3 = vcombine.low %v2745_v50, %v2748_v51 }
 0x32a   :  { %4872 = vmatpush1.bf16.msra.mxu0 %v14634_v55  ;;  %5044 = vmatpush1.bf16.msra.mxu1 %v14636_v56  ;;  %v14677_v55 = vcombine.high %v2744_v49, %v2747_v22  ;;  %v14679_v56 = vcombine.high %v2745_v50, %v2748_v51  ;;  %v2754_v61 = vld [vmem:[#allocation11 + $0x2be8] sm:$0xff] }
 0x32b   :  { %4873 = vmatprep.subr.bf16.mxu0 %v14641_v58  ;;  %5045 = vmatprep.subr.bf16.mxu1 %v14643_v59  ;;  %v2750_v58 = vld [vmem:[#allocation11 + $0x2b80] sm:$0xff]  ;;  %v2757_v11 = vld [vmem:[#allocation11 + $0x2c48] sm:$0xff]  ;;  %v14684_v14 = vcombine.low %v2751_v60, %v2754_v61 }
 0x32c   :  { %v2753_v59 = vld [vmem:[#allocation11 + $0x2be0] sm:$0xff]  ;;  %v2760_v12 = vld [vmem:[#allocation11 + $0x2ca8] sm:$0xff] }
 0x32d   :  { %v14682_v13 = vcombine.low %v2750_v58, %v2753_v59  ;;  %v2763_v18 = vld [vmem:[#allocation11 + $0x2d08] sm:$0xff]  ;;  %v14690_v24 = vcombine.low %v2757_v11, %v2760_v12 }
 0x32e   :  { %4874 = vmatpush1.bf16.msra.mxu0 %v14640_v4  ;;  %5046 = vmatpush1.bf16.msra.mxu1 %v14642_v5  ;;  %v14683_v4 = vcombine.high %v2750_v58, %v2753_v59  ;;  %v14685_v5 = vcombine.high %v2751_v60, %v2754_v61  ;;  %v2766_v9 = vld [vmem:[#allocation11 + $0x2d68] sm:$0xff]  ;;  %v5308_v58 = vld [vmem:[#allocation11 + $0x18] sm:$0xff] }
 0x32f   :  { %4875 = vmatprep.subr.bf16.mxu0 %v14647_v8  ;;  %5047 = vmatprep.subr.bf16.mxu1 %v14649_v10  ;;  %v2756_v8 = vld [vmem:[#allocation11 + $0x2c40] sm:$0xff]  ;;  %v2769_v28 = vld [vmem:[#allocation11 + $0x2dc8] sm:$0xff]  ;;  %v14696_v32 = vcombine.low %v2763_v18, %v2766_v9  ;;  %v5311_v59 = vld [vmem:[#allocation11 + $0x78] sm:$0xff] }
 0x330   :  { %v2759_v10 = vld [vmem:[#allocation11 + $0x2ca0] sm:$0xff]  ;;  %v2772_v29 = vld [vmem:[#allocation11 + $0x2e28] sm:$0xff] }
 0x331   :  { %v14688_v23 = vcombine.low %v2756_v8, %v2759_v10  ;;  %v2775_v38 = vld [vmem:[#allocation11 + $0x2e88] sm:$0xff]  ;;  %v14702_v41 = vcombine.low %v2769_v28, %v2772_v29 }
 0x332   :  { %4876 = vmatpush1.bf16.msra.mxu0 %v14646_v19  ;;  %5048 = vmatpush1.bf16.msra.mxu1 %v14648_v20  ;;  %v14689_v19 = vcombine.high %v2756_v8, %v2759_v10  ;;  %v14691_v20 = vcombine.high %v2757_v11, %v2760_v12  ;;  %v2778_v39 = vld [vmem:[#allocation11 + $0x2ee8] sm:$0xff]  ;;  %v5314_v8 = vld [vmem:[#allocation11 + $0xd8] sm:$0xff]  ;;  %v14724_v12 = vcombine.low %v5308_v58, %v5311_v59 }
 0x333   :  { %4877 = vmatprep.subr.bf16.mxu0 %v14653_v16  ;;  %5049 = vmatprep.subr.bf16.mxu1 %v14655_v17  ;;  %v2762_v16 = vld [vmem:[#allocation11 + $0x2d00] sm:$0xff]  ;;  %v2781_v49 = vld [vmem:[#allocation11 + $0x2f48] sm:$0xff]  ;;  %v14708_v51 = vcombine.low %v2775_v38, %v2778_v39  ;;  %v5317_v10 = vld [vmem:[#allocation11 + $0x138] sm:$0xff] }
 0x334   :  { %v2765_v17 = vld [vmem:[#allocation11 + $0x2d60] sm:$0xff]  ;;  %v2784_v22 = vld [vmem:[#allocation11 + $0x2fa8] sm:$0xff] }
 0x335   :  { %v14694_v31 = vcombine.low %v2762_v16, %v2765_v17  ;;  %v14714_v61 = vcombine.low %v2781_v49, %v2784_v22 }
 0x336   :  { %4878 = vmatpush1.bf16.msra.mxu0 %v14652_v25  ;;  %5050 = vmatpush1.bf16.msra.mxu1 %v14654_v26  ;;  %v14695_v25 = vcombine.high %v2762_v16, %v2765_v17  ;;  %v14697_v26 = vcombine.high %v2763_v18, %v2766_v9  ;;  %v5320_v16 = vld [vmem:[#allocation11 + $0x198] sm:$0xff]  ;;  %v14730_v9 = vcombine.low %v5314_v8, %v5317_v10 }
 0x337   :  { %4879 = vmatprep.subr.bf16.mxu0 %v14659_v27  ;;  %5051 = vmatprep.subr.bf16.mxu1 %v14661_v57  ;;  %v2768_v27 = vld [vmem:[#allocation11 + $0x2dc0] sm:$0xff]  ;;  %v5323_v17 = vld [vmem:[#allocation11 + $0x1f8] sm:$0xff] }
 0x338   :  { %v2771_v57 = vld [vmem:[#allocation11 + $0x2e20] sm:$0xff] }
 0x339   :  { %v14700_v40 = vcombine.low %v2768_v27, %v2771_v57 }
 0x33a   :  { %4880 = vmatpush1.bf16.msra.mxu0 %v14658_v45  ;;  %5052 = vmatpush1.bf16.msra.mxu1 %v14660_v33  ;;  %v14701_v45 = vcombine.high %v2768_v27, %v2771_v57  ;;  %v14703_v33 = vcombine.high %v2769_v28, %v2772_v29  ;;  %v5326_v27 = vld [vmem:[#allocation11 + $0x258] sm:$0xff]  ;;  %v14736_v29 = vcombine.low %v5320_v16, %v5323_v17 }
 0x33b   :  { %4881 = vmatprep.subr.bf16.mxu0 %v14665_v54  ;;  %5053 = vmatprep.subr.bf16.mxu1 %v14667_v36  ;;  %v2774_v54 = vld [vmem:[#allocation11 + $0x2e80] sm:$0xff]  ;;  %v5329_v57 = vld [vmem:[#allocation11 + $0x2b8] sm:$0xff] }
 0x33c   :  { %v2777_v36 = vld [vmem:[#allocation11 + $0x2ee0] sm:$0xff] }
 0x33d   :  { %v14706_v50 = vcombine.low %v2774_v54, %v2777_v36 }
 0x33e   :  { %4882 = vmatpush1.bf16.msra.mxu0 %v14664_v42  ;;  %5054 = vmatpush1.bf16.msra.mxu1 %v14666_v43  ;;  %v14707_v42 = vcombine.high %v2774_v54, %v2777_v36  ;;  %v14709_v43 = vcombine.high %v2775_v38, %v2778_v39  ;;  %v5332_v54 = vld [vmem:[#allocation11 + $0x318] sm:$0xff]  ;;  %v14742_v39 = vcombine.low %v5326_v27, %v5329_v57 }
 0x33f   :  { %4883 = vmatprep.subr.bf16.mxu0 %v14671_v44  ;;  %5055 = vmatprep.subr.bf16.mxu1 %v14673_v47  ;;  %v2780_v44 = vld [vmem:[#allocation11 + $0x2f40] sm:$0xff]  ;;  %v5335_v36 = vld [vmem:[#allocation11 + $0x378] sm:$0xff] }
 0x340   :  { %v2783_v47 = vld [vmem:[#allocation11 + $0x2fa0] sm:$0xff] }
 0x341   :  { %v14712_v60 = vcombine.low %v2780_v44, %v2783_v47 }
 0x342   :  { %4884 = vmatpush1.bf16.msra.mxu0 %v14670_v52  ;;  %5056 = vmatpush1.bf16.msra.mxu1 %v14672_v53  ;;  %v14713_v52 = vcombine.high %v2780_v44, %v2783_v47  ;;  %v14715_v53 = vcombine.high %v2781_v49, %v2784_v22  ;;  %v5338_v44 = vld [vmem:[#allocation11 + $0x3d8] sm:$0xff]  ;;  %v14748_v22 = vcombine.low %v5332_v54, %v5335_v36 }
 0x343   :  { %4885 = vmatprep.subr.bf16.mxu0 %v14677_v55  ;;  %5057 = vmatprep.subr.bf16.mxu1 %v14679_v56  ;;  %v2404_v55 = vld [vmem:[#allocation11 + $0x10] sm:$0xff]  ;;  %v5341_v47 = vld [vmem:[#allocation11 + $0x438] sm:$0xff] }
 0x344   :  { %v2407_v56 = vld [vmem:[#allocation11 + $0x70] sm:$0xff] }
 0x345   :  { %v14338_v11 = vcombine.low %v2404_v55, %v2407_v56 }
 0x346   :  { %4886 = vmatpush1.bf16.msra.mxu0 %v14676_v63  ;;  %5058 = vmatpush1.bf16.msra.mxu1 %v14678_v3  ;;  %v14339_v63 = vcombine.high %v2404_v55, %v2407_v56  ;;  %v14725_v3 = vcombine.high %v5308_v58, %v5311_v59  ;;  %v5344_v55 = vld [vmem:[#allocation11 + $0x498] sm:$0xff]  ;;  %v14754_v59 = vcombine.low %v5338_v44, %v5341_v47 }
 0x347   :  { %4887 = vmatprep.subr.bf16.mxu0 %v14683_v4  ;;  %5059 = vmatprep.subr.bf16.mxu1 %v14685_v5  ;;  %v2410_v4 = vld [vmem:[#allocation11 + $0xd0] sm:$0xff]  ;;  %v5347_v56 = vld [vmem:[#allocation11 + $0x4f8] sm:$0xff] }
 0x348   :  { %v2413_v5 = vld [vmem:[#allocation11 + $0x130] sm:$0xff] }
 0x349   :  { %v14344_v18 = vcombine.low %v2410_v4, %v2413_v5 }
 0x34a   :  { %4888 = vmatpush1.bf16.msra.mxu0 %v14682_v13  ;;  %5060 = vmatpush1.bf16.msra.mxu1 %v14684_v14  ;;  %v14345_v13 = vcombine.high %v2410_v4, %v2413_v5  ;;  %v14731_v14 = vcombine.high %v5314_v8, %v5317_v10  ;;  %v5350_v4 = vld [vmem:[#allocation11 + $0x558] sm:$0xff]  ;;  %v14760_v10 = vcombine.low %v5344_v55, %v5347_v56 }
 0x34b   :  { %4889 = vmatprep.subr.bf16.mxu0 %v14689_v19  ;;  %5061 = vmatprep.subr.bf16.mxu1 %v14691_v20  ;;  %v2416_v19 = vld [vmem:[#allocation11 + $0x190] sm:$0xff]  ;;  %v5353_v5 = vld [vmem:[#allocation11 + $0x5b8] sm:$0xff] }
 0x34c   :  { %v2419_v20 = vld [vmem:[#allocation11 + $0x1f0] sm:$0xff] }
 0x34d   :  { %v14350_v28 = vcombine.low %v2416_v19, %v2419_v20 }
 0x34e   :  { %4890 = vmatpush1.bf16.msra.mxu0 %v14688_v23  ;;  %5062 = vmatpush1.bf16.msra.mxu1 %v14690_v24  ;;  %v14351_v23 = vcombine.high %v2416_v19, %v2419_v20  ;;  %v14737_v24 = vcombine.high %v5320_v16, %v5323_v17  ;;  %v5356_v19 = vld [vmem:[#allocation11 + $0x618] sm:$0xff]  ;;  %v14766_v17 = vcombine.low %v5350_v4, %v5353_v5 }
 0x34f   :  { %4891 = vmatprep.subr.bf16.mxu0 %v14695_v25  ;;  %5063 = vmatprep.subr.bf16.mxu1 %v14697_v26  ;;  %v2422_v25 = vld [vmem:[#allocation11 + $0x250] sm:$0xff]  ;;  %v5359_v20 = vld [vmem:[#allocation11 + $0x678] sm:$0xff] }
 0x350   :  { %v2425_v26 = vld [vmem:[#allocation11 + $0x2b0] sm:$0xff] }
 0x351   :  { %v14356_v38 = vcombine.low %v2422_v25, %v2425_v26 }
 0x352   :  { %4892 = vmatpush1.bf16.msra.mxu0 %v14694_v31  ;;  %5064 = vmatpush1.bf16.msra.mxu1 %v14696_v32  ;;  %v14357_v31 = vcombine.high %v2422_v25, %v2425_v26  ;;  %v14743_v32 = vcombine.high %v5326_v27, %v5329_v57  ;;  %v5362_v25 = vld [vmem:[#allocation11 + $0x6d8] sm:$0xff]  ;;  %v14772_v57 = vcombine.low %v5356_v19, %v5359_v20 }
 0x353   :  { %4893 = vmatprep.subr.bf16.mxu0 %v14701_v45  ;;  %5065 = vmatprep.subr.bf16.mxu1 %v14703_v33  ;;  %v2428_v45 = vld [vmem:[#allocation11 + $0x310] sm:$0xff]  ;;  %v5365_v26 = vld [vmem:[#allocation11 + $0x738] sm:$0xff] }
 0x354   :  { %v2431_v33 = vld [vmem:[#allocation11 + $0x370] sm:$0xff] }
 0x355   :  { %v14362_v49 = vcombine.low %v2428_v45, %v2431_v33 }
 0x356   :  { %4894 = vmatpush1.bf16.msra.mxu0 %v14700_v40  ;;  %5066 = vmatpush1.bf16.msra.mxu1 %v14702_v41  ;;  %v14363_v40 = vcombine.high %v2428_v45, %v2431_v33  ;;  %v14749_v41 = vcombine.high %v5332_v54, %v5335_v36  ;;  %v5368_v45 = vld [vmem:[#allocation11 + $0x798] sm:$0xff]  ;;  %v14778_v36 = vcombine.low %v5362_v25, %v5365_v26 }
 0x357   :  { %4895 = vmatprep.subr.bf16.mxu0 %v14707_v42  ;;  %5067 = vmatprep.subr.bf16.mxu1 %v14709_v43  ;;  %v2434_v42 = vld [vmem:[#allocation11 + $0x3d0] sm:$0xff]  ;;  %v5371_v33 = vld [vmem:[#allocation11 + $0x7f8] sm:$0xff] }
 0x358   :  { %v2437_v43 = vld [vmem:[#allocation11 + $0x430] sm:$0xff] }
 0x359   :  { %v14368_v58 = vcombine.low %v2434_v42, %v2437_v43 }
 0x35a   :  { %4896 = vmatpush1.bf16.msra.mxu0 %v14706_v50  ;;  %5068 = vmatpush1.bf16.msra.mxu1 %v14708_v51  ;;  %v14369_v50 = vcombine.high %v2434_v42, %v2437_v43  ;;  %v14755_v51 = vcombine.high %v5338_v44, %v5341_v47  ;;  %v5374_v42 = vld [vmem:[#allocation11 + $0x858] sm:$0xff]  ;;  %v14784_v47 = vcombine.low %v5368_v45, %v5371_v33 }
 0x35b   :  { %4897 = vmatprep.subr.bf16.mxu0 %v14713_v52  ;;  %5069 = vmatprep.subr.bf16.mxu1 %v14715_v53  ;;  %v2440_v52 = vld [vmem:[#allocation11 + $0x490] sm:$0xff]  ;;  %v5377_v43 = vld [vmem:[#allocation11 + $0x8b8] sm:$0xff] }
 0x35c   :  { %v2443_v53 = vld [vmem:[#allocation11 + $0x4f0] sm:$0xff] }
 0x35d   :  { %v14374_v8 = vcombine.low %v2440_v52, %v2443_v53 }
 0x35e   :  { %4898 = vmatpush1.bf16.msra.mxu0 %v14712_v60  ;;  %5070 = vmatpush1.bf16.msra.mxu1 %v14714_v61  ;;  %v14375_v60 = vcombine.high %v2440_v52, %v2443_v53  ;;  %v14761_v61 = vcombine.high %v5344_v55, %v5347_v56  ;;  %v5380_v52 = vld [vmem:[#allocation11 + $0x918] sm:$0xff]  ;;  %v14790_v56 = vcombine.low %v5374_v42, %v5377_v43 }
 0x35f   :  { %5082 = vmatprep.subr.bf16.mxu0 %v14339_v63  ;;  %7644 = vmatprep.subr.bf16.mxu1 %v14725_v3  ;;  %v2446_v63 = vld [vmem:[#allocation11 + $0x550] sm:$0xff]  ;;  %v5383_v53 = vld [vmem:[#allocation11 + $0x978] sm:$0xff] }
 0x360   :  { %v2449_v3 = vld [vmem:[#allocation11 + $0x5b0] sm:$0xff] }
 0x361   :  { %4900 = vmatmul.mubr.bf16.vlgmr.msra.gmra.mrb[12].mxu0 %v16748_v34  ;;  %5072 = vmatmul.mubr.bf16.vlgmr.msra.gmra.mrb[12].mxu1 %v16748_v34  ;;  %v14380_v16 = vcombine.low %v2446_v63, %v2449_v3 }
 0x362   :  { %5083 = vmatpush1.bf16.msra.mxu0 %v14338_v11  ;;  %5114 = vmatprep.mubr.bf16.mxu0 %v16704_v6  ;;  %v14381_v11 = vcombine.high %v2446_v63, %v2449_v3  ;;  %v5386_v63 = vld [vmem:[#allocation11 + $0x9d8] sm:$0xff] }
 0x363   :  { %7645 = vmatpush1.bf16.msra.mxu1 %v14724_v12  ;;  %7676 = vmatprep.mubr.bf16.mxu1 %v16704_v6  ;;  %v14767_v12 = vcombine.high %v5350_v4, %v5353_v5  ;;  %v5389_v3 = vld [vmem:[#allocation11 + $0xa38] sm:$0xff]  ;;  %v14796_v5 = vcombine.low %v5380_v52, %v5383_v53 }
 0x364   :  { %5084 = vmatprep.subr.bf16.mxu0 %v14345_v13  ;;  %7646 = vmatprep.subr.bf16.mxu1 %v14731_v14  ;;  %v2452_v13 = vld [vmem:[#allocation11 + $0x610] sm:$0xff] }
 0x365   :  { %v2455_v14 = vld [vmem:[#allocation11 + $0x670] sm:$0xff] }
 0x366   :  { %5085 = vmatpush1.bf16.msra.mxu0 %v14344_v18  ;;  %v14387_v18 = vcombine.high %v2452_v13, %v2455_v14  ;;  %v14386_v27 = vcombine.low %v2452_v13, %v2455_v14  ;;  %v5392_v13 = vld [vmem:[#allocation11 + $0xa98] sm:$0xff] }
 0x367   :  { %7647 = vmatpush1.bf16.msra.mxu1 %v14730_v9  ;;  %5086 = vmatprep.subr.bf16.mxu0 %v14351_v23  ;;  %v14773_v9 = vcombine.high %v5356_v19, %v5359_v20  ;;  %v2458_v23 = vld [vmem:[#allocation11 + $0x6d0] sm:$0xff]  ;;  %v5395_v14 = vld [vmem:[#allocation11 + $0xaf8] sm:$0xff]  ;;  %v14802_v20 = vcombine.low %v5386_v63, %v5389_v3 }
 0x368   :  { %7648 = vmatprep.subr.bf16.mxu1 %v14737_v24  ;;  %v2461_v24 = vld [vmem:[#allocation11 + $0x730] sm:$0xff] }
 0x369   :  { %v14392_v54 = vcombine.low %v2458_v23, %v2461_v24 }
 0x36a   :  { %5087 = vmatpush1.bf16.msra.mxu0 %v14350_v28  ;;  %v14393_v28 = vcombine.high %v2458_v23, %v2461_v24  ;;  %v5398_v23 = vld [vmem:[#allocation11 + $0xb58] sm:$0xff] }
 0x36b   :  { %7649 = vmatpush1.bf16.msra.mxu1 %v14736_v29  ;;  %5088 = vmatprep.subr.bf16.mxu0 %v14357_v31  ;;  %v14779_v29 = vcombine.high %v5362_v25, %v5365_v26  ;;  %v2464_v31 = vld [vmem:[#allocation11 + $0x790] sm:$0xff]  ;;  %v5401_v24 = vld [vmem:[#allocation11 + $0xbb8] sm:$0xff]  ;;  %v14808_v26 = vcombine.low %v5392_v13, %v5395_v14 }
 0x36c   :  { %7650 = vmatprep.subr.bf16.mxu1 %v14743_v32  ;;  %v2467_v32 = vld [vmem:[#allocation11 + $0x7f0] sm:$0xff] }
 0x36d   :  { %v14398_v44 = vcombine.low %v2464_v31, %v2467_v32 }
 0x36e   :  { %5089 = vmatpush1.bf16.msra.mxu0 %v14356_v38  ;;  %v14399_v38 = vcombine.high %v2464_v31, %v2467_v32  ;;  %v5404_v31 = vld [vmem:[#allocation11 + $0xc18] sm:$0xff] }
 0x36f   :  { %7651 = vmatpush1.bf16.msra.mxu1 %v14742_v39  ;;  %5090 = vmatprep.subr.bf16.mxu0 %v14363_v40  ;;  %v14785_v39 = vcombine.high %v5368_v45, %v5371_v33  ;;  %v2470_v40 = vld [vmem:[#allocation11 + $0x850] sm:$0xff]  ;;  %v5407_v32 = vld [vmem:[#allocation11 + $0xc78] sm:$0xff]  ;;  %v14814_v33 = vcombine.low %v5398_v23, %v5401_v24 }
 0x370   :  { %7652 = vmatprep.subr.bf16.mxu1 %v14749_v41  ;;  %v2473_v41 = vld [vmem:[#allocation11 + $0x8b0] sm:$0xff] }
 0x371   :  { %v14404_v55 = vcombine.low %v2470_v40, %v2473_v41 }
 0x372   :  { %5091 = vmatpush1.bf16.msra.mxu0 %v14362_v49  ;;  %v14405_v49 = vcombine.high %v2470_v40, %v2473_v41  ;;  %v5410_v41 = vld [vmem:[#allocation11 + $0xcd8] sm:$0xff] }
 0x373   :  { %7653 = vmatpush1.bf16.msra.mxu1 %v14748_v22  ;;  %5092 = vmatprep.subr.bf16.mxu0 %v14369_v50  ;;  %v14791_v22 = vcombine.high %v5374_v42, %v5377_v43  ;;  %v2476_v50 = vld [vmem:[#allocation11 + $0x910] sm:$0xff]  ;;  %v5413_v42 = vld [vmem:[#allocation11 + $0xd38] sm:$0xff]  ;;  %v14820_v43 = vcombine.low %v5404_v31, %v5407_v32 }
 0x374   :  { %7654 = vmatprep.subr.bf16.mxu1 %v14755_v51  ;;  %v2479_v51 = vld [vmem:[#allocation11 + $0x970] sm:$0xff] }
 0x375   :  { %v14410_v4 = vcombine.low %v2476_v50, %v2479_v51 }
 0x376   :  { %5093 = vmatpush1.bf16.msra.mxu0 %v14368_v58  ;;  %v14411_v58 = vcombine.high %v2476_v50, %v2479_v51  ;;  %v5416_v50 = vld [vmem:[#allocation11 + $0xd98] sm:$0xff] }
 0x377   :  { %7655 = vmatpush1.bf16.msra.mxu1 %v14754_v59  ;;  %5094 = vmatprep.subr.bf16.mxu0 %v14375_v60  ;;  %v14797_v59 = vcombine.high %v5380_v52, %v5383_v53  ;;  %v2482_v60 = vld [vmem:[#allocation11 + $0x9d0] sm:$0xff]  ;;  %v5419_v51 = vld [vmem:[#allocation11 + $0xdf8] sm:$0xff]  ;;  %v14826_v53 = vcombine.low %v5410_v41, %v5413_v42 }
 0x378   :  { %7656 = vmatprep.subr.bf16.mxu1 %v14761_v61  ;;  %v2485_v61 = vld [vmem:[#allocation11 + $0xa30] sm:$0xff] }
 0x379   :  { %v14416_v19 = vcombine.low %v2482_v60, %v2485_v61 }
 0x37a   :  { %5095 = vmatpush1.bf16.msra.mxu0 %v14374_v8  ;;  %v14417_v8 = vcombine.high %v2482_v60, %v2485_v61  ;;  %v5422_v60 = vld [vmem:[#allocation11 + $0xe58] sm:$0xff] }
 0x37b   :  { %7657 = vmatpush1.bf16.msra.mxu1 %v14760_v10  ;;  %5096 = vmatprep.subr.bf16.mxu0 %v14381_v11  ;;  %v14803_v10 = vcombine.high %v5386_v63, %v5389_v3  ;;  %v2488_v11 = vld [vmem:[#allocation11 + $0xa90] sm:$0xff]  ;;  %v5425_v61 = vld [vmem:[#allocation11 + $0xeb8] sm:$0xff]  ;;  %v14832_v3 = vcombine.low %v5416_v50, %v5419_v51 }
 0x37c   :  { %7658 = vmatprep.subr.bf16.mxu1 %v14767_v12  ;;  %v2491_v12 = vld [vmem:[#allocation11 + $0xaf0] sm:$0xff] }
 0x37d   :  { %v14422_v25 = vcombine.low %v2488_v11, %v2491_v12 }
 0x37e   :  { %5097 = vmatpush1.bf16.msra.mxu0 %v14380_v16  ;;  %v14423_v16 = vcombine.high %v2488_v11, %v2491_v12  ;;  %v5428_v11 = vld [vmem:[#allocation11 + $0xf18] sm:$0xff] }
 0x37f   :  { %7659 = vmatpush1.bf16.msra.mxu1 %v14766_v17  ;;  %5098 = vmatprep.subr.bf16.mxu0 %v14387_v18  ;;  %v14809_v17 = vcombine.high %v5392_v13, %v5395_v14  ;;  %v2494_v18 = vld [vmem:[#allocation11 + $0xb50] sm:$0xff]  ;;  %v5431_v12 = vld [vmem:[#allocation11 + $0xf78] sm:$0xff]  ;;  %v14838_v14 = vcombine.low %v5422_v60, %v5425_v61 }
 0x380   :  { %7660 = vmatprep.subr.bf16.mxu1 %v14773_v9  ;;  %v2497_v9 = vld [vmem:[#allocation11 + $0xbb0] sm:$0xff] }
 0x381   :  { %v14428_v45 = vcombine.low %v2494_v18, %v2497_v9 }
 0x382   :  { %5099 = vmatpush1.bf16.msra.mxu0 %v14386_v27  ;;  %v14429_v27 = vcombine.high %v2494_v18, %v2497_v9  ;;  %v5434_v18 = vld [vmem:[#allocation11 + $0xfd8] sm:$0xff] }
 0x383   :  { %7661 = vmatpush1.bf16.msra.mxu1 %v14772_v57  ;;  %5100 = vmatprep.subr.bf16.mxu0 %v14393_v28  ;;  %v14815_v57 = vcombine.high %v5398_v23, %v5401_v24  ;;  %v2500_v28 = vld [vmem:[#allocation11 + $0xc10] sm:$0xff]  ;;  %v5437_v9 = vld [vmem:[#allocation11 + $0x1038] sm:$0xff]  ;;  %v14844_v24 = vcombine.low %v5428_v11, %v5431_v12 }
 0x384   :  { %7662 = vmatprep.subr.bf16.mxu1 %v14779_v29  ;;  %v2503_v29 = vld [vmem:[#allocation11 + $0xc70] sm:$0xff] }
 0x385   :  { %v14434_v40 = vcombine.low %v2500_v28, %v2503_v29 }
 0x386   :  { %5101 = vmatpush1.bf16.msra.mxu0 %v14392_v54  ;;  %v14435_v54 = vcombine.high %v2500_v28, %v2503_v29  ;;  %v5440_v28 = vld [vmem:[#allocation11 + $0x1098] sm:$0xff] }
 0x387   :  { %7663 = vmatpush1.bf16.msra.mxu1 %v14778_v36  ;;  %5102 = vmatprep.subr.bf16.mxu0 %v14399_v38  ;;  %v14821_v36 = vcombine.high %v5404_v31, %v5407_v32  ;;  %v2506_v38 = vld [vmem:[#allocation11 + $0xcd0] sm:$0xff]  ;;  %v5443_v29 = vld [vmem:[#allocation11 + $0x10f8] sm:$0xff]  ;;  %v14850_v32 = vcombine.low %v5434_v18, %v5437_v9 }
 0x388   :  { %7664 = vmatprep.subr.bf16.mxu1 %v14785_v39  ;;  %v2509_v39 = vld [vmem:[#allocation11 + $0xd30] sm:$0xff] }
 0x389   :  { %v14440_v52 = vcombine.low %v2506_v38, %v2509_v39 }
 0x38a   :  { %5103 = vmatpush1.bf16.msra.mxu0 %v14398_v44  ;;  %v14441_v44 = vcombine.high %v2506_v38, %v2509_v39  ;;  %v5446_v38 = vld [vmem:[#allocation11 + $0x1158] sm:$0xff] }
 0x38b   :  { %7665 = vmatpush1.bf16.msra.mxu1 %v14784_v47  ;;  %5104 = vmatprep.subr.bf16.mxu0 %v14405_v49  ;;  %v2512_v47 = vld [vmem:[#allocation11 + $0xd90] sm:$0xff]  ;;  %v5449_v39 = vld [vmem:[#allocation11 + $0x11b8] sm:$0xff] }
 0x38c   :  { %7666 = vmatprep.subr.bf16.mxu1 %v14791_v22  ;;  %v2515_v49 = vld [vmem:[#allocation11 + $0xdf0] sm:$0xff]  ;;  %v14827_v22 = vcombine.high %v5410_v41, %v5413_v42  ;;  %v14856_v41 = vcombine.low %v5440_v28, %v5443_v29 }
 0x38d   :  { %v14446_v63 = vcombine.low %v2512_v47, %v2515_v49 }
 0x38e   :  { %5105 = vmatpush1.bf16.msra.mxu0 %v14404_v55  ;;  %v14447_v55 = vcombine.high %v2512_v47, %v2515_v49  ;;  %v2551_v47 = vld [vmem:[#allocation11 + $0x1270] sm:$0xff]  ;;  %v5452_v49 = vld [vmem:[#allocation11 + $0x1218] sm:$0xff] }
 0x38f   :  { %7667 = vmatpush1.bf16.msra.mxu1 %v14790_v56  ;;  %5106 = vmatprep.subr.bf16.mxu0 %v14411_v58  ;;  %v14833_v56 = vcombine.high %v5416_v50, %v5419_v51  ;;  %v2518_v58 = vld [vmem:[#allocation11 + $0xe50] sm:$0xff]  ;;  %v14862_v51 = vcombine.low %v5446_v38, %v5449_v39 }
 0x390   :  { %7668 = vmatprep.subr.bf16.mxu1 %v14797_v59  ;;  %v2521_v59 = vld [vmem:[#allocation11 + $0xeb0] sm:$0xff] }
 0x391   :  { %v14452_v13 = vcombine.low %v2518_v58, %v2521_v59 }
 0x392   :  { %5107 = vmatpush1.bf16.msra.mxu0 %v14410_v4  ;;  %v14453_v4 = vcombine.high %v2518_v58, %v2521_v59  ;;  %v5458_v58 = vld [vmem:[#allocation11 + $0x12d8] sm:$0xff] }
 0x393   :  { %7669 = vmatpush1.bf16.msra.mxu1 %v14796_v5  ;;  %5108 = vmatprep.subr.bf16.mxu0 %v14417_v8  ;;  %v14839_v5 = vcombine.high %v5422_v60, %v5425_v61  ;;  %v2524_v8 = vld [vmem:[#allocation11 + $0xf10] sm:$0xff]  ;;  %v5461_v59 = vld [vmem:[#allocation11 + $0x1338] sm:$0xff] }
 0x394   :  { %7670 = vmatprep.subr.bf16.mxu1 %v14803_v10  ;;  %v2527_v10 = vld [vmem:[#allocation11 + $0xf70] sm:$0xff] }
 0x395   :  { %v14458_v23 = vcombine.low %v2524_v8, %v2527_v10 }
 0x396   :  { %5109 = vmatpush1.bf16.msra.mxu0 %v14416_v19  ;;  %v14459_v19 = vcombine.high %v2524_v8, %v2527_v10  ;;  %v5464_v8 = vld [vmem:[#allocation11 + $0x1398] sm:$0xff] }
 0x397   :  { %7671 = vmatpush1.bf16.msra.mxu1 %v14802_v20  ;;  %5110 = vmatprep.subr.bf16.mxu0 %v14423_v16  ;;  %v14845_v20 = vcombine.high %v5428_v11, %v5431_v12  ;;  %v2530_v16 = vld [vmem:[#allocation11 + $0xfd0] sm:$0xff]  ;;  %v5467_v10 = vld [vmem:[#allocation11 + $0x13f8] sm:$0xff]  ;;  %v14874_v12 = vcombine.low %v5458_v58, %v5461_v59 }
 0x398   :  { %7672 = vmatprep.subr.bf16.mxu1 %v14809_v17  ;;  %v2533_v17 = vld [vmem:[#allocation11 + $0x1030] sm:$0xff] }
 0x399   :  { %v14464_v31 = vcombine.low %v2530_v16, %v2533_v17 }
 0x39a   :  { %5111 = vmatpush1.bf16.msra.mxu0 %v14422_v25  ;;  %v14465_v25 = vcombine.high %v2530_v16, %v2533_v17  ;;  %v5470_v16 = vld [vmem:[#allocation11 + $0x1458] sm:$0xff] }
 0x39b   :  { %7673 = vmatpush1.bf16.msra.mxu1 %v14808_v26  ;;  %5112 = vmatprep.subr.bf16.mxu0 %v14429_v27  ;;  %v14851_v26 = vcombine.high %v5434_v18, %v5437_v9  ;;  %v2536_v27 = vld [vmem:[#allocation11 + $0x1090] sm:$0xff]  ;;  %v5473_v17 = vld [vmem:[#allocation11 + $0x14b8] sm:$0xff]  ;;  %v14880_v9 = vcombine.low %v5464_v8, %v5467_v10 }
 0x39c   :  { %7674 = vmatprep.subr.bf16.mxu1 %v14815_v57  ;;  %v2539_v57 = vld [vmem:[#allocation11 + $0x10f0] sm:$0xff] }
 0x39e   :  { %5113 = vmatpush1.bf16.msra.mxu0 %v14428_v45  ;;  %v14471_v45 = vcombine.high %v2536_v27, %v2539_v57 }
 0x39f   :  { %7675 = vmatpush1.bf16.msra.mxu1 %v14814_v33  ;;  %5125 = vmatprep.subr.bf16.mxu0 %v14435_v54  ;;  %v14857_v33 = vcombine.high %v5440_v28, %v5443_v29  ;;  %v2542_v54 = vld [vmem:[#allocation11 + $0x1150] sm:$0xff]  ;;  %v14886_v29 = vcombine.low %v5470_v16, %v5473_v17 }
 0x3a0   :  { %7687 = vmatprep.subr.bf16.mxu1 %v14821_v36  ;;  %v2545_v36 = vld [vmem:[#allocation11 + $0x11b0] sm:$0xff] }
 0x3a1   :  { %5115 = vmatmul.mubr.bf16.vlgmr.msra.gmra.mrb[16].mxu0 %v16700_v1  ;;  %v14477_v42 = vcombine.high %v2542_v54, %v2545_v36  ;;  %v14476_v50 = vcombine.low %v2542_v54, %v2545_v36  ;;  %v5482_v54 = vld [vmem:[#allocation11 + $0x15d8] sm:$0xff] }
 0x3a2   :  { %7677 = vmatmul.mubr.bf16.vlgmr.msra.gmra.mrb[16].mxu1 %v16700_v1  ;;  %5126 = vmatpush1.bf16.msra.mxu0 %v14434_v40  ;;  %v14470_v40 = vcombine.low %v2536_v27, %v2539_v57  ;;  %v5476_v27 = vld [vmem:[#allocation11 + $0x1518] sm:$0xff] }
 0x3a3   :  { %5157 = vmatprep.mubr.bf16.mxu0 %v16706_v7  ;;  %7688 = vmatpush1.bf16.msra.mxu1 %v14820_v43  ;;  %v14863_v43 = vcombine.high %v5446_v38, %v5449_v39  ;;  %v5479_v57 = vld [vmem:[#allocation11 + $0x1578] sm:$0xff] }
 0x3a4   :  { %7719 = vmatprep.mubr.bf16.mxu1 %v16706_v7  ;;  %5127 = vmatprep.subr.bf16.mxu0 %v14441_v44  ;;  %v2548_v44 = vld [vmem:[#allocation11 + $0x1210] sm:$0xff]  ;;  %v5485_v36 = vld [vmem:[#allocation11 + $0x1638] sm:$0xff]  ;;  %v14892_v39 = vcombine.low %v5476_v27, %v5479_v57 }
 0x3a5   :  { %7689 = vmatprep.subr.bf16.mxu1 %v14827_v22  ;;  %v5455_v22 = vld [vmem:[#allocation11 + $0x1278] sm:$0xff]  ;;  %v14482_v60 = vcombine.low %v2548_v44, %v2551_v47 }
 0x3a6   :  { %5128 = vmatpush1.bf16.msra.mxu0 %v14440_v52  ;;  %v14483_v52 = vcombine.high %v2548_v44, %v2551_v47  ;;  %v14868_v61 = vcombine.low %v5452_v49, %v5455_v22  ;;  %v5488_v44 = vld [vmem:[#allocation11 + $0x1698] sm:$0xff] }
 0x3a7   :  { %7690 = vmatpush1.bf16.msra.mxu1 %v14826_v53  ;;  %5129 = vmatprep.subr.bf16.mxu0 %v14447_v55  ;;  %v14869_v53 = vcombine.high %v5452_v49, %v5455_v22  ;;  %v2554_v55 = vld [vmem:[#allocation11 + $0x12d0] sm:$0xff]  ;;  %v5491_v47 = vld [vmem:[#allocation11 + $0x16f8] sm:$0xff]  ;;  %v14898_v22 = vcombine.low %v5482_v54, %v5485_v36 }
 0x3a8   :  { %7691 = vmatprep.subr.bf16.mxu1 %v14833_v56  ;;  %v2557_v56 = vld [vmem:[#allocation11 + $0x1330] sm:$0xff] }
 0x3a9   :  { %v14488_v11 = vcombine.low %v2554_v55, %v2557_v56 }
 0x3aa   :  { %5130 = vmatpush1.bf16.msra.mxu0 %v14446_v63  ;;  %v14489_v63 = vcombine.high %v2554_v55, %v2557_v56  ;;  %v5494_v55 = vld [vmem:[#allocation11 + $0x1758] sm:$0xff] }
 0x3ab   :  { %7692 = vmatpush1.bf16.msra.mxu1 %v14832_v3  ;;  %5131 = vmatprep.subr.bf16.mxu0 %v14453_v4  ;;  %v14875_v3 = vcombine.high %v5458_v58, %v5461_v59  ;;  %v2560_v4 = vld [vmem:[#allocation11 + $0x1390] sm:$0xff]  ;;  %v5497_v56 = vld [vmem:[#allocation11 + $0x17b8] sm:$0xff]  ;;  %v14904_v59 = vcombine.low %v5488_v44, %v5491_v47 }
 0x3ac   :  { %7693 = vmatprep.subr.bf16.mxu1 %v14839_v5  ;;  %v2563_v5 = vld [vmem:[#allocation11 + $0x13f0] sm:$0xff] }
 0x3ad   :  { %v14494_v18 = vcombine.low %v2560_v4, %v2563_v5 }
 0x3ae   :  { %5132 = vmatpush1.bf16.msra.mxu0 %v14452_v13  ;;  %v14495_v13 = vcombine.high %v2560_v4, %v2563_v5  ;;  %v5500_v4 = vld [vmem:[#allocation11 + $0x1818] sm:$0xff] }
 0x3af   :  { %7694 = vmatpush1.bf16.msra.mxu1 %v14838_v14  ;;  %5133 = vmatprep.subr.bf16.mxu0 %v14459_v19  ;;  %v14881_v14 = vcombine.high %v5464_v8, %v5467_v10  ;;  %v2566_v19 = vld [vmem:[#allocation11 + $0x1450] sm:$0xff]  ;;  %v5503_v5 = vld [vmem:[#allocation11 + $0x1878] sm:$0xff]  ;;  %v14910_v10 = vcombine.low %v5494_v55, %v5497_v56 }
 0x3b0   :  { %7695 = vmatprep.subr.bf16.mxu1 %v14845_v20  ;;  %v2569_v20 = vld [vmem:[#allocation11 + $0x14b0] sm:$0xff] }
 0x3b1   :  { %v14500_v28 = vcombine.low %v2566_v19, %v2569_v20 }
 0x3b2   :  { %5134 = vmatpush1.bf16.msra.mxu0 %v14458_v23  ;;  %v14501_v23 = vcombine.high %v2566_v19, %v2569_v20  ;;  %v5506_v20 = vld [vmem:[#allocation11 + $0x18d8] sm:$0xff] }
 0x3b3   :  { %7696 = vmatpush1.bf16.msra.mxu1 %v14844_v24  ;;  %5135 = vmatprep.subr.bf16.mxu0 %v14465_v25  ;;  %v14887_v24 = vcombine.high %v5470_v16, %v5473_v17  ;;  %v2572_v25 = vld [vmem:[#allocation11 + $0x1510] sm:$0xff]  ;;  %v5509_v16 = vld [vmem:[#allocation11 + $0x1938] sm:$0xff]  ;;  %v14916_v17 = vcombine.low %v5500_v4, %v5503_v5 }
 0x3b4   :  { %7697 = vmatprep.subr.bf16.mxu1 %v14851_v26  ;;  %v2575_v26 = vld [vmem:[#allocation11 + $0x1570] sm:$0xff] }
 0x3b5   :  { %v14506_v38 = vcombine.low %v2572_v25, %v2575_v26 }
 0x3b6   :  { %5136 = vmatpush1.bf16.msra.mxu0 %v14464_v31  ;;  %v14507_v31 = vcombine.high %v2572_v25, %v2575_v26  ;;  %v5512_v25 = vld [vmem:[#allocation11 + $0x1998] sm:$0xff] }
 0x3b7   :  { %7698 = vmatpush1.bf16.msra.mxu1 %v14850_v32  ;;  %5137 = vmatprep.subr.bf16.mxu0 %v14471_v45  ;;  %v14893_v32 = vcombine.high %v5476_v27, %v5479_v57  ;;  %v2578_v45 = vld [vmem:[#allocation11 + $0x15d0] sm:$0xff]  ;;  %v5515_v26 = vld [vmem:[#allocation11 + $0x19f8] sm:$0xff]  ;;  %v14922_v57 = vcombine.low %v5506_v20, %v5509_v16 }
 0x3b8   :  { %7699 = vmatprep.subr.bf16.mxu1 %v14857_v33  ;;  %v2581_v33 = vld [vmem:[#allocation11 + $0x1630] sm:$0xff] }
 0x3b9   :  { %v14512_v49 = vcombine.low %v2578_v45, %v2581_v33 }
 0x3ba   :  { %5138 = vmatpush1.bf16.msra.mxu0 %v14470_v40  ;;  %v14513_v40 = vcombine.high %v2578_v45, %v2581_v33  ;;  %v5518_v45 = vld [vmem:[#allocation11 + $0x1a58] sm:$0xff] }
 0x3bb   :  { %7700 = vmatpush1.bf16.msra.mxu1 %v14856_v41  ;;  %5139 = vmatprep.subr.bf16.mxu0 %v14477_v42  ;;  %v14899_v41 = vcombine.high %v5482_v54, %v5485_v36  ;;  %v2584_v42 = vld [vmem:[#allocation11 + $0x1690] sm:$0xff]  ;;  %v5521_v33 = vld [vmem:[#allocation11 + $0x1ab8] sm:$0xff]  ;;  %v14928_v36 = vcombine.low %v5512_v25, %v5515_v26 }
 0x3bc   :  { %7701 = vmatprep.subr.bf16.mxu1 %v14863_v43  ;;  %v2587_v43 = vld [vmem:[#allocation11 + $0x16f0] sm:$0xff] }
 0x3bd   :  { %v14518_v58 = vcombine.low %v2584_v42, %v2587_v43 }
 0x3be   :  { %5140 = vmatpush1.bf16.msra.mxu0 %v14476_v50  ;;  %v14519_v50 = vcombine.high %v2584_v42, %v2587_v43  ;;  %v5524_v42 = vld [vmem:[#allocation11 + $0x1b18] sm:$0xff] }
 0x3bf   :  { %7702 = vmatpush1.bf16.msra.mxu1 %v14862_v51  ;;  %5141 = vmatprep.subr.bf16.mxu0 %v14483_v52  ;;  %v14905_v51 = vcombine.high %v5488_v44, %v5491_v47  ;;  %v2590_v52 = vld [vmem:[#allocation11 + $0x1750] sm:$0xff]  ;;  %v5527_v43 = vld [vmem:[#allocation11 + $0x1b78] sm:$0xff]  ;;  %v14934_v47 = vcombine.low %v5518_v45, %v5521_v33 }
 0x3c0   :  { %7703 = vmatprep.subr.bf16.mxu1 %v14869_v53  ;;  %v2593_v53 = vld [vmem:[#allocation11 + $0x17b0] sm:$0xff] }
 0x3c1   :  { %v14524_v8 = vcombine.low %v2590_v52, %v2593_v53 }
 0x3c2   :  { %5142 = vmatpush1.bf16.msra.mxu0 %v14482_v60  ;;  %v14525_v60 = vcombine.high %v2590_v52, %v2593_v53  ;;  %v5530_v52 = vld [vmem:[#allocation11 + $0x1bd8] sm:$0xff] }
 0x3c3   :  { %7704 = vmatpush1.bf16.msra.mxu1 %v14868_v61  ;;  %5143 = vmatprep.subr.bf16.mxu0 %v14489_v63  ;;  %v14911_v61 = vcombine.high %v5494_v55, %v5497_v56  ;;  %v2596_v63 = vld [vmem:[#allocation11 + $0x1810] sm:$0xff]  ;;  %v5533_v53 = vld [vmem:[#allocation11 + $0x1c38] sm:$0xff]  ;;  %v14940_v56 = vcombine.low %v5524_v42, %v5527_v43 }
 0x3c4   :  { %7705 = vmatprep.subr.bf16.mxu1 %v14875_v3  ;;  %v2599_v3 = vld [vmem:[#allocation11 + $0x1870] sm:$0xff] }
 0x3c5   :  { %v14530_v19 = vcombine.low %v2596_v63, %v2599_v3 }
 0x3c6   :  { %5144 = vmatpush1.bf16.msra.mxu0 %v14488_v11  ;;  %v14531_v11 = vcombine.high %v2596_v63, %v2599_v3  ;;  %v5536_v63 = vld [vmem:[#allocation11 + $0x1c98] sm:$0xff] }
 0x3c7   :  { %7706 = vmatpush1.bf16.msra.mxu1 %v14874_v12  ;;  %5145 = vmatprep.subr.bf16.mxu0 %v14495_v13  ;;  %v14917_v12 = vcombine.high %v5500_v4, %v5503_v5  ;;  %v2602_v13 = vld [vmem:[#allocation11 + $0x18d0] sm:$0xff]  ;;  %v5539_v3 = vld [vmem:[#allocation11 + $0x1cf8] sm:$0xff]  ;;  %v14946_v5 = vcombine.low %v5530_v52, %v5533_v53 }
 0x3c8   :  { %7707 = vmatprep.subr.bf16.mxu1 %v14881_v14  ;;  %v2605_v14 = vld [vmem:[#allocation11 + $0x1930] sm:$0xff] }
 0x3c9   :  { %v14536_v27 = vcombine.low %v2602_v13, %v2605_v14 }
 0x3ca   :  { %5146 = vmatpush1.bf16.msra.mxu0 %v14494_v18  ;;  %v14537_v18 = vcombine.high %v2602_v13, %v2605_v14  ;;  %v5542_v13 = vld [vmem:[#allocation11 + $0x1d58] sm:$0xff] }
 0x3cb   :  { %7708 = vmatpush1.bf16.msra.mxu1 %v14880_v9  ;;  %5147 = vmatprep.subr.bf16.mxu0 %v14501_v23  ;;  %v2608_v9 = vld [vmem:[#allocation11 + $0x1990] sm:$0xff]  ;;  %v5545_v14 = vld [vmem:[#allocation11 + $0x1db8] sm:$0xff] }
 0x3cc   :  { %7709 = vmatprep.subr.bf16.mxu1 %v14887_v24  ;;  %v2611_v23 = vld [vmem:[#allocation11 + $0x19f0] sm:$0xff]  ;;  %v14923_v24 = vcombine.high %v5506_v20, %v5509_v16  ;;  %v14952_v20 = vcombine.low %v5536_v63, %v5539_v3 }
 0x3cd   :  { %v14542_v54 = vcombine.low %v2608_v9, %v2611_v23 }
 0x3ce   :  { %5148 = vmatpush1.bf16.msra.mxu0 %v14500_v28  ;;  %v14543_v28 = vcombine.high %v2608_v9, %v2611_v23  ;;  %v2647_v9 = vld [vmem:[#allocation11 + $0x1e70] sm:$0xff]  ;;  %v5548_v23 = vld [vmem:[#allocation11 + $0x1e18] sm:$0xff] }
 0x3cf   :  { %7710 = vmatpush1.bf16.msra.mxu1 %v14886_v29  ;;  %5149 = vmatprep.subr.bf16.mxu0 %v14507_v31  ;;  %v14929_v29 = vcombine.high %v5512_v25, %v5515_v26  ;;  %v2614_v31 = vld [vmem:[#allocation11 + $0x1a50] sm:$0xff]  ;;  %v14958_v26 = vcombine.low %v5542_v13, %v5545_v14 }
 0x3d0   :  { %7711 = vmatprep.subr.bf16.mxu1 %v14893_v32  ;;  %v2617_v32 = vld [vmem:[#allocation11 + $0x1ab0] sm:$0xff] }
 0x3d1   :  { %v14548_v44 = vcombine.low %v2614_v31, %v2617_v32 }
 0x3d2   :  { %5150 = vmatpush1.bf16.msra.mxu0 %v14506_v38  ;;  %v14549_v38 = vcombine.high %v2614_v31, %v2617_v32  ;;  %v5554_v31 = vld [vmem:[#allocation11 + $0x1ed8] sm:$0xff] }
 0x3d3   :  { %7712 = vmatpush1.bf16.msra.mxu1 %v14892_v39  ;;  %5151 = vmatprep.subr.bf16.mxu0 %v14513_v40  ;;  %v14935_v39 = vcombine.high %v5518_v45, %v5521_v33  ;;  %v2620_v40 = vld [vmem:[#allocation11 + $0x1b10] sm:$0xff]  ;;  %v5557_v32 = vld [vmem:[#allocation11 + $0x1f38] sm:$0xff] }
 0x3d4   :  { %7713 = vmatprep.subr.bf16.mxu1 %v14899_v41  ;;  %v2623_v41 = vld [vmem:[#allocation11 + $0x1b70] sm:$0xff] }
 0x3d5   :  { %v14554_v55 = vcombine.low %v2620_v40, %v2623_v41 }
 0x3d6   :  { %5152 = vmatpush1.bf16.msra.mxu0 %v14512_v49  ;;  %v14555_v49 = vcombine.high %v2620_v40, %v2623_v41  ;;  %v5560_v40 = vld [vmem:[#allocation11 + $0x1f98] sm:$0xff] }
 0x3d7   :  { %7714 = vmatpush1.bf16.msra.mxu1 %v14898_v22  ;;  %5153 = vmatprep.subr.bf16.mxu0 %v14519_v50  ;;  %v14941_v22 = vcombine.high %v5524_v42, %v5527_v43  ;;  %v2626_v50 = vld [vmem:[#allocation11 + $0x1bd0] sm:$0xff]  ;;  %v5563_v41 = vld [vmem:[#allocation11 + $0x1ff8] sm:$0xff]  ;;  %v14970_v43 = vcombine.low %v5554_v31, %v5557_v32 }
 0x3d8   :  { %7715 = vmatprep.subr.bf16.mxu1 %v14905_v51  ;;  %v2629_v51 = vld [vmem:[#allocation11 + $0x1c30] sm:$0xff] }
 0x3d9   :  { %v14560_v4 = vcombine.low %v2626_v50, %v2629_v51 }
 0x3da   :  { %5154 = vmatpush1.bf16.msra.mxu0 %v14518_v58  ;;  %v14561_v58 = vcombine.high %v2626_v50, %v2629_v51  ;;  %v5566_v50 = vld [vmem:[#allocation11 + $0x2058] sm:$0xff] }
 0x3db   :  { %7716 = vmatpush1.bf16.msra.mxu1 %v14904_v59  ;;  %5155 = vmatprep.subr.bf16.mxu0 %v14525_v60  ;;  %v14947_v59 = vcombine.high %v5530_v52, %v5533_v53  ;;  %v2632_v60 = vld [vmem:[#allocation11 + $0x1c90] sm:$0xff]  ;;  %v5569_v51 = vld [vmem:[#allocation11 + $0x20b8] sm:$0xff]  ;;  %v14976_v53 = vcombine.low %v5560_v40, %v5563_v41 }
 0x3dc   :  { %7717 = vmatprep.subr.bf16.mxu1 %v14911_v61  ;;  %v2635_v61 = vld [vmem:[#allocation11 + $0x1cf0] sm:$0xff] }
 0x3de   :  { %5156 = vmatpush1.bf16.msra.mxu0 %v14524_v8  ;;  %v14567_v8 = vcombine.high %v2632_v60, %v2635_v61 }
 0x3df   :  { %7718 = vmatpush1.bf16.msra.mxu1 %v14910_v10  ;;  %5168 = vmatprep.subr.bf16.mxu0 %v14531_v11  ;;  %v14953_v10 = vcombine.high %v5536_v63, %v5539_v3  ;;  %v2638_v11 = vld [vmem:[#allocation11 + $0x1d50] sm:$0xff]  ;;  %v14982_v3 = vcombine.low %v5566_v50, %v5569_v51 }
 0x3e0   :  { %7730 = vmatprep.subr.bf16.mxu1 %v14917_v12  ;;  %v2641_v12 = vld [vmem:[#allocation11 + $0x1db0] sm:$0xff] }
 0x3e1   :  { %5158 = vmatmul.mubr.bf16.vlgmr.msra.gmra.mrb[16].mxu0 %v16702_v2  ;;  %v14573_v16 = vcombine.high %v2638_v11, %v2641_v12  ;;  %v14572_v25 = vcombine.low %v2638_v11, %v2641_v12  ;;  %v5578_v11 = vld [vmem:[#allocation11 + $0x21d8] sm:$0xff] }
 0x3e2   :  { %7720 = vmatmul.mubr.bf16.vlgmr.msra.gmra.mrb[16].mxu1 %v16702_v2  ;;  %5169 = vmatpush1.bf16.msra.mxu0 %v14530_v19  ;;  %v14566_v19 = vcombine.low %v2632_v60, %v2635_v61  ;;  %v5572_v60 = vld [vmem:[#allocation11 + $0x2118] sm:$0xff] }
 0x3e3   :  { %5200 = vmatprep.mubr.bf16.mxu0 %v16750_v35  ;;  %7731 = vmatpush1.bf16.msra.mxu1 %v14916_v17  ;;  %v14959_v17 = vcombine.high %v5542_v13, %v5545_v14  ;;  %v5575_v61 = vld [vmem:[#allocation11 + $0x2178] sm:$0xff] }
 0x3e4   :  { %7762 = vmatprep.mubr.bf16.mxu1 %v16750_v35  ;;  %5170 = vmatprep.subr.bf16.mxu0 %v14537_v18  ;;  %v2644_v18 = vld [vmem:[#allocation11 + $0x1e10] sm:$0xff]  ;;  %v5581_v12 = vld [vmem:[#allocation11 + $0x2238] sm:$0xff]  ;;  %v14988_v14 = vcombine.low %v5572_v60, %v5575_v61 }
 0x3e5   :  { %7732 = vmatprep.subr.bf16.mxu1 %v14923_v24  ;;  %v5551_v24 = vld [vmem:[#allocation11 + $0x1e78] sm:$0xff]  ;;  %v14578_v45 = vcombine.low %v2644_v18, %v2647_v9 }
 0x3e6   :  { %5171 = vmatpush1.bf16.msra.mxu0 %v14536_v27  ;;  %v14579_v27 = vcombine.high %v2644_v18, %v2647_v9  ;;  %v14964_v33 = vcombine.low %v5548_v23, %v5551_v24  ;;  %v5584_v18 = vld [vmem:[#allocation11 + $0x2298] sm:$0xff] }
 0x3e7   :  { %7733 = vmatpush1.bf16.msra.mxu1 %v14922_v57  ;;  %5172 = vmatprep.subr.bf16.mxu0 %v14543_v28  ;;  %v14965_v57 = vcombine.high %v5548_v23, %v5551_v24  ;;  %v2650_v28 = vld [vmem:[#allocation11 + $0x1ed0] sm:$0xff]  ;;  %v5587_v9 = vld [vmem:[#allocation11 + $0x22f8] sm:$0xff]  ;;  %v14994_v24 = vcombine.low %v5578_v11, %v5581_v12 }
 0x3e8   :  { %7734 = vmatprep.subr.bf16.mxu1 %v14929_v29  ;;  %v2653_v29 = vld [vmem:[#allocation11 + $0x1f30] sm:$0xff] }
 0x3e9   :  { %v14584_v42 = vcombine.low %v2650_v28, %v2653_v29 }
 0x3ea   :  { %5173 = vmatpush1.bf16.msra.mxu0 %v14542_v54  ;;  %v14585_v54 = vcombine.high %v2650_v28, %v2653_v29  ;;  %v5590_v28 = vld [vmem:[#allocation11 + $0x2358] sm:$0xff] }
 0x3eb   :  { %7735 = vmatpush1.bf16.msra.mxu1 %v14928_v36  ;;  %5174 = vmatprep.subr.bf16.mxu0 %v14549_v38  ;;  %v14971_v36 = vcombine.high %v5554_v31, %v5557_v32  ;;  %v2656_v38 = vld [vmem:[#allocation11 + $0x1f90] sm:$0xff]  ;;  %v5593_v29 = vld [vmem:[#allocation11 + $0x23b8] sm:$0xff]  ;;  %v15000_v32 = vcombine.low %v5584_v18, %v5587_v9 }
 0x3ec   :  { %7736 = vmatprep.subr.bf16.mxu1 %v14935_v39  ;;  %v2659_v39 = vld [vmem:[#allocation11 + $0x1ff0] sm:$0xff] }
 0x3ed   :  { %v14590_v52 = vcombine.low %v2656_v38, %v2659_v39 }
 0x3ee   :  { %5175 = vmatpush1.bf16.msra.mxu0 %v14548_v44  ;;  %v14591_v44 = vcombine.high %v2656_v38, %v2659_v39  ;;  %v5596_v38 = vld [vmem:[#allocation11 + $0x2418] sm:$0xff] }
 0x3ef   :  { %7737 = vmatpush1.bf16.msra.mxu1 %v14934_v47  ;;  %5176 = vmatprep.subr.bf16.mxu0 %v14555_v49  ;;  %v14977_v47 = vcombine.high %v5560_v40, %v5563_v41  ;;  %v2662_v49 = vld [vmem:[#allocation11 + $0x2050] sm:$0xff]  ;;  %v5599_v39 = vld [vmem:[#allocation11 + $0x2478] sm:$0xff]  ;;  %v15006_v41 = vcombine.low %v5590_v28, %v5593_v29 }
 0x3f0   :  { %7738 = vmatprep.subr.bf16.mxu1 %v14941_v22  ;;  %v2665_v22 = vld [vmem:[#allocation11 + $0x20b0] sm:$0xff] }
 0x3f1   :  { %v14596_v63 = vcombine.low %v2662_v49, %v2665_v22 }
 0x3f2   :  { %5177 = vmatpush1.bf16.msra.mxu0 %v14554_v55  ;;  %v14597_v55 = vcombine.high %v2662_v49, %v2665_v22  ;;  %v5602_v22 = vld [vmem:[#allocation11 + $0x24d8] sm:$0xff] }
 0x3f3   :  { %7739 = vmatpush1.bf16.msra.mxu1 %v14940_v56  ;;  %5178 = vmatprep.subr.bf16.mxu0 %v14561_v58  ;;  %v14983_v56 = vcombine.high %v5566_v50, %v5569_v51  ;;  %v2668_v58 = vld [vmem:[#allocation11 + $0x2110] sm:$0xff]  ;;  %v5605_v50 = vld [vmem:[#allocation11 + $0x2538] sm:$0xff]  ;;  %v15012_v51 = vcombine.low %v5596_v38, %v5599_v39 }
 0x3f4   :  { %7740 = vmatprep.subr.bf16.mxu1 %v14947_v59  ;;  %v2671_v59 = vld [vmem:[#allocation11 + $0x2170] sm:$0xff] }
 0x3f5   :  { %v14602_v13 = vcombine.low %v2668_v58, %v2671_v59 }
 0x3f6   :  { %5179 = vmatpush1.bf16.msra.mxu0 %v14560_v4  ;;  %v14603_v4 = vcombine.high %v2668_v58, %v2671_v59  ;;  %v5608_v58 = vld [vmem:[#allocation11 + $0x2598] sm:$0xff] }
 0x3f7   :  { %7741 = vmatpush1.bf16.msra.mxu1 %v14946_v5  ;;  %5180 = vmatprep.subr.bf16.mxu0 %v14567_v8  ;;  %v14989_v5 = vcombine.high %v5572_v60, %v5575_v61  ;;  %v2674_v8 = vld [vmem:[#allocation11 + $0x21d0] sm:$0xff]  ;;  %v5611_v59 = vld [vmem:[#allocation11 + $0x25f8] sm:$0xff]  ;;  %v15018_v61 = vcombine.low %v5602_v22, %v5605_v50 }
 0x3f8   :  { %7742 = vmatprep.subr.bf16.mxu1 %v14953_v10  ;;  %v2677_v10 = vld [vmem:[#allocation11 + $0x2230] sm:$0xff] }
 0x3f9   :  { %v14608_v23 = vcombine.low %v2674_v8, %v2677_v10 }
 0x3fa   :  { %5181 = vmatpush1.bf16.msra.mxu0 %v14566_v19  ;;  %v14609_v19 = vcombine.high %v2674_v8, %v2677_v10  ;;  %v5614_v8 = vld [vmem:[#allocation11 + $0x2658] sm:$0xff] }
 0x3fb   :  { %7743 = vmatpush1.bf16.msra.mxu1 %v14952_v20  ;;  %5182 = vmatprep.subr.bf16.mxu0 %v14573_v16  ;;  %v14995_v20 = vcombine.high %v5578_v11, %v5581_v12  ;;  %v2680_v16 = vld [vmem:[#allocation11 + $0x2290] sm:$0xff]  ;;  %v5617_v10 = vld [vmem:[#allocation11 + $0x26b8] sm:$0xff]  ;;  %v15024_v12 = vcombine.low %v5608_v58, %v5611_v59 }
 0x3fc   :  { %7744 = vmatprep.subr.bf16.mxu1 %v14959_v17  ;;  %v2683_v17 = vld [vmem:[#allocation11 + $0x22f0] sm:$0xff] }
 0x3fd   :  { %v14614_v31 = vcombine.low %v2680_v16, %v2683_v17 }
 0x3fe   :  { %5183 = vmatpush1.bf16.msra.mxu0 %v14572_v25  ;;  %v14615_v25 = vcombine.high %v2680_v16, %v2683_v17  ;;  %v5620_v16 = vld [vmem:[#allocation11 + $0x2718] sm:$0xff] }
 0x3ff   :  { %7745 = vmatpush1.bf16.msra.mxu1 %v14958_v26  ;;  %5184 = vmatprep.subr.bf16.mxu0 %v14579_v27  ;;  %v15001_v26 = vcombine.high %v5584_v18, %v5587_v9  ;;  %v2686_v27 = vld [vmem:[#allocation11 + $0x2350] sm:$0xff]  ;;  %v5623_v17 = vld [vmem:[#allocation11 + $0x2778] sm:$0xff]  ;;  %v15030_v9 = vcombine.low %v5614_v8, %v5617_v10 }
 0x400   :  { %7746 = vmatprep.subr.bf16.mxu1 %v14965_v57  ;;  %v2689_v57 = vld [vmem:[#allocation11 + $0x23b0] sm:$0xff] }
 0x401   :  { %v14620_v40 = vcombine.low %v2686_v27, %v2689_v57 }
 0x402   :  { %5185 = vmatpush1.bf16.msra.mxu0 %v14578_v45  ;;  %v14621_v45 = vcombine.high %v2686_v27, %v2689_v57  ;;  %v5626_v27 = vld [vmem:[#allocation11 + $0x27d8] sm:$0xff] }
 0x403   :  { %7747 = vmatpush1.bf16.msra.mxu1 %v14964_v33  ;;  %5186 = vmatprep.subr.bf16.mxu0 %v14585_v54  ;;  %v15007_v33 = vcombine.high %v5590_v28, %v5593_v29  ;;  %v2692_v54 = vld [vmem:[#allocation11 + $0x2410] sm:$0xff]  ;;  %v5629_v57 = vld [vmem:[#allocation11 + $0x2838] sm:$0xff]  ;;  %v2786_v29 = vld [vmem:[#allocation13] sm:$0x3f] }
 0x404   :  { %7748 = vmatprep.subr.bf16.mxu1 %v14971_v36  ;;  %v2695_v36 = vld [vmem:[#allocation11 + $0x2470] sm:$0xff] }
 0x405   :  { %v14626_v49 = vcombine.low %v2692_v54, %v2695_v36 }
 0x406   :  { %5187 = vmatpush1.bf16.msra.mxu0 %v14584_v42  ;;  %v14627_v42 = vcombine.high %v2692_v54, %v2695_v36  ;;  %v2731_v54 = vld [vmem:[#allocation11 + $0x28f0] sm:$0xff]  ;;  %v2791_v36 = vrot.slane %v2786_v29, %v16639_v46 }
 0x407   :  { %7749 = vmatpush1.bf16.msra.mxu1 %v14970_v43  ;;  %5188 = vmatprep.subr.bf16.mxu0 %v14591_v44  ;;  %v15013_v43 = vcombine.high %v5596_v38, %v5599_v39  ;;  %v2698_v44 = vld [vmem:[#allocation11 + $0x24d0] sm:$0xff]  ;;  %v2799_v38 = vrot.slane %v2786_v29, %v16647_v62  ;;  %v5632_v39 = vld [vmem:[#allocation11 + $0x2898] sm:$0xff] }
 0x408   :  { %7750 = vmatprep.subr.bf16.mxu1 %v14977_v47  ;;  %v2701_v47 = vld [vmem:[#allocation11 + $0x2530] sm:$0xff] }
 0x409   :  { %v14632_v60 = vcombine.low %v2698_v44, %v2701_v47 }
 0x40a   :  { %5189 = vmatpush1.bf16.msra.mxu0 %v14590_v52  ;;  %v14633_v52 = vcombine.high %v2698_v44, %v2701_v47  ;;  %v15042_v44 = vcombine.low %v5626_v27, %v5629_v57 }
 0x40b   :  { %7751 = vmatpush1.bf16.msra.mxu1 %v14976_v53  ;;  %5190 = vmatprep.subr.bf16.mxu0 %v14597_v55  ;;  %v2704_v53 = vld [vmem:[#allocation11 + $0x2590] sm:$0xff] }
 0x40c   :  { %7752 = vmatprep.subr.bf16.mxu1 %v14983_v56  ;;  %v2707_v55 = vld [vmem:[#allocation11 + $0x25f0] sm:$0xff]  ;;  %v15019_v56 = vcombine.high %v5602_v22, %v5605_v50 }
 0x40d   :  { %v14638_v11 = vcombine.low %v2704_v53, %v2707_v55 }
 0x40e   :  { %5191 = vmatpush1.bf16.msra.mxu0 %v14596_v63  ;;  %v14639_v63 = vcombine.high %v2704_v53, %v2707_v55 }
 0x40f   :  { %7753 = vmatpush1.bf16.msra.mxu1 %v14982_v3  ;;  %5192 = vmatprep.subr.bf16.mxu0 %v14603_v4  ;;  %v15025_v3 = vcombine.high %v5608_v58, %v5611_v59  ;;  %v2710_v4 = vld [vmem:[#allocation11 + $0x2650] sm:$0xff]  ;;  %v5638_v59 = vld [vmem:[#allocation11 + $0x2958] sm:$0xff] }
 0x410   :  { %7754 = vmatprep.subr.bf16.mxu1 %v14989_v5  ;;  %v2713_v5 = vld [vmem:[#allocation11 + $0x26b0] sm:$0xff] }
 0x411   :  { %v14644_v18 = vcombine.low %v2710_v4, %v2713_v5 }
 0x412   :  { %5193 = vmatpush1.bf16.msra.mxu0 %v14602_v13  ;;  %v14645_v13 = vcombine.high %v2710_v4, %v2713_v5 }
 0x413   :  { %7755 = vmatpush1.bf16.msra.mxu1 %v14988_v14  ;;  %5194 = vmatprep.subr.bf16.mxu0 %v14609_v19  ;;  %v15031_v14 = vcombine.high %v5614_v8, %v5617_v10  ;;  %v2716_v19 = vld [vmem:[#allocation11 + $0x2710] sm:$0xff] }
 0x414   :  { %7756 = vmatprep.subr.bf16.mxu1 %v14995_v20  ;;  %v2719_v20 = vld [vmem:[#allocation11 + $0x2770] sm:$0xff] }
 0x415   :  { %v14650_v28 = vcombine.low %v2716_v19, %v2719_v20 }
 0x416   :  { %5195 = vmatpush1.bf16.msra.mxu0 %v14608_v23  ;;  %v14651_v23 = vcombine.high %v2716_v19, %v2719_v20  ;;  %v2740_v20 = vld [vmem:[#allocation11 + $0x2a10] sm:$0xff] }
 0x417   :  { %7757 = vmatpush1.bf16.msra.mxu1 %v14994_v24  ;;  %5196 = vmatprep.subr.bf16.mxu0 %v14615_v25  ;;  %v15037_v24 = vcombine.high %v5620_v16, %v5623_v17  ;;  %v2722_v25 = vld [vmem:[#allocation11 + $0x27d0] sm:$0xff] }
 0x418   :  { %7758 = vmatprep.subr.bf16.mxu1 %v15001_v26  ;;  %v2725_v26 = vld [vmem:[#allocation11 + $0x2830] sm:$0xff] }
 0x41a   :  { %5197 = vmatpush1.bf16.msra.mxu0 %v14614_v31  ;;  %v15036_v31 = vcombine.low %v5620_v16, %v5623_v17  ;;  %v2743_v16 = vld [vmem:[#allocation11 + $0x2a70] sm:$0xff] }
 0x41b   :  { %7759 = vmatpush1.bf16.msra.mxu1 %v15000_v32  ;;  %5198 = vmatprep.subr.bf16.mxu0 %v14621_v45  ;;  %v14657_v32 = vcombine.high %v2722_v25, %v2725_v26  ;;  %v15043_v45 = vcombine.high %v5626_v27, %v5629_v57  ;;  %v2746_v57 = vld [vmem:[#allocation11 + $0x2ad0] sm:$0xff] }
 0x41c   :  { %7760 = vmatprep.subr.bf16.mxu1 %v15007_v33  ;;  %v2728_v33 = vld [vmem:[#allocation11 + $0x2890] sm:$0xff] }
 0x41d   :  { %v14663_v47 = vcombine.high %v2728_v33, %v2731_v54  ;;  %v14662_v5 = vcombine.low %v2728_v33, %v2731_v54 }
 0x41e   :  { %5199 = vmatpush1.bf16.msra.mxu0 %v14620_v40  ;;  %v5635_v40 = vld [vmem:[#allocation11 + $0x28f8] sm:$0xff] }
 0x41f   :  { %7761 = vmatpush1.bf16.msra.mxu1 %v15006_v41  ;;  %5211 = vmatprep.subr.bf16.mxu0 %v14627_v42  ;;  %v2795_v41 = vrot.slane %v2786_v29, %v16642_v48  ;;  %v2803_v42 = vrot.slane %v2786_v29, %v16650_v0  ;;  %v15049_v50 = vcombine.high %v5632_v39, %v5635_v40  ;;  %v5650_v29 = vld [vmem:[#allocation11 + $0x2ad8] sm:$0xff] }
 0x420   :  { %7773 = vmatprep.subr.bf16.mxu1 %v15013_v43  ;;  %v14656_v43 = vcombine.low %v2722_v25, %v2725_v26  ;;  %v14675_v26 = vcombine.high %v2740_v20, %v2743_v16 }
 0x421   :  { %5201 = vmatmul.mubr.bf16.vlgmr.msra.gmra.mrb[16].mxu0 %v16745_v30 }
 0x422   :  { %7763 = vmatmul.mubr.bf16.vlgmr.msra.gmra.mrb[16].mxu1 %v16745_v30  ;;  %5212 = vmatpush1.bf16.msra.mxu0 %v14626_v49 }
 0x423   :  { %5243 = vmatprep.mubr.bf16.mxu0 %v16752_v37  ;;  %7774 = vmatpush1.bf16.msra.mxu1 %v15012_v51  ;;  %v2734_v51 = vld [vmem:[#allocation11 + $0x2950] sm:$0xff] }
 0x424   :  { %7805 = vmatprep.mubr.bf16.mxu1 %v16752_v37  ;;  %5213 = vmatprep.subr.bf16.mxu0 %v14633_v52  ;;  %v2737_v52 = vld [vmem:[#allocation11 + $0x29b0] sm:$0xff] }
 0x425   :  { %7775 = vmatprep.subr.bf16.mxu1 %v15019_v56 }
 0x426   :  { %5214 = vmatpush1.bf16.msra.mxu0 %v14632_v60  ;;  %v5641_v60 = vld [vmem:[#allocation11 + $0x29b8] sm:$0xff] }
 0x427   :  { %7776 = vmatpush1.bf16.msra.mxu1 %v15018_v61  ;;  %5215 = vmatprep.subr.bf16.mxu0 %v14639_v63  ;;  %v15055_v19 = vcombine.high %v5638_v59, %v5641_v60  ;;  %v15054_v25 = vcombine.low %v5638_v59, %v5641_v60  ;;  %v5665_v59 = vld [vmem:[#allocation11 + $0x2cb8] sm:$0xff] }
 0x428   :  { %7777 = vmatprep.subr.bf16.mxu1 %v15025_v3 }
 0x42a   :  { %5216 = vmatpush1.bf16.msra.mxu0 %v14638_v11 }
 0x42b   :  { %7778 = vmatpush1.bf16.msra.mxu1 %v15024_v12  ;;  %5217 = vmatprep.subr.bf16.mxu0 %v14645_v13  ;;  %v15048_v12 = vcombine.low %v5632_v39, %v5635_v40  ;;  %v14669_v13 = vcombine.high %v2734_v51, %v2737_v52  ;;  %v5656_v40 = vld [vmem:[#allocation11 + $0x2b98] sm:$0xff] }
 0x42c   :  { %7779 = vmatprep.subr.bf16.mxu1 %v15031_v14 }
 0x42e   :  { %5218 = vmatpush1.bf16.msra.mxu0 %v14644_v18  ;;  %v5644_v18 = vld [vmem:[#allocation11 + $0x2a18] sm:$0xff] }
 0x42f   :  { %7780 = vmatpush1.bf16.msra.mxu1 %v15030_v9  ;;  %5219 = vmatprep.subr.bf16.mxu0 %v14651_v23  ;;  %v5647_v9 = vld [vmem:[#allocation11 + $0x2a78] sm:$0xff] }
 0x430   :  { %7781 = vmatprep.subr.bf16.mxu1 %v15037_v24  ;;  %v14668_v24 = vcombine.low %v2734_v51, %v2737_v52  ;;  %v15061_v27 = vcombine.high %v5644_v18, %v5647_v9  ;;  %v2758_v52 = vld [vmem:[#allocation11 + $0x2c50] sm:$0xff] }
 0x432   :  { %5220 = vmatpush1.bf16.msra.mxu0 %v14650_v28  ;;  %v2749_v28 = vld [vmem:[#allocation11 + $0x2b30] sm:$0xff] }
 0x433   :  { %7782 = vmatpush1.bf16.msra.mxu1 %v15036_v31  ;;  %5221 = vmatprep.subr.bf16.mxu0 %v14657_v32  ;;  %v5653_v31 = vld [vmem:[#allocation11 + $0x2b38] sm:$0xff]  ;;  %v14674_v32 = vcombine.low %v2740_v20, %v2743_v16  ;;  %v14681_v33 = vcombine.high %v2746_v57, %v2749_v28 }
 0x434   :  { %v4901_v49 = vpop.f32.mrb[12].mxu0  ;;  %v5073_v22 = vpop.f32.mrb[12].mxu1  ;;  %7783 = vmatprep.subr.bf16.mxu1 %v15043_v45  ;;  %v15060_v45 = vcombine.low %v5644_v18, %v5647_v9  ;;  %v15067_v54 = vcombine.high %v5650_v29, %v5653_v31  ;;  %v2770_v9 = vld [vmem:[#allocation11 + $0x2dd0] sm:$0xff] }
 0x435   :  { %v15934_v53 = vadd.f32 %v4901_v49, %v2791_v36  ;;  %v15938_v55 = vadd.f32 %v5073_v22, %v2799_v38  ;;  %v4903_v56 = vpop.f32.mrb[13].mxu0  ;;  %v5075_v58 = vpop.f32.mrb[13].mxu1 }
 0x436   :  { %v15935_v61 = vadd.f32 %v4903_v56, %v2795_v41  ;;  %v15939_v63 = vadd.f32 %v5075_v58, %v2803_v42  ;;  %v4905_v3 = vpop.f32.mrb[14].mxu0  ;;  %v5077_v4 = vpop.f32.mrb[14].mxu1  ;;  %5222 = vmatpush1.bf16.msra.mxu0 %v14656_v43  ;;  %v14680_v43 = vcombine.low %v2746_v57, %v2749_v28  ;;  %v5662_v58 = vld [vmem:[#allocation11 + $0x2c58] sm:$0xff] }
 0x437   :  { %16207 = vtanh.f32 %v15934_v53  ;;  %v15936_v8 = vadd.f32 %v4905_v3, %v2791_v36  ;;  %7784 = vmatpush1.bf16.msra.mxu1 %v15042_v44  ;;  %v4907_v10 = vpop.f32.mrb[15].mxu0  ;;  %v5079_v11 = vpop.f32.mrb[15].mxu1  ;;  %5223 = vmatprep.subr.bf16.mxu0 %v14663_v47  ;;  %v15940_v14 = vadd.f32 %v5077_v4, %v2799_v38  ;;  %v2752_v36 = vld [vmem:[#allocation11 + $0x2b90] sm:$0xff]  ;;  %v15066_v47 = vcombine.low %v5650_v29, %v5653_v31 }
 0x438   :  { %16209 = vtanh.f32 %v15938_v55  ;;  %7785 = vmatprep.subr.bf16.mxu1 %v15049_v50  ;;  %v15937_v17 = vadd.f32 %v4907_v10, %v2795_v41  ;;  %v15941_v23 = vadd.f32 %v5079_v11, %v2803_v42  ;;  %v2755_v38 = vld [vmem:[#allocation11 + $0x2bf0] sm:$0xff]  ;;  %v5659_v41 = vld [vmem:[#allocation11 + $0x2bf8] sm:$0xff]  ;;  %v15079_v10 = vcombine.high %v5662_v58, %v5665_v59 }
 0x439   :  { %16211 = vtanh.f32 %v15935_v61  ;;  %v14687_v49 = vcombine.high %v2752_v36, %v2755_v38  ;;  %v15073_v51 = vcombine.high %v5656_v40, %v5659_v41  ;;  %v2761_v53 = vld [vmem:[#allocation11 + $0x2cb0] sm:$0xff]  ;;  %v14686_v61 = vcombine.low %v2752_v36, %v2755_v38 }
 0x43a   :  { %16213 = vtanh.f32 %v15939_v63  ;;  %5224 = vmatpush1.bf16.msra.mxu0 %v14662_v5  ;;  %v15072_v3 = vcombine.low %v5656_v40, %v5659_v41  ;;  %v14693_v4 = vcombine.high %v2758_v52, %v2761_v53  ;;  %v2764_v11 = vld [vmem:[#allocation11 + $0x2d10] sm:$0xff]  ;;  %v14692_v20 = vcombine.low %v2758_v52, %v2761_v53  ;;  %v5686_v41 = vld [vmem:[#allocation11 + $0x2f58] sm:$0xff]  ;;  %v5313_v52 = vld [vmem:[#allocation11 + $0x88] sm:$0xff] }
 0x43b   :  { %16215 = vtanh.f32 %v15936_v8  ;;  %7786 = vmatpush1.bf16.msra.mxu1 %v15048_v12  ;;  %5225 = vmatprep.subr.bf16.mxu0 %v14669_v13  ;;  %v2767_v12 = vld [vmem:[#allocation11 + $0x2d70] sm:$0xff]  ;;  %v15078_v16 = vcombine.low %v5662_v58, %v5665_v59  ;;  %v5315_v59 = vld [vmem:[#allocation11 + $0xe0] sm:$0xff] }
 0x43c   :  { %16217 = vtanh.f32 %v15940_v14  ;;  %7787 = vmatprep.subr.bf16.mxu1 %v15055_v19  ;;  %v5668_v14 = vld [vmem:[#allocation11 + $0x2d18] sm:$0xff]  ;;  %v2776_v29 = vld [vmem:[#allocation11 + $0x2e90] sm:$0xff] }
 0x43d   :  { %16219 = vtanh.f32 %v15937_v17  ;;  %v5671_v19 = vld [vmem:[#allocation11 + $0x2d78] sm:$0xff]  ;;  %v14699_v17 = vcombine.high %v2764_v11, %v2767_v12  ;;  %v2779_v31 = vld [vmem:[#allocation11 + $0x2ef0] sm:$0xff] }
 0x43e   :  { %16221 = vtanh.f32 %v15941_v23  ;;  %5226 = vmatpush1.bf16.msra.mxu0 %v14668_v24  ;;  %v15085_v18 = vcombine.high %v5668_v14, %v5671_v19  ;;  %v2773_v23 = vld [vmem:[#allocation11 + $0x2e30] sm:$0xff]  ;;  %v5674_v24 = vld [vmem:[#allocation11 + $0x2dd8] sm:$0xff]  ;;  %v14711_v36 = vcombine.high %v2776_v29, %v2779_v31 }
 0x43f   :  { %7788 = vmatpush1.bf16.msra.mxu1 %v15054_v25  ;;  %5227 = vmatprep.subr.bf16.mxu0 %v14675_v26  ;;  %v5677_v25 = vld [vmem:[#allocation11 + $0x2e38] sm:$0xff]  ;;  %v14698_v26 = vcombine.low %v2764_v11, %v2767_v12  ;;  %v14705_v57 = vcombine.high %v2770_v9, %v2773_v23  ;;  %v2785_v40 = vld [vmem:[#allocation11 + $0x2fb0] sm:$0xff]  ;;  %v5322_v12 = vld [vmem:[#allocation11 + $0x1a8] sm:$0xff] }
 0x440   :  { %7789 = vmatprep.subr.bf16.mxu1 %v15061_v27  ;;  %v15084_v27 = vcombine.low %v5668_v14, %v5671_v19  ;;  %v15091_v28 = vcombine.high %v5674_v24, %v5677_v25 }
 0x441   :  { %v16208_v39 = vpop.eup %16207 }
 0x442   :  { %v16210_v42 = vpop.eup %16209  ;;  %5228 = vmatpush1.bf16.msra.mxu0 %v14674_v32  ;;  %v5680_v32 = vld [vmem:[#allocation11 + $0x2e98] sm:$0xff] }
 0x443   :  { %v16212_v44 = vpop.eup %16211  ;;  %7790 = vmatpush1.bf16.msra.mxu1 %v15060_v45  ;;  %5229 = vmatprep.subr.bf16.mxu0 %v14681_v33  ;;  %v5683_v45 = vld [vmem:[#allocation11 + $0x2ef8] sm:$0xff]  ;;  %v14704_v33 = vcombine.low %v2770_v9, %v2773_v23  ;;  %v5328_v9 = vld [vmem:[#allocation11 + $0x268] sm:$0xff] }
 0x444   :  { %v16214_v22 = vpop.eup %16213  ;;  %v15894_v50 = vpack.c.bf16 %v16212_v44, %v16208_v39  ;;  %7791 = vmatprep.subr.bf16.mxu1 %v15067_v54  ;;  %v15090_v54 = vcombine.low %v5674_v24, %v5677_v25  ;;  %v15097_v38 = vcombine.high %v5680_v32, %v5683_v45  ;;  %v2782_v39 = vld [vmem:[#allocation11 + $0x2f50] sm:$0xff]  ;;  %v15096_v44 = vcombine.low %v5680_v32, %v5683_v45  ;;  %v5331_v23 = vld [vmem:[#allocation11 + $0x2c8] sm:$0xff] }
 0x445   :  { %v16216_v55 = vpop.eup %16215  ;;  %v15895_v56 = vpack.c.bf16 %v16214_v22, %v16210_v42  ;;  %v5689_v42 = vld [vmem:[#allocation11 + $0x2fb8] sm:$0xff]  ;;  %v5309_v22 = vld [vmem:[#allocation11 + $0x20] sm:$0xff]  ;;  %v14716_v53 = vcombine.low %v2782_v39, %v2785_v40  ;;  %v14746_v45 = vcombine.low %v5328_v9, %v5331_v23 }
 0x446   :  { %v16218_v60 = vpop.eup %16217  ;;  %5302 = vst [vmem:[#allocation14] sm:$0xff] %v15894_v50  ;;  %5230 = vmatpush1.bf16.msra.mxu0 %v14680_v43  ;;  %v14710_v43 = vcombine.low %v2776_v29, %v2779_v31  ;;  %v5312_v50 = vld [vmem:[#allocation11 + $0x80] sm:$0xff]  ;;  %v5334_v29 = vld [vmem:[#allocation11 + $0x328] sm:$0xff] }
 0x447   :  { %v16220_v63 = vpop.eup %16219  ;;  %5303 = vst [vmem:[#allocation14 + $0x8] sm:$0xff] %v15895_v56  ;;  %7792 = vmatpush1.bf16.msra.mxu1 %v15066_v47  ;;  %5231 = vmatprep.subr.bf16.mxu0 %v14687_v49  ;;  %v14717_v47 = vcombine.high %v2782_v39, %v2785_v40  ;;  %v15103_v49 = vcombine.high %v5686_v41, %v5689_v42  ;;  %v5337_v31 = vld [vmem:[#allocation11 + $0x388] sm:$0xff] }
 0x448   :  { %v16222_v5 = vpop.eup %16221  ;;  %v15897_v8 = vpack.c.bf16 %v16220_v63, %v16216_v55  ;;  %7793 = vmatprep.subr.bf16.mxu1 %v15073_v51  ;;  %v5310_v51 = vld [vmem:[#allocation11 + $0x28] sm:$0xff]  ;;  %v15102_v55 = vcombine.low %v5686_v41, %v5689_v42  ;;  %v14727_v56 = vcombine.high %v5309_v22, %v5312_v50  ;;  %v14752_v42 = vcombine.low %v5334_v29, %v5337_v31 }
 0x449   :  { %v15898_v13 = vpack.c.bf16 %v16222_v5, %v16218_v60  ;;  %v14729_v58 = vcombine.high %v5310_v51, %v5313_v52  ;;  %v5318_v60 = vld [vmem:[#allocation11 + $0x140] sm:$0xff]  ;;  %v5316_v63 = vld [vmem:[#allocation11 + $0xe8] sm:$0xff] }
 0x44a   :  { %5305 = vst [vmem:[#allocation14 + $0x60] sm:$0xff] %v15897_v8  ;;  %5232 = vmatpush1.bf16.msra.mxu0 %v14686_v61  ;;  %v14726_v61 = vcombine.low %v5309_v22, %v5312_v50  ;;  %v14733_v5 = vcombine.high %v5315_v59, %v5318_v60  ;;  %v5321_v8 = vld [vmem:[#allocation11 + $0x1a0] sm:$0xff]  ;;  %v14732_v14 = vcombine.low %v5315_v59, %v5318_v60  ;;  %v5340_v39 = vld [vmem:[#allocation11 + $0x3e8] sm:$0xff] }
 0x44b   :  { %5306 = vst [vmem:[#allocation14 + $0x68] sm:$0xff] %v15898_v13  ;;  %7794 = vmatpush1.bf16.msra.mxu1 %v15072_v3  ;;  %5233 = vmatprep.subr.bf16.mxu0 %v14693_v4  ;;  %v5319_v3 = vld [vmem:[#allocation11 + $0x148] sm:$0xff]  ;;  %v14728_v4 = vcombine.low %v5310_v51, %v5313_v52 }
 0x44c   :  { %7795 = vmatprep.subr.bf16.mxu1 %v15079_v10  ;;  %v5324_v10 = vld [vmem:[#allocation11 + $0x200] sm:$0xff]  ;;  %v14735_v11 = vcombine.high %v5316_v63, %v5319_v3  ;;  %v5325_v13 = vld [vmem:[#allocation11 + $0x208] sm:$0xff]  ;;  %v14734_v19 = vcombine.low %v5316_v63, %v5319_v3 }
 0x44d   :  { %v14738_v24 = vcombine.low %v5321_v8, %v5324_v10  ;;  %v14740_v25 = vcombine.low %v5322_v12, %v5325_v13  ;;  %v5343_v40 = vld [vmem:[#allocation11 + $0x448] sm:$0xff] }
 0x44e   :  { %5234 = vmatpush1.bf16.msra.mxu0 %v14692_v20  ;;  %v14739_v20 = vcombine.high %v5321_v8, %v5324_v10  ;;  %v5346_v22 = vld [vmem:[#allocation11 + $0x4a8] sm:$0xff]  ;;  %v14758_v52 = vcombine.low %v5340_v39, %v5343_v40  ;;  %v5360_v8 = vld [vmem:[#allocation11 + $0x680] sm:$0xff] }
 0x44f   :  { %7796 = vmatpush1.bf16.msra.mxu1 %v15078_v16  ;;  %5235 = vmatprep.subr.bf16.mxu0 %v14699_v17  ;;  %v14741_v16 = vcombine.high %v5322_v12, %v5325_v13  ;;  %v5327_v17 = vld [vmem:[#allocation11 + $0x260] sm:$0xff]  ;;  %v5349_v50 = vld [vmem:[#allocation11 + $0x508] sm:$0xff] }
 0x450   :  { %7797 = vmatprep.subr.bf16.mxu1 %v15085_v18  ;;  %v5330_v18 = vld [vmem:[#allocation11 + $0x2c0] sm:$0xff]  ;;  %v5352_v59 = vld [vmem:[#allocation11 + $0x568] sm:$0xff]  ;;  %v14764_v63 = vcombine.low %v5346_v22, %v5349_v50 }
 0x451   :  { %v14744_v32 = vcombine.low %v5327_v17, %v5330_v18  ;;  %v5355_v60 = vld [vmem:[#allocation11 + $0x5c8] sm:$0xff] }
 0x452   :  { %5236 = vmatpush1.bf16.msra.mxu0 %v14698_v26  ;;  %v14745_v26 = vcombine.high %v5327_v17, %v5330_v18  ;;  %v5358_v10 = vld [vmem:[#allocation11 + $0x628] sm:$0xff]  ;;  %v14770_v13 = vcombine.low %v5352_v59, %v5355_v60 }
 0x453   :  { %7798 = vmatpush1.bf16.msra.mxu1 %v15084_v27  ;;  %5237 = vmatprep.subr.bf16.mxu0 %v14705_v57  ;;  %v14747_v27 = vcombine.high %v5328_v9, %v5331_v23  ;;  %v5333_v57 = vld [vmem:[#allocation11 + $0x320] sm:$0xff]  ;;  %v5364_v17 = vld [vmem:[#allocation11 + $0x6e8] sm:$0xff] }
 0x454   :  { %7799 = vmatprep.subr.bf16.mxu1 %v15091_v28  ;;  %v5336_v28 = vld [vmem:[#allocation11 + $0x380] sm:$0xff]  ;;  %v5367_v18 = vld [vmem:[#allocation11 + $0x748] sm:$0xff] }
 0x455   :  { %v14750_v41 = vcombine.low %v5333_v57, %v5336_v28 }
 0x456   :  { %5238 = vmatpush1.bf16.msra.mxu0 %v14704_v33  ;;  %v14751_v33 = vcombine.high %v5333_v57, %v5336_v28  ;;  %v5370_v57 = vld [vmem:[#allocation11 + $0x7a8] sm:$0xff] }
 0x457   :  { %7800 = vmatpush1.bf16.msra.mxu1 %v15090_v54  ;;  %5239 = vmatprep.subr.bf16.mxu0 %v14711_v36  ;;  %v14753_v54 = vcombine.high %v5334_v29, %v5337_v31  ;;  %v5339_v36 = vld [vmem:[#allocation11 + $0x3e0] sm:$0xff]  ;;  %v5373_v28 = vld [vmem:[#allocation11 + $0x808] sm:$0xff]  ;;  %v14782_v31 = vcombine.low %v5364_v17, %v5367_v18 }
 0x458   :  { %7801 = vmatprep.subr.bf16.mxu1 %v15097_v38  ;;  %v5342_v38 = vld [vmem:[#allocation11 + $0x440] sm:$0xff] }
 0x459   :  { %v14756_v51 = vcombine.low %v5339_v36, %v5342_v38 }
 0x45a   :  { %5240 = vmatpush1.bf16.msra.mxu0 %v14710_v43  ;;  %v14757_v43 = vcombine.high %v5339_v36, %v5342_v38  ;;  %v5376_v36 = vld [vmem:[#allocation11 + $0x868] sm:$0xff] }
 0x45b   :  { %7802 = vmatpush1.bf16.msra.mxu1 %v15096_v44  ;;  %5241 = vmatprep.subr.bf16.mxu0 %v14717_v47  ;;  %v14759_v44 = vcombine.high %v5340_v39, %v5343_v40  ;;  %v5345_v47 = vld [vmem:[#allocation11 + $0x4a0] sm:$0xff]  ;;  %v5379_v38 = vld [vmem:[#allocation11 + $0x8c8] sm:$0xff]  ;;  %v14788_v40 = vcombine.low %v5370_v57, %v5373_v28 }
 0x45c   :  { %7803 = vmatprep.subr.bf16.mxu1 %v15103_v49  ;;  %v5348_v49 = vld [vmem:[#allocation11 + $0x500] sm:$0xff] }
 0x45e   :  { %5242 = vmatpush1.bf16.msra.mxu0 %v14716_v53  ;;  %v14763_v53 = vcombine.high %v5345_v47, %v5348_v49 }
 0x45f   :  { %7804 = vmatpush1.bf16.msra.mxu1 %v15102_v55  ;;  %7816 = vmatprep.subr.bf16.mxu0 %v14727_v56  ;;  %v14765_v55 = vcombine.high %v5346_v22, %v5349_v50  ;;  %v5351_v56 = vld [vmem:[#allocation11 + $0x560] sm:$0xff]  ;;  %v14794_v50 = vcombine.low %v5376_v36, %v5379_v38 }
 0x460   :  { %7988 = vmatprep.subr.bf16.mxu1 %v14729_v58  ;;  %v5354_v58 = vld [vmem:[#allocation11 + $0x5c0] sm:$0xff] }
 0x461   :  { %5244 = vmatmul.mubr.bf16.vlgmr.msra.gmra.mrb[16].mxu0 %v16748_v34  ;;  %v14769_v3 = vcombine.high %v5351_v56, %v5354_v58  ;;  %v14768_v12 = vcombine.low %v5351_v56, %v5354_v58  ;;  %v5388_v56 = vld [vmem:[#allocation11 + $0x9e8] sm:$0xff] }
 0x462   :  { %7806 = vmatmul.mubr.bf16.vlgmr.msra.gmra.mrb[16].mxu1 %v16748_v34  ;;  %7817 = vmatpush1.bf16.msra.mxu0 %v14726_v61  ;;  %v14762_v61 = vcombine.low %v5345_v47, %v5348_v49  ;;  %v5382_v47 = vld [vmem:[#allocation11 + $0x928] sm:$0xff] }
 0x463   :  { %7848 = vmatprep.mubr.bf16.mxu0 %v16704_v6  ;;  %7989 = vmatpush1.bf16.msra.mxu1 %v14728_v4  ;;  %v14771_v4 = vcombine.high %v5352_v59, %v5355_v60  ;;  %v5385_v49 = vld [vmem:[#allocation11 + $0x988] sm:$0xff] }
 0x464   :  { %8020 = vmatprep.mubr.bf16.mxu1 %v16704_v6  ;;  %7818 = vmatprep.subr.bf16.mxu0 %v14733_v5  ;;  %v5357_v5 = vld [vmem:[#allocation11 + $0x620] sm:$0xff]  ;;  %v5391_v58 = vld [vmem:[#allocation11 + $0xa48] sm:$0xff]  ;;  %v14800_v60 = vcombine.low %v5382_v47, %v5385_v49 }
 0x465   :  { %7990 = vmatprep.subr.bf16.mxu1 %v14735_v11  ;;  %v5361_v11 = vld [vmem:[#allocation11 + $0x688] sm:$0xff]  ;;  %v14774_v9 = vcombine.low %v5357_v5, %v5360_v8 }
 0x466   :  { %7819 = vmatpush1.bf16.msra.mxu0 %v14732_v14  ;;  %v14775_v14 = vcombine.high %v5357_v5, %v5360_v8  ;;  %v14776_v23 = vcombine.low %v5358_v10, %v5361_v11  ;;  %v5394_v5 = vld [vmem:[#allocation11 + $0xaa8] sm:$0xff] }
 0x467   :  { %7991 = vmatpush1.bf16.msra.mxu1 %v14734_v19  ;;  %7820 = vmatprep.subr.bf16.mxu0 %v14739_v20  ;;  %v14777_v19 = vcombine.high %v5358_v10, %v5361_v11  ;;  %v5363_v20 = vld [vmem:[#allocation11 + $0x6e0] sm:$0xff]  ;;  %v5397_v8 = vld [vmem:[#allocation11 + $0xb08] sm:$0xff]  ;;  %v14806_v11 = vcombine.low %v5388_v56, %v5391_v58 }
 0x468   :  { %7992 = vmatprep.subr.bf16.mxu1 %v14741_v16  ;;  %v5366_v16 = vld [vmem:[#allocation11 + $0x740] sm:$0xff] }
 0x469   :  { %v14780_v29 = vcombine.low %v5363_v20, %v5366_v16 }
 0x46a   :  { %7821 = vmatpush1.bf16.msra.mxu0 %v14738_v24  ;;  %v14781_v24 = vcombine.high %v5363_v20, %v5366_v16  ;;  %v5400_v20 = vld [vmem:[#allocation11 + $0xb68] sm:$0xff] }
 0x46b   :  { %7993 = vmatpush1.bf16.msra.mxu1 %v14740_v25  ;;  %7822 = vmatprep.subr.bf16.mxu0 %v14745_v26  ;;  %v14783_v25 = vcombine.high %v5364_v17, %v5367_v18  ;;  %v5369_v26 = vld [vmem:[#allocation11 + $0x7a0] sm:$0xff]  ;;  %v5403_v16 = vld [vmem:[#allocation11 + $0xbc8] sm:$0xff]  ;;  %v14812_v18 = vcombine.low %v5394_v5, %v5397_v8 }
 0x46c   :  { %7994 = vmatprep.subr.bf16.mxu1 %v14747_v27  ;;  %v5372_v27 = vld [vmem:[#allocation11 + $0x800] sm:$0xff] }
 0x46d   :  { %v14786_v39 = vcombine.low %v5369_v26, %v5372_v27 }
 0x46e   :  { %7823 = vmatpush1.bf16.msra.mxu0 %v14744_v32  ;;  %v14787_v32 = vcombine.high %v5369_v26, %v5372_v27  ;;  %v5406_v26 = vld [vmem:[#allocation11 + $0xc28] sm:$0xff] }
 0x46f   :  { %7995 = vmatpush1.bf16.msra.mxu1 %v14746_v45  ;;  %7824 = vmatprep.subr.bf16.mxu0 %v14751_v33  ;;  %v14789_v45 = vcombine.high %v5370_v57, %v5373_v28  ;;  %v5375_v33 = vld [vmem:[#allocation11 + $0x860] sm:$0xff]  ;;  %v5409_v27 = vld [vmem:[#allocation11 + $0xc88] sm:$0xff]  ;;  %v14818_v28 = vcombine.low %v5400_v20, %v5403_v16 }
 0x470   :  { %7996 = vmatprep.subr.bf16.mxu1 %v14753_v54  ;;  %v5378_v54 = vld [vmem:[#allocation11 + $0x8c0] sm:$0xff] }
 0x471   :  { %v14792_v22 = vcombine.low %v5375_v33, %v5378_v54 }
 0x472   :  { %7825 = vmatpush1.bf16.msra.mxu0 %v14750_v41  ;;  %v14793_v41 = vcombine.high %v5375_v33, %v5378_v54  ;;  %v5412_v54 = vld [vmem:[#allocation11 + $0xce8] sm:$0xff] }
 0x473   :  { %7997 = vmatpush1.bf16.msra.mxu1 %v14752_v42  ;;  %7826 = vmatprep.subr.bf16.mxu0 %v14757_v43  ;;  %v14795_v42 = vcombine.high %v5376_v36, %v5379_v38  ;;  %v5381_v43 = vld [vmem:[#allocation11 + $0x920] sm:$0xff]  ;;  %v5415_v36 = vld [vmem:[#allocation11 + $0xd48] sm:$0xff]  ;;  %v14824_v38 = vcombine.low %v5406_v26, %v5409_v27 }
 0x474   :  { %7998 = vmatprep.subr.bf16.mxu1 %v14759_v44  ;;  %v5384_v44 = vld [vmem:[#allocation11 + $0x980] sm:$0xff] }
 0x475   :  { %v14798_v59 = vcombine.low %v5381_v43, %v5384_v44 }
 0x476   :  { %7827 = vmatpush1.bf16.msra.mxu0 %v14756_v51  ;;  %v14799_v51 = vcombine.high %v5381_v43, %v5384_v44  ;;  %v5418_v43 = vld [vmem:[#allocation11 + $0xda8] sm:$0xff] }
 0x477   :  { %7999 = vmatpush1.bf16.msra.mxu1 %v14758_v52  ;;  %7828 = vmatprep.subr.bf16.mxu0 %v14763_v53  ;;  %v14801_v52 = vcombine.high %v5382_v47, %v5385_v49  ;;  %v5387_v53 = vld [vmem:[#allocation11 + $0x9e0] sm:$0xff]  ;;  %v5421_v44 = vld [vmem:[#allocation11 + $0xe08] sm:$0xff]  ;;  %v14830_v49 = vcombine.low %v5412_v54, %v5415_v36 }
 0x478   :  { %8000 = vmatprep.subr.bf16.mxu1 %v14765_v55  ;;  %v5390_v55 = vld [vmem:[#allocation11 + $0xa40] sm:$0xff] }
 0x479   :  { %v14804_v10 = vcombine.low %v5387_v53, %v5390_v55 }
 0x47a   :  { %7829 = vmatpush1.bf16.msra.mxu0 %v14762_v61  ;;  %v14805_v61 = vcombine.high %v5387_v53, %v5390_v55  ;;  %v5424_v53 = vld [vmem:[#allocation11 + $0xe68] sm:$0xff] }
 0x47b   :  { %8001 = vmatpush1.bf16.msra.mxu1 %v14764_v63  ;;  %7830 = vmatprep.subr.bf16.mxu0 %v14769_v3  ;;  %v14807_v63 = vcombine.high %v5388_v56, %v5391_v58  ;;  %v5393_v3 = vld [vmem:[#allocation11 + $0xaa0] sm:$0xff]  ;;  %v5427_v55 = vld [vmem:[#allocation11 + $0xec8] sm:$0xff]  ;;  %v14836_v58 = vcombine.low %v5418_v43, %v5421_v44 }
 0x47c   :  { %8002 = vmatprep.subr.bf16.mxu1 %v14771_v4  ;;  %v5396_v4 = vld [vmem:[#allocation11 + $0xb00] sm:$0xff] }
 0x47d   :  { %v14810_v17 = vcombine.low %v5393_v3, %v5396_v4 }
 0x47e   :  { %7831 = vmatpush1.bf16.msra.mxu0 %v14768_v12  ;;  %v14811_v12 = vcombine.high %v5393_v3, %v5396_v4  ;;  %v5430_v3 = vld [vmem:[#allocation11 + $0xf28] sm:$0xff] }
 0x47f   :  { %8003 = vmatpush1.bf16.msra.mxu1 %v14770_v13  ;;  %7832 = vmatprep.subr.bf16.mxu0 %v14775_v14  ;;  %v14813_v13 = vcombine.high %v5394_v5, %v5397_v8  ;;  %v5399_v14 = vld [vmem:[#allocation11 + $0xb60] sm:$0xff]  ;;  %v5433_v4 = vld [vmem:[#allocation11 + $0xf88] sm:$0xff]  ;;  %v14842_v8 = vcombine.low %v5424_v53, %v5427_v55 }
 0x480   :  { %8004 = vmatprep.subr.bf16.mxu1 %v14777_v19  ;;  %v5402_v19 = vld [vmem:[#allocation11 + $0xbc0] sm:$0xff] }
 0x481   :  { %v14816_v57 = vcombine.low %v5399_v14, %v5402_v19 }
 0x482   :  { %7833 = vmatpush1.bf16.msra.mxu0 %v14774_v9  ;;  %v14817_v9 = vcombine.high %v5399_v14, %v5402_v19  ;;  %v5436_v14 = vld [vmem:[#allocation11 + $0xfe8] sm:$0xff] }
 0x483   :  { %8005 = vmatpush1.bf16.msra.mxu1 %v14776_v23  ;;  %7834 = vmatprep.subr.bf16.mxu0 %v14781_v24  ;;  %v14819_v23 = vcombine.high %v5400_v20, %v5403_v16  ;;  %v5405_v24 = vld [vmem:[#allocation11 + $0xc20] sm:$0xff]  ;;  %v5439_v19 = vld [vmem:[#allocation11 + $0x1048] sm:$0xff]  ;;  %v14848_v16 = vcombine.low %v5430_v3, %v5433_v4 }
 0x484   :  { %8006 = vmatprep.subr.bf16.mxu1 %v14783_v25  ;;  %v5408_v25 = vld [vmem:[#allocation11 + $0xc80] sm:$0xff] }
 0x485   :  { %v14822_v33 = vcombine.low %v5405_v24, %v5408_v25 }
 0x486   :  { %7835 = vmatpush1.bf16.msra.mxu0 %v14780_v29  ;;  %v14823_v29 = vcombine.high %v5405_v24, %v5408_v25  ;;  %v5442_v24 = vld [vmem:[#allocation11 + $0x10a8] sm:$0xff] }
 0x487   :  { %8007 = vmatpush1.bf16.msra.mxu1 %v14782_v31  ;;  %7836 = vmatprep.subr.bf16.mxu0 %v14787_v32  ;;  %v14825_v31 = vcombine.high %v5406_v26, %v5409_v27  ;;  %v5411_v32 = vld [vmem:[#allocation11 + $0xce0] sm:$0xff]  ;;  %v5445_v25 = vld [vmem:[#allocation11 + $0x1108] sm:$0xff]  ;;  %v14854_v27 = vcombine.low %v5436_v14, %v5439_v19 }
 0x488   :  { %8008 = vmatprep.subr.bf16.mxu1 %v14789_v45  ;;  %v5414_v45 = vld [vmem:[#allocation11 + $0xd40] sm:$0xff] }
 0x489   :  { %v14828_v47 = vcombine.low %v5411_v32, %v5414_v45 }
 0x48a   :  { %7837 = vmatpush1.bf16.msra.mxu0 %v14786_v39  ;;  %v14829_v39 = vcombine.high %v5411_v32, %v5414_v45  ;;  %v5448_v32 = vld [vmem:[#allocation11 + $0x1168] sm:$0xff] }
 0x48b   :  { %8009 = vmatpush1.bf16.msra.mxu1 %v14788_v40  ;;  %7838 = vmatprep.subr.bf16.mxu0 %v14793_v41  ;;  %v5417_v40 = vld [vmem:[#allocation11 + $0xda0] sm:$0xff]  ;;  %v5451_v45 = vld [vmem:[#allocation11 + $0x11c8] sm:$0xff] }
 0x48c   :  { %8010 = vmatprep.subr.bf16.mxu1 %v14795_v42  ;;  %v5420_v41 = vld [vmem:[#allocation11 + $0xe00] sm:$0xff]  ;;  %v14831_v42 = vcombine.high %v5412_v54, %v5415_v36  ;;  %v14860_v54 = vcombine.low %v5442_v24, %v5445_v25 }
 0x48d   :  { %v14834_v56 = vcombine.low %v5417_v40, %v5420_v41 }
 0x48e   :  { %7839 = vmatpush1.bf16.msra.mxu0 %v14792_v22  ;;  %v14835_v22 = vcombine.high %v5417_v40, %v5420_v41  ;;  %v5456_v40 = vld [vmem:[#allocation11 + $0x1280] sm:$0xff]  ;;  %v5454_v41 = vld [vmem:[#allocation11 + $0x1228] sm:$0xff] }
 0x48f   :  { %8011 = vmatpush1.bf16.msra.mxu1 %v14794_v50  ;;  %7840 = vmatprep.subr.bf16.mxu0 %v14799_v51  ;;  %v14837_v50 = vcombine.high %v5418_v43, %v5421_v44  ;;  %v5423_v51 = vld [vmem:[#allocation11 + $0xe60] sm:$0xff]  ;;  %v14866_v44 = vcombine.low %v5448_v32, %v5451_v45 }
 0x490   :  { %8012 = vmatprep.subr.bf16.mxu1 %v14801_v52  ;;  %v5426_v52 = vld [vmem:[#allocation11 + $0xec0] sm:$0xff] }
 0x491   :  { %v14840_v5 = vcombine.low %v5423_v51, %v5426_v52 }
 0x492   :  { %7841 = vmatpush1.bf16.msra.mxu0 %v14798_v59  ;;  %v14841_v59 = vcombine.high %v5423_v51, %v5426_v52  ;;  %v5460_v51 = vld [vmem:[#allocation11 + $0x12e8] sm:$0xff] }
 0x493   :  { %8013 = vmatpush1.bf16.msra.mxu1 %v14800_v60  ;;  %7842 = vmatprep.subr.bf16.mxu0 %v14805_v61  ;;  %v14843_v60 = vcombine.high %v5424_v53, %v5427_v55  ;;  %v5429_v61 = vld [vmem:[#allocation11 + $0xf20] sm:$0xff]  ;;  %v5463_v52 = vld [vmem:[#allocation11 + $0x1348] sm:$0xff] }
 0x494   :  { %8014 = vmatprep.subr.bf16.mxu1 %v14807_v63  ;;  %v5432_v63 = vld [vmem:[#allocation11 + $0xf80] sm:$0xff] }
 0x495   :  { %v14846_v20 = vcombine.low %v5429_v61, %v5432_v63 }
 0x496   :  { %7843 = vmatpush1.bf16.msra.mxu0 %v14804_v10  ;;  %v14847_v10 = vcombine.high %v5429_v61, %v5432_v63  ;;  %v5466_v61 = vld [vmem:[#allocation11 + $0x13a8] sm:$0xff] }
 0x497   :  { %8015 = vmatpush1.bf16.msra.mxu1 %v14806_v11  ;;  %7844 = vmatprep.subr.bf16.mxu0 %v14811_v12  ;;  %v14849_v11 = vcombine.high %v5430_v3, %v5433_v4  ;;  %v5435_v12 = vld [vmem:[#allocation11 + $0xfe0] sm:$0xff]  ;;  %v5469_v63 = vld [vmem:[#allocation11 + $0x1408] sm:$0xff]  ;;  %v14878_v4 = vcombine.low %v5460_v51, %v5463_v52 }
 0x498   :  { %8016 = vmatprep.subr.bf16.mxu1 %v14813_v13  ;;  %v5438_v13 = vld [vmem:[#allocation11 + $0x1040] sm:$0xff] }
 0x499   :  { %v14852_v26 = vcombine.low %v5435_v12, %v5438_v13 }
 0x49a   :  { %7845 = vmatpush1.bf16.msra.mxu0 %v14810_v17  ;;  %v14853_v17 = vcombine.high %v5435_v12, %v5438_v13  ;;  %v5472_v12 = vld [vmem:[#allocation11 + $0x1468] sm:$0xff] }
 0x49b   :  { %8017 = vmatpush1.bf16.msra.mxu1 %v14812_v18  ;;  %7846 = vmatprep.subr.bf16.mxu0 %v14817_v9  ;;  %v14855_v18 = vcombine.high %v5436_v14, %v5439_v19  ;;  %v5441_v9 = vld [vmem:[#allocation11 + $0x10a0] sm:$0xff]  ;;  %v5475_v13 = vld [vmem:[#allocation11 + $0x14c8] sm:$0xff]  ;;  %v14884_v19 = vcombine.low %v5466_v61, %v5469_v63 }
 0x49c   :  { %8018 = vmatprep.subr.bf16.mxu1 %v14819_v23  ;;  %v5444_v23 = vld [vmem:[#allocation11 + $0x1100] sm:$0xff] }
 0x49e   :  { %7847 = vmatpush1.bf16.msra.mxu0 %v14816_v57  ;;  %v14859_v57 = vcombine.high %v5441_v9, %v5444_v23 }
 0x49f   :  { %8019 = vmatpush1.bf16.msra.mxu1 %v14818_v28  ;;  %7859 = vmatprep.subr.bf16.mxu0 %v14823_v29  ;;  %v14861_v28 = vcombine.high %v5442_v24, %v5445_v25  ;;  %v5447_v29 = vld [vmem:[#allocation11 + $0x1160] sm:$0xff]  ;;  %v14890_v25 = vcombine.low %v5472_v12, %v5475_v13 }
 0x4a0   :  { %8031 = vmatprep.subr.bf16.mxu1 %v14825_v31  ;;  %v5450_v31 = vld [vmem:[#allocation11 + $0x11c0] sm:$0xff] }
 0x4a1   :  { %7849 = vmatmul.mubr.bf16.vlgmr.msra.gmra.mrb[20].mxu0 %v16700_v1  ;;  %v14865_v36 = vcombine.high %v5447_v29, %v5450_v31  ;;  %v14864_v43 = vcombine.low %v5447_v29, %v5450_v31  ;;  %v5484_v29 = vld [vmem:[#allocation11 + $0x15e8] sm:$0xff] }
 0x4a2   :  { %8021 = vmatmul.mubr.bf16.vlgmr.msra.gmra.mrb[20].mxu1 %v16700_v1  ;;  %7860 = vmatpush1.bf16.msra.mxu0 %v14822_v33  ;;  %v14858_v33 = vcombine.low %v5441_v9, %v5444_v23  ;;  %v5478_v9 = vld [vmem:[#allocation11 + $0x1528] sm:$0xff] }
 0x4a3   :  { %7891 = vmatprep.mubr.bf16.mxu0 %v16706_v7  ;;  %8032 = vmatpush1.bf16.msra.mxu1 %v14824_v38  ;;  %v14867_v38 = vcombine.high %v5448_v32, %v5451_v45  ;;  %v5481_v23 = vld [vmem:[#allocation11 + $0x1588] sm:$0xff] }
 0x4a4   :  { %8063 = vmatprep.mubr.bf16.mxu1 %v16706_v7  ;;  %7861 = vmatprep.subr.bf16.mxu0 %v14829_v39  ;;  %v5453_v39 = vld [vmem:[#allocation11 + $0x1220] sm:$0xff]  ;;  %v5487_v31 = vld [vmem:[#allocation11 + $0x1648] sm:$0xff]  ;;  %v14896_v45 = vcombine.low %v5478_v9, %v5481_v23 }
 0x4a5   :  { %8033 = vmatprep.subr.bf16.mxu1 %v14831_v42  ;;  %v5457_v42 = vld [vmem:[#allocation11 + $0x1288] sm:$0xff]  ;;  %v14870_v53 = vcombine.low %v5453_v39, %v5456_v40 }
 0x4a6   :  { %7862 = vmatpush1.bf16.msra.mxu0 %v14828_v47  ;;  %v14871_v47 = vcombine.high %v5453_v39, %v5456_v40  ;;  %v14872_v55 = vcombine.low %v5454_v41, %v5457_v42  ;;  %v5490_v39 = vld [vmem:[#allocation11 + $0x16a8] sm:$0xff] }
 0x4a7   :  { %8034 = vmatpush1.bf16.msra.mxu1 %v14830_v49  ;;  %7863 = vmatprep.subr.bf16.mxu0 %v14835_v22  ;;  %v14873_v49 = vcombine.high %v5454_v41, %v5457_v42  ;;  %v5459_v22 = vld [vmem:[#allocation11 + $0x12e0] sm:$0xff]  ;;  %v5493_v40 = vld [vmem:[#allocation11 + $0x1708] sm:$0xff]  ;;  %v14902_v42 = vcombine.low %v5484_v29, %v5487_v31 }
 0x4a8   :  { %8035 = vmatprep.subr.bf16.mxu1 %v14837_v50  ;;  %v5462_v50 = vld [vmem:[#allocation11 + $0x1340] sm:$0xff] }
 0x4a9   :  { %v14876_v3 = vcombine.low %v5459_v22, %v5462_v50 }
 0x4aa   :  { %7864 = vmatpush1.bf16.msra.mxu0 %v14834_v56  ;;  %v14877_v56 = vcombine.high %v5459_v22, %v5462_v50  ;;  %v5496_v22 = vld [vmem:[#allocation11 + $0x1768] sm:$0xff] }
 0x4ab   :  { %8036 = vmatpush1.bf16.msra.mxu1 %v14836_v58  ;;  %7865 = vmatprep.subr.bf16.mxu0 %v14841_v59  ;;  %v14879_v58 = vcombine.high %v5460_v51, %v5463_v52  ;;  %v5465_v59 = vld [vmem:[#allocation11 + $0x13a0] sm:$0xff]  ;;  %v5499_v50 = vld [vmem:[#allocation11 + $0x17c8] sm:$0xff]  ;;  %v14908_v52 = vcombine.low %v5490_v39, %v5493_v40 }
 0x4ac   :  { %8037 = vmatprep.subr.bf16.mxu1 %v14843_v60  ;;  %v5468_v60 = vld [vmem:[#allocation11 + $0x1400] sm:$0xff] }
 0x4ad   :  { %v14882_v14 = vcombine.low %v5465_v59, %v5468_v60 }
 0x4ae   :  { %7866 = vmatpush1.bf16.msra.mxu0 %v14840_v5  ;;  %v14883_v5 = vcombine.high %v5465_v59, %v5468_v60  ;;  %v5502_v59 = vld [vmem:[#allocation11 + $0x1828] sm:$0xff] }
 0x4af   :  { %8038 = vmatpush1.bf16.msra.mxu1 %v14842_v8  ;;  %7867 = vmatprep.subr.bf16.mxu0 %v14847_v10  ;;  %v14885_v8 = vcombine.high %v5466_v61, %v5469_v63  ;;  %v5471_v10 = vld [vmem:[#allocation11 + $0x1460] sm:$0xff]  ;;  %v5505_v60 = vld [vmem:[#allocation11 + $0x1888] sm:$0xff]  ;;  %v14914_v63 = vcombine.low %v5496_v22, %v5499_v50 }
 0x4b0   :  { %8039 = vmatprep.subr.bf16.mxu1 %v14849_v11  ;;  %v5474_v11 = vld [vmem:[#allocation11 + $0x14c0] sm:$0xff] }
 0x4b1   :  { %v14888_v24 = vcombine.low %v5471_v10, %v5474_v11 }
 0x4b2   :  { %7868 = vmatpush1.bf16.msra.mxu0 %v14846_v20  ;;  %v14889_v20 = vcombine.high %v5471_v10, %v5474_v11  ;;  %v5508_v11 = vld [vmem:[#allocation11 + $0x18e8] sm:$0xff] }
 0x4b3   :  { %8040 = vmatpush1.bf16.msra.mxu1 %v14848_v16  ;;  %7869 = vmatprep.subr.bf16.mxu0 %v14853_v17  ;;  %v14891_v16 = vcombine.high %v5472_v12, %v5475_v13  ;;  %v5477_v17 = vld [vmem:[#allocation11 + $0x1520] sm:$0xff]  ;;  %v5511_v12 = vld [vmem:[#allocation11 + $0x1948] sm:$0xff]  ;;  %v14920_v13 = vcombine.low %v5502_v59, %v5505_v60 }
 0x4b4   :  { %8041 = vmatprep.subr.bf16.mxu1 %v14855_v18  ;;  %v5480_v18 = vld [vmem:[#allocation11 + $0x1580] sm:$0xff] }
 0x4b5   :  { %v14894_v32 = vcombine.low %v5477_v17, %v5480_v18 }
 0x4b6   :  { %7870 = vmatpush1.bf16.msra.mxu0 %v14852_v26  ;;  %v14895_v26 = vcombine.high %v5477_v17, %v5480_v18  ;;  %v5514_v17 = vld [vmem:[#allocation11 + $0x19a8] sm:$0xff] }
 0x4b7   :  { %8042 = vmatpush1.bf16.msra.mxu1 %v14854_v27  ;;  %7871 = vmatprep.subr.bf16.mxu0 %v14859_v57  ;;  %v14897_v27 = vcombine.high %v5478_v9, %v5481_v23  ;;  %v5483_v57 = vld [vmem:[#allocation11 + $0x15e0] sm:$0xff]  ;;  %v5517_v18 = vld [vmem:[#allocation11 + $0x1a08] sm:$0xff]  ;;  %v14926_v23 = vcombine.low %v5508_v11, %v5511_v12 }
 0x4b8   :  { %8043 = vmatprep.subr.bf16.mxu1 %v14861_v28  ;;  %v5486_v28 = vld [vmem:[#allocation11 + $0x1640] sm:$0xff] }
 0x4b9   :  { %v14900_v41 = vcombine.low %v5483_v57, %v5486_v28 }
 0x4ba   :  { %7872 = vmatpush1.bf16.msra.mxu0 %v14858_v33  ;;  %v14901_v33 = vcombine.high %v5483_v57, %v5486_v28  ;;  %v5520_v57 = vld [vmem:[#allocation11 + $0x1a68] sm:$0xff] }
 0x4bb   :  { %8044 = vmatpush1.bf16.msra.mxu1 %v14860_v54  ;;  %7873 = vmatprep.subr.bf16.mxu0 %v14865_v36  ;;  %v14903_v54 = vcombine.high %v5484_v29, %v5487_v31  ;;  %v5489_v36 = vld [vmem:[#allocation11 + $0x16a0] sm:$0xff]  ;;  %v5523_v28 = vld [vmem:[#allocation11 + $0x1ac8] sm:$0xff]  ;;  %v14932_v31 = vcombine.low %v5514_v17, %v5517_v18 }
 0x4bc   :  { %8045 = vmatprep.subr.bf16.mxu1 %v14867_v38  ;;  %v5492_v38 = vld [vmem:[#allocation11 + $0x1700] sm:$0xff] }
 0x4bd   :  { %v14906_v51 = vcombine.low %v5489_v36, %v5492_v38 }
 0x4be   :  { %7874 = vmatpush1.bf16.msra.mxu0 %v14864_v43  ;;  %v14907_v43 = vcombine.high %v5489_v36, %v5492_v38  ;;  %v5526_v36 = vld [vmem:[#allocation11 + $0x1b28] sm:$0xff] }
 0x4bf   :  { %8046 = vmatpush1.bf16.msra.mxu1 %v14866_v44  ;;  %7875 = vmatprep.subr.bf16.mxu0 %v14871_v47  ;;  %v14909_v44 = vcombine.high %v5490_v39, %v5493_v40  ;;  %v5495_v47 = vld [vmem:[#allocation11 + $0x1760] sm:$0xff]  ;;  %v5529_v38 = vld [vmem:[#allocation11 + $0x1b88] sm:$0xff]  ;;  %v14938_v40 = vcombine.low %v5520_v57, %v5523_v28 }
 0x4c0   :  { %8047 = vmatprep.subr.bf16.mxu1 %v14873_v49  ;;  %v5498_v49 = vld [vmem:[#allocation11 + $0x17c0] sm:$0xff] }
 0x4c1   :  { %v14912_v61 = vcombine.low %v5495_v47, %v5498_v49 }
 0x4c2   :  { %7876 = vmatpush1.bf16.msra.mxu0 %v14870_v53  ;;  %v14913_v53 = vcombine.high %v5495_v47, %v5498_v49  ;;  %v5532_v47 = vld [vmem:[#allocation11 + $0x1be8] sm:$0xff] }
 0x4c3   :  { %8048 = vmatpush1.bf16.msra.mxu1 %v14872_v55  ;;  %7877 = vmatprep.subr.bf16.mxu0 %v14877_v56  ;;  %v14915_v55 = vcombine.high %v5496_v22, %v5499_v50  ;;  %v5501_v56 = vld [vmem:[#allocation11 + $0x1820] sm:$0xff]  ;;  %v5535_v49 = vld [vmem:[#allocation11 + $0x1c48] sm:$0xff]  ;;  %v14944_v50 = vcombine.low %v5526_v36, %v5529_v38 }
 0x4c4   :  { %8049 = vmatprep.subr.bf16.mxu1 %v14879_v58  ;;  %v5504_v58 = vld [vmem:[#allocation11 + $0x1880] sm:$0xff] }
 0x4c5   :  { %v14918_v10 = vcombine.low %v5501_v56, %v5504_v58 }
 0x4c6   :  { %7878 = vmatpush1.bf16.msra.mxu0 %v14876_v3  ;;  %v14919_v3 = vcombine.high %v5501_v56, %v5504_v58  ;;  %v5538_v56 = vld [vmem:[#allocation11 + $0x1ca8] sm:$0xff] }
 0x4c7   :  { %8050 = vmatpush1.bf16.msra.mxu1 %v14878_v4  ;;  %7879 = vmatprep.subr.bf16.mxu0 %v14883_v5  ;;  %v14921_v4 = vcombine.high %v5502_v59, %v5505_v60  ;;  %v5507_v5 = vld [vmem:[#allocation11 + $0x18e0] sm:$0xff]  ;;  %v5541_v58 = vld [vmem:[#allocation11 + $0x1d08] sm:$0xff]  ;;  %v14950_v60 = vcombine.low %v5532_v47, %v5535_v49 }
 0x4c8   :  { %8051 = vmatprep.subr.bf16.mxu1 %v14885_v8  ;;  %v5510_v8 = vld [vmem:[#allocation11 + $0x1940] sm:$0xff] }
 0x4c9   :  { %v14924_v9 = vcombine.low %v5507_v5, %v5510_v8 }
 0x4ca   :  { %7880 = vmatpush1.bf16.msra.mxu0 %v14882_v14  ;;  %v14925_v14 = vcombine.high %v5507_v5, %v5510_v8  ;;  %v5544_v5 = vld [vmem:[#allocation11 + $0x1d68] sm:$0xff] }
 0x4cb   :  { %8052 = vmatpush1.bf16.msra.mxu1 %v14884_v19  ;;  %7881 = vmatprep.subr.bf16.mxu0 %v14889_v20  ;;  %v5513_v19 = vld [vmem:[#allocation11 + $0x19a0] sm:$0xff]  ;;  %v5547_v8 = vld [vmem:[#allocation11 + $0x1dc8] sm:$0xff] }
 0x4cc   :  { %8053 = vmatprep.subr.bf16.mxu1 %v14891_v16  ;;  %v5516_v20 = vld [vmem:[#allocation11 + $0x1a00] sm:$0xff]  ;;  %v14927_v16 = vcombine.high %v5508_v11, %v5511_v12  ;;  %v14956_v11 = vcombine.low %v5538_v56, %v5541_v58 }
 0x4cd   :  { %v14930_v29 = vcombine.low %v5513_v19, %v5516_v20 }
 0x4ce   :  { %7882 = vmatpush1.bf16.msra.mxu0 %v14888_v24  ;;  %v14931_v24 = vcombine.high %v5513_v19, %v5516_v20  ;;  %v5552_v19 = vld [vmem:[#allocation11 + $0x1e80] sm:$0xff]  ;;  %v5550_v20 = vld [vmem:[#allocation11 + $0x1e28] sm:$0xff] }
 0x4cf   :  { %8054 = vmatpush1.bf16.msra.mxu1 %v14890_v25  ;;  %7883 = vmatprep.subr.bf16.mxu0 %v14895_v26  ;;  %v14933_v25 = vcombine.high %v5514_v17, %v5517_v18  ;;  %v5519_v26 = vld [vmem:[#allocation11 + $0x1a60] sm:$0xff]  ;;  %v14962_v18 = vcombine.low %v5544_v5, %v5547_v8 }
 0x4d0   :  { %8055 = vmatprep.subr.bf16.mxu1 %v14897_v27  ;;  %v5522_v27 = vld [vmem:[#allocation11 + $0x1ac0] sm:$0xff] }
 0x4d1   :  { %v14936_v39 = vcombine.low %v5519_v26, %v5522_v27 }
 0x4d2   :  { %7884 = vmatpush1.bf16.msra.mxu0 %v14894_v32  ;;  %v14937_v32 = vcombine.high %v5519_v26, %v5522_v27  ;;  %v5556_v26 = vld [vmem:[#allocation11 + $0x1ee8] sm:$0xff] }
 0x4d3   :  { %8056 = vmatpush1.bf16.msra.mxu1 %v14896_v45  ;;  %7885 = vmatprep.subr.bf16.mxu0 %v14901_v33  ;;  %v14939_v45 = vcombine.high %v5520_v57, %v5523_v28  ;;  %v5525_v33 = vld [vmem:[#allocation11 + $0x1b20] sm:$0xff]  ;;  %v5559_v27 = vld [vmem:[#allocation11 + $0x1f48] sm:$0xff] }
 0x4d4   :  { %8057 = vmatprep.subr.bf16.mxu1 %v14903_v54  ;;  %v5528_v54 = vld [vmem:[#allocation11 + $0x1b80] sm:$0xff] }
 0x4d5   :  { %v14942_v22 = vcombine.low %v5525_v33, %v5528_v54 }
 0x4d6   :  { %7886 = vmatpush1.bf16.msra.mxu0 %v14900_v41  ;;  %v14943_v41 = vcombine.high %v5525_v33, %v5528_v54  ;;  %v5562_v33 = vld [vmem:[#allocation11 + $0x1fa8] sm:$0xff] }
 0x4d7   :  { %8058 = vmatpush1.bf16.msra.mxu1 %v14902_v42  ;;  %7887 = vmatprep.subr.bf16.mxu0 %v14907_v43  ;;  %v14945_v42 = vcombine.high %v5526_v36, %v5529_v38  ;;  %v5531_v43 = vld [vmem:[#allocation11 + $0x1be0] sm:$0xff]  ;;  %v5565_v54 = vld [vmem:[#allocation11 + $0x2008] sm:$0xff]  ;;  %v14974_v38 = vcombine.low %v5556_v26, %v5559_v27 }
 0x4d8   :  { %8059 = vmatprep.subr.bf16.mxu1 %v14909_v44  ;;  %v5534_v44 = vld [vmem:[#allocation11 + $0x1c40] sm:$0xff] }
 0x4d9   :  { %v14948_v59 = vcombine.low %v5531_v43, %v5534_v44 }
 0x4da   :  { %7888 = vmatpush1.bf16.msra.mxu0 %v14906_v51  ;;  %v14949_v51 = vcombine.high %v5531_v43, %v5534_v44  ;;  %v5568_v43 = vld [vmem:[#allocation11 + $0x2068] sm:$0xff] }
 0x4db   :  { %8060 = vmatpush1.bf16.msra.mxu1 %v14908_v52  ;;  %7889 = vmatprep.subr.bf16.mxu0 %v14913_v53  ;;  %v14951_v52 = vcombine.high %v5532_v47, %v5535_v49  ;;  %v5537_v53 = vld [vmem:[#allocation11 + $0x1ca0] sm:$0xff]  ;;  %v5571_v44 = vld [vmem:[#allocation11 + $0x20c8] sm:$0xff]  ;;  %v14980_v49 = vcombine.low %v5562_v33, %v5565_v54 }
 0x4dc   :  { %8061 = vmatprep.subr.bf16.mxu1 %v14915_v55  ;;  %v5540_v55 = vld [vmem:[#allocation11 + $0x1d00] sm:$0xff] }
 0x4de   :  { %7890 = vmatpush1.bf16.msra.mxu0 %v14912_v61  ;;  %v14955_v61 = vcombine.high %v5537_v53, %v5540_v55 }
 0x4df   :  { %8062 = vmatpush1.bf16.msra.mxu1 %v14914_v63  ;;  %7902 = vmatprep.subr.bf16.mxu0 %v14919_v3  ;;  %v14957_v63 = vcombine.high %v5538_v56, %v5541_v58  ;;  %v5543_v3 = vld [vmem:[#allocation11 + $0x1d60] sm:$0xff]  ;;  %v14986_v58 = vcombine.low %v5568_v43, %v5571_v44 }
 0x4e0   :  { %8074 = vmatprep.subr.bf16.mxu1 %v14921_v4  ;;  %v5546_v4 = vld [vmem:[#allocation11 + $0x1dc0] sm:$0xff] }
 0x4e1   :  { %7892 = vmatmul.mubr.bf16.vlgmr.msra.gmra.mrb[20].mxu0 %v16702_v2  ;;  %v14961_v12 = vcombine.high %v5543_v3, %v5546_v4  ;;  %v14960_v17 = vcombine.low %v5543_v3, %v5546_v4  ;;  %v5580_v3 = vld [vmem:[#allocation11 + $0x21e8] sm:$0xff] }
 0x4e2   :  { %8064 = vmatmul.mubr.bf16.vlgmr.msra.gmra.mrb[20].mxu1 %v16702_v2  ;;  %7903 = vmatpush1.bf16.msra.mxu0 %v14918_v10  ;;  %v14954_v10 = vcombine.low %v5537_v53, %v5540_v55  ;;  %v5574_v53 = vld [vmem:[#allocation11 + $0x2128] sm:$0xff] }
 0x4e3   :  { %7934 = vmatprep.mubr.bf16.mxu0 %v16750_v35  ;;  %8075 = vmatpush1.bf16.msra.mxu1 %v14920_v13  ;;  %v14963_v13 = vcombine.high %v5544_v5, %v5547_v8  ;;  %v5577_v55 = vld [vmem:[#allocation11 + $0x2188] sm:$0xff] }
 0x4e4   :  { %8106 = vmatprep.mubr.bf16.mxu1 %v16750_v35  ;;  %7904 = vmatprep.subr.bf16.mxu0 %v14925_v14  ;;  %v5549_v14 = vld [vmem:[#allocation11 + $0x1e20] sm:$0xff]  ;;  %v5583_v4 = vld [vmem:[#allocation11 + $0x2248] sm:$0xff]  ;;  %v14992_v8 = vcombine.low %v5574_v53, %v5577_v55 }
 0x4e5   :  { %8076 = vmatprep.subr.bf16.mxu1 %v14927_v16  ;;  %v5553_v16 = vld [vmem:[#allocation11 + $0x1e88] sm:$0xff]  ;;  %v14966_v57 = vcombine.low %v5549_v14, %v5552_v19 }
 0x4e6   :  { %7905 = vmatpush1.bf16.msra.mxu0 %v14924_v9  ;;  %v14967_v9 = vcombine.high %v5549_v14, %v5552_v19  ;;  %v14968_v28 = vcombine.low %v5550_v20, %v5553_v16  ;;  %v5586_v14 = vld [vmem:[#allocation11 + $0x22a8] sm:$0xff] }
 0x4e7   :  { %8077 = vmatpush1.bf16.msra.mxu1 %v14926_v23  ;;  %7906 = vmatprep.subr.bf16.mxu0 %v14931_v24  ;;  %v14969_v23 = vcombine.high %v5550_v20, %v5553_v16  ;;  %v5555_v24 = vld [vmem:[#allocation11 + $0x1ee0] sm:$0xff]  ;;  %v5589_v19 = vld [vmem:[#allocation11 + $0x2308] sm:$0xff]  ;;  %v14998_v16 = vcombine.low %v5580_v3, %v5583_v4 }
 0x4e8   :  { %8078 = vmatprep.subr.bf16.mxu1 %v14933_v25  ;;  %v5558_v25 = vld [vmem:[#allocation11 + $0x1f40] sm:$0xff] }
 0x4e9   :  { %v14972_v36 = vcombine.low %v5555_v24, %v5558_v25 }
 0x4ea   :  { %7907 = vmatpush1.bf16.msra.mxu0 %v14930_v29  ;;  %v14973_v29 = vcombine.high %v5555_v24, %v5558_v25  ;;  %v5592_v24 = vld [vmem:[#allocation11 + $0x2368] sm:$0xff] }
 0x4eb   :  { %8079 = vmatpush1.bf16.msra.mxu1 %v14932_v31  ;;  %7908 = vmatprep.subr.bf16.mxu0 %v14937_v32  ;;  %v14975_v31 = vcombine.high %v5556_v26, %v5559_v27  ;;  %v5561_v32 = vld [vmem:[#allocation11 + $0x1fa0] sm:$0xff]  ;;  %v5595_v25 = vld [vmem:[#allocation11 + $0x23c8] sm:$0xff]  ;;  %v15004_v27 = vcombine.low %v5586_v14, %v5589_v19 }
 0x4ec   :  { %8080 = vmatprep.subr.bf16.mxu1 %v14939_v45  ;;  %v5564_v45 = vld [vmem:[#allocation11 + $0x2000] sm:$0xff] }
 0x4ed   :  { %v14978_v47 = vcombine.low %v5561_v32, %v5564_v45 }
 0x4ee   :  { %7909 = vmatpush1.bf16.msra.mxu0 %v14936_v39  ;;  %v14979_v39 = vcombine.high %v5561_v32, %v5564_v45  ;;  %v5598_v32 = vld [vmem:[#allocation11 + $0x2428] sm:$0xff] }
 0x4ef   :  { %8081 = vmatpush1.bf16.msra.mxu1 %v14938_v40  ;;  %7910 = vmatprep.subr.bf16.mxu0 %v14943_v41  ;;  %v14981_v40 = vcombine.high %v5562_v33, %v5565_v54  ;;  %v5567_v41 = vld [vmem:[#allocation11 + $0x2060] sm:$0xff]  ;;  %v5601_v45 = vld [vmem:[#allocation11 + $0x2488] sm:$0xff]  ;;  %v15010_v54 = vcombine.low %v5592_v24, %v5595_v25 }
 0x4f0   :  { %8082 = vmatprep.subr.bf16.mxu1 %v14945_v42  ;;  %v5570_v42 = vld [vmem:[#allocation11 + $0x20c0] sm:$0xff] }
 0x4f1   :  { %v14984_v56 = vcombine.low %v5567_v41, %v5570_v42 }
 0x4f2   :  { %7911 = vmatpush1.bf16.msra.mxu0 %v14942_v22  ;;  %v14985_v22 = vcombine.high %v5567_v41, %v5570_v42  ;;  %v5604_v42 = vld [vmem:[#allocation11 + $0x24e8] sm:$0xff] }
 0x4f3   :  { %8083 = vmatpush1.bf16.msra.mxu1 %v14944_v50  ;;  %7912 = vmatprep.subr.bf16.mxu0 %v14949_v51  ;;  %v14987_v50 = vcombine.high %v5568_v43, %v5571_v44  ;;  %v5573_v51 = vld [vmem:[#allocation11 + $0x2120] sm:$0xff]  ;;  %v5607_v43 = vld [vmem:[#allocation11 + $0x2548] sm:$0xff]  ;;  %v15016_v44 = vcombine.low %v5598_v32, %v5601_v45 }
 0x4f4   :  { %8084 = vmatprep.subr.bf16.mxu1 %v14951_v52  ;;  %v5576_v52 = vld [vmem:[#allocation11 + $0x2180] sm:$0xff] }
 0x4f5   :  { %v14990_v5 = vcombine.low %v5573_v51, %v5576_v52 }
 0x4f6   :  { %7913 = vmatpush1.bf16.msra.mxu0 %v14948_v59  ;;  %v14991_v59 = vcombine.high %v5573_v51, %v5576_v52  ;;  %v5610_v51 = vld [vmem:[#allocation11 + $0x25a8] sm:$0xff] }
 0x4f7   :  { %8085 = vmatpush1.bf16.msra.mxu1 %v14950_v60  ;;  %7914 = vmatprep.subr.bf16.mxu0 %v14955_v61  ;;  %v14993_v60 = vcombine.high %v5574_v53, %v5577_v55  ;;  %v5579_v61 = vld [vmem:[#allocation11 + $0x21e0] sm:$0xff]  ;;  %v5613_v52 = vld [vmem:[#allocation11 + $0x2608] sm:$0xff]  ;;  %v15022_v55 = vcombine.low %v5604_v42, %v5607_v43 }
 0x4f8   :  { %8086 = vmatprep.subr.bf16.mxu1 %v14957_v63  ;;  %v5582_v63 = vld [vmem:[#allocation11 + $0x2240] sm:$0xff] }
 0x4f9   :  { %v14996_v20 = vcombine.low %v5579_v61, %v5582_v63 }
 0x4fa   :  { %7915 = vmatpush1.bf16.msra.mxu0 %v14954_v10  ;;  %v14997_v10 = vcombine.high %v5579_v61, %v5582_v63  ;;  %v5616_v61 = vld [vmem:[#allocation11 + $0x2668] sm:$0xff] }
 0x4fb   :  { %8087 = vmatpush1.bf16.msra.mxu1 %v14956_v11  ;;  %7916 = vmatprep.subr.bf16.mxu0 %v14961_v12  ;;  %v14999_v11 = vcombine.high %v5580_v3, %v5583_v4  ;;  %v5585_v12 = vld [vmem:[#allocation11 + $0x22a0] sm:$0xff]  ;;  %v5619_v63 = vld [vmem:[#allocation11 + $0x26c8] sm:$0xff]  ;;  %v15028_v4 = vcombine.low %v5610_v51, %v5613_v52 }
 0x4fc   :  { %8088 = vmatprep.subr.bf16.mxu1 %v14963_v13  ;;  %v5588_v13 = vld [vmem:[#allocation11 + $0x2300] sm:$0xff] }
 0x4fd   :  { %v15002_v26 = vcombine.low %v5585_v12, %v5588_v13 }
 0x4fe   :  { %7917 = vmatpush1.bf16.msra.mxu0 %v14960_v17  ;;  %v15003_v17 = vcombine.high %v5585_v12, %v5588_v13  ;;  %v5622_v12 = vld [vmem:[#allocation11 + $0x2728] sm:$0xff] }
 0x4ff   :  { %8089 = vmatpush1.bf16.msra.mxu1 %v14962_v18  ;;  %7918 = vmatprep.subr.bf16.mxu0 %v14967_v9  ;;  %v15005_v18 = vcombine.high %v5586_v14, %v5589_v19  ;;  %v5591_v9 = vld [vmem:[#allocation11 + $0x2360] sm:$0xff]  ;;  %v5625_v13 = vld [vmem:[#allocation11 + $0x2788] sm:$0xff]  ;;  %v15034_v19 = vcombine.low %v5616_v61, %v5619_v63 }
 0x500   :  { %8090 = vmatprep.subr.bf16.mxu1 %v14969_v23  ;;  %v5594_v23 = vld [vmem:[#allocation11 + $0x23c0] sm:$0xff] }
 0x501   :  { %v15008_v33 = vcombine.low %v5591_v9, %v5594_v23 }
 0x502   :  { %7919 = vmatpush1.bf16.msra.mxu0 %v14966_v57  ;;  %v15009_v57 = vcombine.high %v5591_v9, %v5594_v23  ;;  %v5628_v9 = vld [vmem:[#allocation11 + $0x27e8] sm:$0xff] }
 0x503   :  { %8091 = vmatpush1.bf16.msra.mxu1 %v14968_v28  ;;  %7920 = vmatprep.subr.bf16.mxu0 %v14973_v29  ;;  %v15011_v28 = vcombine.high %v5592_v24, %v5595_v25  ;;  %v5597_v29 = vld [vmem:[#allocation11 + $0x2420] sm:$0xff]  ;;  %v5631_v23 = vld [vmem:[#allocation11 + $0x2848] sm:$0xff]  ;;  %v15040_v25 = vcombine.low %v5622_v12, %v5625_v13 }
 0x504   :  { %8092 = vmatprep.subr.bf16.mxu1 %v14975_v31  ;;  %v5600_v31 = vld [vmem:[#allocation11 + $0x2480] sm:$0xff] }
 0x505   :  { %v15014_v41 = vcombine.low %v5597_v29, %v5600_v31 }
 0x506   :  { %7921 = vmatpush1.bf16.msra.mxu0 %v14972_v36  ;;  %v15015_v36 = vcombine.high %v5597_v29, %v5600_v31  ;;  %v5636_v29 = vld [vmem:[#allocation11 + $0x2900] sm:$0xff] }
 0x507   :  { %8093 = vmatpush1.bf16.msra.mxu1 %v14974_v38  ;;  %7922 = vmatprep.subr.bf16.mxu0 %v14979_v39  ;;  %v15017_v38 = vcombine.high %v5598_v32, %v5601_v45  ;;  %v5603_v39 = vld [vmem:[#allocation11 + $0x24e0] sm:$0xff]  ;;  %v5634_v45 = vld [vmem:[#allocation11 + $0x28a8] sm:$0xff] }
 0x508   :  { %8094 = vmatprep.subr.bf16.mxu1 %v14981_v40  ;;  %v5606_v40 = vld [vmem:[#allocation11 + $0x2540] sm:$0xff] }
 0x509   :  { %v15020_v53 = vcombine.low %v5603_v39, %v5606_v40  ;;  %v16303_v31 = vld [vmem:[#allocation13] sm:$0x3f] }
 0x50a   :  { %7923 = vmatpush1.bf16.msra.mxu0 %v14978_v47  ;;  %v15021_v47 = vcombine.high %v5603_v39, %v5606_v40  ;;  %v2807_v32 = vrot.slane %v16303_v31, %v16721_v15  ;;  %v15046_v40 = vcombine.low %v5628_v9, %v5631_v23 }
 0x50b   :  { %8095 = vmatpush1.bf16.msra.mxu1 %v14980_v49  ;;  %7924 = vmatprep.subr.bf16.mxu0 %v14985_v22  ;;  %v5609_v49 = vld [vmem:[#allocation11 + $0x25a0] sm:$0xff] }
 0x50c   :  { %8096 = vmatprep.subr.bf16.mxu1 %v14987_v50  ;;  %v5612_v22 = vld [vmem:[#allocation11 + $0x2600] sm:$0xff]  ;;  %v15023_v50 = vcombine.high %v5604_v42, %v5607_v43 }
 0x50d   :  { %v15026_v3 = vcombine.low %v5609_v49, %v5612_v22 }
 0x50e   :  { %7925 = vmatpush1.bf16.msra.mxu0 %v14984_v56  ;;  %v15027_v56 = vcombine.high %v5609_v49, %v5612_v22 }
 0x50f   :  { %8097 = vmatpush1.bf16.msra.mxu1 %v14986_v58  ;;  %7926 = vmatprep.subr.bf16.mxu0 %v14991_v59  ;;  %v15029_v58 = vcombine.high %v5610_v51, %v5613_v52  ;;  %v5615_v59 = vld [vmem:[#allocation11 + $0x2660] sm:$0xff]  ;;  %v5640_v51 = vld [vmem:[#allocation11 + $0x2968] sm:$0xff] }
 0x510   :  { %8098 = vmatprep.subr.bf16.mxu1 %v14993_v60  ;;  %v5618_v60 = vld [vmem:[#allocation11 + $0x26c0] sm:$0xff]  ;;  %v5643_v52 = vld [vmem:[#allocation11 + $0x29c8] sm:$0xff] }
 0x511   :  { %v15032_v14 = vcombine.low %v5615_v59, %v5618_v60 }
 0x512   :  { %7927 = vmatpush1.bf16.msra.mxu0 %v14990_v5  ;;  %v15033_v5 = vcombine.high %v5615_v59, %v5618_v60 }
 0x513   :  { %8099 = vmatpush1.bf16.msra.mxu1 %v14992_v8  ;;  %7928 = vmatprep.subr.bf16.mxu0 %v14997_v10  ;;  %v15035_v8 = vcombine.high %v5616_v61, %v5619_v63  ;;  %v5621_v10 = vld [vmem:[#allocation11 + $0x2720] sm:$0xff] }
 0x514   :  { %8100 = vmatprep.subr.bf16.mxu1 %v14999_v11  ;;  %v5624_v11 = vld [vmem:[#allocation11 + $0x2780] sm:$0xff] }
 0x515   :  { %v15038_v24 = vcombine.low %v5621_v10, %v5624_v11 }
 0x516   :  { %7929 = vmatpush1.bf16.msra.mxu0 %v14996_v20  ;;  %v15039_v20 = vcombine.high %v5621_v10, %v5624_v11  ;;  %v15059_v11 = vcombine.high %v5640_v51, %v5643_v52 }
 0x517   :  { %8101 = vmatpush1.bf16.msra.mxu1 %v14998_v16  ;;  %7930 = vmatprep.subr.bf16.mxu0 %v15003_v17  ;;  %v15041_v16 = vcombine.high %v5622_v12, %v5625_v13  ;;  %v5627_v17 = vld [vmem:[#allocation11 + $0x27e0] sm:$0xff] }
 0x518   :  { %8102 = vmatprep.subr.bf16.mxu1 %v15005_v18  ;;  %v5630_v18 = vld [vmem:[#allocation11 + $0x2840] sm:$0xff] }
 0x519   :  { %v5645_v12 = vld [vmem:[#allocation11 + $0x2a20] sm:$0xff] }
 0x51a   :  { %7931 = vmatpush1.bf16.msra.mxu0 %v15002_v26  ;;  %v5692_v26 = vld [vmem:[#allocation13 + $0x6] sm:$0x3f] }
 0x51b   :  { %8103 = vmatpush1.bf16.msra.mxu1 %v15004_v27  ;;  %7932 = vmatprep.subr.bf16.mxu0 %v15009_v57  ;;  %v15045_v27 = vcombine.high %v5627_v17, %v5630_v18  ;;  %v15047_v57 = vcombine.high %v5628_v9, %v5631_v23  ;;  %v5701_v39 = vrot.slane %v5692_v26, %v16642_v48  ;;  %v5648_v13 = vld [vmem:[#allocation11 + $0x2a80] sm:$0xff] }
 0x51c   :  { %8104 = vmatprep.subr.bf16.mxu1 %v15011_v28  ;;  %v5633_v28 = vld [vmem:[#allocation11 + $0x28a0] sm:$0xff]  ;;  %v15063_v9 = vcombine.high %v5645_v12, %v5648_v13 }
 0x51d   :  { %v15050_v59 = vcombine.low %v5633_v28, %v5636_v29 }
 0x51e   :  { %7933 = vmatpush1.bf16.msra.mxu0 %v15008_v33  ;;  %v5637_v33 = vld [vmem:[#allocation11 + $0x2908] sm:$0xff] }
 0x51f   :  { %8105 = vmatpush1.bf16.msra.mxu1 %v15010_v54  ;;  %7945 = vmatprep.subr.bf16.mxu0 %v15015_v36  ;;  %v5697_v54 = vrot.slane %v5692_v26, %v16639_v46  ;;  %v2811_v36 = vrot.slane %v16303_v31, %v16725_v21  ;;  %v15053_v43 = vcombine.high %v5634_v45, %v5637_v33  ;;  %v5652_v26 = vld [vmem:[#allocation11 + $0x2ae8] sm:$0xff] }
 0x520   :  { %8117 = vmatprep.subr.bf16.mxu1 %v15017_v38  ;;  %v15044_v38 = vcombine.low %v5627_v17, %v5630_v18  ;;  %v15052_v60 = vcombine.low %v5634_v45, %v5637_v33  ;;  %v15058_v18 = vcombine.low %v5640_v51, %v5643_v52  ;;  %v5660_v45 = vld [vmem:[#allocation11 + $0x2c00] sm:$0xff]  ;;  %v5664_v52 = vld [vmem:[#allocation11 + $0x2c68] sm:$0xff] }
 0x521   :  { %7935 = vmatmul.mubr.bf16.vlgmr.msra.gmra.mrb[20].mxu0 %v16745_v30 }
 0x522   :  { %8107 = vmatmul.mubr.bf16.vlgmr.msra.gmra.mrb[20].mxu1 %v16745_v30  ;;  %7946 = vmatpush1.bf16.msra.mxu0 %v15014_v41  ;;  %v15051_v41 = vcombine.high %v5633_v28, %v5636_v29 }
 0x523   :  { %7977 = vmatprep.mubr.bf16.mxu0 %v16752_v37  ;;  %8118 = vmatpush1.bf16.msra.mxu1 %v15016_v44  ;;  %v5639_v44 = vld [vmem:[#allocation11 + $0x2960] sm:$0xff] }
 0x524   :  { %8149 = vmatprep.mubr.bf16.mxu1 %v16752_v37  ;;  %7947 = vmatprep.subr.bf16.mxu0 %v15021_v47  ;;  %v5642_v47 = vld [vmem:[#allocation11 + $0x29c0] sm:$0xff] }
 0x525   :  { %8119 = vmatprep.subr.bf16.mxu1 %v15023_v50  ;;  %v15056_v17 = vcombine.low %v5639_v44, %v5642_v47 }
 0x526   :  { %7948 = vmatpush1.bf16.msra.mxu0 %v15020_v53 }
 0x527   :  { %8120 = vmatpush1.bf16.msra.mxu1 %v15022_v55  ;;  %7949 = vmatprep.subr.bf16.mxu0 %v15027_v56 }
 0x528   :  { %8121 = vmatprep.subr.bf16.mxu1 %v15029_v58 }
 0x52a   :  { %7950 = vmatpush1.bf16.msra.mxu0 %v15026_v3 }
 0x52b   :  { %8122 = vmatpush1.bf16.msra.mxu1 %v15028_v4  ;;  %7951 = vmatprep.subr.bf16.mxu0 %v15033_v5  ;;  %v15057_v5 = vcombine.high %v5639_v44, %v5642_v47 }
 0x52c   :  { %8123 = vmatprep.subr.bf16.mxu1 %v15035_v8 }
 0x52e   :  { %7952 = vmatpush1.bf16.msra.mxu0 %v15032_v14 }
 0x52f   :  { %8124 = vmatpush1.bf16.msra.mxu1 %v15034_v19  ;;  %7953 = vmatprep.subr.bf16.mxu0 %v15039_v20  ;;  %v5646_v19 = vld [vmem:[#allocation11 + $0x2a28] sm:$0xff] }
 0x530   :  { %8125 = vmatprep.subr.bf16.mxu1 %v15041_v16  ;;  %v5649_v20 = vld [vmem:[#allocation11 + $0x2a88] sm:$0xff] }
 0x531   :  { %v15065_v23 = vcombine.high %v5646_v19, %v5649_v20  ;;  %v15064_v28 = vcombine.low %v5646_v19, %v5649_v20  ;;  %v5675_v20 = vld [vmem:[#allocation11 + $0x2de0] sm:$0xff] }
 0x532   :  { %7954 = vmatpush1.bf16.msra.mxu0 %v15038_v24  ;;  %v5651_v24 = vld [vmem:[#allocation11 + $0x2ae0] sm:$0xff] }
 0x533   :  { %8126 = vmatpush1.bf16.msra.mxu1 %v15040_v25  ;;  %7955 = vmatprep.subr.bf16.mxu0 %v15045_v27  ;;  %v5654_v25 = vld [vmem:[#allocation11 + $0x2b40] sm:$0xff]  ;;  %v5655_v27 = vld [vmem:[#allocation11 + $0x2b48] sm:$0xff] }
 0x534   :  { %v5245_v42 = vpop.f32.mrb[16].mxu0  ;;  %8127 = vmatprep.subr.bf16.mxu1 %v15047_v57  ;;  %v15062_v57 = vcombine.low %v5645_v12, %v5648_v13  ;;  %v15069_v29 = vcombine.high %v5651_v24, %v5654_v25  ;;  %v15071_v31 = vcombine.high %v5652_v26, %v5655_v27 }
 0x535   :  { %v15942_v49 = vadd.f32 %v5245_v42, %v2807_v32  ;;  %v7807_v22 = vpop.f32.mrb[16].mxu1  ;;  %v5247_v50 = vpop.f32.mrb[17].mxu0 }
 0x536   :  { %v15946_v53 = vadd.f32 %v7807_v22, %v5697_v54  ;;  %v15943_v55 = vadd.f32 %v5247_v50, %v2811_v36  ;;  %v7809_v56 = vpop.f32.mrb[17].mxu1  ;;  %v5249_v58 = vpop.f32.mrb[18].mxu0  ;;  %7956 = vmatpush1.bf16.msra.mxu0 %v15044_v38  ;;  %v5666_v22 = vld [vmem:[#allocation11 + $0x2cc0] sm:$0xff] }
 0x537   :  { %16223 = vtanh.f32 %v15942_v49  ;;  %v15947_v61 = vadd.f32 %v7809_v56, %v5701_v39  ;;  %v15944_v63 = vadd.f32 %v5249_v58, %v2807_v32  ;;  %v7811_v3 = vpop.f32.mrb[18].mxu1  ;;  %8128 = vmatpush1.bf16.msra.mxu1 %v15046_v40  ;;  %v5251_v4 = vpop.f32.mrb[19].mxu0  ;;  %7957 = vmatprep.subr.bf16.mxu0 %v15051_v41  ;;  %v5657_v32 = vld [vmem:[#allocation11 + $0x2ba0] sm:$0xff]  ;;  %v15070_v41 = vcombine.low %v5652_v26, %v5655_v27 }
 0x538   :  { %16225 = vtanh.f32 %v15946_v53  ;;  %v15948_v8 = vadd.f32 %v7811_v3, %v5697_v54  ;;  %v7813_v10 = vpop.f32.mrb[19].mxu1  ;;  %8129 = vmatprep.subr.bf16.mxu1 %v15053_v43  ;;  %v15945_v14 = vadd.f32 %v5251_v4, %v2811_v36  ;;  %v5658_v54 = vld [vmem:[#allocation11 + $0x2ba8] sm:$0xff]  ;;  %v15075_v42 = vcombine.high %v5657_v32, %v5660_v45  ;;  %v5663_v49 = vld [vmem:[#allocation11 + $0x2c60] sm:$0xff] }
 0x539   :  { %16227 = vtanh.f32 %v15943_v55  ;;  %v15949_v16 = vadd.f32 %v7813_v10, %v5701_v39  ;;  %v5661_v36 = vld [vmem:[#allocation11 + $0x2c08] sm:$0xff]  ;;  %v15068_v39 = vcombine.low %v5651_v24, %v5654_v25  ;;  %v15074_v56 = vcombine.low %v5657_v32, %v5660_v45  ;;  %v5669_v4 = vld [vmem:[#allocation11 + $0x2d20] sm:$0xff] }
 0x53a   :  { %16229 = vtanh.f32 %v15947_v61  ;;  %7958 = vmatpush1.bf16.msra.mxu0 %v15050_v59  ;;  %v15077_v47 = vcombine.high %v5658_v54, %v5661_v36  ;;  %v5667_v53 = vld [vmem:[#allocation11 + $0x2cc8] sm:$0xff]  ;;  %v15076_v59 = vcombine.low %v5658_v54, %v5661_v36  ;;  %v15080_v12 = vcombine.low %v5663_v49, %v5666_v22  ;;  %v5681_v26 = vld [vmem:[#allocation11 + $0x2ea0] sm:$0xff] }
 0x53b   :  { %16231 = vtanh.f32 %v15944_v63  ;;  %8130 = vmatpush1.bf16.msra.mxu1 %v15052_v60  ;;  %7959 = vmatprep.subr.bf16.mxu0 %v15057_v5  ;;  %v15081_v60 = vcombine.high %v5663_v49, %v5666_v22  ;;  %v15083_v3 = vcombine.high %v5664_v52, %v5667_v53  ;;  %v5672_v5 = vld [vmem:[#allocation11 + $0x2d80] sm:$0xff]  ;;  %v5670_v10 = vld [vmem:[#allocation11 + $0x2d28] sm:$0xff]  ;;  %v15082_v13 = vcombine.low %v5664_v52, %v5667_v53  ;;  %v8218_v49 = vld [vmem:[#allocation11 + $0x98] sm:$0xff] }
 0x53c   :  { %16233 = vtanh.f32 %v15948_v8  ;;  %8131 = vmatprep.subr.bf16.mxu1 %v15059_v11  ;;  %v5673_v11 = vld [vmem:[#allocation11 + $0x2d88] sm:$0xff]  ;;  %v5684_v27 = vld [vmem:[#allocation11 + $0x2f00] sm:$0xff]  ;;  %v8220_v53 = vld [vmem:[#allocation11 + $0xf0] sm:$0xff] }
 0x53d   :  { %16235 = vtanh.f32 %v15945_v14  ;;  %v15087_v14 = vcombine.high %v5669_v4, %v5672_v5  ;;  %v15089_v19 = vcombine.high %v5670_v10, %v5673_v11  ;;  %v15099_v32 = vcombine.high %v5681_v26, %v5684_v27  ;;  %v5690_v54 = vld [vmem:[#allocation11 + $0x2fc0] sm:$0xff]  ;;  %v5688_v36 = vld [vmem:[#allocation11 + $0x2f68] sm:$0xff] }
 0x53e   :  { %16237 = vtanh.f32 %v15949_v16  ;;  %7960 = vmatpush1.bf16.msra.mxu0 %v15056_v17  ;;  %v5678_v16 = vld [vmem:[#allocation11 + $0x2e40] sm:$0xff]  ;;  %v5676_v17 = vld [vmem:[#allocation11 + $0x2de8] sm:$0xff] }
 0x53f   :  { %8132 = vmatpush1.bf16.msra.mxu1 %v15058_v18  ;;  %7961 = vmatprep.subr.bf16.mxu0 %v15063_v9  ;;  %v5679_v18 = vld [vmem:[#allocation11 + $0x2e48] sm:$0xff]  ;;  %v15086_v9 = vcombine.low %v5669_v4, %v5672_v5  ;;  %v15093_v24 = vcombine.high %v5675_v20, %v5678_v16  ;;  %v8227_v5 = vld [vmem:[#allocation11 + $0x1b8] sm:$0xff] }
 0x540   :  { %8133 = vmatprep.subr.bf16.mxu1 %v15065_v23  ;;  %v15088_v23 = vcombine.low %v5670_v10, %v5673_v11  ;;  %v15095_v25 = vcombine.high %v5676_v17, %v5679_v18 }
 0x541   :  { %v16224_v33 = vpop.eup %16223 }
 0x542   :  { %v16226_v38 = vpop.eup %16225  ;;  %7962 = vmatpush1.bf16.msra.mxu0 %v15062_v57  ;;  %v5682_v57 = vld [vmem:[#allocation11 + $0x2ea8] sm:$0xff] }
 0x543   :  { %v16228_v40 = vpop.eup %16227  ;;  %8134 = vmatpush1.bf16.msra.mxu1 %v15064_v28  ;;  %7963 = vmatprep.subr.bf16.mxu0 %v15069_v29  ;;  %v5685_v28 = vld [vmem:[#allocation11 + $0x2f08] sm:$0xff]  ;;  %v15092_v29 = vcombine.low %v5675_v20, %v5678_v16  ;;  %v8233_v20 = vld [vmem:[#allocation11 + $0x278] sm:$0xff] }
 0x544   :  { %v16230_v43 = vpop.eup %16229  ;;  %v15896_v44 = vpack.c.bf16 %v16228_v40, %v16224_v33  ;;  %8135 = vmatprep.subr.bf16.mxu1 %v15071_v31  ;;  %v15094_v31 = vcombine.low %v5676_v17, %v5679_v18  ;;  %v15101_v45 = vcombine.high %v5682_v57, %v5685_v28  ;;  %v5687_v33 = vld [vmem:[#allocation11 + $0x2f60] sm:$0xff]  ;;  %v15100_v40 = vcombine.low %v5682_v57, %v5685_v28  ;;  %v8236_v16 = vld [vmem:[#allocation11 + $0x2d8] sm:$0xff] }
 0x545   :  { %v16232_v50 = vpop.eup %16231  ;;  %v15900_v51 = vpack.c.bf16 %v16230_v43, %v16226_v38  ;;  %v5691_v38 = vld [vmem:[#allocation11 + $0x2fc8] sm:$0xff]  ;;  %v8214_v43 = vld [vmem:[#allocation11 + $0x30] sm:$0xff]  ;;  %v15104_v22 = vcombine.low %v5687_v33, %v5690_v54  ;;  %v15134_v28 = vcombine.low %v8233_v20, %v8236_v16 }
 0x546   :  { %v16234_v55 = vpop.eup %16233  ;;  %5304 = vst [vmem:[#allocation14 + $0x10] sm:$0xff] %v15896_v44  ;;  %7964 = vmatpush1.bf16.msra.mxu0 %v15068_v39  ;;  %v15098_v39 = vcombine.low %v5681_v26, %v5684_v27  ;;  %v8217_v44 = vld [vmem:[#allocation11 + $0x90] sm:$0xff]  ;;  %v8239_v26 = vld [vmem:[#allocation11 + $0x338] sm:$0xff] }
 0x547   :  { %v16236_v58 = vpop.eup %16235  ;;  %8208 = vst [vmem:[#allocation14 + $0x18] sm:$0xff] %v15900_v51  ;;  %8136 = vmatpush1.bf16.msra.mxu1 %v15070_v41  ;;  %7965 = vmatprep.subr.bf16.mxu0 %v15075_v42  ;;  %v15105_v41 = vcombine.high %v5687_v33, %v5690_v54  ;;  %v15107_v42 = vcombine.high %v5688_v36, %v5691_v38  ;;  %v8242_v27 = vld [vmem:[#allocation11 + $0x398] sm:$0xff] }
 0x548   :  { %v16238_v61 = vpop.eup %16237  ;;  %v15899_v63 = vpack.c.bf16 %v16236_v58, %v16232_v50  ;;  %8137 = vmatprep.subr.bf16.mxu1 %v15077_v47  ;;  %v8215_v47 = vld [vmem:[#allocation11 + $0x38] sm:$0xff]  ;;  %v15106_v50 = vcombine.low %v5688_v36, %v5691_v38  ;;  %v15115_v51 = vcombine.high %v8214_v43, %v8217_v44  ;;  %v15140_v38 = vcombine.low %v8239_v26, %v8242_v27 }
 0x549   :  { %v15903_v8 = vpack.c.bf16 %v16238_v61, %v16234_v55  ;;  %v15117_v52 = vcombine.high %v8215_v47, %v8218_v49  ;;  %v8223_v55 = vld [vmem:[#allocation11 + $0x150] sm:$0xff]  ;;  %v8221_v58 = vld [vmem:[#allocation11 + $0xf8] sm:$0xff] }
 0x54a   :  { %5307 = vst [vmem:[#allocation14 + $0x70] sm:$0xff] %v15899_v63  ;;  %7966 = vmatpush1.bf16.msra.mxu0 %v15074_v56  ;;  %v15114_v56 = vcombine.low %v8214_v43, %v8217_v44  ;;  %v15121_v61 = vcombine.high %v8220_v53, %v8223_v55  ;;  %v8226_v63 = vld [vmem:[#allocation11 + $0x1b0] sm:$0xff]  ;;  %v15120_v10 = vcombine.low %v8220_v53, %v8223_v55  ;;  %v8245_v33 = vld [vmem:[#allocation11 + $0x3f8] sm:$0xff] }
 0x54b   :  { %8211 = vst [vmem:[#allocation14 + $0x78] sm:$0xff] %v15903_v8  ;;  %8138 = vmatpush1.bf16.msra.mxu1 %v15076_v59  ;;  %7967 = vmatprep.subr.bf16.mxu0 %v15081_v60  ;;  %v8224_v59 = vld [vmem:[#allocation11 + $0x158] sm:$0xff]  ;;  %v15116_v60 = vcombine.low %v8215_v47, %v8218_v49 }
 0x54c   :  { %8139 = vmatprep.subr.bf16.mxu1 %v15083_v3  ;;  %v8229_v3 = vld [vmem:[#allocation11 + $0x210] sm:$0xff]  ;;  %v15123_v4 = vcombine.high %v8221_v58, %v8224_v59  ;;  %v8230_v8 = vld [vmem:[#allocation11 + $0x218] sm:$0xff]  ;;  %v15122_v11 = vcombine.low %v8221_v58, %v8224_v59 }
 0x54d   :  { %v15126_v17 = vcombine.low %v8226_v63, %v8229_v3  ;;  %v15128_v18 = vcombine.low %v8227_v5, %v8230_v8  ;;  %v8248_v54 = vld [vmem:[#allocation11 + $0x458] sm:$0xff] }
 0x54e   :  { %7968 = vmatpush1.bf16.msra.mxu0 %v15080_v12  ;;  %v15127_v12 = vcombine.high %v8226_v63, %v8229_v3  ;;  %v8251_v43 = vld [vmem:[#allocation11 + $0x4b8] sm:$0xff]  ;;  %v15146_v49 = vcombine.low %v8245_v33, %v8248_v54  ;;  %v8265_v63 = vld [vmem:[#allocation11 + $0x690] sm:$0xff] }
 0x54f   :  { %8140 = vmatpush1.bf16.msra.mxu1 %v15082_v13  ;;  %7969 = vmatprep.subr.bf16.mxu0 %v15087_v14  ;;  %v15129_v13 = vcombine.high %v8227_v5, %v8230_v8  ;;  %v8232_v14 = vld [vmem:[#allocation11 + $0x270] sm:$0xff]  ;;  %v8254_v44 = vld [vmem:[#allocation11 + $0x518] sm:$0xff] }
 0x550   :  { %8141 = vmatprep.subr.bf16.mxu1 %v15089_v19  ;;  %v8235_v19 = vld [vmem:[#allocation11 + $0x2d0] sm:$0xff]  ;;  %v8257_v53 = vld [vmem:[#allocation11 + $0x578] sm:$0xff]  ;;  %v15152_v58 = vcombine.low %v8251_v43, %v8254_v44 }
 0x551   :  { %v15132_v57 = vcombine.low %v8232_v14, %v8235_v19  ;;  %v8260_v55 = vld [vmem:[#allocation11 + $0x5d8] sm:$0xff] }
 0x552   :  { %7970 = vmatpush1.bf16.msra.mxu0 %v15086_v9  ;;  %v15133_v9 = vcombine.high %v8232_v14, %v8235_v19  ;;  %v8263_v3 = vld [vmem:[#allocation11 + $0x638] sm:$0xff]  ;;  %v15158_v8 = vcombine.low %v8257_v53, %v8260_v55 }
 0x553   :  { %8142 = vmatpush1.bf16.msra.mxu1 %v15088_v23  ;;  %7971 = vmatprep.subr.bf16.mxu0 %v15093_v24  ;;  %v15135_v23 = vcombine.high %v8233_v20, %v8236_v16  ;;  %v8238_v24 = vld [vmem:[#allocation11 + $0x330] sm:$0xff]  ;;  %v8269_v14 = vld [vmem:[#allocation11 + $0x6f8] sm:$0xff] }
 0x554   :  { %8143 = vmatprep.subr.bf16.mxu1 %v15095_v25  ;;  %v8241_v25 = vld [vmem:[#allocation11 + $0x390] sm:$0xff]  ;;  %v8272_v19 = vld [vmem:[#allocation11 + $0x758] sm:$0xff] }
 0x555   :  { %v15138_v36 = vcombine.low %v8238_v24, %v8241_v25 }
 0x556   :  { %7972 = vmatpush1.bf16.msra.mxu0 %v15092_v29  ;;  %v15139_v29 = vcombine.high %v8238_v24, %v8241_v25  ;;  %v8275_v24 = vld [vmem:[#allocation11 + $0x7b8] sm:$0xff] }
 0x557   :  { %8144 = vmatpush1.bf16.msra.mxu1 %v15094_v31  ;;  %7973 = vmatprep.subr.bf16.mxu0 %v15099_v32  ;;  %v15141_v31 = vcombine.high %v8239_v26, %v8242_v27  ;;  %v8244_v32 = vld [vmem:[#allocation11 + $0x3f0] sm:$0xff]  ;;  %v8278_v25 = vld [vmem:[#allocation11 + $0x818] sm:$0xff]  ;;  %v15170_v27 = vcombine.low %v8269_v14, %v8272_v19 }
 0x558   :  { %8145 = vmatprep.subr.bf16.mxu1 %v15101_v45  ;;  %v8247_v45 = vld [vmem:[#allocation11 + $0x450] sm:$0xff] }
 0x559   :  { %v15144_v47 = vcombine.low %v8244_v32, %v8247_v45 }
 0x55a   :  { %7974 = vmatpush1.bf16.msra.mxu0 %v15098_v39  ;;  %v15145_v39 = vcombine.high %v8244_v32, %v8247_v45  ;;  %v8281_v32 = vld [vmem:[#allocation11 + $0x878] sm:$0xff] }
 0x55b   :  { %8146 = vmatpush1.bf16.msra.mxu1 %v15100_v40  ;;  %7975 = vmatprep.subr.bf16.mxu0 %v15105_v41  ;;  %v15147_v40 = vcombine.high %v8245_v33, %v8248_v54  ;;  %v8250_v41 = vld [vmem:[#allocation11 + $0x4b0] sm:$0xff]  ;;  %v8284_v45 = vld [vmem:[#allocation11 + $0x8d8] sm:$0xff]  ;;  %v15176_v54 = vcombine.low %v8275_v24, %v8278_v25 }
 0x55c   :  { %8147 = vmatprep.subr.bf16.mxu1 %v15107_v42  ;;  %v8253_v42 = vld [vmem:[#allocation11 + $0x510] sm:$0xff] }
 0x55e   :  { %7976 = vmatpush1.bf16.msra.mxu0 %v15104_v22  ;;  %v15151_v22 = vcombine.high %v8250_v41, %v8253_v42 }
 0x55f   :  { %8148 = vmatpush1.bf16.msra.mxu1 %v15106_v50  ;;  %10550 = vmatprep.subr.bf16.mxu0 %v15115_v51  ;;  %v15153_v50 = vcombine.high %v8251_v43, %v8254_v44  ;;  %v8256_v51 = vld [vmem:[#allocation11 + $0x570] sm:$0xff]  ;;  %v15182_v44 = vcombine.low %v8281_v32, %v8284_v45 }
 0x560   :  { %10722 = vmatprep.subr.bf16.mxu1 %v15117_v52  ;;  %v8259_v52 = vld [vmem:[#allocation11 + $0x5d0] sm:$0xff] }
 0x561   :  { %7978 = vmatmul.mubr.bf16.vlgmr.msra.gmra.mrb[20].mxu0 %v16748_v34  ;;  %v15157_v59 = vcombine.high %v8256_v51, %v8259_v52  ;;  %v15156_v5 = vcombine.low %v8256_v51, %v8259_v52  ;;  %v8293_v51 = vld [vmem:[#allocation11 + $0x9f8] sm:$0xff] }
 0x562   :  { %8150 = vmatmul.mubr.bf16.vlgmr.msra.gmra.mrb[20].mxu1 %v16748_v34  ;;  %10551 = vmatpush1.bf16.msra.mxu0 %v15114_v56  ;;  %v15150_v56 = vcombine.low %v8250_v41, %v8253_v42  ;;  %v8287_v41 = vld [vmem:[#allocation11 + $0x938] sm:$0xff] }
 0x563   :  { %10582 = vmatprep.mubr.bf16.mxu0 %v16704_v6  ;;  %10723 = vmatpush1.bf16.msra.mxu1 %v15116_v60  ;;  %v15159_v60 = vcombine.high %v8257_v53, %v8260_v55  ;;  %v8290_v42 = vld [vmem:[#allocation11 + $0x998] sm:$0xff] }
 0x564   :  { %10754 = vmatprep.mubr.bf16.mxu1 %v16704_v6  ;;  %10552 = vmatprep.subr.bf16.mxu0 %v15121_v61  ;;  %v8262_v61 = vld [vmem:[#allocation11 + $0x630] sm:$0xff]  ;;  %v8296_v52 = vld [vmem:[#allocation11 + $0xa58] sm:$0xff]  ;;  %v15188_v55 = vcombine.low %v8287_v41, %v8290_v42 }
 0x565   :  { %10724 = vmatprep.subr.bf16.mxu1 %v15123_v4  ;;  %v8266_v4 = vld [vmem:[#allocation11 + $0x698] sm:$0xff]  ;;  %v15162_v20 = vcombine.low %v8262_v61, %v8265_v63 }
 0x566   :  { %10553 = vmatpush1.bf16.msra.mxu0 %v15120_v10  ;;  %v15163_v10 = vcombine.high %v8262_v61, %v8265_v63  ;;  %v15164_v16 = vcombine.low %v8263_v3, %v8266_v4  ;;  %v8299_v61 = vld [vmem:[#allocation11 + $0xab8] sm:$0xff] }
 0x567   :  { %10725 = vmatpush1.bf16.msra.mxu1 %v15122_v11  ;;  %10554 = vmatprep.subr.bf16.mxu0 %v15127_v12  ;;  %v15165_v11 = vcombine.high %v8263_v3, %v8266_v4  ;;  %v8268_v12 = vld [vmem:[#allocation11 + $0x6f0] sm:$0xff]  ;;  %v8302_v63 = vld [vmem:[#allocation11 + $0xb18] sm:$0xff]  ;;  %v15194_v4 = vcombine.low %v8293_v51, %v8296_v52 }
 0x568   :  { %10726 = vmatprep.subr.bf16.mxu1 %v15129_v13  ;;  %v8271_v13 = vld [vmem:[#allocation11 + $0x750] sm:$0xff] }
 0x569   :  { %v15168_v26 = vcombine.low %v8268_v12, %v8271_v13 }
 0x56a   :  { %10555 = vmatpush1.bf16.msra.mxu0 %v15126_v17  ;;  %v15169_v17 = vcombine.high %v8268_v12, %v8271_v13  ;;  %v8305_v12 = vld [vmem:[#allocation11 + $0xb78] sm:$0xff] }
 0x56b   :  { %10727 = vmatpush1.bf16.msra.mxu1 %v15128_v18  ;;  %10556 = vmatprep.subr.bf16.mxu0 %v15133_v9  ;;  %v15171_v18 = vcombine.high %v8269_v14, %v8272_v19  ;;  %v8274_v9 = vld [vmem:[#allocation11 + $0x7b0] sm:$0xff]  ;;  %v8308_v13 = vld [vmem:[#allocation11 + $0xbd8] sm:$0xff]  ;;  %v15200_v19 = vcombine.low %v8299_v61, %v8302_v63 }
 0x56c   :  { %10728 = vmatprep.subr.bf16.mxu1 %v15135_v23  ;;  %v8277_v23 = vld [vmem:[#allocation11 + $0x810] sm:$0xff] }
 0x56d   :  { %v15174_v33 = vcombine.low %v8274_v9, %v8277_v23 }
 0x56e   :  { %10557 = vmatpush1.bf16.msra.mxu0 %v15132_v57  ;;  %v15175_v57 = vcombine.high %v8274_v9, %v8277_v23  ;;  %v8311_v9 = vld [vmem:[#allocation11 + $0xc38] sm:$0xff] }
 0x56f   :  { %10729 = vmatpush1.bf16.msra.mxu1 %v15134_v28  ;;  %10558 = vmatprep.subr.bf16.mxu0 %v15139_v29  ;;  %v15177_v28 = vcombine.high %v8275_v24, %v8278_v25  ;;  %v8280_v29 = vld [vmem:[#allocation11 + $0x870] sm:$0xff]  ;;  %v8314_v23 = vld [vmem:[#allocation11 + $0xc98] sm:$0xff]  ;;  %v15206_v25 = vcombine.low %v8305_v12, %v8308_v13 }
 0x570   :  { %10730 = vmatprep.subr.bf16.mxu1 %v15141_v31  ;;  %v8283_v31 = vld [vmem:[#allocation11 + $0x8d0] sm:$0xff] }
 0x571   :  { %v15180_v43 = vcombine.low %v8280_v29, %v8283_v31 }
 0x572   :  { %10559 = vmatpush1.bf16.msra.mxu0 %v15138_v36  ;;  %v15181_v36 = vcombine.high %v8280_v29, %v8283_v31  ;;  %v8317_v31 = vld [vmem:[#allocation11 + $0xcf8] sm:$0xff] }
 0x573   :  { %10731 = vmatpush1.bf16.msra.mxu1 %v15140_v38  ;;  %10560 = vmatprep.subr.bf16.mxu0 %v15145_v39  ;;  %v15183_v38 = vcombine.high %v8281_v32, %v8284_v45  ;;  %v8286_v39 = vld [vmem:[#allocation11 + $0x930] sm:$0xff]  ;;  %v8320_v32 = vld [vmem:[#allocation11 + $0xd58] sm:$0xff]  ;;  %v15212_v45 = vcombine.low %v8311_v9, %v8314_v23 }
 0x574   :  { %10732 = vmatprep.subr.bf16.mxu1 %v15147_v40  ;;  %v8289_v40 = vld [vmem:[#allocation11 + $0x990] sm:$0xff] }
 0x575   :  { %v15186_v53 = vcombine.low %v8286_v39, %v8289_v40 }
 0x576   :  { %10561 = vmatpush1.bf16.msra.mxu0 %v15144_v47  ;;  %v15187_v47 = vcombine.high %v8286_v39, %v8289_v40  ;;  %v8323_v39 = vld [vmem:[#allocation11 + $0xdb8] sm:$0xff] }
 0x577   :  { %10733 = vmatpush1.bf16.msra.mxu1 %v15146_v49  ;;  %10562 = vmatprep.subr.bf16.mxu0 %v15151_v22  ;;  %v15189_v49 = vcombine.high %v8287_v41, %v8290_v42  ;;  %v8292_v22 = vld [vmem:[#allocation11 + $0x9f0] sm:$0xff]  ;;  %v8326_v40 = vld [vmem:[#allocation11 + $0xe18] sm:$0xff]  ;;  %v15218_v42 = vcombine.low %v8317_v31, %v8320_v32 }
 0x578   :  { %10734 = vmatprep.subr.bf16.mxu1 %v15153_v50  ;;  %v8295_v50 = vld [vmem:[#allocation11 + $0xa50] sm:$0xff] }
 0x579   :  { %v15192_v3 = vcombine.low %v8292_v22, %v8295_v50 }
 0x57a   :  { %10563 = vmatpush1.bf16.msra.mxu0 %v15150_v56  ;;  %v15193_v56 = vcombine.high %v8292_v22, %v8295_v50  ;;  %v8329_v22 = vld [vmem:[#allocation11 + $0xe78] sm:$0xff] }
 0x57b   :  { %10735 = vmatpush1.bf16.msra.mxu1 %v15152_v58  ;;  %10564 = vmatprep.subr.bf16.mxu0 %v15157_v59  ;;  %v15195_v58 = vcombine.high %v8293_v51, %v8296_v52  ;;  %v8298_v59 = vld [vmem:[#allocation11 + $0xab0] sm:$0xff]  ;;  %v8332_v50 = vld [vmem:[#allocation11 + $0xed8] sm:$0xff]  ;;  %v15224_v52 = vcombine.low %v8323_v39, %v8326_v40 }
 0x57c   :  { %10736 = vmatprep.subr.bf16.mxu1 %v15159_v60  ;;  %v8301_v60 = vld [vmem:[#allocation11 + $0xb10] sm:$0xff] }
 0x57d   :  { %v15198_v14 = vcombine.low %v8298_v59, %v8301_v60 }
 0x57e   :  { %10565 = vmatpush1.bf16.msra.mxu0 %v15156_v5  ;;  %v15199_v5 = vcombine.high %v8298_v59, %v8301_v60  ;;  %v8335_v59 = vld [vmem:[#allocation11 + $0xf38] sm:$0xff] }
 0x57f   :  { %10737 = vmatpush1.bf16.msra.mxu1 %v15158_v8  ;;  %10566 = vmatprep.subr.bf16.mxu0 %v15163_v10  ;;  %v15201_v8 = vcombine.high %v8299_v61, %v8302_v63  ;;  %v8304_v10 = vld [vmem:[#allocation11 + $0xb70] sm:$0xff]  ;;  %v8338_v60 = vld [vmem:[#allocation11 + $0xf98] sm:$0xff]  ;;  %v15230_v63 = vcombine.low %v8329_v22, %v8332_v50 }
 0x580   :  { %10738 = vmatprep.subr.bf16.mxu1 %v15165_v11  ;;  %v8307_v11 = vld [vmem:[#allocation11 + $0xbd0] sm:$0xff] }
 0x581   :  { %v15204_v24 = vcombine.low %v8304_v10, %v8307_v11 }
 0x582   :  { %10567 = vmatpush1.bf16.msra.mxu0 %v15162_v20  ;;  %v15205_v20 = vcombine.high %v8304_v10, %v8307_v11  ;;  %v8341_v10 = vld [vmem:[#allocation11 + $0xff8] sm:$0xff] }
 0x583   :  { %10739 = vmatpush1.bf16.msra.mxu1 %v15164_v16  ;;  %10568 = vmatprep.subr.bf16.mxu0 %v15169_v17  ;;  %v15207_v16 = vcombine.high %v8305_v12, %v8308_v13  ;;  %v8310_v17 = vld [vmem:[#allocation11 + $0xc30] sm:$0xff]  ;;  %v8344_v11 = vld [vmem:[#allocation11 + $0x1058] sm:$0xff]  ;;  %v15236_v13 = vcombine.low %v8335_v59, %v8338_v60 }
 0x584   :  { %10740 = vmatprep.subr.bf16.mxu1 %v15171_v18  ;;  %v8313_v18 = vld [vmem:[#allocation11 + $0xc90] sm:$0xff] }
 0x585   :  { %v15210_v29 = vcombine.low %v8310_v17, %v8313_v18 }
 0x586   :  { %10569 = vmatpush1.bf16.msra.mxu0 %v15168_v26  ;;  %v15211_v26 = vcombine.high %v8310_v17, %v8313_v18  ;;  %v8347_v17 = vld [vmem:[#allocation11 + $0x10b8] sm:$0xff] }
 0x587   :  { %10741 = vmatpush1.bf16.msra.mxu1 %v15170_v27  ;;  %10570 = vmatprep.subr.bf16.mxu0 %v15175_v57  ;;  %v15213_v27 = vcombine.high %v8311_v9, %v8314_v23  ;;  %v8316_v57 = vld [vmem:[#allocation11 + $0xcf0] sm:$0xff]  ;;  %v8350_v18 = vld [vmem:[#allocation11 + $0x1118] sm:$0xff]  ;;  %v15242_v23 = vcombine.low %v8341_v10, %v8344_v11 }
 0x588   :  { %10742 = vmatprep.subr.bf16.mxu1 %v15177_v28  ;;  %v8319_v28 = vld [vmem:[#allocation11 + $0xd50] sm:$0xff] }
 0x589   :  { %v15216_v41 = vcombine.low %v8316_v57, %v8319_v28 }
 0x58a   :  { %10571 = vmatpush1.bf16.msra.mxu0 %v15174_v33  ;;  %v15217_v33 = vcombine.high %v8316_v57, %v8319_v28  ;;  %v8353_v57 = vld [vmem:[#allocation11 + $0x1178] sm:$0xff] }
 0x58b   :  { %10743 = vmatpush1.bf16.msra.mxu1 %v15176_v54  ;;  %10572 = vmatprep.subr.bf16.mxu0 %v15181_v36  ;;  %v8322_v54 = vld [vmem:[#allocation11 + $0xdb0] sm:$0xff]  ;;  %v8356_v28 = vld [vmem:[#allocation11 + $0x11d8] sm:$0xff] }
 0x58c   :  { %10744 = vmatprep.subr.bf16.mxu1 %v15183_v38  ;;  %v8325_v36 = vld [vmem:[#allocation11 + $0xe10] sm:$0xff]  ;;  %v15219_v38 = vcombine.high %v8317_v31, %v8320_v32  ;;  %v15248_v31 = vcombine.low %v8347_v17, %v8350_v18 }
 0x58d   :  { %v15222_v51 = vcombine.low %v8322_v54, %v8325_v36 }
 0x58e   :  { %10573 = vmatpush1.bf16.msra.mxu0 %v15180_v43  ;;  %v15223_v43 = vcombine.high %v8322_v54, %v8325_v36  ;;  %v8361_v54 = vld [vmem:[#allocation11 + $0x1290] sm:$0xff]  ;;  %v8359_v36 = vld [vmem:[#allocation11 + $0x1238] sm:$0xff] }
 0x58f   :  { %10745 = vmatpush1.bf16.msra.mxu1 %v15182_v44  ;;  %10574 = vmatprep.subr.bf16.mxu0 %v15187_v47  ;;  %v15225_v44 = vcombine.high %v8323_v39, %v8326_v40  ;;  %v8328_v47 = vld [vmem:[#allocation11 + $0xe70] sm:$0xff]  ;;  %v15254_v40 = vcombine.low %v8353_v57, %v8356_v28 }
 0x590   :  { %10746 = vmatprep.subr.bf16.mxu1 %v15189_v49  ;;  %v8331_v49 = vld [vmem:[#allocation11 + $0xed0] sm:$0xff] }
 0x591   :  { %v15228_v61 = vcombine.low %v8328_v47, %v8331_v49 }
 0x592   :  { %10575 = vmatpush1.bf16.msra.mxu0 %v15186_v53  ;;  %v15229_v53 = vcombine.high %v8328_v47, %v8331_v49  ;;  %v8365_v47 = vld [vmem:[#allocation11 + $0x12f8] sm:$0xff] }
 0x593   :  { %10747 = vmatpush1.bf16.msra.mxu1 %v15188_v55  ;;  %10576 = vmatprep.subr.bf16.mxu0 %v15193_v56  ;;  %v15231_v55 = vcombine.high %v8329_v22, %v8332_v50  ;;  %v8334_v56 = vld [vmem:[#allocation11 + $0xf30] sm:$0xff]  ;;  %v8368_v49 = vld [vmem:[#allocation11 + $0x1358] sm:$0xff] }
 0x594   :  { %10748 = vmatprep.subr.bf16.mxu1 %v15195_v58  ;;  %v8337_v58 = vld [vmem:[#allocation11 + $0xf90] sm:$0xff] }
 0x595   :  { %v15234_v12 = vcombine.low %v8334_v56, %v8337_v58 }
 0x596   :  { %10577 = vmatpush1.bf16.msra.mxu0 %v15192_v3  ;;  %v15235_v3 = vcombine.high %v8334_v56, %v8337_v58  ;;  %v8371_v56 = vld [vmem:[#allocation11 + $0x13b8] sm:$0xff] }
 0x597   :  { %10749 = vmatpush1.bf16.msra.mxu1 %v15194_v4  ;;  %10578 = vmatprep.subr.bf16.mxu0 %v15199_v5  ;;  %v15237_v4 = vcombine.high %v8335_v59, %v8338_v60  ;;  %v8340_v5 = vld [vmem:[#allocation11 + $0xff0] sm:$0xff]  ;;  %v8374_v58 = vld [vmem:[#allocation11 + $0x1418] sm:$0xff]  ;;  %v15266_v60 = vcombine.low %v8365_v47, %v8368_v49 }
 0x598   :  { %10750 = vmatprep.subr.bf16.mxu1 %v15201_v8  ;;  %v8343_v8 = vld [vmem:[#allocation11 + $0x1050] sm:$0xff] }
 0x599   :  { %v15240_v9 = vcombine.low %v8340_v5, %v8343_v8 }
 0x59a   :  { %10579 = vmatpush1.bf16.msra.mxu0 %v15198_v14  ;;  %v15241_v14 = vcombine.high %v8340_v5, %v8343_v8  ;;  %v8377_v5 = vld [vmem:[#allocation11 + $0x1478] sm:$0xff] }
 0x59b   :  { %10751 = vmatpush1.bf16.msra.mxu1 %v15200_v19  ;;  %10580 = vmatprep.subr.bf16.mxu0 %v15205_v20  ;;  %v15243_v19 = vcombine.high %v8341_v10, %v8344_v11  ;;  %v8346_v20 = vld [vmem:[#allocation11 + $0x10b0] sm:$0xff]  ;;  %v8380_v8 = vld [vmem:[#allocation11 + $0x14d8] sm:$0xff]  ;;  %v15272_v11 = vcombine.low %v8371_v56, %v8374_v58 }
 0x59c   :  { %10752 = vmatprep.subr.bf16.mxu1 %v15207_v16  ;;  %v8349_v16 = vld [vmem:[#allocation11 + $0x1110] sm:$0xff] }
 0x59e   :  { %10581 = vmatpush1.bf16.msra.mxu0 %v15204_v24  ;;  %v15247_v24 = vcombine.high %v8346_v20, %v8349_v16 }
 0x59f   :  { %10753 = vmatpush1.bf16.msra.mxu1 %v15206_v25  ;;  %10593 = vmatprep.subr.bf16.mxu0 %v15211_v26  ;;  %v15249_v25 = vcombine.high %v8347_v17, %v8350_v18  ;;  %v8352_v26 = vld [vmem:[#allocation11 + $0x1170] sm:$0xff]  ;;  %v15278_v18 = vcombine.low %v8377_v5, %v8380_v8 }
 0x5a0   :  { %10765 = vmatprep.subr.bf16.mxu1 %v15213_v27  ;;  %v8355_v27 = vld [vmem:[#allocation11 + $0x11d0] sm:$0xff] }
 0x5a1   :  { %10583 = vmatmul.mubr.bf16.vlgmr.msra.gmra.mrb[24].mxu0 %v16700_v1  ;;  %v15253_v32 = vcombine.high %v8352_v26, %v8355_v27  ;;  %v15252_v39 = vcombine.low %v8352_v26, %v8355_v27  ;;  %v8389_v26 = vld [vmem:[#allocation11 + $0x15f8] sm:$0xff] }
 0x5a2   :  { %10755 = vmatmul.mubr.bf16.vlgmr.msra.gmra.mrb[24].mxu1 %v16700_v1  ;;  %10594 = vmatpush1.bf16.msra.mxu0 %v15210_v29  ;;  %v15246_v29 = vcombine.low %v8346_v20, %v8349_v16  ;;  %v8383_v20 = vld [vmem:[#allocation11 + $0x1538] sm:$0xff] }
 0x5a3   :  { %10625 = vmatprep.mubr.bf16.mxu0 %v16706_v7  ;;  %10766 = vmatpush1.bf16.msra.mxu1 %v15212_v45  ;;  %v15255_v45 = vcombine.high %v8353_v57, %v8356_v28  ;;  %v8386_v16 = vld [vmem:[#allocation11 + $0x1598] sm:$0xff] }
 0x5a4   :  { %10797 = vmatprep.mubr.bf16.mxu1 %v16706_v7  ;;  %10595 = vmatprep.subr.bf16.mxu0 %v15217_v33  ;;  %v8358_v33 = vld [vmem:[#allocation11 + $0x1230] sm:$0xff]  ;;  %v8392_v27 = vld [vmem:[#allocation11 + $0x1658] sm:$0xff]  ;;  %v15284_v28 = vcombine.low %v8383_v20, %v8386_v16 }
 0x5a5   :  { %10767 = vmatprep.subr.bf16.mxu1 %v15219_v38  ;;  %v8362_v38 = vld [vmem:[#allocation11 + $0x1298] sm:$0xff]  ;;  %v15258_v22 = vcombine.low %v8358_v33, %v8361_v54 }
 0x5a6   :  { %10596 = vmatpush1.bf16.msra.mxu0 %v15216_v41  ;;  %v15259_v41 = vcombine.high %v8358_v33, %v8361_v54  ;;  %v15260_v50 = vcombine.low %v8359_v36, %v8362_v38  ;;  %v8395_v33 = vld [vmem:[#allocation11 + $0x16b8] sm:$0xff] }
 0x5a7   :  { %10768 = vmatpush1.bf16.msra.mxu1 %v15218_v42  ;;  %10597 = vmatprep.subr.bf16.mxu0 %v15223_v43  ;;  %v15261_v42 = vcombine.high %v8359_v36, %v8362_v38  ;;  %v8364_v43 = vld [vmem:[#allocation11 + $0x12f0] sm:$0xff]  ;;  %v8398_v54 = vld [vmem:[#allocation11 + $0x1718] sm:$0xff]  ;;  %v15290_v38 = vcombine.low %v8389_v26, %v8392_v27 }
 0x5a8   :  { %10769 = vmatprep.subr.bf16.mxu1 %v15225_v44  ;;  %v8367_v44 = vld [vmem:[#allocation11 + $0x1350] sm:$0xff] }
 0x5a9   :  { %v15264_v59 = vcombine.low %v8364_v43, %v8367_v44 }
 0x5aa   :  { %10598 = vmatpush1.bf16.msra.mxu0 %v15222_v51  ;;  %v15265_v51 = vcombine.high %v8364_v43, %v8367_v44  ;;  %v8401_v43 = vld [vmem:[#allocation11 + $0x1778] sm:$0xff] }
 0x5ab   :  { %10770 = vmatpush1.bf16.msra.mxu1 %v15224_v52  ;;  %10599 = vmatprep.subr.bf16.mxu0 %v15229_v53  ;;  %v15267_v52 = vcombine.high %v8365_v47, %v8368_v49  ;;  %v8370_v53 = vld [vmem:[#allocation11 + $0x13b0] sm:$0xff]  ;;  %v8404_v44 = vld [vmem:[#allocation11 + $0x17d8] sm:$0xff]  ;;  %v15296_v49 = vcombine.low %v8395_v33, %v8398_v54 }
 0x5ac   :  { %10771 = vmatprep.subr.bf16.mxu1 %v15231_v55  ;;  %v8373_v55 = vld [vmem:[#allocation11 + $0x1410] sm:$0xff] }
 0x5ad   :  { %v15270_v10 = vcombine.low %v8370_v53, %v8373_v55 }
 0x5ae   :  { %10600 = vmatpush1.bf16.msra.mxu0 %v15228_v61  ;;  %v15271_v61 = vcombine.high %v8370_v53, %v8373_v55  ;;  %v8407_v53 = vld [vmem:[#allocation11 + $0x1838] sm:$0xff] }
 0x5af   :  { %10772 = vmatpush1.bf16.msra.mxu1 %v15230_v63  ;;  %10601 = vmatprep.subr.bf16.mxu0 %v15235_v3  ;;  %v15273_v63 = vcombine.high %v8371_v56, %v8374_v58  ;;  %v8376_v3 = vld [vmem:[#allocation11 + $0x1470] sm:$0xff]  ;;  %v8410_v55 = vld [vmem:[#allocation11 + $0x1898] sm:$0xff]  ;;  %v15302_v58 = vcombine.low %v8401_v43, %v8404_v44 }
 0x5b0   :  { %10773 = vmatprep.subr.bf16.mxu1 %v15237_v4  ;;  %v8379_v4 = vld [vmem:[#allocation11 + $0x14d0] sm:$0xff] }
 0x5b1   :  { %v15276_v17 = vcombine.low %v8376_v3, %v8379_v4 }
 0x5b2   :  { %10602 = vmatpush1.bf16.msra.mxu0 %v15234_v12  ;;  %v15277_v12 = vcombine.high %v8376_v3, %v8379_v4  ;;  %v8413_v4 = vld [vmem:[#allocation11 + $0x18f8] sm:$0xff] }
 0x5b3   :  { %10774 = vmatpush1.bf16.msra.mxu1 %v15236_v13  ;;  %10603 = vmatprep.subr.bf16.mxu0 %v15241_v14  ;;  %v15279_v13 = vcombine.high %v8377_v5, %v8380_v8  ;;  %v8382_v14 = vld [vmem:[#allocation11 + $0x1530] sm:$0xff]  ;;  %v8416_v5 = vld [vmem:[#allocation11 + $0x1958] sm:$0xff]  ;;  %v15308_v8 = vcombine.low %v8407_v53, %v8410_v55 }
 0x5b4   :  { %10775 = vmatprep.subr.bf16.mxu1 %v15243_v19  ;;  %v8385_v19 = vld [vmem:[#allocation11 + $0x1590] sm:$0xff] }
 0x5b5   :  { %v15282_v57 = vcombine.low %v8382_v14, %v8385_v19 }
 0x5b6   :  { %10604 = vmatpush1.bf16.msra.mxu0 %v15240_v9  ;;  %v15283_v9 = vcombine.high %v8382_v14, %v8385_v19  ;;  %v8419_v14 = vld [vmem:[#allocation11 + $0x19b8] sm:$0xff] }
 0x5b7   :  { %10776 = vmatpush1.bf16.msra.mxu1 %v15242_v23  ;;  %10605 = vmatprep.subr.bf16.mxu0 %v15247_v24  ;;  %v15285_v23 = vcombine.high %v8383_v20, %v8386_v16  ;;  %v8388_v24 = vld [vmem:[#allocation11 + $0x15f0] sm:$0xff]  ;;  %v8422_v19 = vld [vmem:[#allocation11 + $0x1a18] sm:$0xff]  ;;  %v15314_v16 = vcombine.low %v8413_v4, %v8416_v5 }
 0x5b8   :  { %10777 = vmatprep.subr.bf16.mxu1 %v15249_v25  ;;  %v8391_v25 = vld [vmem:[#allocation11 + $0x1650] sm:$0xff] }
 0x5b9   :  { %v15288_v36 = vcombine.low %v8388_v24, %v8391_v25 }
 0x5ba   :  { %10606 = vmatpush1.bf16.msra.mxu0 %v15246_v29  ;;  %v15289_v29 = vcombine.high %v8388_v24, %v8391_v25  ;;  %v8425_v24 = vld [vmem:[#allocation11 + $0x1a78] sm:$0xff] }
 0x5bb   :  { %10778 = vmatpush1.bf16.msra.mxu1 %v15248_v31  ;;  %10607 = vmatprep.subr.bf16.mxu0 %v15253_v32  ;;  %v15291_v31 = vcombine.high %v8389_v26, %v8392_v27  ;;  %v8394_v32 = vld [vmem:[#allocation11 + $0x16b0] sm:$0xff]  ;;  %v8428_v25 = vld [vmem:[#allocation11 + $0x1ad8] sm:$0xff]  ;;  %v15320_v27 = vcombine.low %v8419_v14, %v8422_v19 }
 0x5bc   :  { %10779 = vmatprep.subr.bf16.mxu1 %v15255_v45  ;;  %v8397_v45 = vld [vmem:[#allocation11 + $0x1710] sm:$0xff] }
 0x5bd   :  { %v15294_v47 = vcombine.low %v8394_v32, %v8397_v45 }
 0x5be   :  { %10608 = vmatpush1.bf16.msra.mxu0 %v15252_v39  ;;  %v15295_v39 = vcombine.high %v8394_v32, %v8397_v45  ;;  %v8431_v32 = vld [vmem:[#allocation11 + $0x1b38] sm:$0xff] }
 0x5bf   :  { %10780 = vmatpush1.bf16.msra.mxu1 %v15254_v40  ;;  %10609 = vmatprep.subr.bf16.mxu0 %v15259_v41  ;;  %v15297_v40 = vcombine.high %v8395_v33, %v8398_v54  ;;  %v8400_v41 = vld [vmem:[#allocation11 + $0x1770] sm:$0xff]  ;;  %v8434_v45 = vld [vmem:[#allocation11 + $0x1b98] sm:$0xff]  ;;  %v15326_v54 = vcombine.low %v8425_v24, %v8428_v25 }
 0x5c0   :  { %10781 = vmatprep.subr.bf16.mxu1 %v15261_v42  ;;  %v8403_v42 = vld [vmem:[#allocation11 + $0x17d0] sm:$0xff] }
 0x5c1   :  { %v15300_v56 = vcombine.low %v8400_v41, %v8403_v42 }
 0x5c2   :  { %10610 = vmatpush1.bf16.msra.mxu0 %v15258_v22  ;;  %v15301_v22 = vcombine.high %v8400_v41, %v8403_v42  ;;  %v8437_v41 = vld [vmem:[#allocation11 + $0x1bf8] sm:$0xff] }
 0x5c3   :  { %10782 = vmatpush1.bf16.msra.mxu1 %v15260_v50  ;;  %10611 = vmatprep.subr.bf16.mxu0 %v15265_v51  ;;  %v15303_v50 = vcombine.high %v8401_v43, %v8404_v44  ;;  %v8406_v51 = vld [vmem:[#allocation11 + $0x1830] sm:$0xff]  ;;  %v8440_v42 = vld [vmem:[#allocation11 + $0x1c58] sm:$0xff]  ;;  %v15332_v44 = vcombine.low %v8431_v32, %v8434_v45 }
 0x5c4   :  { %10783 = vmatprep.subr.bf16.mxu1 %v15267_v52  ;;  %v8409_v52 = vld [vmem:[#allocation11 + $0x1890] sm:$0xff] }
 0x5c5   :  { %v15306_v3 = vcombine.low %v8406_v51, %v8409_v52 }
 0x5c6   :  { %10612 = vmatpush1.bf16.msra.mxu0 %v15264_v59  ;;  %v15307_v59 = vcombine.high %v8406_v51, %v8409_v52  ;;  %v8443_v51 = vld [vmem:[#allocation11 + $0x1cb8] sm:$0xff] }
 0x5c7   :  { %10784 = vmatpush1.bf16.msra.mxu1 %v15266_v60  ;;  %10613 = vmatprep.subr.bf16.mxu0 %v15271_v61  ;;  %v15309_v60 = vcombine.high %v8407_v53, %v8410_v55  ;;  %v8412_v61 = vld [vmem:[#allocation11 + $0x18f0] sm:$0xff]  ;;  %v8446_v52 = vld [vmem:[#allocation11 + $0x1d18] sm:$0xff]  ;;  %v15338_v55 = vcombine.low %v8437_v41, %v8440_v42 }
 0x5c8   :  { %10785 = vmatprep.subr.bf16.mxu1 %v15273_v63  ;;  %v8415_v63 = vld [vmem:[#allocation11 + $0x1950] sm:$0xff] }
 0x5c9   :  { %v15312_v20 = vcombine.low %v8412_v61, %v8415_v63 }
 0x5ca   :  { %10614 = vmatpush1.bf16.msra.mxu0 %v15270_v10  ;;  %v15313_v10 = vcombine.high %v8412_v61, %v8415_v63  ;;  %v8449_v61 = vld [vmem:[#allocation11 + $0x1d78] sm:$0xff] }
 0x5cb   :  { %10786 = vmatpush1.bf16.msra.mxu1 %v15272_v11  ;;  %10615 = vmatprep.subr.bf16.mxu0 %v15277_v12  ;;  %v8418_v11 = vld [vmem:[#allocation11 + $0x19b0] sm:$0xff]  ;;  %v8452_v63 = vld [vmem:[#allocation11 + $0x1dd8] sm:$0xff] }
 0x5cc   :  { %10787 = vmatprep.subr.bf16.mxu1 %v15279_v13  ;;  %v8421_v12 = vld [vmem:[#allocation11 + $0x1a10] sm:$0xff]  ;;  %v15315_v13 = vcombine.high %v8413_v4, %v8416_v5  ;;  %v15344_v4 = vcombine.low %v8443_v51, %v8446_v52 }
 0x5cd   :  { %v15318_v26 = vcombine.low %v8418_v11, %v8421_v12 }
 0x5ce   :  { %10616 = vmatpush1.bf16.msra.mxu0 %v15276_v17  ;;  %v15319_v17 = vcombine.high %v8418_v11, %v8421_v12  ;;  %v8457_v11 = vld [vmem:[#allocation11 + $0x1e90] sm:$0xff]  ;;  %v8455_v12 = vld [vmem:[#allocation11 + $0x1e38] sm:$0xff] }
 0x5cf   :  { %10788 = vmatpush1.bf16.msra.mxu1 %v15278_v18  ;;  %10617 = vmatprep.subr.bf16.mxu0 %v15283_v9  ;;  %v15321_v18 = vcombine.high %v8419_v14, %v8422_v19  ;;  %v8424_v9 = vld [vmem:[#allocation11 + $0x1a70] sm:$0xff]  ;;  %v15350_v19 = vcombine.low %v8449_v61, %v8452_v63 }
 0x5d0   :  { %10789 = vmatprep.subr.bf16.mxu1 %v15285_v23  ;;  %v8427_v23 = vld [vmem:[#allocation11 + $0x1ad0] sm:$0xff] }
 0x5d1   :  { %v15324_v33 = vcombine.low %v8424_v9, %v8427_v23 }
 0x5d2   :  { %10618 = vmatpush1.bf16.msra.mxu0 %v15282_v57  ;;  %v15325_v57 = vcombine.high %v8424_v9, %v8427_v23  ;;  %v8461_v9 = vld [vmem:[#allocation11 + $0x1ef8] sm:$0xff] }
 0x5d3   :  { %10790 = vmatpush1.bf16.msra.mxu1 %v15284_v28  ;;  %10619 = vmatprep.subr.bf16.mxu0 %v15289_v29  ;;  %v15327_v28 = vcombine.high %v8425_v24, %v8428_v25  ;;  %v8430_v29 = vld [vmem:[#allocation11 + $0x1b30] sm:$0xff]  ;;  %v8464_v23 = vld [vmem:[#allocation11 + $0x1f58] sm:$0xff] }
 0x5d4   :  { %10791 = vmatprep.subr.bf16.mxu1 %v15291_v31  ;;  %v8433_v31 = vld [vmem:[#allocation11 + $0x1b90] sm:$0xff] }
 0x5d5   :  { %v15330_v43 = vcombine.low %v8430_v29, %v8433_v31 }
 0x5d6   :  { %10620 = vmatpush1.bf16.msra.mxu0 %v15288_v36  ;;  %v15331_v36 = vcombine.high %v8430_v29, %v8433_v31  ;;  %v8467_v29 = vld [vmem:[#allocation11 + $0x1fb8] sm:$0xff] }
 0x5d7   :  { %10792 = vmatpush1.bf16.msra.mxu1 %v15290_v38  ;;  %10621 = vmatprep.subr.bf16.mxu0 %v15295_v39  ;;  %v15333_v38 = vcombine.high %v8431_v32, %v8434_v45  ;;  %v8436_v39 = vld [vmem:[#allocation11 + $0x1bf0] sm:$0xff]  ;;  %v8470_v31 = vld [vmem:[#allocation11 + $0x2018] sm:$0xff]  ;;  %v15362_v45 = vcombine.low %v8461_v9, %v8464_v23 }
 0x5d8   :  { %10793 = vmatprep.subr.bf16.mxu1 %v15297_v40  ;;  %v8439_v40 = vld [vmem:[#allocation11 + $0x1c50] sm:$0xff] }
 0x5d9   :  { %v15336_v53 = vcombine.low %v8436_v39, %v8439_v40 }
 0x5da   :  { %10622 = vmatpush1.bf16.msra.mxu0 %v15294_v47  ;;  %v15337_v47 = vcombine.high %v8436_v39, %v8439_v40  ;;  %v8473_v39 = vld [vmem:[#allocation11 + $0x2078] sm:$0xff] }
 0x5db   :  { %10794 = vmatpush1.bf16.msra.mxu1 %v15296_v49  ;;  %10623 = vmatprep.subr.bf16.mxu0 %v15301_v22  ;;  %v15339_v49 = vcombine.high %v8437_v41, %v8440_v42  ;;  %v8442_v22 = vld [vmem:[#allocation11 + $0x1cb0] sm:$0xff]  ;;  %v8476_v40 = vld [vmem:[#allocation11 + $0x20d8] sm:$0xff]  ;;  %v15368_v42 = vcombine.low %v8467_v29, %v8470_v31 }
 0x5dc   :  { %10795 = vmatprep.subr.bf16.mxu1 %v15303_v50  ;;  %v8445_v50 = vld [vmem:[#allocation11 + $0x1d10] sm:$0xff] }
 0x5de   :  { %10624 = vmatpush1.bf16.msra.mxu0 %v15300_v56  ;;  %v15343_v56 = vcombine.high %v8442_v22, %v8445_v50 }
 0x5df   :  { %10796 = vmatpush1.bf16.msra.mxu1 %v15302_v58  ;;  %10636 = vmatprep.subr.bf16.mxu0 %v15307_v59  ;;  %v15345_v58 = vcombine.high %v8443_v51, %v8446_v52  ;;  %v8448_v59 = vld [vmem:[#allocation11 + $0x1d70] sm:$0xff]  ;;  %v15374_v52 = vcombine.low %v8473_v39, %v8476_v40 }
 0x5e0   :  { %10808 = vmatprep.subr.bf16.mxu1 %v15309_v60  ;;  %v8451_v60 = vld [vmem:[#allocation11 + $0x1dd0] sm:$0xff] }
 0x5e1   :  { %10626 = vmatmul.mubr.bf16.vlgmr.msra.gmra.mrb[24].mxu0 %v16702_v2  ;;  %v15349_v5 = vcombine.high %v8448_v59, %v8451_v60  ;;  %v15348_v14 = vcombine.low %v8448_v59, %v8451_v60  ;;  %v8485_v59 = vld [vmem:[#allocation11 + $0x21f8] sm:$0xff] }
 0x5e2   :  { %10798 = vmatmul.mubr.bf16.vlgmr.msra.gmra.mrb[24].mxu1 %v16702_v2  ;;  %10637 = vmatpush1.bf16.msra.mxu0 %v15306_v3  ;;  %v15342_v3 = vcombine.low %v8442_v22, %v8445_v50  ;;  %v8479_v22 = vld [vmem:[#allocation11 + $0x2138] sm:$0xff] }
 0x5e3   :  { %10668 = vmatprep.mubr.bf16.mxu0 %v16750_v35  ;;  %10809 = vmatpush1.bf16.msra.mxu1 %v15308_v8  ;;  %v15351_v8 = vcombine.high %v8449_v61, %v8452_v63  ;;  %v8482_v50 = vld [vmem:[#allocation11 + $0x2198] sm:$0xff] }
 0x5e4   :  { %10840 = vmatprep.mubr.bf16.mxu1 %v16750_v35  ;;  %10638 = vmatprep.subr.bf16.mxu0 %v15313_v10  ;;  %v8454_v10 = vld [vmem:[#allocation11 + $0x1e30] sm:$0xff]  ;;  %v8488_v60 = vld [vmem:[#allocation11 + $0x2258] sm:$0xff]  ;;  %v15380_v63 = vcombine.low %v8479_v22, %v8482_v50 }
 0x5e5   :  { %10810 = vmatprep.subr.bf16.mxu1 %v15315_v13  ;;  %v8458_v13 = vld [vmem:[#allocation11 + $0x1e98] sm:$0xff]  ;;  %v15354_v24 = vcombine.low %v8454_v10, %v8457_v11 }
 0x5e6   :  { %10639 = vmatpush1.bf16.msra.mxu0 %v15312_v20  ;;  %v15355_v20 = vcombine.high %v8454_v10, %v8457_v11  ;;  %v15356_v25 = vcombine.low %v8455_v12, %v8458_v13  ;;  %v8491_v10 = vld [vmem:[#allocation11 + $0x22b8] sm:$0xff] }
 0x5e7   :  { %10811 = vmatpush1.bf16.msra.mxu1 %v15314_v16  ;;  %10640 = vmatprep.subr.bf16.mxu0 %v15319_v17  ;;  %v15357_v16 = vcombine.high %v8455_v12, %v8458_v13  ;;  %v8460_v17 = vld [vmem:[#allocation11 + $0x1ef0] sm:$0xff]  ;;  %v8494_v11 = vld [vmem:[#allocation11 + $0x2318] sm:$0xff]  ;;  %v15386_v13 = vcombine.low %v8485_v59, %v8488_v60 }
 0x5e8   :  { %10812 = vmatprep.subr.bf16.mxu1 %v15321_v18  ;;  %v8463_v18 = vld [vmem:[#allocation11 + $0x1f50] sm:$0xff] }
 0x5e9   :  { %v15360_v32 = vcombine.low %v8460_v17, %v8463_v18 }
 0x5ea   :  { %10641 = vmatpush1.bf16.msra.mxu0 %v15318_v26  ;;  %v15361_v26 = vcombine.high %v8460_v17, %v8463_v18  ;;  %v8497_v17 = vld [vmem:[#allocation11 + $0x2378] sm:$0xff] }
 0x5eb   :  { %10813 = vmatpush1.bf16.msra.mxu1 %v15320_v27  ;;  %10642 = vmatprep.subr.bf16.mxu0 %v15325_v57  ;;  %v15363_v27 = vcombine.high %v8461_v9, %v8464_v23  ;;  %v8466_v57 = vld [vmem:[#allocation11 + $0x1fb0] sm:$0xff]  ;;  %v8500_v18 = vld [vmem:[#allocation11 + $0x23d8] sm:$0xff]  ;;  %v15392_v23 = vcombine.low %v8491_v10, %v8494_v11 }
 0x5ec   :  { %10814 = vmatprep.subr.bf16.mxu1 %v15327_v28  ;;  %v8469_v28 = vld [vmem:[#allocation11 + $0x2010] sm:$0xff] }
 0x5ed   :  { %v15366_v41 = vcombine.low %v8466_v57, %v8469_v28 }
 0x5ee   :  { %10643 = vmatpush1.bf16.msra.mxu0 %v15324_v33  ;;  %v15367_v33 = vcombine.high %v8466_v57, %v8469_v28  ;;  %v8503_v57 = vld [vmem:[#allocation11 + $0x2438] sm:$0xff] }
 0x5ef   :  { %10815 = vmatpush1.bf16.msra.mxu1 %v15326_v54  ;;  %10644 = vmatprep.subr.bf16.mxu0 %v15331_v36  ;;  %v15369_v54 = vcombine.high %v8467_v29, %v8470_v31  ;;  %v8472_v36 = vld [vmem:[#allocation11 + $0x2070] sm:$0xff]  ;;  %v8506_v28 = vld [vmem:[#allocation11 + $0x2498] sm:$0xff]  ;;  %v15398_v31 = vcombine.low %v8497_v17, %v8500_v18 }
 0x5f0   :  { %10816 = vmatprep.subr.bf16.mxu1 %v15333_v38  ;;  %v8475_v38 = vld [vmem:[#allocation11 + $0x20d0] sm:$0xff] }
 0x5f1   :  { %v15372_v51 = vcombine.low %v8472_v36, %v8475_v38 }
 0x5f2   :  { %10645 = vmatpush1.bf16.msra.mxu0 %v15330_v43  ;;  %v15373_v43 = vcombine.high %v8472_v36, %v8475_v38  ;;  %v8509_v38 = vld [vmem:[#allocation11 + $0x24f8] sm:$0xff] }
 0x5f3   :  { %10817 = vmatpush1.bf16.msra.mxu1 %v15332_v44  ;;  %10646 = vmatprep.subr.bf16.mxu0 %v15337_v47  ;;  %v15375_v44 = vcombine.high %v8473_v39, %v8476_v40  ;;  %v8478_v47 = vld [vmem:[#allocation11 + $0x2130] sm:$0xff]  ;;  %v8512_v39 = vld [vmem:[#allocation11 + $0x2558] sm:$0xff]  ;;  %v15404_v40 = vcombine.low %v8503_v57, %v8506_v28 }
 0x5f4   :  { %10818 = vmatprep.subr.bf16.mxu1 %v15339_v49  ;;  %v8481_v49 = vld [vmem:[#allocation11 + $0x2190] sm:$0xff] }
 0x5f5   :  { %v15378_v61 = vcombine.low %v8478_v47, %v8481_v49 }
 0x5f6   :  { %10647 = vmatpush1.bf16.msra.mxu0 %v15336_v53  ;;  %v15379_v53 = vcombine.high %v8478_v47, %v8481_v49  ;;  %v8515_v47 = vld [vmem:[#allocation11 + $0x25b8] sm:$0xff] }
 0x5f7   :  { %10819 = vmatpush1.bf16.msra.mxu1 %v15338_v55  ;;  %10648 = vmatprep.subr.bf16.mxu0 %v15343_v56  ;;  %v15381_v55 = vcombine.high %v8479_v22, %v8482_v50  ;;  %v8484_v56 = vld [vmem:[#allocation11 + $0x21f0] sm:$0xff]  ;;  %v8518_v49 = vld [vmem:[#allocation11 + $0x2618] sm:$0xff]  ;;  %v15410_v50 = vcombine.low %v8509_v38, %v8512_v39 }
 0x5f8   :  { %10820 = vmatprep.subr.bf16.mxu1 %v15345_v58  ;;  %v8487_v58 = vld [vmem:[#allocation11 + $0x2250] sm:$0xff] }
 0x5f9   :  { %v15384_v12 = vcombine.low %v8484_v56, %v8487_v58 }
 0x5fa   :  { %10649 = vmatpush1.bf16.msra.mxu0 %v15342_v3  ;;  %v15385_v3 = vcombine.high %v8484_v56, %v8487_v58  ;;  %v8521_v56 = vld [vmem:[#allocation11 + $0x2678] sm:$0xff] }
 0x5fb   :  { %10821 = vmatpush1.bf16.msra.mxu1 %v15344_v4  ;;  %10650 = vmatprep.subr.bf16.mxu0 %v15349_v5  ;;  %v15387_v4 = vcombine.high %v8485_v59, %v8488_v60  ;;  %v8490_v5 = vld [vmem:[#allocation11 + $0x22b0] sm:$0xff]  ;;  %v8524_v58 = vld [vmem:[#allocation11 + $0x26d8] sm:$0xff]  ;;  %v15416_v60 = vcombine.low %v8515_v47, %v8518_v49 }
 0x5fc   :  { %10822 = vmatprep.subr.bf16.mxu1 %v15351_v8  ;;  %v8493_v8 = vld [vmem:[#allocation11 + $0x2310] sm:$0xff] }
 0x5fd   :  { %v15390_v9 = vcombine.low %v8490_v5, %v8493_v8 }
 0x5fe   :  { %10651 = vmatpush1.bf16.msra.mxu0 %v15348_v14  ;;  %v15391_v14 = vcombine.high %v8490_v5, %v8493_v8  ;;  %v8527_v5 = vld [vmem:[#allocation11 + $0x2738] sm:$0xff] }
 0x5ff   :  { %10823 = vmatpush1.bf16.msra.mxu1 %v15350_v19  ;;  %10652 = vmatprep.subr.bf16.mxu0 %v15355_v20  ;;  %v15393_v19 = vcombine.high %v8491_v10, %v8494_v11  ;;  %v8496_v20 = vld [vmem:[#allocation11 + $0x2370] sm:$0xff]  ;;  %v8530_v8 = vld [vmem:[#allocation11 + $0x2798] sm:$0xff]  ;;  %v15422_v11 = vcombine.low %v8521_v56, %v8524_v58 }
 0x600   :  { %10824 = vmatprep.subr.bf16.mxu1 %v15357_v16  ;;  %v8499_v16 = vld [vmem:[#allocation11 + $0x23d0] sm:$0xff] }
 0x601   :  { %v15396_v29 = vcombine.low %v8496_v20, %v8499_v16 }
 0x602   :  { %10653 = vmatpush1.bf16.msra.mxu0 %v15354_v24  ;;  %v15397_v24 = vcombine.high %v8496_v20, %v8499_v16  ;;  %v8533_v20 = vld [vmem:[#allocation11 + $0x27f8] sm:$0xff] }
 0x603   :  { %10825 = vmatpush1.bf16.msra.mxu1 %v15356_v25  ;;  %10654 = vmatprep.subr.bf16.mxu0 %v15361_v26  ;;  %v15399_v25 = vcombine.high %v8497_v17, %v8500_v18  ;;  %v8502_v26 = vld [vmem:[#allocation11 + $0x2430] sm:$0xff]  ;;  %v8536_v16 = vld [vmem:[#allocation11 + $0x2858] sm:$0xff]  ;;  %v15428_v18 = vcombine.low %v8527_v5, %v8530_v8 }
 0x604   :  { %10826 = vmatprep.subr.bf16.mxu1 %v15363_v27  ;;  %v8505_v27 = vld [vmem:[#allocation11 + $0x2490] sm:$0xff] }
 0x605   :  { %v15402_v36 = vcombine.low %v8502_v26, %v8505_v27 }
 0x606   :  { %10655 = vmatpush1.bf16.msra.mxu0 %v15360_v32  ;;  %v15403_v32 = vcombine.high %v8502_v26, %v8505_v27  ;;  %v16304_v26 = vld [vmem:[#allocation13 + $0x6] sm:$0x3f] }
 0x607   :  { %10827 = vmatpush1.bf16.msra.mxu1 %v15362_v45  ;;  %10656 = vmatprep.subr.bf16.mxu0 %v15367_v33  ;;  %v15405_v45 = vcombine.high %v8503_v57, %v8506_v28  ;;  %v8508_v33 = vld [vmem:[#allocation11 + $0x24f0] sm:$0xff]  ;;  %v5705_v27 = vrot.slane %v16304_v26, %v16647_v62  ;;  %v8539_v57 = vld [vmem:[#allocation11 + $0x28b8] sm:$0xff] }
 0x608   :  { %10828 = vmatprep.subr.bf16.mxu1 %v15369_v54  ;;  %v8511_v54 = vld [vmem:[#allocation11 + $0x2550] sm:$0xff]  ;;  %v8542_v28 = vld [vmem:[#allocation11 + $0x2918] sm:$0xff] }
 0x609   :  { %v15408_v22 = vcombine.low %v8508_v33, %v8511_v54 }
 0x60a   :  { %10657 = vmatpush1.bf16.msra.mxu0 %v15366_v41  ;;  %v15409_v41 = vcombine.high %v8508_v33, %v8511_v54  ;;  %v15434_v33 = vcombine.low %v8533_v20, %v8536_v16 }
 0x60b   :  { %10829 = vmatpush1.bf16.msra.mxu1 %v15368_v42  ;;  %10658 = vmatprep.subr.bf16.mxu0 %v15373_v43  ;;  %v8514_v42 = vld [vmem:[#allocation11 + $0x25b0] sm:$0xff] }
 0x60c   :  { %10830 = vmatprep.subr.bf16.mxu1 %v15375_v44  ;;  %v8517_v43 = vld [vmem:[#allocation11 + $0x2610] sm:$0xff]  ;;  %v15411_v44 = vcombine.high %v8509_v38, %v8512_v39  ;;  %v15441_v38 = vcombine.high %v8539_v57, %v8542_v28 }
 0x60d   :  { %v15414_v59 = vcombine.low %v8514_v42, %v8517_v43  ;;  %v8544_v39 = vld [vmem:[#allocation11 + $0x2970] sm:$0xff] }
 0x60e   :  { %10659 = vmatpush1.bf16.msra.mxu0 %v15372_v51  ;;  %v15415_v51 = vcombine.high %v8514_v42, %v8517_v43 }
 0x60f   :  { %10831 = vmatpush1.bf16.msra.mxu1 %v15374_v52  ;;  %10660 = vmatprep.subr.bf16.mxu0 %v15379_v53  ;;  %v15417_v52 = vcombine.high %v8515_v47, %v8518_v49  ;;  %v8520_v53 = vld [vmem:[#allocation11 + $0x2670] sm:$0xff]  ;;  %v8548_v47 = vld [vmem:[#allocation11 + $0x29d8] sm:$0xff] }
 0x610   :  { %10832 = vmatprep.subr.bf16.mxu1 %v15381_v55  ;;  %v8523_v55 = vld [vmem:[#allocation11 + $0x26d0] sm:$0xff] }
 0x611   :  { %v15420_v10 = vcombine.low %v8520_v53, %v8523_v55 }
 0x612   :  { %10661 = vmatpush1.bf16.msra.mxu0 %v15378_v61  ;;  %v15421_v61 = vcombine.high %v8520_v53, %v8523_v55  ;;  %v15440_v53 = vcombine.low %v8539_v57, %v8542_v28  ;;  %v8565_v57 = vld [vmem:[#allocation11 + $0x2c10] sm:$0xff] }
 0x613   :  { %10833 = vmatpush1.bf16.msra.mxu1 %v15380_v63  ;;  %10662 = vmatprep.subr.bf16.mxu0 %v15385_v3  ;;  %v15423_v63 = vcombine.high %v8521_v56, %v8524_v58  ;;  %v8526_v3 = vld [vmem:[#allocation11 + $0x2730] sm:$0xff] }
 0x614   :  { %10834 = vmatprep.subr.bf16.mxu1 %v15387_v4  ;;  %v8529_v4 = vld [vmem:[#allocation11 + $0x2790] sm:$0xff] }
 0x615   :  { %v15426_v17 = vcombine.low %v8526_v3, %v8529_v4 }
 0x616   :  { %10663 = vmatpush1.bf16.msra.mxu0 %v15384_v12  ;;  %v15427_v12 = vcombine.high %v8526_v3, %v8529_v4  ;;  %v8550_v4 = vld [vmem:[#allocation11 + $0x2a30] sm:$0xff] }
 0x617   :  { %10835 = vmatpush1.bf16.msra.mxu1 %v15386_v13  ;;  %10664 = vmatprep.subr.bf16.mxu0 %v15391_v14  ;;  %v15429_v13 = vcombine.high %v8527_v5, %v8530_v8  ;;  %v8532_v14 = vld [vmem:[#allocation11 + $0x27f0] sm:$0xff] }
 0x618   :  { %10836 = vmatprep.subr.bf16.mxu1 %v15393_v19  ;;  %v8535_v19 = vld [vmem:[#allocation11 + $0x2850] sm:$0xff] }
 0x619   :  { %v8553_v5 = vld [vmem:[#allocation11 + $0x2a90] sm:$0xff] }
 0x61a   :  { %10665 = vmatpush1.bf16.msra.mxu0 %v15390_v9  ;;  %v15433_v9 = vcombine.high %v8532_v14, %v8535_v19 }
 0x61b   :  { %10837 = vmatpush1.bf16.msra.mxu1 %v15392_v23  ;;  %10666 = vmatprep.subr.bf16.mxu0 %v15397_v24  ;;  %v15435_v23 = vcombine.high %v8533_v20, %v8536_v16  ;;  %v8538_v24 = vld [vmem:[#allocation11 + $0x28b0] sm:$0xff] }
 0x61c   :  { %10838 = vmatprep.subr.bf16.mxu1 %v15399_v25  ;;  %v8541_v25 = vld [vmem:[#allocation11 + $0x2910] sm:$0xff] }
 0x61d   :  { %v15439_v54 = vcombine.high %v8538_v24, %v8541_v25  ;;  %v8556_v16 = vld [vmem:[#allocation11 + $0x2af0] sm:$0xff] }
 0x61e   :  { %10667 = vmatpush1.bf16.msra.mxu0 %v15396_v29  ;;  %v5713_v29 = vrot.slane %v16304_v26, %v16721_v15 }
 0x61f   :  { %10839 = vmatpush1.bf16.msra.mxu1 %v15398_v31  ;;  %10679 = vmatprep.subr.bf16.mxu0 %v15403_v32  ;;  %v5709_v31 = vrot.slane %v16304_v26, %v16650_v0  ;;  %v15432_v32 = vcombine.low %v8532_v14, %v8535_v19  ;;  %v15451_v19 = vcombine.high %v8550_v4, %v8553_v5 }
 0x620   :  { %10851 = vmatprep.subr.bf16.mxu1 %v15405_v45  ;;  %v5717_v45 = vrot.slane %v16304_v26, %v16725_v21 }
 0x621   :  { %10669 = vmatmul.mubr.bf16.vlgmr.msra.gmra.mrb[24].mxu0 %v16745_v30 }
 0x622   :  { %10841 = vmatmul.mubr.bf16.vlgmr.msra.gmra.mrb[24].mxu1 %v16745_v30  ;;  %10680 = vmatpush1.bf16.msra.mxu0 %v15402_v36 }
 0x623   :  { %10711 = vmatprep.mubr.bf16.mxu0 %v16752_v37  ;;  %10852 = vmatpush1.bf16.msra.mxu1 %v15404_v40  ;;  %v8547_v40 = vld [vmem:[#allocation11 + $0x29d0] sm:$0xff] }
 0x624   :  { %10883 = vmatprep.mubr.bf16.mxu1 %v16752_v37  ;;  %10681 = vmatprep.subr.bf16.mxu0 %v15409_v41 }
 0x625   :  { %10853 = vmatprep.subr.bf16.mxu1 %v15411_v44  ;;  %v8545_v44 = vld [vmem:[#allocation11 + $0x2978] sm:$0xff] }
 0x626   :  { %10682 = vmatpush1.bf16.msra.mxu0 %v15408_v22  ;;  %v15447_v3 = vcombine.high %v8545_v44, %v8548_v47  ;;  %v15446_v14 = vcombine.low %v8545_v44, %v8548_v47  ;;  %v8569_v47 = vld [vmem:[#allocation11 + $0x2c78] sm:$0xff] }
 0x627   :  { %10854 = vmatpush1.bf16.msra.mxu1 %v15410_v50  ;;  %10683 = vmatprep.subr.bf16.mxu0 %v15415_v51 }
 0x628   :  { %10855 = vmatprep.subr.bf16.mxu1 %v15417_v52  ;;  %v15438_v52 = vcombine.low %v8538_v24, %v8541_v25 }
 0x62a   :  { %10684 = vmatpush1.bf16.msra.mxu0 %v15414_v59 }
 0x62b   :  { %10856 = vmatpush1.bf16.msra.mxu1 %v15416_v60  ;;  %10685 = vmatprep.subr.bf16.mxu0 %v15421_v61  ;;  %v15445_v60 = vcombine.high %v8544_v39, %v8547_v40 }
 0x62c   :  { %10857 = vmatprep.subr.bf16.mxu1 %v15423_v63 }
 0x62e   :  { %10686 = vmatpush1.bf16.msra.mxu0 %v15420_v10  ;;  %v8551_v10 = vld [vmem:[#allocation11 + $0x2a38] sm:$0xff] }
 0x62f   :  { %10858 = vmatpush1.bf16.msra.mxu1 %v15422_v11  ;;  %10687 = vmatprep.subr.bf16.mxu0 %v15427_v12  ;;  %v8554_v11 = vld [vmem:[#allocation11 + $0x2a98] sm:$0xff] }
 0x630   :  { %10859 = vmatprep.subr.bf16.mxu1 %v15429_v13  ;;  %v15444_v13 = vcombine.low %v8544_v39, %v8547_v40  ;;  %v15453_v20 = vcombine.high %v8551_v10, %v8554_v11  ;;  %v15452_v24 = vcombine.low %v8551_v10, %v8554_v11  ;;  %v8580_v11 = vld [vmem:[#allocation11 + $0x2df0] sm:$0xff] }
 0x632   :  { %10688 = vmatpush1.bf16.msra.mxu0 %v15426_v17  ;;  %v8559_v17 = vld [vmem:[#allocation11 + $0x2b50] sm:$0xff] }
 0x633   :  { %10860 = vmatpush1.bf16.msra.mxu1 %v15428_v18  ;;  %10689 = vmatprep.subr.bf16.mxu0 %v15433_v9  ;;  %v8557_v18 = vld [vmem:[#allocation11 + $0x2af8] sm:$0xff]  ;;  %v15457_v25 = vcombine.high %v8556_v16, %v8559_v17 }
 0x634   :  { %v7979_v36 = vpop.f32.mrb[20].mxu0  ;;  %10861 = vmatprep.subr.bf16.mxu1 %v15435_v23  ;;  %v8560_v9 = vld [vmem:[#allocation11 + $0x2b58] sm:$0xff]  ;;  %v15450_v23 = vcombine.low %v8550_v4, %v8553_v5 }
 0x635   :  { %v15950_v41 = vadd.f32 %v7979_v36, %v5705_v27  ;;  %v8151_v42 = vpop.f32.mrb[20].mxu1  ;;  %v7981_v43 = vpop.f32.mrb[21].mxu0  ;;  %v15459_v26 = vcombine.high %v8557_v18, %v8560_v9 }
 0x636   :  { %v15954_v49 = vadd.f32 %v8151_v42, %v5713_v29  ;;  %v15951_v22 = vadd.f32 %v7981_v43, %v5709_v31  ;;  %v8153_v50 = vpop.f32.mrb[21].mxu1  ;;  %v7983_v51 = vpop.f32.mrb[22].mxu0  ;;  %10690 = vmatpush1.bf16.msra.mxu0 %v15432_v32  ;;  %v8571_v42 = vld [vmem:[#allocation11 + $0x2cd0] sm:$0xff] }
 0x637   :  { %16239 = vtanh.f32 %v15950_v41  ;;  %v15955_v55 = vadd.f32 %v8153_v50, %v5717_v45  ;;  %v15952_v56 = vadd.f32 %v7983_v51, %v5705_v27  ;;  %v8155_v58 = vpop.f32.mrb[22].mxu1  ;;  %10862 = vmatpush1.bf16.msra.mxu1 %v15434_v33  ;;  %v7985_v59 = vpop.f32.mrb[23].mxu0  ;;  %10691 = vmatprep.subr.bf16.mxu0 %v15439_v54  ;;  %v8562_v27 = vld [vmem:[#allocation11 + $0x2bb0] sm:$0xff]  ;;  %v15458_v54 = vcombine.low %v8557_v18, %v8560_v9 }
 0x638   :  { %16241 = vtanh.f32 %v15954_v49  ;;  %v15956_v61 = vadd.f32 %v8155_v58, %v5713_v29  ;;  %v8157_v63 = vpop.f32.mrb[23].mxu1  ;;  %10863 = vmatprep.subr.bf16.mxu1 %v15441_v38  ;;  %v15953_v8 = vadd.f32 %v7985_v59, %v5709_v31  ;;  %v8563_v29 = vld [vmem:[#allocation11 + $0x2bb8] sm:$0xff]  ;;  %v15463_v36 = vcombine.high %v8562_v27, %v8565_v57  ;;  %v8568_v41 = vld [vmem:[#allocation11 + $0x2c70] sm:$0xff] }
 0x639   :  { %16243 = vtanh.f32 %v15951_v22  ;;  %v15957_v12 = vadd.f32 %v8157_v63, %v5717_v45  ;;  %v8566_v31 = vld [vmem:[#allocation11 + $0x2c18] sm:$0xff]  ;;  %v15456_v45 = vcombine.low %v8556_v16, %v8559_v17  ;;  %v15462_v50 = vcombine.low %v8562_v27, %v8565_v57  ;;  %v8574_v59 = vld [vmem:[#allocation11 + $0x2d30] sm:$0xff] }
 0x63a   :  { %16245 = vtanh.f32 %v15955_v55  ;;  %10692 = vmatpush1.bf16.msra.mxu0 %v15438_v52  ;;  %v15465_v40 = vcombine.high %v8563_v29, %v8566_v31  ;;  %v8572_v49 = vld [vmem:[#allocation11 + $0x2cd8] sm:$0xff]  ;;  %v15464_v52 = vcombine.low %v8563_v29, %v8566_v31  ;;  %v15468_v4 = vcombine.low %v8568_v41, %v8571_v42  ;;  %v8586_v18 = vld [vmem:[#allocation11 + $0x2eb0] sm:$0xff] }
 0x63b   :  { %16247 = vtanh.f32 %v15952_v56  ;;  %10864 = vmatpush1.bf16.msra.mxu1 %v15440_v53  ;;  %10693 = vmatprep.subr.bf16.mxu0 %v15445_v60  ;;  %v15469_v53 = vcombine.high %v8568_v41, %v8571_v42  ;;  %v15471_v58 = vcombine.high %v8569_v47, %v8572_v49  ;;  %v8577_v60 = vld [vmem:[#allocation11 + $0x2d90] sm:$0xff]  ;;  %v8575_v63 = vld [vmem:[#allocation11 + $0x2d38] sm:$0xff]  ;;  %v15470_v5 = vcombine.low %v8569_v47, %v8572_v49  ;;  %v11123_v41 = vld [vmem:[#allocation11 + $0xa8] sm:$0xff] }
 0x63c   :  { %16249 = vtanh.f32 %v15956_v61  ;;  %10865 = vmatprep.subr.bf16.mxu1 %v15447_v3  ;;  %v8578_v3 = vld [vmem:[#allocation11 + $0x2d98] sm:$0xff]  ;;  %v8589_v9 = vld [vmem:[#allocation11 + $0x2f10] sm:$0xff]  ;;  %v8222_v49 = vld [vmem:[#allocation11 + $0x100] sm:$0xff] }
 0x63d   :  { %16251 = vtanh.f32 %v15953_v8  ;;  %v15475_v8 = vcombine.high %v8574_v59, %v8577_v60  ;;  %v15477_v10 = vcombine.high %v8575_v63, %v8578_v3  ;;  %v15487_v27 = vcombine.high %v8586_v18, %v8589_v9  ;;  %v8595_v29 = vld [vmem:[#allocation11 + $0x2fd0] sm:$0xff]  ;;  %v8593_v31 = vld [vmem:[#allocation11 + $0x2f78] sm:$0xff] }
 0x63e   :  { %16253 = vtanh.f32 %v15957_v12  ;;  %10694 = vmatpush1.bf16.msra.mxu0 %v15444_v13  ;;  %v8583_v12 = vld [vmem:[#allocation11 + $0x2e50] sm:$0xff]  ;;  %v8581_v13 = vld [vmem:[#allocation11 + $0x2df8] sm:$0xff] }
 0x63f   :  { %10866 = vmatpush1.bf16.msra.mxu1 %v15446_v14  ;;  %10695 = vmatprep.subr.bf16.mxu0 %v15451_v19  ;;  %v8584_v14 = vld [vmem:[#allocation11 + $0x2e58] sm:$0xff]  ;;  %v15474_v19 = vcombine.low %v8574_v59, %v8577_v60  ;;  %v15481_v16 = vcombine.high %v8580_v11, %v8583_v12  ;;  %v11132_v60 = vld [vmem:[#allocation11 + $0x1c8] sm:$0xff] }
 0x640   :  { %10867 = vmatprep.subr.bf16.mxu1 %v15453_v20  ;;  %v15476_v20 = vcombine.low %v8575_v63, %v8578_v3  ;;  %v15483_v17 = vcombine.high %v8581_v13, %v8584_v14 }
 0x641   :  { %v16240_v28 = vpop.eup %16239 }
 0x642   :  { %v16242_v32 = vpop.eup %16241  ;;  %10696 = vmatpush1.bf16.msra.mxu0 %v15450_v23  ;;  %v8587_v23 = vld [vmem:[#allocation11 + $0x2eb8] sm:$0xff] }
 0x643   :  { %v16244_v33 = vpop.eup %16243  ;;  %10868 = vmatpush1.bf16.msra.mxu1 %v15452_v24  ;;  %10697 = vmatprep.subr.bf16.mxu0 %v15457_v25  ;;  %v8590_v24 = vld [vmem:[#allocation11 + $0x2f18] sm:$0xff]  ;;  %v15480_v25 = vcombine.low %v8580_v11, %v8583_v12  ;;  %v11138_v11 = vld [vmem:[#allocation11 + $0x288] sm:$0xff] }
 0x644   :  { %v16246_v38 = vpop.eup %16245  ;;  %v15901_v39 = vpack.c.bf16 %v16244_v33, %v16240_v28  ;;  %10869 = vmatprep.subr.bf16.mxu1 %v15459_v26  ;;  %v15482_v26 = vcombine.low %v8581_v13, %v8584_v14  ;;  %v15489_v57 = vcombine.high %v8587_v23, %v8590_v24  ;;  %v8592_v28 = vld [vmem:[#allocation11 + $0x2f70] sm:$0xff]  ;;  %v15488_v33 = vcombine.low %v8587_v23, %v8590_v24  ;;  %v11141_v12 = vld [vmem:[#allocation11 + $0x2e8] sm:$0xff] }
 0x645   :  { %v16248_v43 = vpop.eup %16247  ;;  %v15902_v44 = vpack.c.bf16 %v16246_v38, %v16242_v32  ;;  %v8596_v32 = vld [vmem:[#allocation11 + $0x2fd8] sm:$0xff]  ;;  %v8216_v38 = vld [vmem:[#allocation11 + $0x40] sm:$0xff]  ;;  %v15492_v42 = vcombine.low %v8592_v28, %v8595_v29  ;;  %v15522_v24 = vcombine.low %v11138_v11, %v11141_v12 }
 0x646   :  { %v16250_v22 = vpop.eup %16249  ;;  %8209 = vst [vmem:[#allocation14 + $0x20] sm:$0xff] %v15901_v39  ;;  %10698 = vmatpush1.bf16.msra.mxu0 %v15456_v45  ;;  %v15486_v45 = vcombine.low %v8586_v18, %v8589_v9  ;;  %v8219_v39 = vld [vmem:[#allocation11 + $0xa0] sm:$0xff]  ;;  %v11144_v18 = vld [vmem:[#allocation11 + $0x348] sm:$0xff] }
 0x647   :  { %v16252_v51 = vpop.eup %16251  ;;  %8210 = vst [vmem:[#allocation14 + $0x28] sm:$0xff] %v15902_v44  ;;  %10870 = vmatpush1.bf16.msra.mxu1 %v15458_v54  ;;  %10699 = vmatprep.subr.bf16.mxu0 %v15463_v36  ;;  %v15493_v54 = vcombine.high %v8592_v28, %v8595_v29  ;;  %v15495_v36 = vcombine.high %v8593_v31, %v8596_v32  ;;  %v11147_v9 = vld [vmem:[#allocation11 + $0x3a8] sm:$0xff] }
 0x648   :  { %v16254_v55 = vpop.eup %16253  ;;  %v15904_v56 = vpack.c.bf16 %v16252_v51, %v16248_v43  ;;  %10871 = vmatprep.subr.bf16.mxu1 %v15465_v40  ;;  %v11120_v40 = vld [vmem:[#allocation11 + $0x48] sm:$0xff]  ;;  %v15494_v43 = vcombine.low %v8593_v31, %v8596_v32  ;;  %v15119_v44 = vcombine.high %v8216_v38, %v8219_v39  ;;  %v15528_v32 = vcombine.low %v11144_v18, %v11147_v9 }
 0x649   :  { %v15905_v61 = vpack.c.bf16 %v16254_v55, %v16250_v22  ;;  %v15505_v47 = vcombine.high %v11120_v40, %v11123_v41  ;;  %v8225_v22 = vld [vmem:[#allocation11 + $0x160] sm:$0xff]  ;;  %v11126_v51 = vld [vmem:[#allocation11 + $0x108] sm:$0xff] }
 0x64a   :  { %8212 = vst [vmem:[#allocation14 + $0x80] sm:$0xff] %v15904_v56  ;;  %10700 = vmatpush1.bf16.msra.mxu0 %v15462_v50  ;;  %v15118_v50 = vcombine.low %v8216_v38, %v8219_v39  ;;  %v15125_v55 = vcombine.high %v8222_v49, %v8225_v22  ;;  %v8228_v56 = vld [vmem:[#allocation11 + $0x1c0] sm:$0xff]  ;;  %v15124_v63 = vcombine.low %v8222_v49, %v8225_v22  ;;  %v11150_v28 = vld [vmem:[#allocation11 + $0x408] sm:$0xff] }
 0x64b   :  { %8213 = vst [vmem:[#allocation14 + $0x88] sm:$0xff] %v15905_v61  ;;  %10872 = vmatpush1.bf16.msra.mxu1 %v15464_v52  ;;  %10701 = vmatprep.subr.bf16.mxu0 %v15469_v53  ;;  %v11129_v52 = vld [vmem:[#allocation11 + $0x168] sm:$0xff]  ;;  %v15504_v53 = vcombine.low %v11120_v40, %v11123_v41 }
 0x64c   :  { %10873 = vmatprep.subr.bf16.mxu1 %v15471_v58  ;;  %v8231_v58 = vld [vmem:[#allocation11 + $0x220] sm:$0xff]  ;;  %v15511_v59 = vcombine.high %v11126_v51, %v11129_v52  ;;  %v11135_v61 = vld [vmem:[#allocation11 + $0x228] sm:$0xff]  ;;  %v15510_v3 = vcombine.low %v11126_v51, %v11129_v52 }
 0x64d   :  { %v15130_v13 = vcombine.low %v8228_v56, %v8231_v58  ;;  %v15516_v14 = vcombine.low %v11132_v60, %v11135_v61  ;;  %v11153_v29 = vld [vmem:[#allocation11 + $0x468] sm:$0xff] }
 0x64e   :  { %10702 = vmatpush1.bf16.msra.mxu0 %v15468_v4  ;;  %v15131_v4 = vcombine.high %v8228_v56, %v8231_v58  ;;  %v11156_v38 = vld [vmem:[#allocation11 + $0x4c8] sm:$0xff]  ;;  %v15534_v41 = vcombine.low %v11150_v28, %v11153_v29  ;;  %v8267_v56 = vld [vmem:[#allocation11 + $0x6a0] sm:$0xff] }
 0x64f   :  { %10874 = vmatpush1.bf16.msra.mxu1 %v15470_v5  ;;  %10703 = vmatprep.subr.bf16.mxu0 %v15475_v8  ;;  %v15517_v5 = vcombine.high %v11132_v60, %v11135_v61  ;;  %v8234_v8 = vld [vmem:[#allocation11 + $0x280] sm:$0xff]  ;;  %v11159_v39 = vld [vmem:[#allocation11 + $0x528] sm:$0xff] }
 0x650   :  { %10875 = vmatprep.subr.bf16.mxu1 %v15477_v10  ;;  %v8237_v10 = vld [vmem:[#allocation11 + $0x2e0] sm:$0xff]  ;;  %v11162_v49 = vld [vmem:[#allocation11 + $0x588] sm:$0xff]  ;;  %v15540_v51 = vcombine.low %v11156_v38, %v11159_v39 }
 0x651   :  { %v15136_v23 = vcombine.low %v8234_v8, %v8237_v10  ;;  %v11165_v22 = vld [vmem:[#allocation11 + $0x5e8] sm:$0xff] }
 0x652   :  { %10704 = vmatpush1.bf16.msra.mxu0 %v15474_v19  ;;  %v15137_v19 = vcombine.high %v8234_v8, %v8237_v10  ;;  %v11168_v58 = vld [vmem:[#allocation11 + $0x648] sm:$0xff]  ;;  %v15546_v61 = vcombine.low %v11162_v49, %v11165_v22 }
 0x653   :  { %10876 = vmatpush1.bf16.msra.mxu1 %v15476_v20  ;;  %10705 = vmatprep.subr.bf16.mxu0 %v15481_v16  ;;  %v15523_v20 = vcombine.high %v11138_v11, %v11141_v12  ;;  %v8240_v16 = vld [vmem:[#allocation11 + $0x340] sm:$0xff]  ;;  %v11174_v8 = vld [vmem:[#allocation11 + $0x708] sm:$0xff] }
 0x654   :  { %10877 = vmatprep.subr.bf16.mxu1 %v15483_v17  ;;  %v8243_v17 = vld [vmem:[#allocation11 + $0x3a0] sm:$0xff]  ;;  %v11177_v10 = vld [vmem:[#allocation11 + $0x768] sm:$0xff] }
 0x655   :  { %v15142_v31 = vcombine.low %v8240_v16, %v8243_v17 }
 0x656   :  { %10706 = vmatpush1.bf16.msra.mxu0 %v15480_v25  ;;  %v15143_v25 = vcombine.high %v8240_v16, %v8243_v17  ;;  %v11180_v16 = vld [vmem:[#allocation11 + $0x7c8] sm:$0xff] }
 0x657   :  { %10878 = vmatpush1.bf16.msra.mxu1 %v15482_v26  ;;  %10707 = vmatprep.subr.bf16.mxu0 %v15487_v27  ;;  %v15529_v26 = vcombine.high %v11144_v18, %v11147_v9  ;;  %v8246_v27 = vld [vmem:[#allocation11 + $0x400] sm:$0xff]  ;;  %v11183_v17 = vld [vmem:[#allocation11 + $0x828] sm:$0xff]  ;;  %v15558_v9 = vcombine.low %v11174_v8, %v11177_v10 }
 0x658   :  { %10879 = vmatprep.subr.bf16.mxu1 %v15489_v57  ;;  %v8249_v57 = vld [vmem:[#allocation11 + $0x460] sm:$0xff] }
 0x659   :  { %v15148_v40 = vcombine.low %v8246_v27, %v8249_v57 }
 0x65a   :  { %10708 = vmatpush1.bf16.msra.mxu0 %v15486_v45  ;;  %v15149_v45 = vcombine.high %v8246_v27, %v8249_v57  ;;  %v11186_v27 = vld [vmem:[#allocation11 + $0x888] sm:$0xff] }
 0x65b   :  { %10880 = vmatpush1.bf16.msra.mxu1 %v15488_v33  ;;  %10709 = vmatprep.subr.bf16.mxu0 %v15493_v54  ;;  %v15535_v33 = vcombine.high %v11150_v28, %v11153_v29  ;;  %v8252_v54 = vld [vmem:[#allocation11 + $0x4c0] sm:$0xff]  ;;  %v11189_v57 = vld [vmem:[#allocation11 + $0x8e8] sm:$0xff]  ;;  %v15564_v29 = vcombine.low %v11180_v16, %v11183_v17 }
 0x65c   :  { %10881 = vmatprep.subr.bf16.mxu1 %v15495_v36  ;;  %v8255_v36 = vld [vmem:[#allocation11 + $0x520] sm:$0xff] }
 0x65e   :  { %10710 = vmatpush1.bf16.msra.mxu0 %v15492_v42  ;;  %v15155_v42 = vcombine.high %v8252_v54, %v8255_v36 }
 0x65f   :  { %10882 = vmatpush1.bf16.msra.mxu1 %v15494_v43  ;;  %10894 = vmatprep.subr.bf16.mxu0 %v15119_v44  ;;  %v15541_v43 = vcombine.high %v11156_v38, %v11159_v39  ;;  %v8258_v44 = vld [vmem:[#allocation11 + $0x580] sm:$0xff]  ;;  %v15570_v39 = vcombine.low %v11186_v27, %v11189_v57 }
 0x660   :  { %13456 = vmatprep.subr.bf16.mxu1 %v15505_v47  ;;  %v8261_v47 = vld [vmem:[#allocation11 + $0x5e0] sm:$0xff] }
 0x661   :  { %10712 = vmatmul.mubr.bf16.vlgmr.msra.gmra.mrb[24].mxu0 %v16748_v34  ;;  %v15161_v52 = vcombine.high %v8258_v44, %v8261_v47  ;;  %v15160_v60 = vcombine.low %v8258_v44, %v8261_v47  ;;  %v11198_v44 = vld [vmem:[#allocation11 + $0xa08] sm:$0xff] }
 0x662   :  { %10884 = vmatmul.mubr.bf16.vlgmr.msra.gmra.mrb[24].mxu1 %v16748_v34  ;;  %10895 = vmatpush1.bf16.msra.mxu0 %v15118_v50  ;;  %v15154_v50 = vcombine.low %v8252_v54, %v8255_v36  ;;  %v11192_v54 = vld [vmem:[#allocation11 + $0x948] sm:$0xff] }
 0x663   :  { %10926 = vmatprep.mubr.bf16.mxu0 %v16704_v6  ;;  %13457 = vmatpush1.bf16.msra.mxu1 %v15504_v53  ;;  %v15547_v53 = vcombine.high %v11162_v49, %v11165_v22  ;;  %v11195_v36 = vld [vmem:[#allocation11 + $0x9a8] sm:$0xff] }
 0x664   :  { %13488 = vmatprep.mubr.bf16.mxu1 %v16704_v6  ;;  %10896 = vmatprep.subr.bf16.mxu0 %v15125_v55  ;;  %v8264_v55 = vld [vmem:[#allocation11 + $0x640] sm:$0xff]  ;;  %v11201_v47 = vld [vmem:[#allocation11 + $0xa68] sm:$0xff]  ;;  %v15576_v22 = vcombine.low %v11192_v54, %v11195_v36 }
 0x665   :  { %13458 = vmatprep.subr.bf16.mxu1 %v15511_v59  ;;  %v11171_v59 = vld [vmem:[#allocation11 + $0x6a8] sm:$0xff]  ;;  %v15166_v11 = vcombine.low %v8264_v55, %v8267_v56 }
 0x666   :  { %10897 = vmatpush1.bf16.msra.mxu0 %v15124_v63  ;;  %v15167_v63 = vcombine.high %v8264_v55, %v8267_v56  ;;  %v15552_v12 = vcombine.low %v11168_v58, %v11171_v59  ;;  %v11204_v55 = vld [vmem:[#allocation11 + $0xac8] sm:$0xff] }
 0x667   :  { %13459 = vmatpush1.bf16.msra.mxu1 %v15510_v3  ;;  %10898 = vmatprep.subr.bf16.mxu0 %v15131_v4  ;;  %v15553_v3 = vcombine.high %v11168_v58, %v11171_v59  ;;  %v8270_v4 = vld [vmem:[#allocation11 + $0x700] sm:$0xff]  ;;  %v11207_v56 = vld [vmem:[#allocation11 + $0xb28] sm:$0xff]  ;;  %v15582_v59 = vcombine.low %v11198_v44, %v11201_v47 }
 0x668   :  { %13460 = vmatprep.subr.bf16.mxu1 %v15517_v5  ;;  %v8273_v5 = vld [vmem:[#allocation11 + $0x760] sm:$0xff] }
 0x669   :  { %v15172_v18 = vcombine.low %v8270_v4, %v8273_v5 }
 0x66a   :  { %10899 = vmatpush1.bf16.msra.mxu0 %v15130_v13  ;;  %v15173_v13 = vcombine.high %v8270_v4, %v8273_v5  ;;  %v11210_v4 = vld [vmem:[#allocation11 + $0xb88] sm:$0xff] }
 0x66b   :  { %13461 = vmatpush1.bf16.msra.mxu1 %v15516_v14  ;;  %10900 = vmatprep.subr.bf16.mxu0 %v15137_v19  ;;  %v15559_v14 = vcombine.high %v11174_v8, %v11177_v10  ;;  %v8276_v19 = vld [vmem:[#allocation11 + $0x7c0] sm:$0xff]  ;;  %v11213_v5 = vld [vmem:[#allocation11 + $0xbe8] sm:$0xff]  ;;  %v15588_v10 = vcombine.low %v11204_v55, %v11207_v56 }
 0x66c   :  { %13462 = vmatprep.subr.bf16.mxu1 %v15523_v20  ;;  %v8279_v20 = vld [vmem:[#allocation11 + $0x820] sm:$0xff] }
 0x66d   :  { %v15178_v28 = vcombine.low %v8276_v19, %v8279_v20 }
 0x66e   :  { %10901 = vmatpush1.bf16.msra.mxu0 %v15136_v23  ;;  %v15179_v23 = vcombine.high %v8276_v19, %v8279_v20  ;;  %v11216_v19 = vld [vmem:[#allocation11 + $0xc48] sm:$0xff] }
 0x66f   :  { %13463 = vmatpush1.bf16.msra.mxu1 %v15522_v24  ;;  %10902 = vmatprep.subr.bf16.mxu0 %v15143_v25  ;;  %v15565_v24 = vcombine.high %v11180_v16, %v11183_v17  ;;  %v8282_v25 = vld [vmem:[#allocation11 + $0x880] sm:$0xff]  ;;  %v11219_v20 = vld [vmem:[#allocation11 + $0xca8] sm:$0xff]  ;;  %v15594_v17 = vcombine.low %v11210_v4, %v11213_v5 }
 0x670   :  { %13464 = vmatprep.subr.bf16.mxu1 %v15529_v26  ;;  %v8285_v26 = vld [vmem:[#allocation11 + $0x8e0] sm:$0xff] }
 0x671   :  { %v15184_v38 = vcombine.low %v8282_v25, %v8285_v26 }
 0x672   :  { %10903 = vmatpush1.bf16.msra.mxu0 %v15142_v31  ;;  %v15185_v31 = vcombine.high %v8282_v25, %v8285_v26  ;;  %v11222_v26 = vld [vmem:[#allocation11 + $0xd08] sm:$0xff] }
 0x673   :  { %13465 = vmatpush1.bf16.msra.mxu1 %v15528_v32  ;;  %10904 = vmatprep.subr.bf16.mxu0 %v15149_v45  ;;  %v15571_v32 = vcombine.high %v11186_v27, %v11189_v57  ;;  %v8288_v45 = vld [vmem:[#allocation11 + $0x940] sm:$0xff]  ;;  %v11225_v27 = vld [vmem:[#allocation11 + $0xd68] sm:$0xff]  ;;  %v15600_v57 = vcombine.low %v11216_v19, %v11219_v20 }
 0x674   :  { %13466 = vmatprep.subr.bf16.mxu1 %v15535_v33  ;;  %v8291_v33 = vld [vmem:[#allocation11 + $0x9a0] sm:$0xff] }
 0x675   :  { %v15190_v49 = vcombine.low %v8288_v45, %v8291_v33 }
 0x676   :  { %10905 = vmatpush1.bf16.msra.mxu0 %v15148_v40  ;;  %v15191_v40 = vcombine.high %v8288_v45, %v8291_v33  ;;  %v11228_v45 = vld [vmem:[#allocation11 + $0xdc8] sm:$0xff] }
 0x677   :  { %13467 = vmatpush1.bf16.msra.mxu1 %v15534_v41  ;;  %10906 = vmatprep.subr.bf16.mxu0 %v15155_v42  ;;  %v15577_v41 = vcombine.high %v11192_v54, %v11195_v36  ;;  %v8294_v42 = vld [vmem:[#allocation11 + $0xa00] sm:$0xff]  ;;  %v11231_v33 = vld [vmem:[#allocation11 + $0xe28] sm:$0xff]  ;;  %v15606_v36 = vcombine.low %v11222_v26, %v11225_v27 }
 0x678   :  { %13468 = vmatprep.subr.bf16.mxu1 %v15541_v43  ;;  %v8297_v43 = vld [vmem:[#allocation11 + $0xa60] sm:$0xff] }
 0x679   :  { %v15196_v58 = vcombine.low %v8294_v42, %v8297_v43 }
 0x67a   :  { %10907 = vmatpush1.bf16.msra.mxu0 %v15154_v50  ;;  %v15197_v50 = vcombine.high %v8294_v42, %v8297_v43  ;;  %v11234_v42 = vld [vmem:[#allocation11 + $0xe88] sm:$0xff] }
 0x67b   :  { %13469 = vmatpush1.bf16.msra.mxu1 %v15540_v51  ;;  %10908 = vmatprep.subr.bf16.mxu0 %v15161_v52  ;;  %v15583_v51 = vcombine.high %v11198_v44, %v11201_v47  ;;  %v8300_v52 = vld [vmem:[#allocation11 + $0xac0] sm:$0xff]  ;;  %v11237_v43 = vld [vmem:[#allocation11 + $0xee8] sm:$0xff]  ;;  %v15612_v47 = vcombine.low %v11228_v45, %v11231_v33 }
 0x67c   :  { %13470 = vmatprep.subr.bf16.mxu1 %v15547_v53  ;;  %v8303_v53 = vld [vmem:[#allocation11 + $0xb20] sm:$0xff] }
 0x67d   :  { %v15202_v8 = vcombine.low %v8300_v52, %v8303_v53 }
 0x67e   :  { %10909 = vmatpush1.bf16.msra.mxu0 %v15160_v60  ;;  %v15203_v60 = vcombine.high %v8300_v52, %v8303_v53  ;;  %v11240_v52 = vld [vmem:[#allocation11 + $0xf48] sm:$0xff] }
 0x67f   :  { %13471 = vmatpush1.bf16.msra.mxu1 %v15546_v61  ;;  %10910 = vmatprep.subr.bf16.mxu0 %v15167_v63  ;;  %v15589_v61 = vcombine.high %v11204_v55, %v11207_v56  ;;  %v8306_v63 = vld [vmem:[#allocation11 + $0xb80] sm:$0xff]  ;;  %v11243_v53 = vld [vmem:[#allocation11 + $0xfa8] sm:$0xff]  ;;  %v15618_v56 = vcombine.low %v11234_v42, %v11237_v43 }
 0x680   :  { %13472 = vmatprep.subr.bf16.mxu1 %v15553_v3  ;;  %v8309_v3 = vld [vmem:[#allocation11 + $0xbe0] sm:$0xff] }
 0x681   :  { %v15208_v16 = vcombine.low %v8306_v63, %v8309_v3 }
 0x682   :  { %10911 = vmatpush1.bf16.msra.mxu0 %v15166_v11  ;;  %v15209_v11 = vcombine.high %v8306_v63, %v8309_v3  ;;  %v11246_v63 = vld [vmem:[#allocation11 + $0x1008] sm:$0xff] }
 0x683   :  { %13473 = vmatpush1.bf16.msra.mxu1 %v15552_v12  ;;  %10912 = vmatprep.subr.bf16.mxu0 %v15173_v13  ;;  %v15595_v12 = vcombine.high %v11210_v4, %v11213_v5  ;;  %v8312_v13 = vld [vmem:[#allocation11 + $0xc40] sm:$0xff]  ;;  %v11249_v3 = vld [vmem:[#allocation11 + $0x1068] sm:$0xff]  ;;  %v15624_v5 = vcombine.low %v11240_v52, %v11243_v53 }
 0x684   :  { %13474 = vmatprep.subr.bf16.mxu1 %v15559_v14  ;;  %v8315_v14 = vld [vmem:[#allocation11 + $0xca0] sm:$0xff] }
 0x685   :  { %v15214_v25 = vcombine.low %v8312_v13, %v8315_v14 }
 0x686   :  { %10913 = vmatpush1.bf16.msra.mxu0 %v15172_v18  ;;  %v15215_v18 = vcombine.high %v8312_v13, %v8315_v14  ;;  %v11252_v13 = vld [vmem:[#allocation11 + $0x10c8] sm:$0xff] }
 0x687   :  { %13475 = vmatpush1.bf16.msra.mxu1 %v15558_v9  ;;  %10914 = vmatprep.subr.bf16.mxu0 %v15179_v23  ;;  %v15601_v9 = vcombine.high %v11216_v19, %v11219_v20  ;;  %v8318_v23 = vld [vmem:[#allocation11 + $0xd00] sm:$0xff]  ;;  %v11255_v14 = vld [vmem:[#allocation11 + $0x1128] sm:$0xff]  ;;  %v15630_v20 = vcombine.low %v11246_v63, %v11249_v3 }
 0x688   :  { %13476 = vmatprep.subr.bf16.mxu1 %v15565_v24  ;;  %v8321_v24 = vld [vmem:[#allocation11 + $0xd60] sm:$0xff] }
 0x689   :  { %v15220_v54 = vcombine.low %v8318_v23, %v8321_v24 }
 0x68a   :  { %10915 = vmatpush1.bf16.msra.mxu0 %v15178_v28  ;;  %v15221_v28 = vcombine.high %v8318_v23, %v8321_v24  ;;  %v11258_v23 = vld [vmem:[#allocation11 + $0x1188] sm:$0xff] }
 0x68b   :  { %13477 = vmatpush1.bf16.msra.mxu1 %v15564_v29  ;;  %10916 = vmatprep.subr.bf16.mxu0 %v15185_v31  ;;  %v8324_v29 = vld [vmem:[#allocation11 + $0xdc0] sm:$0xff]  ;;  %v11261_v24 = vld [vmem:[#allocation11 + $0x11e8] sm:$0xff] }
 0x68c   :  { %13478 = vmatprep.subr.bf16.mxu1 %v15571_v32  ;;  %v8327_v31 = vld [vmem:[#allocation11 + $0xe20] sm:$0xff]  ;;  %v15607_v32 = vcombine.high %v11222_v26, %v11225_v27  ;;  %v15636_v26 = vcombine.low %v11252_v13, %v11255_v14 }
 0x68d   :  { %v15226_v44 = vcombine.low %v8324_v29, %v8327_v31 }
 0x68e   :  { %10917 = vmatpush1.bf16.msra.mxu0 %v15184_v38  ;;  %v15227_v38 = vcombine.high %v8324_v29, %v8327_v31  ;;  %v8363_v29 = vld [vmem:[#allocation11 + $0x12a0] sm:$0xff]  ;;  %v11264_v31 = vld [vmem:[#allocation11 + $0x1248] sm:$0xff] }
 0x68f   :  { %13479 = vmatpush1.bf16.msra.mxu1 %v15570_v39  ;;  %10918 = vmatprep.subr.bf16.mxu0 %v15191_v40  ;;  %v15613_v39 = vcombine.high %v11228_v45, %v11231_v33  ;;  %v8330_v40 = vld [vmem:[#allocation11 + $0xe80] sm:$0xff]  ;;  %v15642_v33 = vcombine.low %v11258_v23, %v11261_v24 }
 0x690   :  { %13480 = vmatprep.subr.bf16.mxu1 %v15577_v41  ;;  %v8333_v41 = vld [vmem:[#allocation11 + $0xee0] sm:$0xff] }
 0x691   :  { %v15232_v55 = vcombine.low %v8330_v40, %v8333_v41 }
 0x692   :  { %10919 = vmatpush1.bf16.msra.mxu0 %v15190_v49  ;;  %v15233_v49 = vcombine.high %v8330_v40, %v8333_v41  ;;  %v11270_v40 = vld [vmem:[#allocation11 + $0x1308] sm:$0xff] }
 0x693   :  { %13481 = vmatpush1.bf16.msra.mxu1 %v15576_v22  ;;  %10920 = vmatprep.subr.bf16.mxu0 %v15197_v50  ;;  %v15619_v22 = vcombine.high %v11234_v42, %v11237_v43  ;;  %v8336_v50 = vld [vmem:[#allocation11 + $0xf40] sm:$0xff]  ;;  %v11273_v41 = vld [vmem:[#allocation11 + $0x1368] sm:$0xff] }
 0x694   :  { %13482 = vmatprep.subr.bf16.mxu1 %v15583_v51  ;;  %v8339_v51 = vld [vmem:[#allocation11 + $0xfa0] sm:$0xff] }
 0x695   :  { %v15238_v4 = vcombine.low %v8336_v50, %v8339_v51 }
 0x696   :  { %10921 = vmatpush1.bf16.msra.mxu0 %v15196_v58  ;;  %v15239_v58 = vcombine.high %v8336_v50, %v8339_v51  ;;  %v11276_v50 = vld [vmem:[#allocation11 + $0x13c8] sm:$0xff] }
 0x697   :  { %13483 = vmatpush1.bf16.msra.mxu1 %v15582_v59  ;;  %10922 = vmatprep.subr.bf16.mxu0 %v15203_v60  ;;  %v15625_v59 = vcombine.high %v11240_v52, %v11243_v53  ;;  %v8342_v60 = vld [vmem:[#allocation11 + $0x1000] sm:$0xff]  ;;  %v11279_v51 = vld [vmem:[#allocation11 + $0x1428] sm:$0xff]  ;;  %v15654_v53 = vcombine.low %v11270_v40, %v11273_v41 }
 0x698   :  { %13484 = vmatprep.subr.bf16.mxu1 %v15589_v61  ;;  %v8345_v61 = vld [vmem:[#allocation11 + $0x1060] sm:$0xff] }
 0x699   :  { %v15244_v19 = vcombine.low %v8342_v60, %v8345_v61 }
 0x69a   :  { %10923 = vmatpush1.bf16.msra.mxu0 %v15202_v8  ;;  %v15245_v8 = vcombine.high %v8342_v60, %v8345_v61  ;;  %v11282_v60 = vld [vmem:[#allocation11 + $0x1488] sm:$0xff] }
 0x69b   :  { %13485 = vmatpush1.bf16.msra.mxu1 %v15588_v10  ;;  %10924 = vmatprep.subr.bf16.mxu0 %v15209_v11  ;;  %v15631_v10 = vcombine.high %v11246_v63, %v11249_v3  ;;  %v8348_v11 = vld [vmem:[#allocation11 + $0x10c0] sm:$0xff]  ;;  %v11285_v61 = vld [vmem:[#allocation11 + $0x14e8] sm:$0xff]  ;;  %v15660_v3 = vcombine.low %v11276_v50, %v11279_v51 }
 0x69c   :  { %13486 = vmatprep.subr.bf16.mxu1 %v15595_v12  ;;  %v8351_v12 = vld [vmem:[#allocation11 + $0x1120] sm:$0xff] }
 0x69e   :  { %10925 = vmatpush1.bf16.msra.mxu0 %v15208_v16  ;;  %v15251_v16 = vcombine.high %v8348_v11, %v8351_v12 }
 0x69f   :  { %13487 = vmatpush1.bf16.msra.mxu1 %v15594_v17  ;;  %10937 = vmatprep.subr.bf16.mxu0 %v15215_v18  ;;  %v15637_v17 = vcombine.high %v11252_v13, %v11255_v14  ;;  %v8354_v18 = vld [vmem:[#allocation11 + $0x1180] sm:$0xff]  ;;  %v15666_v14 = vcombine.low %v11282_v60, %v11285_v61 }
 0x6a0   :  { %13499 = vmatprep.subr.bf16.mxu1 %v15601_v9  ;;  %v8357_v9 = vld [vmem:[#allocation11 + $0x11e0] sm:$0xff] }
 0x6a1   :  { %10927 = vmatmul.mubr.bf16.vlgmr.msra.gmra.mrb[28].mxu0 %v16700_v1  ;;  %v15257_v27 = vcombine.high %v8354_v18, %v8357_v9  ;;  %v15256_v45 = vcombine.low %v8354_v18, %v8357_v9  ;;  %v11294_v18 = vld [vmem:[#allocation11 + $0x1608] sm:$0xff] }
 0x6a2   :  { %13489 = vmatmul.mubr.bf16.vlgmr.msra.gmra.mrb[28].mxu1 %v16700_v1  ;;  %10938 = vmatpush1.bf16.msra.mxu0 %v15214_v25  ;;  %v15250_v25 = vcombine.low %v8348_v11, %v8351_v12  ;;  %v11288_v11 = vld [vmem:[#allocation11 + $0x1548] sm:$0xff] }
 0x6a3   :  { %10969 = vmatprep.mubr.bf16.mxu0 %v16706_v7  ;;  %13500 = vmatpush1.bf16.msra.mxu1 %v15600_v57  ;;  %v15643_v57 = vcombine.high %v11258_v23, %v11261_v24  ;;  %v11291_v12 = vld [vmem:[#allocation11 + $0x15a8] sm:$0xff] }
 0x6a4   :  { %13531 = vmatprep.mubr.bf16.mxu1 %v16706_v7  ;;  %10939 = vmatprep.subr.bf16.mxu0 %v15221_v28  ;;  %v8360_v28 = vld [vmem:[#allocation11 + $0x1240] sm:$0xff]  ;;  %v11297_v9 = vld [vmem:[#allocation11 + $0x1668] sm:$0xff]  ;;  %v15672_v24 = vcombine.low %v11288_v11, %v11291_v12 }
 0x6a5   :  { %13501 = vmatprep.subr.bf16.mxu1 %v15607_v32  ;;  %v11267_v32 = vld [vmem:[#allocation11 + $0x12a8] sm:$0xff]  ;;  %v15262_v42 = vcombine.low %v8360_v28, %v8363_v29 }
 0x6a6   :  { %10940 = vmatpush1.bf16.msra.mxu0 %v15220_v54  ;;  %v15263_v54 = vcombine.high %v8360_v28, %v8363_v29  ;;  %v15648_v43 = vcombine.low %v11264_v31, %v11267_v32  ;;  %v11300_v28 = vld [vmem:[#allocation11 + $0x16c8] sm:$0xff] }
 0x6a7   :  { %13502 = vmatpush1.bf16.msra.mxu1 %v15606_v36  ;;  %10941 = vmatprep.subr.bf16.mxu0 %v15227_v38  ;;  %v15649_v36 = vcombine.high %v11264_v31, %v11267_v32  ;;  %v8366_v38 = vld [vmem:[#allocation11 + $0x1300] sm:$0xff]  ;;  %v11303_v29 = vld [vmem:[#allocation11 + $0x1728] sm:$0xff]  ;;  %v15678_v32 = vcombine.low %v11294_v18, %v11297_v9 }
 0x6a8   :  { %13503 = vmatprep.subr.bf16.mxu1 %v15613_v39  ;;  %v8369_v39 = vld [vmem:[#allocation11 + $0x1360] sm:$0xff] }
 0x6a9   :  { %v15268_v52 = vcombine.low %v8366_v38, %v8369_v39 }
 0x6aa   :  { %10942 = vmatpush1.bf16.msra.mxu0 %v15226_v44  ;;  %v15269_v44 = vcombine.high %v8366_v38, %v8369_v39  ;;  %v11306_v38 = vld [vmem:[#allocation11 + $0x1788] sm:$0xff] }
 0x6ab   :  { %13504 = vmatpush1.bf16.msra.mxu1 %v15612_v47  ;;  %10943 = vmatprep.subr.bf16.mxu0 %v15233_v49  ;;  %v15655_v47 = vcombine.high %v11270_v40, %v11273_v41  ;;  %v8372_v49 = vld [vmem:[#allocation11 + $0x13c0] sm:$0xff]  ;;  %v11309_v39 = vld [vmem:[#allocation11 + $0x17e8] sm:$0xff]  ;;  %v15684_v41 = vcombine.low %v11300_v28, %v11303_v29 }
 0x6ac   :  { %13505 = vmatprep.subr.bf16.mxu1 %v15619_v22  ;;  %v8375_v22 = vld [vmem:[#allocation11 + $0x1420] sm:$0xff] }
 0x6ad   :  { %v15274_v63 = vcombine.low %v8372_v49, %v8375_v22 }
 0x6ae   :  { %10944 = vmatpush1.bf16.msra.mxu0 %v15232_v55  ;;  %v15275_v55 = vcombine.high %v8372_v49, %v8375_v22  ;;  %v11312_v49 = vld [vmem:[#allocation11 + $0x1848] sm:$0xff] }
 0x6af   :  { %13506 = vmatpush1.bf16.msra.mxu1 %v15618_v56  ;;  %10945 = vmatprep.subr.bf16.mxu0 %v15239_v58  ;;  %v15661_v56 = vcombine.high %v11276_v50, %v11279_v51  ;;  %v8378_v58 = vld [vmem:[#allocation11 + $0x1480] sm:$0xff]  ;;  %v11315_v22 = vld [vmem:[#allocation11 + $0x18a8] sm:$0xff]  ;;  %v15690_v51 = vcombine.low %v11306_v38, %v11309_v39 }
 0x6b0   :  { %13507 = vmatprep.subr.bf16.mxu1 %v15625_v59  ;;  %v8381_v59 = vld [vmem:[#allocation11 + $0x14e0] sm:$0xff] }
 0x6b1   :  { %v15280_v13 = vcombine.low %v8378_v58, %v8381_v59 }
 0x6b2   :  { %10946 = vmatpush1.bf16.msra.mxu0 %v15238_v4  ;;  %v15281_v4 = vcombine.high %v8378_v58, %v8381_v59  ;;  %v11318_v59 = vld [vmem:[#allocation11 + $0x1908] sm:$0xff] }
 0x6b3   :  { %13508 = vmatpush1.bf16.msra.mxu1 %v15624_v5  ;;  %10947 = vmatprep.subr.bf16.mxu0 %v15245_v8  ;;  %v15667_v5 = vcombine.high %v11282_v60, %v11285_v61  ;;  %v8384_v8 = vld [vmem:[#allocation11 + $0x1540] sm:$0xff]  ;;  %v11321_v60 = vld [vmem:[#allocation11 + $0x1968] sm:$0xff]  ;;  %v15696_v61 = vcombine.low %v11312_v49, %v11315_v22 }
 0x6b4   :  { %13509 = vmatprep.subr.bf16.mxu1 %v15631_v10  ;;  %v8387_v10 = vld [vmem:[#allocation11 + $0x15a0] sm:$0xff] }
 0x6b5   :  { %v15286_v23 = vcombine.low %v8384_v8, %v8387_v10 }
 0x6b6   :  { %10948 = vmatpush1.bf16.msra.mxu0 %v15244_v19  ;;  %v15287_v19 = vcombine.high %v8384_v8, %v8387_v10  ;;  %v11324_v8 = vld [vmem:[#allocation11 + $0x19c8] sm:$0xff] }
 0x6b7   :  { %13510 = vmatpush1.bf16.msra.mxu1 %v15630_v20  ;;  %10949 = vmatprep.subr.bf16.mxu0 %v15251_v16  ;;  %v15673_v20 = vcombine.high %v11288_v11, %v11291_v12  ;;  %v8390_v16 = vld [vmem:[#allocation11 + $0x1600] sm:$0xff]  ;;  %v11327_v10 = vld [vmem:[#allocation11 + $0x1a28] sm:$0xff]  ;;  %v15702_v12 = vcombine.low %v11318_v59, %v11321_v60 }
 0x6b8   :  { %13511 = vmatprep.subr.bf16.mxu1 %v15637_v17  ;;  %v8393_v17 = vld [vmem:[#allocation11 + $0x1660] sm:$0xff] }
 0x6b9   :  { %v15292_v31 = vcombine.low %v8390_v16, %v8393_v17 }
 0x6ba   :  { %10950 = vmatpush1.bf16.msra.mxu0 %v15250_v25  ;;  %v15293_v25 = vcombine.high %v8390_v16, %v8393_v17  ;;  %v11330_v16 = vld [vmem:[#allocation11 + $0x1a88] sm:$0xff] }
 0x6bb   :  { %13512 = vmatpush1.bf16.msra.mxu1 %v15636_v26  ;;  %10951 = vmatprep.subr.bf16.mxu0 %v15257_v27  ;;  %v15679_v26 = vcombine.high %v11294_v18, %v11297_v9  ;;  %v8396_v27 = vld [vmem:[#allocation11 + $0x16c0] sm:$0xff]  ;;  %v11333_v17 = vld [vmem:[#allocation11 + $0x1ae8] sm:$0xff]  ;;  %v15708_v9 = vcombine.low %v11324_v8, %v11327_v10 }
 0x6bc   :  { %13513 = vmatprep.subr.bf16.mxu1 %v15643_v57  ;;  %v8399_v57 = vld [vmem:[#allocation11 + $0x1720] sm:$0xff] }
 0x6bd   :  { %v15298_v40 = vcombine.low %v8396_v27, %v8399_v57 }
 0x6be   :  { %10952 = vmatpush1.bf16.msra.mxu0 %v15256_v45  ;;  %v15299_v45 = vcombine.high %v8396_v27, %v8399_v57  ;;  %v11336_v27 = vld [vmem:[#allocation11 + $0x1b48] sm:$0xff] }
 0x6bf   :  { %13514 = vmatpush1.bf16.msra.mxu1 %v15642_v33  ;;  %10953 = vmatprep.subr.bf16.mxu0 %v15263_v54  ;;  %v15685_v33 = vcombine.high %v11300_v28, %v11303_v29  ;;  %v8402_v54 = vld [vmem:[#allocation11 + $0x1780] sm:$0xff]  ;;  %v11339_v57 = vld [vmem:[#allocation11 + $0x1ba8] sm:$0xff]  ;;  %v15714_v29 = vcombine.low %v11330_v16, %v11333_v17 }
 0x6c0   :  { %13515 = vmatprep.subr.bf16.mxu1 %v15649_v36  ;;  %v8405_v36 = vld [vmem:[#allocation11 + $0x17e0] sm:$0xff] }
 0x6c1   :  { %v15304_v50 = vcombine.low %v8402_v54, %v8405_v36 }
 0x6c2   :  { %10954 = vmatpush1.bf16.msra.mxu0 %v15262_v42  ;;  %v15305_v42 = vcombine.high %v8402_v54, %v8405_v36  ;;  %v11342_v54 = vld [vmem:[#allocation11 + $0x1c08] sm:$0xff] }
 0x6c3   :  { %13516 = vmatpush1.bf16.msra.mxu1 %v15648_v43  ;;  %10955 = vmatprep.subr.bf16.mxu0 %v15269_v44  ;;  %v15691_v43 = vcombine.high %v11306_v38, %v11309_v39  ;;  %v8408_v44 = vld [vmem:[#allocation11 + $0x1840] sm:$0xff]  ;;  %v11345_v36 = vld [vmem:[#allocation11 + $0x1c68] sm:$0xff]  ;;  %v15720_v39 = vcombine.low %v11336_v27, %v11339_v57 }
 0x6c4   :  { %13517 = vmatprep.subr.bf16.mxu1 %v15655_v47  ;;  %v8411_v47 = vld [vmem:[#allocation11 + $0x18a0] sm:$0xff] }
 0x6c5   :  { %v15310_v58 = vcombine.low %v8408_v44, %v8411_v47 }
 0x6c6   :  { %10956 = vmatpush1.bf16.msra.mxu0 %v15268_v52  ;;  %v15311_v52 = vcombine.high %v8408_v44, %v8411_v47  ;;  %v11348_v44 = vld [vmem:[#allocation11 + $0x1cc8] sm:$0xff] }
 0x6c7   :  { %13518 = vmatpush1.bf16.msra.mxu1 %v15654_v53  ;;  %10957 = vmatprep.subr.bf16.mxu0 %v15275_v55  ;;  %v15697_v53 = vcombine.high %v11312_v49, %v11315_v22  ;;  %v8414_v55 = vld [vmem:[#allocation11 + $0x1900] sm:$0xff]  ;;  %v11351_v47 = vld [vmem:[#allocation11 + $0x1d28] sm:$0xff]  ;;  %v15726_v22 = vcombine.low %v11342_v54, %v11345_v36 }
 0x6c8   :  { %13519 = vmatprep.subr.bf16.mxu1 %v15661_v56  ;;  %v8417_v56 = vld [vmem:[#allocation11 + $0x1960] sm:$0xff] }
 0x6c9   :  { %v15316_v11 = vcombine.low %v8414_v55, %v8417_v56 }
 0x6ca   :  { %10958 = vmatpush1.bf16.msra.mxu0 %v15274_v63  ;;  %v15317_v63 = vcombine.high %v8414_v55, %v8417_v56  ;;  %v11354_v55 = vld [vmem:[#allocation11 + $0x1d88] sm:$0xff] }
 0x6cb   :  { %13520 = vmatpush1.bf16.msra.mxu1 %v15660_v3  ;;  %10959 = vmatprep.subr.bf16.mxu0 %v15281_v4  ;;  %v8420_v3 = vld [vmem:[#allocation11 + $0x19c0] sm:$0xff]  ;;  %v11357_v56 = vld [vmem:[#allocation11 + $0x1de8] sm:$0xff] }
 0x6cc   :  { %13521 = vmatprep.subr.bf16.mxu1 %v15667_v5  ;;  %v8423_v4 = vld [vmem:[#allocation11 + $0x1a20] sm:$0xff]  ;;  %v15703_v5 = vcombine.high %v11318_v59, %v11321_v60  ;;  %v15732_v59 = vcombine.low %v11348_v44, %v11351_v47 }
 0x6cd   :  { %v15322_v18 = vcombine.low %v8420_v3, %v8423_v4 }
 0x6ce   :  { %10960 = vmatpush1.bf16.msra.mxu0 %v15280_v13  ;;  %v15323_v13 = vcombine.high %v8420_v3, %v8423_v4  ;;  %v8459_v3 = vld [vmem:[#allocation11 + $0x1ea0] sm:$0xff]  ;;  %v11360_v4 = vld [vmem:[#allocation11 + $0x1e48] sm:$0xff] }
 0x6cf   :  { %13522 = vmatpush1.bf16.msra.mxu1 %v15666_v14  ;;  %10961 = vmatprep.subr.bf16.mxu0 %v15287_v19  ;;  %v15709_v14 = vcombine.high %v11324_v8, %v11327_v10  ;;  %v8426_v19 = vld [vmem:[#allocation11 + $0x1a80] sm:$0xff]  ;;  %v15738_v10 = vcombine.low %v11354_v55, %v11357_v56 }
 0x6d0   :  { %13523 = vmatprep.subr.bf16.mxu1 %v15673_v20  ;;  %v8429_v20 = vld [vmem:[#allocation11 + $0x1ae0] sm:$0xff] }
 0x6d1   :  { %v15328_v28 = vcombine.low %v8426_v19, %v8429_v20 }
 0x6d2   :  { %10962 = vmatpush1.bf16.msra.mxu0 %v15286_v23  ;;  %v15329_v23 = vcombine.high %v8426_v19, %v8429_v20  ;;  %v11366_v19 = vld [vmem:[#allocation11 + $0x1f08] sm:$0xff] }
 0x6d3   :  { %13524 = vmatpush1.bf16.msra.mxu1 %v15672_v24  ;;  %10963 = vmatprep.subr.bf16.mxu0 %v15293_v25  ;;  %v15715_v24 = vcombine.high %v11330_v16, %v11333_v17  ;;  %v8432_v25 = vld [vmem:[#allocation11 + $0x1b40] sm:$0xff]  ;;  %v11369_v20 = vld [vmem:[#allocation11 + $0x1f68] sm:$0xff] }
 0x6d4   :  { %13525 = vmatprep.subr.bf16.mxu1 %v15679_v26  ;;  %v8435_v26 = vld [vmem:[#allocation11 + $0x1ba0] sm:$0xff] }
 0x6d5   :  { %v15334_v38 = vcombine.low %v8432_v25, %v8435_v26 }
 0x6d6   :  { %10964 = vmatpush1.bf16.msra.mxu0 %v15292_v31  ;;  %v15335_v31 = vcombine.high %v8432_v25, %v8435_v26  ;;  %v11372_v25 = vld [vmem:[#allocation11 + $0x1fc8] sm:$0xff] }
 0x6d7   :  { %13526 = vmatpush1.bf16.msra.mxu1 %v15678_v32  ;;  %10965 = vmatprep.subr.bf16.mxu0 %v15299_v45  ;;  %v15721_v32 = vcombine.high %v11336_v27, %v11339_v57  ;;  %v8438_v45 = vld [vmem:[#allocation11 + $0x1c00] sm:$0xff]  ;;  %v11375_v26 = vld [vmem:[#allocation11 + $0x2028] sm:$0xff]  ;;  %v15750_v57 = vcombine.low %v11366_v19, %v11369_v20 }
 0x6d8   :  { %13527 = vmatprep.subr.bf16.mxu1 %v15685_v33  ;;  %v8441_v33 = vld [vmem:[#allocation11 + $0x1c60] sm:$0xff] }
 0x6d9   :  { %v15340_v49 = vcombine.low %v8438_v45, %v8441_v33 }
 0x6da   :  { %10966 = vmatpush1.bf16.msra.mxu0 %v15298_v40  ;;  %v15341_v40 = vcombine.high %v8438_v45, %v8441_v33  ;;  %v11378_v45 = vld [vmem:[#allocation11 + $0x2088] sm:$0xff] }
 0x6db   :  { %13528 = vmatpush1.bf16.msra.mxu1 %v15684_v41  ;;  %10967 = vmatprep.subr.bf16.mxu0 %v15305_v42  ;;  %v15727_v41 = vcombine.high %v11342_v54, %v11345_v36  ;;  %v8444_v42 = vld [vmem:[#allocation11 + $0x1cc0] sm:$0xff]  ;;  %v11381_v33 = vld [vmem:[#allocation11 + $0x20e8] sm:$0xff]  ;;  %v15756_v36 = vcombine.low %v11372_v25, %v11375_v26 }
 0x6dc   :  { %13529 = vmatprep.subr.bf16.mxu1 %v15691_v43  ;;  %v8447_v43 = vld [vmem:[#allocation11 + $0x1d20] sm:$0xff] }
 0x6de   :  { %10968 = vmatpush1.bf16.msra.mxu0 %v15304_v50  ;;  %v15347_v50 = vcombine.high %v8444_v42, %v8447_v43 }
 0x6df   :  { %13530 = vmatpush1.bf16.msra.mxu1 %v15690_v51  ;;  %10980 = vmatprep.subr.bf16.mxu0 %v15311_v52  ;;  %v15733_v51 = vcombine.high %v11348_v44, %v11351_v47  ;;  %v8450_v52 = vld [vmem:[#allocation11 + $0x1d80] sm:$0xff]  ;;  %v15762_v47 = vcombine.low %v11378_v45, %v11381_v33 }
 0x6e0   :  { %13542 = vmatprep.subr.bf16.mxu1 %v15697_v53  ;;  %v8453_v53 = vld [vmem:[#allocation11 + $0x1de0] sm:$0xff] }
 0x6e1   :  { %10970 = vmatmul.mubr.bf16.vlgmr.msra.gmra.mrb[28].mxu0 %v16702_v2  ;;  %v15353_v60 = vcombine.high %v8450_v52, %v8453_v53  ;;  %v15352_v8 = vcombine.low %v8450_v52, %v8453_v53  ;;  %v11390_v52 = vld [vmem:[#allocation11 + $0x2208] sm:$0xff] }
 0x6e2   :  { %13532 = vmatmul.mubr.bf16.vlgmr.msra.gmra.mrb[28].mxu1 %v16702_v2  ;;  %10981 = vmatpush1.bf16.msra.mxu0 %v15310_v58  ;;  %v15346_v58 = vcombine.low %v8444_v42, %v8447_v43  ;;  %v11384_v42 = vld [vmem:[#allocation11 + $0x2148] sm:$0xff] }
 0x6e3   :  { %11012 = vmatprep.mubr.bf16.mxu0 %v16750_v35  ;;  %13543 = vmatpush1.bf16.msra.mxu1 %v15696_v61  ;;  %v15739_v61 = vcombine.high %v11354_v55, %v11357_v56  ;;  %v11387_v43 = vld [vmem:[#allocation11 + $0x21a8] sm:$0xff] }
 0x6e4   :  { %13574 = vmatprep.mubr.bf16.mxu1 %v16750_v35  ;;  %10982 = vmatprep.subr.bf16.mxu0 %v15317_v63  ;;  %v8456_v63 = vld [vmem:[#allocation11 + $0x1e40] sm:$0xff]  ;;  %v11393_v53 = vld [vmem:[#allocation11 + $0x2268] sm:$0xff]  ;;  %v15768_v56 = vcombine.low %v11384_v42, %v11387_v43 }
 0x6e5   :  { %13544 = vmatprep.subr.bf16.mxu1 %v15703_v5  ;;  %v11363_v5 = vld [vmem:[#allocation11 + $0x1ea8] sm:$0xff]  ;;  %v15358_v16 = vcombine.low %v8456_v63, %v8459_v3 }
 0x6e6   :  { %10983 = vmatpush1.bf16.msra.mxu0 %v15316_v11  ;;  %v15359_v11 = vcombine.high %v8456_v63, %v8459_v3  ;;  %v15744_v17 = vcombine.low %v11360_v4, %v11363_v5  ;;  %v11396_v63 = vld [vmem:[#allocation11 + $0x22c8] sm:$0xff] }
 0x6e7   :  { %13545 = vmatpush1.bf16.msra.mxu1 %v15702_v12  ;;  %10984 = vmatprep.subr.bf16.mxu0 %v15323_v13  ;;  %v15745_v12 = vcombine.high %v11360_v4, %v11363_v5  ;;  %v8462_v13 = vld [vmem:[#allocation11 + $0x1f00] sm:$0xff]  ;;  %v11399_v3 = vld [vmem:[#allocation11 + $0x2328] sm:$0xff]  ;;  %v15774_v5 = vcombine.low %v11390_v52, %v11393_v53 }
 0x6e8   :  { %13546 = vmatprep.subr.bf16.mxu1 %v15709_v14  ;;  %v8465_v14 = vld [vmem:[#allocation11 + $0x1f60] sm:$0xff] }
 0x6e9   :  { %v15364_v27 = vcombine.low %v8462_v13, %v8465_v14 }
 0x6ea   :  { %10985 = vmatpush1.bf16.msra.mxu0 %v15322_v18  ;;  %v15365_v18 = vcombine.high %v8462_v13, %v8465_v14  ;;  %v11402_v13 = vld [vmem:[#allocation11 + $0x2388] sm:$0xff] }
 0x6eb   :  { %13547 = vmatpush1.bf16.msra.mxu1 %v15708_v9  ;;  %10986 = vmatprep.subr.bf16.mxu0 %v15329_v23  ;;  %v15751_v9 = vcombine.high %v11366_v19, %v11369_v20  ;;  %v8468_v23 = vld [vmem:[#allocation11 + $0x1fc0] sm:$0xff]  ;;  %v11405_v14 = vld [vmem:[#allocation11 + $0x23e8] sm:$0xff]  ;;  %v15780_v20 = vcombine.low %v11396_v63, %v11399_v3 }
 0x6ec   :  { %13548 = vmatprep.subr.bf16.mxu1 %v15715_v24  ;;  %v8471_v24 = vld [vmem:[#allocation11 + $0x2020] sm:$0xff] }
 0x6ed   :  { %v15370_v54 = vcombine.low %v8468_v23, %v8471_v24 }
 0x6ee   :  { %10987 = vmatpush1.bf16.msra.mxu0 %v15328_v28  ;;  %v15371_v28 = vcombine.high %v8468_v23, %v8471_v24  ;;  %v11408_v23 = vld [vmem:[#allocation11 + $0x2448] sm:$0xff] }
 0x6ef   :  { %13549 = vmatpush1.bf16.msra.mxu1 %v15714_v29  ;;  %10988 = vmatprep.subr.bf16.mxu0 %v15335_v31  ;;  %v15757_v29 = vcombine.high %v11372_v25, %v11375_v26  ;;  %v8474_v31 = vld [vmem:[#allocation11 + $0x2080] sm:$0xff]  ;;  %v11411_v24 = vld [vmem:[#allocation11 + $0x24a8] sm:$0xff]  ;;  %v15786_v26 = vcombine.low %v11402_v13, %v11405_v14 }
 0x6f0   :  { %13550 = vmatprep.subr.bf16.mxu1 %v15721_v32  ;;  %v8477_v32 = vld [vmem:[#allocation11 + $0x20e0] sm:$0xff] }
 0x6f1   :  { %v15376_v44 = vcombine.low %v8474_v31, %v8477_v32 }
 0x6f2   :  { %10989 = vmatpush1.bf16.msra.mxu0 %v15334_v38  ;;  %v15377_v38 = vcombine.high %v8474_v31, %v8477_v32  ;;  %v11414_v32 = vld [vmem:[#allocation11 + $0x2508] sm:$0xff] }
 0x6f3   :  { %13551 = vmatpush1.bf16.msra.mxu1 %v15720_v39  ;;  %10990 = vmatprep.subr.bf16.mxu0 %v15341_v40  ;;  %v15763_v39 = vcombine.high %v11378_v45, %v11381_v33  ;;  %v8480_v40 = vld [vmem:[#allocation11 + $0x2140] sm:$0xff]  ;;  %v11417_v45 = vld [vmem:[#allocation11 + $0x2568] sm:$0xff]  ;;  %v15792_v33 = vcombine.low %v11408_v23, %v11411_v24 }
 0x6f4   :  { %13552 = vmatprep.subr.bf16.mxu1 %v15727_v41  ;;  %v8483_v41 = vld [vmem:[#allocation11 + $0x21a0] sm:$0xff] }
 0x6f5   :  { %v15382_v55 = vcombine.low %v8480_v40, %v8483_v41 }
 0x6f6   :  { %10991 = vmatpush1.bf16.msra.mxu0 %v15340_v49  ;;  %v15383_v49 = vcombine.high %v8480_v40, %v8483_v41  ;;  %v11420_v40 = vld [vmem:[#allocation11 + $0x25c8] sm:$0xff] }
 0x6f7   :  { %13553 = vmatpush1.bf16.msra.mxu1 %v15726_v22  ;;  %10992 = vmatprep.subr.bf16.mxu0 %v15347_v50  ;;  %v15769_v22 = vcombine.high %v11384_v42, %v11387_v43  ;;  %v8486_v50 = vld [vmem:[#allocation11 + $0x2200] sm:$0xff]  ;;  %v11423_v41 = vld [vmem:[#allocation11 + $0x2628] sm:$0xff]  ;;  %v15798_v43 = vcombine.low %v11414_v32, %v11417_v45 }
 0x6f8   :  { %13554 = vmatprep.subr.bf16.mxu1 %v15733_v51  ;;  %v8489_v51 = vld [vmem:[#allocation11 + $0x2260] sm:$0xff] }
 0x6f9   :  { %v15388_v4 = vcombine.low %v8486_v50, %v8489_v51 }
 0x6fa   :  { %10993 = vmatpush1.bf16.msra.mxu0 %v15346_v58  ;;  %v15389_v58 = vcombine.high %v8486_v50, %v8489_v51  ;;  %v11426_v50 = vld [vmem:[#allocation11 + $0x2688] sm:$0xff] }
 0x6fb   :  { %13555 = vmatpush1.bf16.msra.mxu1 %v15732_v59  ;;  %10994 = vmatprep.subr.bf16.mxu0 %v15353_v60  ;;  %v15775_v59 = vcombine.high %v11390_v52, %v11393_v53  ;;  %v8492_v60 = vld [vmem:[#allocation11 + $0x22c0] sm:$0xff]  ;;  %v11429_v51 = vld [vmem:[#allocation11 + $0x26e8] sm:$0xff]  ;;  %v15804_v53 = vcombine.low %v11420_v40, %v11423_v41 }
 0x6fc   :  { %13556 = vmatprep.subr.bf16.mxu1 %v15739_v61  ;;  %v8495_v61 = vld [vmem:[#allocation11 + $0x2320] sm:$0xff] }
 0x6fd   :  { %v15394_v19 = vcombine.low %v8492_v60, %v8495_v61 }
 0x6fe   :  { %10995 = vmatpush1.bf16.msra.mxu0 %v15352_v8  ;;  %v15395_v8 = vcombine.high %v8492_v60, %v8495_v61  ;;  %v11432_v60 = vld [vmem:[#allocation11 + $0x2748] sm:$0xff] }
 0x6ff   :  { %13557 = vmatpush1.bf16.msra.mxu1 %v15738_v10  ;;  %10996 = vmatprep.subr.bf16.mxu0 %v15359_v11  ;;  %v15781_v10 = vcombine.high %v11396_v63, %v11399_v3  ;;  %v8498_v11 = vld [vmem:[#allocation11 + $0x2380] sm:$0xff]  ;;  %v11435_v61 = vld [vmem:[#allocation11 + $0x27a8] sm:$0xff]  ;;  %v15810_v3 = vcombine.low %v11426_v50, %v11429_v51 }
 0x700   :  { %13558 = vmatprep.subr.bf16.mxu1 %v15745_v12  ;;  %v8501_v12 = vld [vmem:[#allocation11 + $0x23e0] sm:$0xff] }
 0x701   :  { %v15400_v25 = vcombine.low %v8498_v11, %v8501_v12 }
 0x702   :  { %10997 = vmatpush1.bf16.msra.mxu0 %v15358_v16  ;;  %v15401_v16 = vcombine.high %v8498_v11, %v8501_v12  ;;  %v11438_v11 = vld [vmem:[#allocation11 + $0x2808] sm:$0xff] }
 0x703   :  { %13559 = vmatpush1.bf16.msra.mxu1 %v15744_v17  ;;  %10998 = vmatprep.subr.bf16.mxu0 %v15365_v18  ;;  %v15787_v17 = vcombine.high %v11402_v13, %v11405_v14  ;;  %v8504_v18 = vld [vmem:[#allocation11 + $0x2440] sm:$0xff]  ;;  %v11441_v12 = vld [vmem:[#allocation11 + $0x2868] sm:$0xff] }
 0x704   :  { %13560 = vmatprep.subr.bf16.mxu1 %v15751_v9  ;;  %v8507_v9 = vld [vmem:[#allocation11 + $0x24a0] sm:$0xff]  ;;  %v8598_v14 = vld [vmem:[#allocation13 + $0xc] sm:$0x3f] }
 0x705   :  { %v15406_v31 = vcombine.low %v8504_v18, %v8507_v9 }
 0x706   :  { %10999 = vmatpush1.bf16.msra.mxu0 %v15364_v27  ;;  %v15407_v27 = vcombine.high %v8504_v18, %v8507_v9  ;;  %v8543_v18 = vld [vmem:[#allocation11 + $0x2920] sm:$0xff]  ;;  %v8603_v9 = vrot.slane %v8598_v14, %v16639_v46 }
 0x707   :  { %13561 = vmatpush1.bf16.msra.mxu1 %v15750_v57  ;;  %11000 = vmatprep.subr.bf16.mxu0 %v15371_v28  ;;  %v15793_v57 = vcombine.high %v11408_v23, %v11411_v24  ;;  %v8510_v28 = vld [vmem:[#allocation11 + $0x2500] sm:$0xff]  ;;  %v11444_v23 = vld [vmem:[#allocation11 + $0x28c8] sm:$0xff] }
 0x708   :  { %13562 = vmatprep.subr.bf16.mxu1 %v15757_v29  ;;  %v8513_v29 = vld [vmem:[#allocation11 + $0x2560] sm:$0xff]  ;;  %v11447_v24 = vld [vmem:[#allocation11 + $0x2928] sm:$0xff] }
 0x709   :  { %v15412_v42 = vcombine.low %v8510_v28, %v8513_v29 }
 0x70a   :  { %11001 = vmatpush1.bf16.msra.mxu0 %v15370_v54  ;;  %v15413_v54 = vcombine.high %v8510_v28, %v8513_v29  ;;  %v15822_v28 = vcombine.low %v11438_v11, %v11441_v12 }
 0x70b   :  { %13563 = vmatpush1.bf16.msra.mxu1 %v15756_v36  ;;  %11002 = vmatprep.subr.bf16.mxu0 %v15377_v38  ;;  %v8516_v36 = vld [vmem:[#allocation11 + $0x25c0] sm:$0xff] }
 0x70c   :  { %13564 = vmatprep.subr.bf16.mxu1 %v15763_v39  ;;  %v8519_v38 = vld [vmem:[#allocation11 + $0x2620] sm:$0xff]  ;;  %v15799_v39 = vcombine.high %v11414_v32, %v11417_v45  ;;  %v15829_v32 = vcombine.high %v11444_v23, %v11447_v24 }
 0x70d   :  { %v15418_v52 = vcombine.low %v8516_v36, %v8519_v38  ;;  %v8546_v45 = vld [vmem:[#allocation11 + $0x2980] sm:$0xff] }
 0x70e   :  { %11003 = vmatpush1.bf16.msra.mxu0 %v15376_v44  ;;  %v15419_v44 = vcombine.high %v8516_v36, %v8519_v38 }
 0x70f   :  { %13565 = vmatpush1.bf16.msra.mxu1 %v15762_v47  ;;  %11004 = vmatprep.subr.bf16.mxu0 %v15383_v49  ;;  %v15805_v47 = vcombine.high %v11420_v40, %v11423_v41  ;;  %v8522_v49 = vld [vmem:[#allocation11 + $0x2680] sm:$0xff]  ;;  %v11453_v40 = vld [vmem:[#allocation11 + $0x29e8] sm:$0xff] }
 0x710   :  { %13566 = vmatprep.subr.bf16.mxu1 %v15769_v22  ;;  %v8525_v22 = vld [vmem:[#allocation11 + $0x26e0] sm:$0xff] }
 0x711   :  { %v15424_v63 = vcombine.low %v8522_v49, %v8525_v22 }
 0x712   :  { %11005 = vmatpush1.bf16.msra.mxu0 %v15382_v55  ;;  %v15425_v55 = vcombine.high %v8522_v49, %v8525_v22  ;;  %v15828_v49 = vcombine.low %v11444_v23, %v11447_v24  ;;  %v8567_v23 = vld [vmem:[#allocation11 + $0x2c20] sm:$0xff] }
 0x713   :  { %13567 = vmatpush1.bf16.msra.mxu1 %v15768_v56  ;;  %11006 = vmatprep.subr.bf16.mxu0 %v15389_v58  ;;  %v15811_v56 = vcombine.high %v11426_v50, %v11429_v51  ;;  %v8528_v58 = vld [vmem:[#allocation11 + $0x2740] sm:$0xff] }
 0x714   :  { %13568 = vmatprep.subr.bf16.mxu1 %v15775_v59  ;;  %v8531_v59 = vld [vmem:[#allocation11 + $0x27a0] sm:$0xff] }
 0x715   :  { %v15430_v13 = vcombine.low %v8528_v58, %v8531_v59 }
 0x716   :  { %11007 = vmatpush1.bf16.msra.mxu0 %v15388_v4  ;;  %v15431_v4 = vcombine.high %v8528_v58, %v8531_v59  ;;  %v8552_v59 = vld [vmem:[#allocation11 + $0x2a40] sm:$0xff] }
 0x717   :  { %13569 = vmatpush1.bf16.msra.mxu1 %v15774_v5  ;;  %11008 = vmatprep.subr.bf16.mxu0 %v15395_v8  ;;  %v15817_v5 = vcombine.high %v11432_v60, %v11435_v61  ;;  %v8534_v8 = vld [vmem:[#allocation11 + $0x2800] sm:$0xff] }
 0x718   :  { %13570 = vmatprep.subr.bf16.mxu1 %v15781_v10  ;;  %v8537_v10 = vld [vmem:[#allocation11 + $0x2860] sm:$0xff] }
 0x71a   :  { %11009 = vmatpush1.bf16.msra.mxu0 %v15394_v19  ;;  %v15816_v19 = vcombine.low %v11432_v60, %v11435_v61  ;;  %v8555_v60 = vld [vmem:[#allocation11 + $0x2aa0] sm:$0xff] }
 0x71b   :  { %13571 = vmatpush1.bf16.msra.mxu1 %v15780_v20  ;;  %11010 = vmatprep.subr.bf16.mxu0 %v15401_v16  ;;  %v15437_v20 = vcombine.high %v8534_v8, %v8537_v10  ;;  %v15823_v16 = vcombine.high %v11438_v11, %v11441_v12  ;;  %v8558_v12 = vld [vmem:[#allocation11 + $0x2b00] sm:$0xff] }
 0x71c   :  { %13572 = vmatprep.subr.bf16.mxu1 %v15787_v17  ;;  %v8540_v17 = vld [vmem:[#allocation11 + $0x28c0] sm:$0xff] }
 0x71d   :  { %v15443_v29 = vcombine.high %v8540_v17, %v8543_v18 }
 0x71e   :  { %11011 = vmatpush1.bf16.msra.mxu0 %v15400_v25  ;;  %v8611_v25 = vrot.slane %v8598_v14, %v16647_v62 }
 0x71f   :  { %13573 = vmatpush1.bf16.msra.mxu1 %v15786_v26  ;;  %11023 = vmatprep.subr.bf16.mxu0 %v15407_v27  ;;  %v8607_v26 = vrot.slane %v8598_v14, %v16642_v48  ;;  %v15436_v27 = vcombine.low %v8534_v8, %v8537_v10  ;;  %v15455_v10 = vcombine.high %v8552_v59, %v8555_v60 }
 0x720   :  { %13585 = vmatprep.subr.bf16.mxu1 %v15793_v57  ;;  %v8615_v57 = vrot.slane %v8598_v14, %v16650_v0  ;;  %v11462_v14 = vld [vmem:[#allocation11 + $0x2b08] sm:$0xff] }
 0x721   :  { %11013 = vmatmul.mubr.bf16.vlgmr.msra.gmra.mrb[28].mxu0 %v16745_v30 }
 0x722   :  { %13575 = vmatmul.mubr.bf16.vlgmr.msra.gmra.mrb[28].mxu1 %v16745_v30  ;;  %11024 = vmatpush1.bf16.msra.mxu0 %v15406_v31 }
 0x723   :  { %11055 = vmatprep.mubr.bf16.mxu0 %v16752_v37  ;;  %13586 = vmatpush1.bf16.msra.mxu1 %v15792_v33  ;;  %v8549_v33 = vld [vmem:[#allocation11 + $0x29e0] sm:$0xff] }
 0x724   :  { %13617 = vmatprep.mubr.bf16.mxu1 %v16752_v37  ;;  %11025 = vmatprep.subr.bf16.mxu0 %v15413_v54 }
 0x725   :  { %13587 = vmatprep.subr.bf16.mxu1 %v15799_v39  ;;  %v11450_v39 = vld [vmem:[#allocation11 + $0x2988] sm:$0xff] }
 0x726   :  { %11026 = vmatpush1.bf16.msra.mxu0 %v15412_v42  ;;  %v15835_v58 = vcombine.high %v11450_v39, %v11453_v40  ;;  %v15834_v8 = vcombine.low %v11450_v39, %v11453_v40  ;;  %v11474_v40 = vld [vmem:[#allocation11 + $0x2c88] sm:$0xff] }
 0x727   :  { %13588 = vmatpush1.bf16.msra.mxu1 %v15798_v43  ;;  %11027 = vmatprep.subr.bf16.mxu0 %v15419_v44 }
 0x728   :  { %13589 = vmatprep.subr.bf16.mxu1 %v15805_v47  ;;  %v15442_v47 = vcombine.low %v8540_v17, %v8543_v18 }
 0x72a   :  { %11028 = vmatpush1.bf16.msra.mxu0 %v15418_v52 }
 0x72b   :  { %13590 = vmatpush1.bf16.msra.mxu1 %v15804_v53  ;;  %11029 = vmatprep.subr.bf16.mxu0 %v15425_v55  ;;  %v15449_v53 = vcombine.high %v8546_v45, %v8549_v33 }
 0x72c   :  { %13591 = vmatprep.subr.bf16.mxu1 %v15811_v56 }
 0x72e   :  { %11030 = vmatpush1.bf16.msra.mxu0 %v15424_v63  ;;  %v11456_v63 = vld [vmem:[#allocation11 + $0x2a48] sm:$0xff] }
 0x72f   :  { %13592 = vmatpush1.bf16.msra.mxu1 %v15810_v3  ;;  %11031 = vmatprep.subr.bf16.mxu0 %v15431_v4  ;;  %v11459_v3 = vld [vmem:[#allocation11 + $0x2aa8] sm:$0xff] }
 0x730   :  { %13593 = vmatprep.subr.bf16.mxu1 %v15817_v5  ;;  %v15448_v5 = vcombine.low %v8546_v45, %v8549_v33  ;;  %v15841_v11 = vcombine.high %v11456_v63, %v11459_v3 }
 0x732   :  { %11032 = vmatpush1.bf16.msra.mxu0 %v15430_v13  ;;  %v8561_v13 = vld [vmem:[#allocation11 + $0x2b60] sm:$0xff] }
 0x733   :  { %13594 = vmatpush1.bf16.msra.mxu1 %v15816_v19  ;;  %11033 = vmatprep.subr.bf16.mxu0 %v15437_v20  ;;  %v11465_v19 = vld [vmem:[#allocation11 + $0x2b68] sm:$0xff]  ;;  %v15454_v20 = vcombine.low %v8552_v59, %v8555_v60  ;;  %v15461_v17 = vcombine.high %v8558_v12, %v8561_v13 }
 0x734   :  { %v10713_v31 = vpop.f32.mrb[24].mxu0  ;;  %13595 = vmatprep.subr.bf16.mxu1 %v15823_v16  ;;  %v15840_v16 = vcombine.low %v11456_v63, %v11459_v3  ;;  %v15847_v18 = vcombine.high %v11462_v14, %v11465_v19  ;;  %v8582_v3 = vld [vmem:[#allocation11 + $0x2e00] sm:$0xff] }
 0x735   :  { %v15958_v54 = vadd.f32 %v10713_v31, %v8603_v9  ;;  %v10885_v36 = vpop.f32.mrb[24].mxu1  ;;  %v10715_v38 = vpop.f32.mrb[25].mxu0 }
 0x736   :  { %v15962_v41 = vadd.f32 %v10885_v36, %v8611_v25  ;;  %v15959_v42 = vadd.f32 %v10715_v38, %v8607_v26  ;;  %v10887_v43 = vpop.f32.mrb[25].mxu1  ;;  %v10717_v44 = vpop.f32.mrb[26].mxu0  ;;  %11034 = vmatpush1.bf16.msra.mxu0 %v15436_v27  ;;  %v8573_v36 = vld [vmem:[#allocation11 + $0x2ce0] sm:$0xff] }
 0x737   :  { %16255 = vtanh.f32 %v15958_v54  ;;  %v15963_v22 = vadd.f32 %v10887_v43, %v8615_v57  ;;  %v15960_v50 = vadd.f32 %v10717_v44, %v8603_v9  ;;  %v10889_v51 = vpop.f32.mrb[26].mxu1  ;;  %13596 = vmatpush1.bf16.msra.mxu1 %v15822_v28  ;;  %v10719_v52 = vpop.f32.mrb[27].mxu0  ;;  %11035 = vmatprep.subr.bf16.mxu0 %v15443_v29  ;;  %v8564_v9 = vld [vmem:[#allocation11 + $0x2bc0] sm:$0xff]  ;;  %v15846_v29 = vcombine.low %v11462_v14, %v11465_v19 }
 0x738   :  { %16257 = vtanh.f32 %v15962_v41  ;;  %v15964_v55 = vadd.f32 %v10889_v51, %v8611_v25  ;;  %v10891_v56 = vpop.f32.mrb[27].mxu1  ;;  %13597 = vmatprep.subr.bf16.mxu1 %v15829_v32  ;;  %v15961_v61 = vadd.f32 %v10719_v52, %v8607_v26  ;;  %v11468_v25 = vld [vmem:[#allocation11 + $0x2bc8] sm:$0xff]  ;;  %v15467_v31 = vcombine.high %v8564_v9, %v8567_v23  ;;  %v8570_v54 = vld [vmem:[#allocation11 + $0x2c80] sm:$0xff] }
 0x739   :  { %16259 = vtanh.f32 %v15959_v42  ;;  %v15965_v4 = vadd.f32 %v10891_v56, %v8615_v57  ;;  %v11471_v26 = vld [vmem:[#allocation11 + $0x2c28] sm:$0xff]  ;;  %v15460_v57 = vcombine.low %v8558_v12, %v8561_v13  ;;  %v15466_v43 = vcombine.low %v8564_v9, %v8567_v23  ;;  %v8576_v52 = vld [vmem:[#allocation11 + $0x2d40] sm:$0xff] }
 0x73a   :  { %16261 = vtanh.f32 %v15963_v22  ;;  %11036 = vmatpush1.bf16.msra.mxu0 %v15442_v47  ;;  %v15853_v33 = vcombine.high %v11468_v25, %v11471_v26  ;;  %v11477_v41 = vld [vmem:[#allocation11 + $0x2ce8] sm:$0xff]  ;;  %v15852_v47 = vcombine.low %v11468_v25, %v11471_v26  ;;  %v15472_v59 = vcombine.low %v8570_v54, %v8573_v36  ;;  %v8588_v14 = vld [vmem:[#allocation11 + $0x2ec0] sm:$0xff] }
 0x73b   :  { %16263 = vtanh.f32 %v15960_v50  ;;  %13598 = vmatpush1.bf16.msra.mxu1 %v15828_v49  ;;  %11037 = vmatprep.subr.bf16.mxu0 %v15449_v53  ;;  %v15473_v49 = vcombine.high %v8570_v54, %v8573_v36  ;;  %v15859_v51 = vcombine.high %v11474_v40, %v11477_v41  ;;  %v8579_v53 = vld [vmem:[#allocation11 + $0x2da0] sm:$0xff]  ;;  %v11480_v56 = vld [vmem:[#allocation11 + $0x2d48] sm:$0xff]  ;;  %v15858_v60 = vcombine.low %v11474_v40, %v11477_v41  ;;  %v11125_v54 = vld [vmem:[#allocation11 + $0xb8] sm:$0xff] }
 0x73c   :  { %16265 = vtanh.f32 %v15964_v55  ;;  %13599 = vmatprep.subr.bf16.mxu1 %v15835_v58  ;;  %v11483_v58 = vld [vmem:[#allocation11 + $0x2da8] sm:$0xff]  ;;  %v8591_v19 = vld [vmem:[#allocation11 + $0x2f20] sm:$0xff]  ;;  %v11127_v41 = vld [vmem:[#allocation11 + $0x110] sm:$0xff] }
 0x73d   :  { %16267 = vtanh.f32 %v15961_v61  ;;  %v15479_v61 = vcombine.high %v8576_v52, %v8579_v53  ;;  %v15865_v63 = vcombine.high %v11480_v56, %v11483_v58  ;;  %v15491_v9 = vcombine.high %v8588_v14, %v8591_v19  ;;  %v8597_v25 = vld [vmem:[#allocation11 + $0x2fe0] sm:$0xff]  ;;  %v11498_v26 = vld [vmem:[#allocation11 + $0x2f88] sm:$0xff] }
 0x73e   :  { %16269 = vtanh.f32 %v15965_v4  ;;  %11038 = vmatpush1.bf16.msra.mxu0 %v15448_v5  ;;  %v8585_v4 = vld [vmem:[#allocation11 + $0x2e60] sm:$0xff]  ;;  %v11486_v5 = vld [vmem:[#allocation11 + $0x2e08] sm:$0xff] }
 0x73f   :  { %13600 = vmatpush1.bf16.msra.mxu1 %v15834_v8  ;;  %11039 = vmatprep.subr.bf16.mxu0 %v15455_v10  ;;  %v11489_v8 = vld [vmem:[#allocation11 + $0x2e68] sm:$0xff]  ;;  %v15478_v10 = vcombine.low %v8576_v52, %v8579_v53  ;;  %v15485_v12 = vcombine.high %v8582_v3, %v8585_v4  ;;  %v11134_v53 = vld [vmem:[#allocation11 + $0x1d8] sm:$0xff] }
 0x740   :  { %13601 = vmatprep.subr.bf16.mxu1 %v15841_v11  ;;  %v15864_v11 = vcombine.low %v11480_v56, %v11483_v58  ;;  %v15871_v13 = vcombine.high %v11486_v5, %v11489_v8 }
 0x741   :  { %v16256_v24 = vpop.eup %16255 }
 0x742   :  { %v16258_v27 = vpop.eup %16257  ;;  %11040 = vmatpush1.bf16.msra.mxu0 %v15454_v20  ;;  %v11492_v20 = vld [vmem:[#allocation11 + $0x2ec8] sm:$0xff] }
 0x743   :  { %v16260_v28 = vpop.eup %16259  ;;  %13602 = vmatpush1.bf16.msra.mxu1 %v15840_v16  ;;  %11041 = vmatprep.subr.bf16.mxu0 %v15461_v17  ;;  %v11495_v16 = vld [vmem:[#allocation11 + $0x2f28] sm:$0xff]  ;;  %v15484_v17 = vcombine.low %v8582_v3, %v8585_v4  ;;  %v11140_v3 = vld [vmem:[#allocation11 + $0x298] sm:$0xff] }
 0x744   :  { %v16262_v32 = vpop.eup %16261  ;;  %v15906_v45 = vpack.c.bf16 %v16260_v28, %v16256_v24  ;;  %13603 = vmatprep.subr.bf16.mxu1 %v15847_v18  ;;  %v15870_v18 = vcombine.low %v11486_v5, %v11489_v8  ;;  %v15877_v23 = vcombine.high %v11492_v20, %v11495_v16  ;;  %v8594_v24 = vld [vmem:[#allocation11 + $0x2f80] sm:$0xff]  ;;  %v15876_v28 = vcombine.low %v11492_v20, %v11495_v16  ;;  %v11143_v4 = vld [vmem:[#allocation11 + $0x2f8] sm:$0xff] }
 0x745   :  { %v16264_v38 = vpop.eup %16263  ;;  %v15907_v39 = vpack.c.bf16 %v16262_v32, %v16258_v27  ;;  %v11501_v27 = vld [vmem:[#allocation11 + $0x2fe8] sm:$0xff]  ;;  %v11121_v32 = vld [vmem:[#allocation11 + $0x50] sm:$0xff]  ;;  %v15496_v36 = vcombine.low %v8594_v24, %v8597_v25  ;;  %v15526_v20 = vcombine.low %v11140_v3, %v11143_v4 }
 0x746   :  { %v16266_v42 = vpop.eup %16265  ;;  %11114 = vst [vmem:[#allocation14 + $0x30] sm:$0xff] %v15906_v45  ;;  %11042 = vmatpush1.bf16.msra.mxu0 %v15460_v57  ;;  %v15490_v57 = vcombine.low %v8588_v14, %v8591_v19  ;;  %v11124_v45 = vld [vmem:[#allocation11 + $0xb0] sm:$0xff]  ;;  %v11146_v14 = vld [vmem:[#allocation11 + $0x358] sm:$0xff] }
 0x747   :  { %v16268_v44 = vpop.eup %16267  ;;  %11115 = vst [vmem:[#allocation14 + $0x38] sm:$0xff] %v15907_v39  ;;  %13604 = vmatpush1.bf16.msra.mxu1 %v15846_v29  ;;  %11043 = vmatprep.subr.bf16.mxu0 %v15467_v31  ;;  %v15497_v29 = vcombine.high %v8594_v24, %v8597_v25  ;;  %v15883_v31 = vcombine.high %v11498_v26, %v11501_v27  ;;  %v11149_v19 = vld [vmem:[#allocation11 + $0x3b8] sm:$0xff] }
 0x748   :  { %v16270_v22 = vpop.eup %16269  ;;  %v15909_v50 = vpack.c.bf16 %v16268_v44, %v16264_v38  ;;  %13605 = vmatprep.subr.bf16.mxu1 %v15853_v33  ;;  %v11122_v33 = vld [vmem:[#allocation11 + $0x58] sm:$0xff]  ;;  %v15882_v38 = vcombine.low %v11498_v26, %v11501_v27  ;;  %v15507_v39 = vcombine.high %v11121_v32, %v11124_v45  ;;  %v15532_v26 = vcombine.low %v11146_v14, %v11149_v19 }
 0x749   :  { %v15910_v55 = vpack.c.bf16 %v16270_v22, %v16266_v42  ;;  %v15509_v40 = vcombine.high %v11122_v33, %v11125_v54  ;;  %v11130_v42 = vld [vmem:[#allocation11 + $0x170] sm:$0xff]  ;;  %v11128_v44 = vld [vmem:[#allocation11 + $0x118] sm:$0xff] }
 0x74a   :  { %11117 = vst [vmem:[#allocation14 + $0x90] sm:$0xff] %v15909_v50  ;;  %11044 = vmatpush1.bf16.msra.mxu0 %v15466_v43  ;;  %v15506_v43 = vcombine.low %v11121_v32, %v11124_v45  ;;  %v15513_v22 = vcombine.high %v11127_v41, %v11130_v42  ;;  %v11133_v50 = vld [vmem:[#allocation11 + $0x1d0] sm:$0xff]  ;;  %v15512_v56 = vcombine.low %v11127_v41, %v11130_v42  ;;  %v11155_v24 = vld [vmem:[#allocation11 + $0x478] sm:$0xff] }
 0x74b   :  { %11118 = vst [vmem:[#allocation14 + $0x98] sm:$0xff] %v15910_v55  ;;  %13606 = vmatpush1.bf16.msra.mxu1 %v15852_v47  ;;  %11045 = vmatprep.subr.bf16.mxu0 %v15473_v49  ;;  %v11131_v47 = vld [vmem:[#allocation11 + $0x178] sm:$0xff]  ;;  %v15508_v49 = vcombine.low %v11122_v33, %v11125_v54 }
 0x74c   :  { %13607 = vmatprep.subr.bf16.mxu1 %v15859_v51  ;;  %v11136_v51 = vld [vmem:[#allocation11 + $0x230] sm:$0xff]  ;;  %v15515_v52 = vcombine.high %v11128_v44, %v11131_v47  ;;  %v11137_v55 = vld [vmem:[#allocation11 + $0x238] sm:$0xff]  ;;  %v15514_v58 = vcombine.low %v11128_v44, %v11131_v47 }
 0x74d   :  { %v15518_v5 = vcombine.low %v11133_v50, %v11136_v51  ;;  %v15520_v8 = vcombine.low %v11134_v53, %v11137_v55  ;;  %v11161_v32 = vld [vmem:[#allocation11 + $0x538] sm:$0xff] }
 0x74e   :  { %11046 = vmatpush1.bf16.msra.mxu0 %v15472_v59  ;;  %v15519_v59 = vcombine.high %v11133_v50, %v11136_v51  ;;  %v11167_v41 = vld [vmem:[#allocation11 + $0x5f8] sm:$0xff] }
 0x74f   :  { %13608 = vmatpush1.bf16.msra.mxu1 %v15858_v60  ;;  %11047 = vmatprep.subr.bf16.mxu0 %v15479_v61  ;;  %v15521_v60 = vcombine.high %v11134_v53, %v11137_v55  ;;  %v11139_v61 = vld [vmem:[#allocation11 + $0x290] sm:$0xff]  ;;  %v11170_v50 = vld [vmem:[#allocation11 + $0x658] sm:$0xff] }
 0x750   :  { %13609 = vmatprep.subr.bf16.mxu1 %v15865_v63  ;;  %v11142_v63 = vld [vmem:[#allocation11 + $0x2f0] sm:$0xff]  ;;  %v11173_v51 = vld [vmem:[#allocation11 + $0x6b8] sm:$0xff] }
 0x752   :  { %11048 = vmatpush1.bf16.msra.mxu0 %v15478_v10  ;;  %v15525_v10 = vcombine.high %v11139_v61, %v11142_v63 }
 0x753   :  { %13610 = vmatpush1.bf16.msra.mxu1 %v15864_v11  ;;  %11049 = vmatprep.subr.bf16.mxu0 %v15485_v12  ;;  %v15527_v11 = vcombine.high %v11140_v3, %v11143_v4  ;;  %v11145_v12 = vld [vmem:[#allocation11 + $0x350] sm:$0xff]  ;;  %v15556_v3 = vcombine.low %v11170_v50, %v11173_v51 }
 0x754   :  { %13611 = vmatprep.subr.bf16.mxu1 %v15871_v13  ;;  %v11148_v13 = vld [vmem:[#allocation11 + $0x3b0] sm:$0xff] }
 0x755   :  { %v15531_v16 = vcombine.high %v11145_v12, %v11148_v13  ;;  %v15530_v25 = vcombine.low %v11145_v12, %v11148_v13  ;;  %v11185_v12 = vld [vmem:[#allocation11 + $0x838] sm:$0xff] }
 0x756   :  { %11050 = vmatpush1.bf16.msra.mxu0 %v15484_v17  ;;  %v15533_v17 = vcombine.high %v11146_v14, %v11149_v19 }
 0x757   :  { %13612 = vmatpush1.bf16.msra.mxu1 %v15870_v18  ;;  %11051 = vmatprep.subr.bf16.mxu0 %v15491_v9  ;;  %v11151_v18 = vld [vmem:[#allocation11 + $0x410] sm:$0xff] }
 0x758   :  { %13613 = vmatprep.subr.bf16.mxu1 %v15877_v23  ;;  %v11154_v9 = vld [vmem:[#allocation11 + $0x470] sm:$0xff]  ;;  %v11152_v23 = vld [vmem:[#allocation11 + $0x418] sm:$0xff] }
 0x759   :  { %v15537_v27 = vcombine.high %v11151_v18, %v11154_v9  ;;  %v15536_v45 = vcombine.low %v11151_v18, %v11154_v9  ;;  %v15538_v33 = vcombine.low %v11152_v23, %v11155_v24  ;;  %v11191_v18 = vld [vmem:[#allocation11 + $0x8f8] sm:$0xff] }
 0x75a   :  { %11052 = vmatpush1.bf16.msra.mxu0 %v15490_v57  ;;  %v15539_v57 = vcombine.high %v11152_v23, %v11155_v24 }
 0x75b   :  { %13614 = vmatpush1.bf16.msra.mxu1 %v15876_v28  ;;  %11053 = vmatprep.subr.bf16.mxu0 %v15497_v29  ;;  %v11157_v28 = vld [vmem:[#allocation11 + $0x4d0] sm:$0xff] }
 0x75c   :  { %13615 = vmatprep.subr.bf16.mxu1 %v15883_v31  ;;  %v11160_v29 = vld [vmem:[#allocation11 + $0x530] sm:$0xff]  ;;  %v11158_v31 = vld [vmem:[#allocation11 + $0x4d8] sm:$0xff] }
 0x75d   :  { %v15543_v54 = vcombine.high %v11157_v28, %v11160_v29  ;;  %v15542_v42 = vcombine.low %v11157_v28, %v11160_v29  ;;  %v11197_v28 = vld [vmem:[#allocation11 + $0x9b8] sm:$0xff] }
 0x75e   :  { %11054 = vmatpush1.bf16.msra.mxu0 %v15496_v36  ;;  %v15545_v36 = vcombine.high %v11158_v31, %v11161_v32 }
 0x75f   :  { %13616 = vmatpush1.bf16.msra.mxu1 %v15882_v38  ;;  %13628 = vmatprep.subr.bf16.mxu0 %v15507_v39  ;;  %v11163_v38 = vld [vmem:[#allocation11 + $0x590] sm:$0xff] }
 0x760   :  { %13800 = vmatprep.subr.bf16.mxu1 %v15509_v40  ;;  %v11166_v39 = vld [vmem:[#allocation11 + $0x5f0] sm:$0xff]  ;;  %v11164_v40 = vld [vmem:[#allocation11 + $0x598] sm:$0xff] }
 0x761   :  { %11056 = vmatmul.mubr.bf16.vlgmr.msra.gmra.mrb[28].mxu0 %v16748_v34  ;;  %v15549_v44 = vcombine.high %v11163_v38, %v11166_v39  ;;  %v15551_v47 = vcombine.high %v11164_v40, %v11167_v41  ;;  %v15550_v53 = vcombine.low %v11164_v40, %v11167_v41 }
 0x762   :  { %13618 = vmatmul.mubr.bf16.vlgmr.msra.gmra.mrb[28].mxu1 %v16748_v34  ;;  %13629 = vmatpush1.bf16.msra.mxu0 %v15506_v43  ;;  %v15544_v43 = vcombine.low %v11158_v31, %v11161_v32 }
 0x763   :  { %13660 = vmatprep.mubr.bf16.mxu0 %v16704_v6  ;;  %13801 = vmatpush1.bf16.msra.mxu1 %v15508_v49  ;;  %v11169_v49 = vld [vmem:[#allocation11 + $0x650] sm:$0xff] }
 0x764   :  { %13832 = vmatprep.mubr.bf16.mxu1 %v16704_v6  ;;  %13630 = vmatprep.subr.bf16.mxu0 %v15513_v22  ;;  %v15524_v6 = vcombine.low %v11139_v61, %v11142_v63  ;;  %v11172_v22 = vld [vmem:[#allocation11 + $0x6b0] sm:$0xff]  ;;  %v11179_v61 = vld [vmem:[#allocation11 + $0x778] sm:$0xff] }
 0x765   :  { %13802 = vmatprep.subr.bf16.mxu1 %v15515_v52  ;;  %v15548_v52 = vcombine.low %v11163_v38, %v11166_v39  ;;  %v15555_v55 = vcombine.high %v11169_v49, %v11172_v22  ;;  %v15554_v63 = vcombine.low %v11169_v49, %v11172_v22  ;;  %v11203_v38 = vld [vmem:[#allocation11 + $0xa78] sm:$0xff] }
 0x766   :  { %13631 = vmatpush1.bf16.msra.mxu0 %v15512_v56  ;;  %v15557_v56 = vcombine.high %v11170_v50, %v11173_v51  ;;  %v11209_v49 = vld [vmem:[#allocation11 + $0xb38] sm:$0xff] }
 0x767   :  { %13803 = vmatpush1.bf16.msra.mxu1 %v15514_v58  ;;  %13632 = vmatprep.subr.bf16.mxu0 %v15519_v59  ;;  %v11175_v58 = vld [vmem:[#allocation11 + $0x710] sm:$0xff] }
 0x768   :  { %13804 = vmatprep.subr.bf16.mxu1 %v15521_v60  ;;  %v11178_v59 = vld [vmem:[#allocation11 + $0x770] sm:$0xff]  ;;  %v11176_v60 = vld [vmem:[#allocation11 + $0x718] sm:$0xff] }
 0x769   :  { %v15561_v4 = vcombine.high %v11175_v58, %v11178_v59  ;;  %v15560_v13 = vcombine.low %v11175_v58, %v11178_v59  ;;  %v15562_v14 = vcombine.low %v11176_v60, %v11179_v61  ;;  %v11215_v58 = vld [vmem:[#allocation11 + $0xbf8] sm:$0xff] }
 0x76a   :  { %13633 = vmatpush1.bf16.msra.mxu0 %v15518_v5  ;;  %v15563_v5 = vcombine.high %v11176_v60, %v11179_v61 }
 0x76b   :  { %13805 = vmatpush1.bf16.msra.mxu1 %v15520_v8  ;;  %13634 = vmatprep.subr.bf16.mxu0 %v15525_v10  ;;  %v11181_v8 = vld [vmem:[#allocation11 + $0x7d0] sm:$0xff] }
 0x76c   :  { %13806 = vmatprep.subr.bf16.mxu1 %v15527_v11  ;;  %v11184_v10 = vld [vmem:[#allocation11 + $0x830] sm:$0xff]  ;;  %v11182_v11 = vld [vmem:[#allocation11 + $0x7d8] sm:$0xff] }
 0x76d   :  { %v15567_v19 = vcombine.high %v11181_v8, %v11184_v10  ;;  %v15566_v9 = vcombine.low %v11181_v8, %v11184_v10  ;;  %v15568_v23 = vcombine.low %v11182_v11, %v11185_v12  ;;  %v11221_v8 = vld [vmem:[#allocation11 + $0xcb8] sm:$0xff] }
 0x76e   :  { %13635 = vmatpush1.bf16.msra.mxu0 %v15524_v6  ;;  %v15569_v6 = vcombine.high %v11182_v11, %v11185_v12 }
 0x76f   :  { %13807 = vmatpush1.bf16.msra.mxu1 %v15526_v20  ;;  %13636 = vmatprep.subr.bf16.mxu0 %v15531_v16  ;;  %v11187_v20 = vld [vmem:[#allocation11 + $0x890] sm:$0xff] }
 0x770   :  { %13808 = vmatprep.subr.bf16.mxu1 %v15533_v17  ;;  %v11190_v16 = vld [vmem:[#allocation11 + $0x8f0] sm:$0xff]  ;;  %v11188_v17 = vld [vmem:[#allocation11 + $0x898] sm:$0xff] }
 0x771   :  { %v15573_v24 = vcombine.high %v11187_v20, %v11190_v16  ;;  %v15572_v29 = vcombine.low %v11187_v20, %v11190_v16  ;;  %v15574_v31 = vcombine.low %v11188_v17, %v11191_v18  ;;  %v11224_v20 = vld [vmem:[#allocation11 + $0xd18] sm:$0xff] }
 0x772   :  { %13637 = vmatpush1.bf16.msra.mxu0 %v15530_v25  ;;  %v15575_v25 = vcombine.high %v11188_v17, %v11191_v18  ;;  %v11227_v16 = vld [vmem:[#allocation11 + $0xd78] sm:$0xff] }
 0x773   :  { %13809 = vmatpush1.bf16.msra.mxu1 %v15532_v26  ;;  %13638 = vmatprep.subr.bf16.mxu0 %v15537_v27  ;;  %v11193_v26 = vld [vmem:[#allocation11 + $0x950] sm:$0xff] }
 0x774   :  { %13810 = vmatprep.subr.bf16.mxu1 %v15539_v57  ;;  %v11196_v27 = vld [vmem:[#allocation11 + $0x9b0] sm:$0xff]  ;;  %v11194_v57 = vld [vmem:[#allocation11 + $0x958] sm:$0xff] }
 0x775   :  { %v15579_v32 = vcombine.high %v11193_v26, %v11196_v27  ;;  %v15578_v39 = vcombine.low %v11193_v26, %v11196_v27  ;;  %v15580_v40 = vcombine.low %v11194_v57, %v11197_v28  ;;  %v11233_v26 = vld [vmem:[#allocation11 + $0xe38] sm:$0xff] }
 0x776   :  { %13639 = vmatpush1.bf16.msra.mxu0 %v15536_v45  ;;  %v15581_v45 = vcombine.high %v11194_v57, %v11197_v28  ;;  %v15610_v57 = vcombine.low %v11224_v20, %v11227_v16 }
 0x777   :  { %13811 = vmatpush1.bf16.msra.mxu1 %v15538_v33  ;;  %13640 = vmatprep.subr.bf16.mxu0 %v15543_v54  ;;  %v11199_v33 = vld [vmem:[#allocation11 + $0xa10] sm:$0xff] }
 0x778   :  { %13812 = vmatprep.subr.bf16.mxu1 %v15545_v36  ;;  %v11202_v54 = vld [vmem:[#allocation11 + $0xa70] sm:$0xff]  ;;  %v11200_v36 = vld [vmem:[#allocation11 + $0xa18] sm:$0xff] }
 0x779   :  { %v15585_v41 = vcombine.high %v11199_v33, %v11202_v54  ;;  %v15584_v22 = vcombine.low %v11199_v33, %v11202_v54  ;;  %v15586_v50 = vcombine.low %v11200_v36, %v11203_v38  ;;  %v11239_v33 = vld [vmem:[#allocation11 + $0xef8] sm:$0xff] }
 0x77a   :  { %13641 = vmatpush1.bf16.msra.mxu0 %v15542_v42  ;;  %v15587_v42 = vcombine.high %v11200_v36, %v11203_v38 }
 0x77b   :  { %13813 = vmatpush1.bf16.msra.mxu1 %v15544_v43  ;;  %13642 = vmatprep.subr.bf16.mxu0 %v15549_v44  ;;  %v11205_v43 = vld [vmem:[#allocation11 + $0xad0] sm:$0xff] }
 0x77c   :  { %13814 = vmatprep.subr.bf16.mxu1 %v15551_v47  ;;  %v11208_v44 = vld [vmem:[#allocation11 + $0xb30] sm:$0xff]  ;;  %v11206_v47 = vld [vmem:[#allocation11 + $0xad8] sm:$0xff] }
 0x77d   :  { %v15591_v51 = vcombine.high %v11205_v43, %v11208_v44  ;;  %v15590_v59 = vcombine.low %v11205_v43, %v11208_v44  ;;  %v15592_v60 = vcombine.low %v11206_v47, %v11209_v49 }
 0x77e   :  { %13643 = vmatpush1.bf16.msra.mxu0 %v15548_v52  ;;  %v15593_v52 = vcombine.high %v11206_v47, %v11209_v49  ;;  %v11247_v49 = vld [vmem:[#allocation11 + $0x1010] sm:$0xff] }
 0x77f   :  { %13815 = vmatpush1.bf16.msra.mxu1 %v15550_v53  ;;  %13644 = vmatprep.subr.bf16.mxu0 %v15555_v55  ;;  %v11211_v53 = vld [vmem:[#allocation11 + $0xb90] sm:$0xff] }
 0x780   :  { %13816 = vmatprep.subr.bf16.mxu1 %v15557_v56  ;;  %v11214_v55 = vld [vmem:[#allocation11 + $0xbf0] sm:$0xff]  ;;  %v11212_v56 = vld [vmem:[#allocation11 + $0xb98] sm:$0xff] }
 0x781   :  { %v15597_v61 = vcombine.high %v11211_v53, %v11214_v55  ;;  %v15596_v10 = vcombine.low %v11211_v53, %v11214_v55  ;;  %v15598_v11 = vcombine.low %v11212_v56, %v11215_v58 }
 0x782   :  { %13645 = vmatpush1.bf16.msra.mxu0 %v15554_v63  ;;  %v15599_v63 = vcombine.high %v11212_v56, %v11215_v58  ;;  %v11253_v58 = vld [vmem:[#allocation11 + $0x10d0] sm:$0xff] }
 0x783   :  { %13817 = vmatpush1.bf16.msra.mxu1 %v15556_v3  ;;  %13646 = vmatprep.subr.bf16.mxu0 %v15561_v4  ;;  %v11217_v3 = vld [vmem:[#allocation11 + $0xc50] sm:$0xff] }
 0x784   :  { %13818 = vmatprep.subr.bf16.mxu1 %v15563_v5  ;;  %v11220_v4 = vld [vmem:[#allocation11 + $0xcb0] sm:$0xff]  ;;  %v11218_v5 = vld [vmem:[#allocation11 + $0xc58] sm:$0xff] }
 0x785   :  { %v15603_v12 = vcombine.high %v11217_v3, %v11220_v4  ;;  %v15604_v17 = vcombine.low %v11218_v5, %v11221_v8 }
 0x786   :  { %13647 = vmatpush1.bf16.msra.mxu0 %v15560_v13  ;;  %v15605_v13 = vcombine.high %v11218_v5, %v11221_v8  ;;  %v11259_v8 = vld [vmem:[#allocation11 + $0x1190] sm:$0xff] }
 0x787   :  { %13819 = vmatpush1.bf16.msra.mxu1 %v15562_v14  ;;  %13648 = vmatprep.subr.bf16.mxu0 %v15567_v19  ;;  %v11223_v14 = vld [vmem:[#allocation11 + $0xd10] sm:$0xff] }
 0x788   :  { %13820 = vmatprep.subr.bf16.mxu1 %v15569_v6  ;;  %v11226_v19 = vld [vmem:[#allocation11 + $0xd70] sm:$0xff]  ;;  %v15602_v6 = vcombine.low %v11217_v3, %v11220_v4 }
 0x789   :  { %v15609_v18 = vcombine.high %v11223_v14, %v11226_v19  ;;  %v15608_v27 = vcombine.low %v11223_v14, %v11226_v19 }
 0x78a   :  { %13649 = vmatpush1.bf16.msra.mxu0 %v15566_v9  ;;  %v11229_v9 = vld [vmem:[#allocation11 + $0xdd0] sm:$0xff] }
 0x78b   :  { %13821 = vmatpush1.bf16.msra.mxu1 %v15568_v23  ;;  %13650 = vmatprep.subr.bf16.mxu0 %v15573_v24  ;;  %v11232_v23 = vld [vmem:[#allocation11 + $0xe30] sm:$0xff]  ;;  %v15611_v24 = vcombine.high %v11224_v20, %v11227_v16 }
 0x78c   :  { %13822 = vmatprep.subr.bf16.mxu1 %v15575_v25  ;;  %v11230_v25 = vld [vmem:[#allocation11 + $0xdd8] sm:$0xff]  ;;  %v15615_v28 = vcombine.high %v11229_v9, %v11232_v23  ;;  %v15614_v54 = vcombine.low %v11229_v9, %v11232_v23  ;;  %v11265_v20 = vld [vmem:[#allocation11 + $0x1250] sm:$0xff] }
 0x78d   :  { %v11268_v16 = vld [vmem:[#allocation11 + $0x12b0] sm:$0xff] }
 0x78e   :  { %13651 = vmatpush1.bf16.msra.mxu0 %v15572_v29  ;;  %v15617_v29 = vcombine.high %v11230_v25, %v11233_v26 }
 0x78f   :  { %13823 = vmatpush1.bf16.msra.mxu1 %v15574_v31  ;;  %13652 = vmatprep.subr.bf16.mxu0 %v15579_v32  ;;  %v11235_v31 = vld [vmem:[#allocation11 + $0xe90] sm:$0xff] }
 0x790   :  { %13824 = vmatprep.subr.bf16.mxu1 %v15581_v45  ;;  %v11238_v32 = vld [vmem:[#allocation11 + $0xef0] sm:$0xff]  ;;  %v11236_v45 = vld [vmem:[#allocation11 + $0xe98] sm:$0xff] }
 0x791   :  { %v15621_v36 = vcombine.high %v11235_v31, %v11238_v32  ;;  %v15623_v38 = vcombine.high %v11236_v45, %v11239_v33  ;;  %v15622_v43 = vcombine.low %v11236_v45, %v11239_v33  ;;  %v11277_v33 = vld [vmem:[#allocation11 + $0x13d0] sm:$0xff] }
 0x792   :  { %13653 = vmatpush1.bf16.msra.mxu0 %v15578_v39  ;;  %v11241_v39 = vld [vmem:[#allocation11 + $0xf50] sm:$0xff] }
 0x793   :  { %13825 = vmatpush1.bf16.msra.mxu1 %v15580_v40  ;;  %13654 = vmatprep.subr.bf16.mxu0 %v15585_v41  ;;  %v11244_v40 = vld [vmem:[#allocation11 + $0xfb0] sm:$0xff]  ;;  %v11242_v41 = vld [vmem:[#allocation11 + $0xf58] sm:$0xff] }
 0x794   :  { %13826 = vmatprep.subr.bf16.mxu1 %v15587_v42  ;;  %v11245_v42 = vld [vmem:[#allocation11 + $0xfb8] sm:$0xff]  ;;  %v15627_v44 = vcombine.high %v11241_v39, %v11244_v40 }
 0x795   :  { %v15629_v47 = vcombine.high %v11242_v41, %v11245_v42  ;;  %v15628_v53 = vcombine.low %v11242_v41, %v11245_v42  ;;  %v11283_v42 = vld [vmem:[#allocation11 + $0x1490] sm:$0xff] }
 0x796   :  { %13655 = vmatpush1.bf16.msra.mxu0 %v15584_v22  ;;  %v11250_v22 = vld [vmem:[#allocation11 + $0x1070] sm:$0xff] }
 0x797   :  { %13827 = vmatpush1.bf16.msra.mxu1 %v15586_v50  ;;  %13656 = vmatprep.subr.bf16.mxu0 %v15591_v51  ;;  %v11248_v50 = vld [vmem:[#allocation11 + $0x1018] sm:$0xff]  ;;  %v15633_v55 = vcombine.high %v11247_v49, %v11250_v22 }
 0x798   :  { %13828 = vmatprep.subr.bf16.mxu1 %v15593_v52  ;;  %v11251_v51 = vld [vmem:[#allocation11 + $0x1078] sm:$0xff]  ;;  %v15626_v52 = vcombine.low %v11241_v39, %v11244_v40 }
 0x799   :  { %v15635_v56 = vcombine.high %v11248_v50, %v11251_v51  ;;  %v15634_v3 = vcombine.low %v11248_v50, %v11251_v51  ;;  %v11289_v51 = vld [vmem:[#allocation11 + $0x1550] sm:$0xff] }
 0x79a   :  { %13657 = vmatpush1.bf16.msra.mxu0 %v15590_v59  ;;  %v11256_v59 = vld [vmem:[#allocation11 + $0x1130] sm:$0xff] }
 0x79b   :  { %13829 = vmatpush1.bf16.msra.mxu1 %v15592_v60  ;;  %13658 = vmatprep.subr.bf16.mxu0 %v15597_v61  ;;  %v11254_v60 = vld [vmem:[#allocation11 + $0x10d8] sm:$0xff]  ;;  %v15639_v4 = vcombine.high %v11253_v58, %v11256_v59 }
 0x79c   :  { %13830 = vmatprep.subr.bf16.mxu1 %v15599_v63  ;;  %v11257_v61 = vld [vmem:[#allocation11 + $0x1138] sm:$0xff]  ;;  %v15632_v63 = vcombine.low %v11247_v49, %v11250_v22 }
 0x79d   :  { %v15641_v5 = vcombine.high %v11254_v60, %v11257_v61  ;;  %v15640_v14 = vcombine.low %v11254_v60, %v11257_v61  ;;  %v11295_v61 = vld [vmem:[#allocation11 + $0x1610] sm:$0xff] }
 0x79e   :  { %13659 = vmatpush1.bf16.msra.mxu0 %v15596_v10  ;;  %v11262_v10 = vld [vmem:[#allocation11 + $0x11f0] sm:$0xff] }
 0x79f   :  { %13831 = vmatpush1.bf16.msra.mxu1 %v15598_v11  ;;  %13671 = vmatprep.subr.bf16.mxu0 %v15603_v12  ;;  %v11260_v11 = vld [vmem:[#allocation11 + $0x1198] sm:$0xff]  ;;  %v15645_v19 = vcombine.high %v11259_v8, %v11262_v10  ;;  %v15644_v9 = vcombine.low %v11259_v8, %v11262_v10 }
 0x7a0   :  { %13843 = vmatprep.subr.bf16.mxu1 %v15605_v13  ;;  %v11263_v12 = vld [vmem:[#allocation11 + $0x11f8] sm:$0xff]  ;;  %v15638_v13 = vcombine.low %v11253_v58, %v11256_v59 }
 0x7a1   :  { %13661 = vmatmul.mubr.bf16.vlgmr.msra.gmra.mrb[32].mxu0 %v16700_v1  ;;  %v15646_v23 = vcombine.low %v11260_v11, %v11263_v12 }
 0x7a2   :  { %13833 = vmatmul.mubr.bf16.vlgmr.msra.gmra.mrb[32].mxu1 %v16700_v1  ;;  %13672 = vmatpush1.bf16.msra.mxu0 %v15602_v6  ;;  %v15616_v1 = vcombine.low %v11230_v25, %v11233_v26  ;;  %v15647_v6 = vcombine.high %v11260_v11, %v11263_v12  ;;  %v11271_v26 = vld [vmem:[#allocation11 + $0x1310] sm:$0xff] }
 0x7a3   :  { %13703 = vmatprep.mubr.bf16.mxu0 %v16706_v7  ;;  %13844 = vmatpush1.bf16.msra.mxu1 %v15604_v17  ;;  %v11266_v17 = vld [vmem:[#allocation11 + $0x1258] sm:$0xff]  ;;  %v11301_v12 = vld [vmem:[#allocation11 + $0x16d0] sm:$0xff] }
 0x7a4   :  { %13875 = vmatprep.mubr.bf16.mxu1 %v16706_v7  ;;  %13673 = vmatprep.subr.bf16.mxu0 %v15609_v18  ;;  %v15620_v7 = vcombine.low %v11235_v31, %v11238_v32  ;;  %v11269_v18 = vld [vmem:[#allocation11 + $0x12b8] sm:$0xff] }
 0x7a5   :  { %13845 = vmatprep.subr.bf16.mxu1 %v15611_v24  ;;  %v15651_v24 = vcombine.high %v11265_v20, %v11268_v16  ;;  %v15653_v25 = vcombine.high %v11266_v17, %v11269_v18  ;;  %v15652_v31 = vcombine.low %v11266_v17, %v11269_v18  ;;  %v11307_v18 = vld [vmem:[#allocation11 + $0x1790] sm:$0xff] }
 0x7a6   :  { %13674 = vmatpush1.bf16.msra.mxu0 %v15608_v27  ;;  %v11274_v27 = vld [vmem:[#allocation11 + $0x1370] sm:$0xff] }
 0x7a7   :  { %13846 = vmatpush1.bf16.msra.mxu1 %v15610_v57  ;;  %13675 = vmatprep.subr.bf16.mxu0 %v15615_v28  ;;  %v11272_v57 = vld [vmem:[#allocation11 + $0x1318] sm:$0xff]  ;;  %v15657_v32 = vcombine.high %v11271_v26, %v11274_v27 }
 0x7a8   :  { %13847 = vmatprep.subr.bf16.mxu1 %v15617_v29  ;;  %v11275_v28 = vld [vmem:[#allocation11 + $0x1378] sm:$0xff]  ;;  %v15650_v29 = vcombine.low %v11265_v20, %v11268_v16 }
 0x7a9   :  { %v15659_v45 = vcombine.high %v11272_v57, %v11275_v28  ;;  %v15658_v39 = vcombine.low %v11272_v57, %v11275_v28  ;;  %v11313_v28 = vld [vmem:[#allocation11 + $0x1850] sm:$0xff] }
 0x7aa   :  { %13676 = vmatpush1.bf16.msra.mxu0 %v15614_v54  ;;  %v11280_v54 = vld [vmem:[#allocation11 + $0x1430] sm:$0xff] }
 0x7ab   :  { %13848 = vmatpush1.bf16.msra.mxu1 %v15616_v1  ;;  %13677 = vmatprep.subr.bf16.mxu0 %v15621_v36  ;;  %v11278_v1 = vld [vmem:[#allocation11 + $0x13d8] sm:$0xff]  ;;  %v15663_v40 = vcombine.high %v11277_v33, %v11280_v54 }
 0x7ac   :  { %13849 = vmatprep.subr.bf16.mxu1 %v15623_v38  ;;  %v11281_v36 = vld [vmem:[#allocation11 + $0x1438] sm:$0xff]  ;;  %v15656_v38 = vcombine.low %v11271_v26, %v11274_v27 }
 0x7ad   :  { %v15665_v41 = vcombine.high %v11278_v1, %v11281_v36  ;;  %v15664_v49 = vcombine.low %v11278_v1, %v11281_v36  ;;  %v11319_v36 = vld [vmem:[#allocation11 + $0x1910] sm:$0xff] }
 0x7ae   :  { %13678 = vmatpush1.bf16.msra.mxu0 %v15620_v7  ;;  %v11286_v7 = vld [vmem:[#allocation11 + $0x14f0] sm:$0xff] }
 0x7af   :  { %13850 = vmatpush1.bf16.msra.mxu1 %v15622_v43  ;;  %13679 = vmatprep.subr.bf16.mxu0 %v15627_v44  ;;  %v11284_v43 = vld [vmem:[#allocation11 + $0x1498] sm:$0xff]  ;;  %v15669_v22 = vcombine.high %v11283_v42, %v11286_v7 }
 0x7b0   :  { %13851 = vmatprep.subr.bf16.mxu1 %v15629_v47  ;;  %v11287_v44 = vld [vmem:[#allocation11 + $0x14f8] sm:$0xff]  ;;  %v15662_v47 = vcombine.low %v11277_v33, %v11280_v54 }
 0x7b1   :  { %v15671_v50 = vcombine.high %v11284_v43, %v11287_v44  ;;  %v15670_v58 = vcombine.low %v11284_v43, %v11287_v44  ;;  %v11325_v43 = vld [vmem:[#allocation11 + $0x19d0] sm:$0xff] }
 0x7b2   :  { %13680 = vmatpush1.bf16.msra.mxu0 %v15626_v52  ;;  %v11292_v52 = vld [vmem:[#allocation11 + $0x15b0] sm:$0xff] }
 0x7b3   :  { %13852 = vmatpush1.bf16.msra.mxu1 %v15628_v53  ;;  %13681 = vmatprep.subr.bf16.mxu0 %v15633_v55  ;;  %v11290_v53 = vld [vmem:[#allocation11 + $0x1558] sm:$0xff]  ;;  %v15675_v59 = vcombine.high %v11289_v51, %v11292_v52  ;;  %v11328_v44 = vld [vmem:[#allocation11 + $0x1a30] sm:$0xff] }
 0x7b4   :  { %13853 = vmatprep.subr.bf16.mxu1 %v15635_v56  ;;  %v11293_v55 = vld [vmem:[#allocation11 + $0x15b8] sm:$0xff]  ;;  %v15668_v56 = vcombine.low %v11283_v42, %v11286_v7 }
 0x7b5   :  { %v15677_v60 = vcombine.high %v11290_v53, %v11293_v55  ;;  %v15676_v8 = vcombine.low %v11290_v53, %v11293_v55  ;;  %v11331_v55 = vld [vmem:[#allocation11 + $0x1a90] sm:$0xff] }
 0x7b6   :  { %13682 = vmatpush1.bf16.msra.mxu0 %v15632_v63  ;;  %v11298_v63 = vld [vmem:[#allocation11 + $0x1670] sm:$0xff] }
 0x7b7   :  { %13854 = vmatpush1.bf16.msra.mxu1 %v15634_v3  ;;  %13683 = vmatprep.subr.bf16.mxu0 %v15639_v4  ;;  %v11296_v3 = vld [vmem:[#allocation11 + $0x1618] sm:$0xff]  ;;  %v15681_v10 = vcombine.high %v11295_v61, %v11298_v63 }
 0x7b8   :  { %13855 = vmatprep.subr.bf16.mxu1 %v15641_v5  ;;  %v11299_v4 = vld [vmem:[#allocation11 + $0x1678] sm:$0xff]  ;;  %v15674_v5 = vcombine.low %v11289_v51, %v11292_v52  ;;  %v15711_v52 = vcombine.high %v11325_v43, %v11328_v44 }
 0x7b9   :  { %v15683_v11 = vcombine.high %v11296_v3, %v11299_v4  ;;  %v15682_v20 = vcombine.low %v11296_v3, %v11299_v4  ;;  %v11337_v3 = vld [vmem:[#allocation11 + $0x1b50] sm:$0xff] }
 0x7ba   :  { %13684 = vmatpush1.bf16.msra.mxu0 %v15638_v13  ;;  %v11304_v13 = vld [vmem:[#allocation11 + $0x1730] sm:$0xff] }
 0x7bb   :  { %13856 = vmatpush1.bf16.msra.mxu1 %v15640_v14  ;;  %13685 = vmatprep.subr.bf16.mxu0 %v15645_v19  ;;  %v11302_v14 = vld [vmem:[#allocation11 + $0x16d8] sm:$0xff]  ;;  %v15687_v16 = vcombine.high %v11301_v12, %v11304_v13  ;;  %v11340_v4 = vld [vmem:[#allocation11 + $0x1bb0] sm:$0xff] }
 0x7bc   :  { %13857 = vmatprep.subr.bf16.mxu1 %v15647_v6  ;;  %v11305_v19 = vld [vmem:[#allocation11 + $0x1738] sm:$0xff]  ;;  %v15680_v6 = vcombine.low %v11295_v61, %v11298_v63 }
 0x7bd   :  { %v15689_v17 = vcombine.high %v11302_v14, %v11305_v19  ;;  %v15688_v26 = vcombine.low %v11302_v14, %v11305_v19  ;;  %v11346_v14 = vld [vmem:[#allocation11 + $0x1c70] sm:$0xff]  ;;  %v11344_v19 = vld [vmem:[#allocation11 + $0x1c18] sm:$0xff] }
 0x7be   :  { %13686 = vmatpush1.bf16.msra.mxu0 %v15644_v9  ;;  %v11310_v9 = vld [vmem:[#allocation11 + $0x17f0] sm:$0xff] }
 0x7bf   :  { %13858 = vmatpush1.bf16.msra.mxu1 %v15646_v23  ;;  %13687 = vmatprep.subr.bf16.mxu0 %v15651_v24  ;;  %v11308_v23 = vld [vmem:[#allocation11 + $0x1798] sm:$0xff]  ;;  %v15693_v27 = vcombine.high %v11307_v18, %v11310_v9 }
 0x7c0   :  { %13859 = vmatprep.subr.bf16.mxu1 %v15653_v25  ;;  %v11311_v24 = vld [vmem:[#allocation11 + $0x17f8] sm:$0xff]  ;;  %v15686_v25 = vcombine.low %v11301_v12, %v11304_v13  ;;  %v11343_v13 = vld [vmem:[#allocation11 + $0x1c10] sm:$0xff] }
 0x7c1   :  { %v15695_v57 = vcombine.high %v11308_v23, %v11311_v24  ;;  %v15694_v33 = vcombine.low %v11308_v23, %v11311_v24  ;;  %v11352_v23 = vld [vmem:[#allocation11 + $0x1d30] sm:$0xff]  ;;  %v11350_v24 = vld [vmem:[#allocation11 + $0x1cd8] sm:$0xff] }
 0x7c2   :  { %13688 = vmatpush1.bf16.msra.mxu0 %v15650_v29  ;;  %v11316_v29 = vld [vmem:[#allocation11 + $0x18b0] sm:$0xff] }
 0x7c3   :  { %13860 = vmatpush1.bf16.msra.mxu1 %v15652_v31  ;;  %13689 = vmatprep.subr.bf16.mxu0 %v15657_v32  ;;  %v11314_v31 = vld [vmem:[#allocation11 + $0x1858] sm:$0xff]  ;;  %v15699_v54 = vcombine.high %v11313_v28, %v11316_v29 }
 0x7c4   :  { %13861 = vmatprep.subr.bf16.mxu1 %v15659_v45  ;;  %v11317_v32 = vld [vmem:[#allocation11 + $0x18b8] sm:$0xff]  ;;  %v15692_v45 = vcombine.low %v11307_v18, %v11310_v9  ;;  %v11349_v9 = vld [vmem:[#allocation11 + $0x1cd0] sm:$0xff] }
 0x7c5   :  { %v15701_v1 = vcombine.high %v11314_v31, %v11317_v32  ;;  %v15700_v42 = vcombine.low %v11314_v31, %v11317_v32  ;;  %v11358_v31 = vld [vmem:[#allocation11 + $0x1df0] sm:$0xff]  ;;  %v11356_v32 = vld [vmem:[#allocation11 + $0x1d98] sm:$0xff] }
 0x7c6   :  { %13690 = vmatpush1.bf16.msra.mxu0 %v15656_v38  ;;  %v11322_v38 = vld [vmem:[#allocation11 + $0x1970] sm:$0xff] }
 0x7c7   :  { %13862 = vmatpush1.bf16.msra.mxu1 %v15658_v39  ;;  %13691 = vmatprep.subr.bf16.mxu0 %v15663_v40  ;;  %v15698_v39 = vcombine.low %v11313_v28, %v11316_v29  ;;  %v11320_v40 = vld [vmem:[#allocation11 + $0x1918] sm:$0xff]  ;;  %v15705_v7 = vcombine.high %v11319_v36, %v11322_v38  ;;  %v11355_v29 = vld [vmem:[#allocation11 + $0x1d90] sm:$0xff] }
 0x7c8   :  { %13863 = vmatprep.subr.bf16.mxu1 %v15665_v41  ;;  %v11323_v41 = vld [vmem:[#allocation11 + $0x1978] sm:$0xff] }
 0x7c9   :  { %v15706_v51 = vcombine.low %v11320_v40, %v11323_v41 }
 0x7ca   :  { %13692 = vmatpush1.bf16.msra.mxu0 %v15662_v47  ;;  %v15707_v47 = vcombine.high %v11320_v40, %v11323_v41  ;;  %v11362_v40 = vld [vmem:[#allocation11 + $0x1e58] sm:$0xff] }
 0x7cb   :  { %13864 = vmatpush1.bf16.msra.mxu1 %v15664_v49  ;;  %13693 = vmatprep.subr.bf16.mxu0 %v15669_v22  ;;  %v11326_v49 = vld [vmem:[#allocation11 + $0x19d8] sm:$0xff] }
 0x7cc   :  { %13865 = vmatprep.subr.bf16.mxu1 %v15671_v50  ;;  %v11329_v22 = vld [vmem:[#allocation11 + $0x1a38] sm:$0xff]  ;;  %v15704_v50 = vcombine.low %v11319_v36, %v11322_v38  ;;  %v11361_v38 = vld [vmem:[#allocation11 + $0x1e50] sm:$0xff] }
 0x7cd   :  { %v15713_v53 = vcombine.high %v11326_v49, %v11329_v22  ;;  %v11365_v41 = vld [vmem:[#allocation11 + $0x1eb8] sm:$0xff] }
 0x7ce   :  { %13694 = vmatpush1.bf16.msra.mxu0 %v15668_v56  ;;  %v11334_v56 = vld [vmem:[#allocation11 + $0x1af0] sm:$0xff] }
 0x7cf   :  { %13866 = vmatpush1.bf16.msra.mxu1 %v15670_v58  ;;  %13695 = vmatprep.subr.bf16.mxu0 %v15675_v59  ;;  %v11332_v58 = vld [vmem:[#allocation11 + $0x1a98] sm:$0xff]  ;;  %v15717_v61 = vcombine.high %v11331_v55, %v11334_v56 }
 0x7d0   :  { %13867 = vmatprep.subr.bf16.mxu1 %v15677_v60  ;;  %v11335_v59 = vld [vmem:[#allocation11 + $0x1af8] sm:$0xff]  ;;  %v15710_v60 = vcombine.low %v11325_v43, %v11328_v44  ;;  %v15749_v44 = vcombine.high %v11362_v40, %v11365_v41 }
 0x7d1   :  { %v15719_v63 = vcombine.high %v11332_v58, %v11335_v59 }
 0x7d2   :  { %13696 = vmatpush1.bf16.msra.mxu0 %v15674_v5  ;;  %v11338_v5 = vld [vmem:[#allocation11 + $0x1b58] sm:$0xff] }
 0x7d3   :  { %13868 = vmatpush1.bf16.msra.mxu1 %v15676_v8  ;;  %13697 = vmatprep.subr.bf16.mxu0 %v15681_v10  ;;  %v11341_v8 = vld [vmem:[#allocation11 + $0x1bb8] sm:$0xff]  ;;  %v15718_v10 = vcombine.low %v11332_v58, %v11335_v59  ;;  %v11376_v58 = vld [vmem:[#allocation11 + $0x2030] sm:$0xff] }
 0x7d4   :  { %13869 = vmatprep.subr.bf16.mxu1 %v15683_v11  ;;  %v15723_v11 = vcombine.high %v11337_v3, %v11340_v4  ;;  %v15725_v12 = vcombine.high %v11338_v5, %v11341_v8  ;;  %v11374_v59 = vld [vmem:[#allocation11 + $0x1fd8] sm:$0xff] }
 0x7d6   :  { %13698 = vmatpush1.bf16.msra.mxu0 %v15680_v6  ;;  %v11347_v6 = vld [vmem:[#allocation11 + $0x1c78] sm:$0xff] }
 0x7d7   :  { %13870 = vmatpush1.bf16.msra.mxu1 %v15682_v20  ;;  %13699 = vmatprep.subr.bf16.mxu0 %v15687_v16  ;;  %v15722_v20 = vcombine.low %v11337_v3, %v11340_v4  ;;  %v15724_v16 = vcombine.low %v11338_v5, %v11341_v8  ;;  %v15731_v18 = vcombine.high %v11344_v19, %v11347_v6  ;;  %v11379_v4 = vld [vmem:[#allocation11 + $0x2090] sm:$0xff]  ;;  %v11380_v8 = vld [vmem:[#allocation11 + $0x2098] sm:$0xff] }
 0x7d8   :  { %13871 = vmatprep.subr.bf16.mxu1 %v15689_v17  ;;  %v15729_v17 = vcombine.high %v11343_v13, %v11346_v14  ;;  %v11382_v5 = vld [vmem:[#allocation11 + $0x20f0] sm:$0xff] }
 0x7da   :  { %13700 = vmatpush1.bf16.msra.mxu0 %v15686_v25  ;;  %v11353_v25 = vld [vmem:[#allocation11 + $0x1d38] sm:$0xff] }
 0x7db   :  { %13872 = vmatpush1.bf16.msra.mxu1 %v15688_v26  ;;  %13701 = vmatprep.subr.bf16.mxu0 %v15693_v27  ;;  %v15728_v26 = vcombine.low %v11343_v13, %v11346_v14  ;;  %v15730_v27 = vcombine.low %v11344_v19, %v11347_v6  ;;  %v15737_v28 = vcombine.high %v11350_v24, %v11353_v25  ;;  %v11385_v14 = vld [vmem:[#allocation11 + $0x2150] sm:$0xff]  ;;  %v11386_v6 = vld [vmem:[#allocation11 + $0x2158] sm:$0xff] }
 0x7dc   :  { %13873 = vmatprep.subr.bf16.mxu1 %v15695_v57  ;;  %v15735_v57 = vcombine.high %v11349_v9, %v11352_v23  ;;  %v11388_v19 = vld [vmem:[#allocation11 + $0x21b0] sm:$0xff] }
 0x7de   :  { %13702 = vmatpush1.bf16.msra.mxu0 %v15692_v45  ;;  %v11359_v45 = vld [vmem:[#allocation11 + $0x1df8] sm:$0xff] }
 0x7df   :  { %13874 = vmatpush1.bf16.msra.mxu1 %v15694_v33  ;;  %13714 = vmatprep.subr.bf16.mxu0 %v15699_v54  ;;  %v15734_v33 = vcombine.low %v11349_v9, %v11352_v23  ;;  %v15736_v54 = vcombine.low %v11350_v24, %v11353_v25  ;;  %v15743_v36 = vcombine.high %v11356_v32, %v11359_v45  ;;  %v11391_v23 = vld [vmem:[#allocation11 + $0x2210] sm:$0xff]  ;;  %v11392_v25 = vld [vmem:[#allocation11 + $0x2218] sm:$0xff] }
 0x7e0   :  { %13886 = vmatprep.subr.bf16.mxu1 %v15701_v1  ;;  %v15741_v1 = vcombine.high %v11355_v29, %v11358_v31  ;;  %v11394_v24 = vld [vmem:[#allocation11 + $0x2270] sm:$0xff] }
 0x7e1   :  { %13704 = vmatmul.mubr.bf16.vlgmr.msra.gmra.mrb[32].mxu0 %v16702_v2 }
 0x7e2   :  { %13876 = vmatmul.mubr.bf16.vlgmr.msra.gmra.mrb[32].mxu1 %v16702_v2  ;;  %13715 = vmatpush1.bf16.msra.mxu0 %v15698_v39  ;;  %v15712_v2 = vcombine.low %v11326_v49, %v11329_v22  ;;  %v11364_v39 = vld [vmem:[#allocation11 + $0x1eb0] sm:$0xff]  ;;  %v11368_v22 = vld [vmem:[#allocation11 + $0x1f18] sm:$0xff] }
 0x7e3   :  { %13746 = vmatprep.mubr.bf16.mxu0 %v16750_v35  ;;  %13887 = vmatpush1.bf16.msra.mxu1 %v15700_v42  ;;  %v15740_v42 = vcombine.low %v11355_v29, %v11358_v31  ;;  %v15747_v43 = vcombine.high %v11361_v38, %v11364_v39  ;;  %v11370_v49 = vld [vmem:[#allocation11 + $0x1f70] sm:$0xff] }
 0x7e4   :  { %13918 = vmatprep.mubr.bf16.mxu1 %v16750_v35  ;;  %13716 = vmatprep.subr.bf16.mxu0 %v15705_v7  ;;  %v15716_v35 = vcombine.low %v11331_v55, %v11334_v56  ;;  %v15742_v7 = vcombine.low %v11356_v32, %v11359_v45  ;;  %v11373_v56 = vld [vmem:[#allocation11 + $0x1fd0] sm:$0xff]  ;;  %v11398_v45 = vld [vmem:[#allocation11 + $0x22d8] sm:$0xff] }
 0x7e5   :  { %13888 = vmatprep.subr.bf16.mxu1 %v15707_v47  ;;  %v11367_v47 = vld [vmem:[#allocation11 + $0x1f10] sm:$0xff] }
 0x7e6   :  { %13717 = vmatpush1.bf16.msra.mxu0 %v15704_v50  ;;  %v11371_v50 = vld [vmem:[#allocation11 + $0x1f78] sm:$0xff]  ;;  %v11397_v31 = vld [vmem:[#allocation11 + $0x22d0] sm:$0xff] }
 0x7e7   :  { %13889 = vmatpush1.bf16.msra.mxu1 %v15706_v51  ;;  %13718 = vmatprep.subr.bf16.mxu0 %v15711_v52  ;;  %v15746_v51 = vcombine.low %v11361_v38, %v11364_v39  ;;  %v15748_v52 = vcombine.low %v11362_v40, %v11365_v41  ;;  %v15755_v55 = vcombine.high %v11368_v22, %v11371_v50  ;;  %v11400_v32 = vld [vmem:[#allocation11 + $0x2330] sm:$0xff]  ;;  %v11404_v41 = vld [vmem:[#allocation11 + $0x2398] sm:$0xff] }
 0x7e8   :  { %13890 = vmatprep.subr.bf16.mxu1 %v15713_v53  ;;  %v15753_v53 = vcombine.high %v11367_v47, %v11370_v49  ;;  %v11403_v39 = vld [vmem:[#allocation11 + $0x2390] sm:$0xff] }
 0x7e9   :  { %v11406_v40 = vld [vmem:[#allocation11 + $0x23f0] sm:$0xff] }
 0x7ea   :  { %13719 = vmatpush1.bf16.msra.mxu0 %v15710_v60  ;;  %v11377_v60 = vld [vmem:[#allocation11 + $0x2038] sm:$0xff] }
 0x7eb   :  { %13891 = vmatpush1.bf16.msra.mxu1 %v15712_v2  ;;  %13720 = vmatprep.subr.bf16.mxu0 %v15717_v61  ;;  %v15752_v2 = vcombine.low %v11367_v47, %v11370_v49  ;;  %v15754_v61 = vcombine.low %v11368_v22, %v11371_v50  ;;  %v15761_v3 = vcombine.high %v11374_v59, %v11377_v60  ;;  %v11409_v49 = vld [vmem:[#allocation11 + $0x2450] sm:$0xff]  ;;  %v11410_v50 = vld [vmem:[#allocation11 + $0x2458] sm:$0xff] }
 0x7ec   :  { %13892 = vmatprep.subr.bf16.mxu1 %v15719_v63  ;;  %v15759_v63 = vcombine.high %v11373_v56, %v11376_v58  ;;  %v11412_v22 = vld [vmem:[#allocation11 + $0x24b0] sm:$0xff] }
 0x7ee   :  { %13721 = vmatpush1.bf16.msra.mxu0 %v15716_v35  ;;  %v11383_v35 = vld [vmem:[#allocation11 + $0x20f8] sm:$0xff] }
 0x7ef   :  { %13893 = vmatpush1.bf16.msra.mxu1 %v15718_v10  ;;  %13722 = vmatprep.subr.bf16.mxu0 %v15723_v11  ;;  %v15758_v10 = vcombine.low %v11373_v56, %v11376_v58  ;;  %v15760_v11 = vcombine.low %v11374_v59, %v11377_v60  ;;  %v15767_v13 = vcombine.high %v11380_v8, %v11383_v35  ;;  %v11415_v58 = vld [vmem:[#allocation11 + $0x2510] sm:$0xff] }
 0x7f0   :  { %13894 = vmatprep.subr.bf16.mxu1 %v15725_v12  ;;  %v15765_v12 = vcombine.high %v11379_v4, %v11382_v5  ;;  %v11418_v59 = vld [vmem:[#allocation11 + $0x2570] sm:$0xff]  ;;  %v15794_v60 = vcombine.low %v11409_v49, %v11412_v22 }
 0x7f2   :  { %13723 = vmatpush1.bf16.msra.mxu0 %v15722_v20  ;;  %v11389_v20 = vld [vmem:[#allocation11 + $0x21b8] sm:$0xff] }
 0x7f3   :  { %13895 = vmatpush1.bf16.msra.mxu1 %v15724_v16  ;;  %13724 = vmatprep.subr.bf16.mxu0 %v15729_v17  ;;  %v15764_v16 = vcombine.low %v11379_v4, %v11382_v5  ;;  %v15766_v17 = vcombine.low %v11380_v8, %v11383_v35  ;;  %v15773_v9 = vcombine.high %v11386_v6, %v11389_v20  ;;  %v11421_v4 = vld [vmem:[#allocation11 + $0x25d0] sm:$0xff]  ;;  %v11422_v35 = vld [vmem:[#allocation11 + $0x25d8] sm:$0xff] }
 0x7f4   :  { %13896 = vmatprep.subr.bf16.mxu1 %v15731_v18  ;;  %v15771_v18 = vcombine.high %v11385_v14, %v11388_v19  ;;  %v11424_v5 = vld [vmem:[#allocation11 + $0x2630] sm:$0xff] }
 0x7f6   :  { %13725 = vmatpush1.bf16.msra.mxu0 %v15728_v26  ;;  %v11395_v26 = vld [vmem:[#allocation11 + $0x2278] sm:$0xff] }
 0x7f7   :  { %13897 = vmatpush1.bf16.msra.mxu1 %v15730_v27  ;;  %13726 = vmatprep.subr.bf16.mxu0 %v15735_v57  ;;  %v15770_v27 = vcombine.low %v11385_v14, %v11388_v19  ;;  %v15772_v57 = vcombine.low %v11386_v6, %v11389_v20  ;;  %v15779_v29 = vcombine.high %v11392_v25, %v11395_v26  ;;  %v11427_v19 = vld [vmem:[#allocation11 + $0x2690] sm:$0xff]  ;;  %v11428_v20 = vld [vmem:[#allocation11 + $0x2698] sm:$0xff] }
 0x7f8   :  { %13898 = vmatprep.subr.bf16.mxu1 %v15737_v28  ;;  %v15777_v28 = vcombine.high %v11391_v23, %v11394_v24  ;;  %v11430_v6 = vld [vmem:[#allocation11 + $0x26f0] sm:$0xff] }
 0x7fa   :  { %13727 = vmatpush1.bf16.msra.mxu0 %v15734_v33  ;;  %v11401_v33 = vld [vmem:[#allocation11 + $0x2338] sm:$0xff] }
 0x7fb   :  { %13899 = vmatpush1.bf16.msra.mxu1 %v15736_v54  ;;  %13728 = vmatprep.subr.bf16.mxu0 %v15741_v1  ;;  %v15776_v54 = vcombine.low %v11391_v23, %v11394_v24  ;;  %v15778_v1 = vcombine.low %v11392_v25, %v11395_v26  ;;  %v15785_v38 = vcombine.high %v11398_v45, %v11401_v33  ;;  %v11433_v23 = vld [vmem:[#allocation11 + $0x2750] sm:$0xff]  ;;  %v11434_v25 = vld [vmem:[#allocation11 + $0x2758] sm:$0xff] }
 0x7fc   :  { %13900 = vmatprep.subr.bf16.mxu1 %v15743_v36  ;;  %v15783_v36 = vcombine.high %v11397_v31, %v11400_v32  ;;  %v11436_v24 = vld [vmem:[#allocation11 + $0x27b0] sm:$0xff]  ;;  %v11437_v26 = vld [vmem:[#allocation11 + $0x27b8] sm:$0xff] }
 0x7fe   :  { %13729 = vmatpush1.bf16.msra.mxu0 %v15740_v42  ;;  %v11407_v42 = vld [vmem:[#allocation11 + $0x23f8] sm:$0xff] }
 0x7ff   :  { %13901 = vmatpush1.bf16.msra.mxu1 %v15742_v7  ;;  %13730 = vmatprep.subr.bf16.mxu0 %v15747_v43  ;;  %v15782_v7 = vcombine.low %v11397_v31, %v11400_v32  ;;  %v15784_v43 = vcombine.low %v11398_v45, %v11401_v33  ;;  %v15791_v47 = vcombine.high %v11404_v41, %v11407_v42  ;;  %v11442_v31 = vld [vmem:[#allocation11 + $0x2870] sm:$0xff]  ;;  %v11440_v32 = vld [vmem:[#allocation11 + $0x2818] sm:$0xff] }
 0x800   :  { %13902 = vmatprep.subr.bf16.mxu1 %v15749_v44  ;;  %v15789_v44 = vcombine.high %v11403_v39, %v11406_v40  ;;  %v11443_v45 = vld [vmem:[#allocation11 + $0x2878] sm:$0xff]  ;;  %v15818_v33 = vcombine.low %v11433_v23, %v11436_v24 }
 0x802   :  { %13731 = vmatpush1.bf16.msra.mxu0 %v15746_v51  ;;  %v11413_v51 = vld [vmem:[#allocation11 + $0x24b8] sm:$0xff] }
 0x803   :  { %13903 = vmatpush1.bf16.msra.mxu1 %v15748_v52  ;;  %13732 = vmatprep.subr.bf16.mxu0 %v15753_v53  ;;  %v15788_v52 = vcombine.low %v11403_v39, %v11406_v40  ;;  %v15790_v53 = vcombine.low %v11404_v41, %v11407_v42  ;;  %v15797_v56 = vcombine.high %v11410_v50, %v11413_v51  ;;  %v11445_v39 = vld [vmem:[#allocation11 + $0x28d0] sm:$0xff] }
 0x804   :  { %13904 = vmatprep.subr.bf16.mxu1 %v15755_v55  ;;  %v15795_v55 = vcombine.high %v11409_v49, %v11412_v22  ;;  %v11448_v40 = vld [vmem:[#allocation11 + $0x2930] sm:$0xff] }
 0x805   :  { %v16305_v41 = vld [vmem:[#allocation13 + $0xc] sm:$0x3f] }
 0x806   :  { %13733 = vmatpush1.bf16.msra.mxu0 %v15752_v2  ;;  %v11416_v2 = vld [vmem:[#allocation11 + $0x2518] sm:$0xff]  ;;  %v8619_v42 = vrot.slane %v16305_v41, %v16721_v15 }
 0x807   :  { %13905 = vmatpush1.bf16.msra.mxu1 %v15754_v61  ;;  %13734 = vmatprep.subr.bf16.mxu0 %v15759_v63  ;;  %v11419_v61 = vld [vmem:[#allocation11 + $0x2578] sm:$0xff]  ;;  %v15796_v63 = vcombine.low %v11410_v50, %v11413_v51  ;;  %v15826_v50 = vcombine.low %v11440_v32, %v11443_v45  ;;  %v15831_v51 = vcombine.high %v11445_v39, %v11448_v40 }
 0x808   :  { %13906 = vmatprep.subr.bf16.mxu1 %v15761_v3  ;;  %v15801_v3 = vcombine.high %v11415_v58, %v11418_v59  ;;  %v15803_v8 = vcombine.high %v11416_v2, %v11419_v61 }
 0x80a   :  { %13735 = vmatpush1.bf16.msra.mxu0 %v15758_v10  ;;  %v11425_v10 = vld [vmem:[#allocation11 + $0x2638] sm:$0xff] }
 0x80b   :  { %13907 = vmatpush1.bf16.msra.mxu1 %v15760_v11  ;;  %13736 = vmatprep.subr.bf16.mxu0 %v15765_v12  ;;  %v15800_v11 = vcombine.low %v11415_v58, %v11418_v59  ;;  %v15802_v12 = vcombine.low %v11416_v2, %v11419_v61  ;;  %v15809_v14 = vcombine.high %v11422_v35, %v11425_v10  ;;  %v11452_v2 = vld [vmem:[#allocation11 + $0x2998] sm:$0xff] }
 0x80c   :  { %13908 = vmatprep.subr.bf16.mxu1 %v15767_v13  ;;  %v15807_v13 = vcombine.high %v11421_v4, %v11424_v5 }
 0x80e   :  { %13737 = vmatpush1.bf16.msra.mxu0 %v15764_v16  ;;  %v11431_v16 = vld [vmem:[#allocation11 + $0x26f8] sm:$0xff] }
 0x80f   :  { %13909 = vmatpush1.bf16.msra.mxu1 %v15766_v17  ;;  %13738 = vmatprep.subr.bf16.mxu0 %v15771_v18  ;;  %v15806_v17 = vcombine.low %v11421_v4, %v11424_v5  ;;  %v15813_v18 = vcombine.high %v11427_v19, %v11430_v6  ;;  %v15830_v5 = vcombine.low %v11445_v39, %v11448_v40 }
 0x810   :  { %13910 = vmatprep.subr.bf16.mxu1 %v15773_v9  ;;  %v15815_v9 = vcombine.high %v11428_v20, %v11431_v16 }
 0x812   :  { %13739 = vmatpush1.bf16.msra.mxu0 %v15770_v27  ;;  %v15814_v27 = vcombine.low %v11428_v20, %v11431_v16  ;;  %v11460_v20 = vld [vmem:[#allocation11 + $0x2ab0] sm:$0xff] }
 0x813   :  { %13911 = vmatpush1.bf16.msra.mxu1 %v15772_v57  ;;  %13740 = vmatprep.subr.bf16.mxu0 %v15777_v28  ;;  %v15819_v57 = vcombine.high %v11433_v23, %v11436_v24  ;;  %v15821_v28 = vcombine.high %v11434_v25, %v11437_v26 }
 0x814   :  { %13912 = vmatprep.subr.bf16.mxu1 %v15779_v29  ;;  %v11439_v29 = vld [vmem:[#allocation11 + $0x2810] sm:$0xff] }
 0x815   :  { %v15824_v49 = vcombine.low %v11439_v29, %v11442_v31 }
 0x816   :  { %13741 = vmatpush1.bf16.msra.mxu0 %v15776_v54  ;;  %v15820_v54 = vcombine.low %v11434_v25, %v11437_v26  ;;  %v11463_v26 = vld [vmem:[#allocation11 + $0x2b10] sm:$0xff] }
 0x817   :  { %13913 = vmatpush1.bf16.msra.mxu1 %v15778_v1  ;;  %13742 = vmatprep.subr.bf16.mxu0 %v15783_v36  ;;  %v16856_v1 = vld [vmem:[#allocation13 + $0x12] sm:$0x3f]  ;;  %v15825_v36 = vcombine.high %v11439_v29, %v11442_v31 }
 0x818   :  { %13914 = vmatprep.subr.bf16.mxu1 %v15785_v38  ;;  %v15827_v38 = vcombine.high %v11440_v32, %v11443_v45  ;;  %v11513_v22 = vrot.slane %v16856_v1, %v16642_v48  ;;  %v11469_v45 = vld [vmem:[#allocation11 + $0x2bd0] sm:$0xff] }
 0x81a   :  { %13743 = vmatpush1.bf16.msra.mxu0 %v15782_v7  ;;  %v11446_v7 = vld [vmem:[#allocation11 + $0x28d8] sm:$0xff] }
 0x81b   :  { %13915 = vmatpush1.bf16.msra.mxu1 %v15784_v43  ;;  %13744 = vmatprep.subr.bf16.mxu0 %v15789_v44  ;;  %v11449_v43 = vld [vmem:[#allocation11 + $0x2938] sm:$0xff]  ;;  %v11509_v44 = vrot.slane %v16856_v1, %v16639_v46 }
 0x81c   :  { %13916 = vmatprep.subr.bf16.mxu1 %v15791_v47  ;;  %v8623_v47 = vrot.slane %v16305_v41, %v16725_v21  ;;  %v11455_v46 = vld [vmem:[#allocation11 + $0x29f8] sm:$0xff]  ;;  %v15832_v48 = vcombine.low %v11446_v7, %v11449_v43 }
 0x81d   :  { %v15838_v23 = vcombine.low %v11452_v2, %v11455_v46 }
 0x81e   :  { %13745 = vmatpush1.bf16.msra.mxu0 %v15788_v52 }
 0x81f   :  { %13917 = vmatpush1.bf16.msra.mxu1 %v15790_v53  ;;  %13757 = vmatprep.subr.bf16.mxu0 %v15795_v55  ;;  %v15833_v53 = vcombine.high %v11446_v7, %v11449_v43  ;;  %v11451_v55 = vld [vmem:[#allocation11 + $0x2990] sm:$0xff] }
 0x820   :  { %13929 = vmatprep.subr.bf16.mxu1 %v15797_v56  ;;  %v11454_v56 = vld [vmem:[#allocation11 + $0x29f0] sm:$0xff] }
 0x821   :  { %13747 = vmatmul.mubr.bf16.vlgmr.msra.gmra.mrb[32].mxu0 %v16745_v30 }
 0x822   :  { %13919 = vmatmul.mubr.bf16.vlgmr.msra.gmra.mrb[32].mxu1 %v16745_v30  ;;  %13758 = vmatpush1.bf16.msra.mxu0 %v15794_v60  ;;  %v15808_v30 = vcombine.low %v11422_v35, %v11425_v10 }
 0x823   :  { %13789 = vmatprep.mubr.bf16.mxu0 %v16752_v37  ;;  %13930 = vmatpush1.bf16.msra.mxu1 %v15796_v63 }
 0x824   :  { %13961 = vmatprep.mubr.bf16.mxu1 %v16752_v37  ;;  %13759 = vmatprep.subr.bf16.mxu0 %v15801_v3  ;;  %v15812_v37 = vcombine.low %v11427_v19, %v11430_v6  ;;  %v15839_v19 = vcombine.high %v11452_v2, %v11455_v46  ;;  %v11457_v6 = vld [vmem:[#allocation11 + $0x2a50] sm:$0xff] }
 0x825   :  { %13931 = vmatprep.subr.bf16.mxu1 %v15803_v8  ;;  %v15843_v24 = vcombine.high %v11457_v6, %v11460_v20 }
 0x826   :  { %13760 = vmatpush1.bf16.msra.mxu0 %v15800_v11 }
 0x827   :  { %13932 = vmatpush1.bf16.msra.mxu1 %v15802_v12  ;;  %13761 = vmatprep.subr.bf16.mxu0 %v15807_v13  ;;  %v15837_v12 = vcombine.high %v11451_v55, %v11454_v56 }
 0x828   :  { %13933 = vmatprep.subr.bf16.mxu1 %v15809_v14 }
 0x82a   :  { %13762 = vmatpush1.bf16.msra.mxu0 %v15806_v17  ;;  %v11458_v17 = vld [vmem:[#allocation11 + $0x2a58] sm:$0xff] }
 0x82b   :  { %13934 = vmatpush1.bf16.msra.mxu1 %v15808_v30  ;;  %13763 = vmatprep.subr.bf16.mxu0 %v15813_v18  ;;  %v11461_v30 = vld [vmem:[#allocation11 + $0x2ab8] sm:$0xff] }
 0x82c   :  { %13935 = vmatprep.subr.bf16.mxu1 %v15815_v9  ;;  %v15836_v9 = vcombine.low %v11451_v55, %v11454_v56  ;;  %v15845_v25 = vcombine.high %v11458_v17, %v11461_v30  ;;  %v15844_v29 = vcombine.low %v11458_v17, %v11461_v30  ;;  %v11493_v30 = vld [vmem:[#allocation11 + $0x2ed0] sm:$0xff] }
 0x82e   :  { %13764 = vmatpush1.bf16.msra.mxu0 %v15812_v37  ;;  %v11466_v37 = vld [vmem:[#allocation11 + $0x2b70] sm:$0xff] }
 0x82f   :  { %13936 = vmatpush1.bf16.msra.mxu1 %v15814_v27  ;;  %13765 = vmatprep.subr.bf16.mxu0 %v15819_v57  ;;  %v11464_v27 = vld [vmem:[#allocation11 + $0x2b18] sm:$0xff]  ;;  %v15849_v31 = vcombine.high %v11463_v26, %v11466_v37  ;;  %v15848_v40 = vcombine.low %v11463_v26, %v11466_v37 }
 0x830   :  { %13937 = vmatprep.subr.bf16.mxu1 %v15821_v28  ;;  %v11467_v57 = vld [vmem:[#allocation11 + $0x2b78] sm:$0xff]  ;;  %v15842_v28 = vcombine.low %v11457_v6, %v11460_v20 }
 0x831   :  { %v15851_v32 = vcombine.high %v11464_v27, %v11467_v57 }
 0x832   :  { %13766 = vmatpush1.bf16.msra.mxu0 %v15818_v33  ;;  %v11472_v33 = vld [vmem:[#allocation11 + $0x2c30] sm:$0xff] }
 0x833   :  { %13938 = vmatpush1.bf16.msra.mxu1 %v15820_v54  ;;  %13767 = vmatprep.subr.bf16.mxu0 %v15825_v36  ;;  %v11470_v36 = vld [vmem:[#allocation11 + $0x2bd8] sm:$0xff]  ;;  %v15855_v7 = vcombine.high %v11469_v45, %v11472_v33  ;;  %v15854_v56 = vcombine.low %v11469_v45, %v11472_v33 }
 0x834   :  { %v11057_v52 = vpop.f32.mrb[28].mxu0  ;;  %13939 = vmatprep.subr.bf16.mxu1 %v15827_v38  ;;  %v11473_v38 = vld [vmem:[#allocation11 + $0x2c38] sm:$0xff] }
 0x835   :  { %v15966_v58 = vadd.f32 %v11057_v52, %v8619_v42  ;;  %v13619_v59 = vpop.f32.mrb[28].mxu1  ;;  %v11059_v60 = vpop.f32.mrb[29].mxu0  ;;  %v11476_v52 = vld [vmem:[#allocation11 + $0x2c98] sm:$0xff] }
 0x836   :  { %v15970_v61 = vadd.f32 %v13619_v59, %v11509_v44  ;;  %v15967_v63 = vadd.f32 %v11059_v60, %v8623_v47  ;;  %v13621_v3 = vpop.f32.mrb[29].mxu1  ;;  %v11061_v4 = vpop.f32.mrb[30].mxu0  ;;  %13768 = vmatpush1.bf16.msra.mxu0 %v15824_v49  ;;  %v11475_v49 = vld [vmem:[#allocation11 + $0x2c90] sm:$0xff]  ;;  %v15856_v59 = vcombine.low %v11470_v36, %v11473_v38 }
 0x837   :  { %16271 = vtanh.f32 %v15966_v58  ;;  %v15971_v8 = vadd.f32 %v13621_v3, %v11513_v22  ;;  %v15968_v35 = vadd.f32 %v11061_v4, %v8619_v42  ;;  %v13623_v10 = vpop.f32.mrb[30].mxu1  ;;  %13940 = vmatpush1.bf16.msra.mxu1 %v15826_v50  ;;  %v11063_v11 = vpop.f32.mrb[31].mxu0  ;;  %13769 = vmatprep.subr.bf16.mxu0 %v15831_v51  ;;  %v15850_v42 = vcombine.low %v11464_v27, %v11467_v57  ;;  %v11484_v3 = vld [vmem:[#allocation11 + $0x2db0] sm:$0xff] }
 0x838   :  { %16273 = vtanh.f32 %v15970_v61  ;;  %v15972_v13 = vadd.f32 %v13623_v10, %v11509_v44  ;;  %v13625_v14 = vpop.f32.mrb[31].mxu1  ;;  %13941 = vmatprep.subr.bf16.mxu1 %v15833_v53  ;;  %v15969_v16 = vadd.f32 %v11063_v11, %v8623_v47  ;;  %v15857_v47 = vcombine.high %v11470_v36, %v11473_v38  ;;  %v11479_v53 = vld [vmem:[#allocation11 + $0x2cf8] sm:$0xff]  ;;  %v11499_v27 = vld [vmem:[#allocation11 + $0x2f90] sm:$0xff] }
 0x839   :  { %16275 = vtanh.f32 %v15967_v63  ;;  %v15973_v18 = vadd.f32 %v13625_v14, %v11513_v22  ;;  %v11478_v22 = vld [vmem:[#allocation11 + $0x2cf0] sm:$0xff]  ;;  %v15863_v61 = vcombine.high %v11476_v52, %v11479_v53  ;;  %v11488_v14 = vld [vmem:[#allocation11 + $0x2e18] sm:$0xff]  ;;  %v11517_v38 = vrot.slane %v16856_v1, %v16647_v62 }
 0x83a   :  { %16277 = vtanh.f32 %v15971_v8  ;;  %13770 = vmatpush1.bf16.msra.mxu0 %v15830_v5  ;;  %v15861_v60 = vcombine.high %v11475_v49, %v11478_v22  ;;  %v11481_v63 = vld [vmem:[#allocation11 + $0x2d50] sm:$0xff]  ;;  %v11482_v5 = vld [vmem:[#allocation11 + $0x2d58] sm:$0xff]  ;;  %v15860_v8 = vcombine.low %v11475_v49, %v11478_v22 }
 0x83b   :  { %16279 = vtanh.f32 %v15968_v35  ;;  %13942 = vmatpush1.bf16.msra.mxu1 %v15832_v48  ;;  %13771 = vmatprep.subr.bf16.mxu0 %v15837_v12  ;;  %v11485_v48 = vld [vmem:[#allocation11 + $0x2db8] sm:$0xff]  ;;  %v15862_v35 = vcombine.low %v11476_v52, %v11479_v53  ;;  %v15867_v10 = vcombine.high %v11481_v63, %v11484_v3  ;;  %v11487_v12 = vld [vmem:[#allocation11 + $0x2e10] sm:$0xff]  ;;  %v15866_v6 = vcombine.low %v11481_v63, %v11484_v3 }
 0x83c   :  { %16281 = vtanh.f32 %v15972_v13  ;;  %13943 = vmatprep.subr.bf16.mxu1 %v15839_v19  ;;  %v15869_v11 = vcombine.high %v11482_v5, %v11485_v48  ;;  %v11490_v13 = vld [vmem:[#allocation11 + $0x2e70] sm:$0xff]  ;;  %v11491_v19 = vld [vmem:[#allocation11 + $0x2e78] sm:$0xff]  ;;  %v15868_v20 = vcombine.low %v11482_v5, %v11485_v48 }
 0x83d   :  { %16283 = vtanh.f32 %v15969_v16  ;;  %v15873_v16 = vcombine.high %v11487_v12, %v11490_v13  ;;  %v15875_v17 = vcombine.high %v11488_v14, %v11491_v19  ;;  %v11502_v57 = vld [vmem:[#allocation11 + $0x2ff0] sm:$0xff] }
 0x83e   :  { %16285 = vtanh.f32 %v15973_v18  ;;  %13772 = vmatpush1.bf16.msra.mxu0 %v15836_v9  ;;  %v11496_v18 = vld [vmem:[#allocation11 + $0x2f30] sm:$0xff]  ;;  %v11494_v9 = vld [vmem:[#allocation11 + $0x2ed8] sm:$0xff]  ;;  %v15885_v45 = vcombine.high %v11499_v27, %v11502_v57 }
 0x83f   :  { %13944 = vmatpush1.bf16.msra.mxu1 %v15838_v23  ;;  %13773 = vmatprep.subr.bf16.mxu0 %v15843_v24  ;;  %v11497_v23 = vld [vmem:[#allocation11 + $0x2f38] sm:$0xff]  ;;  %v15872_v24 = vcombine.low %v11487_v12, %v11490_v13  ;;  %v15879_v26 = vcombine.high %v11493_v30, %v11496_v18 }
 0x840   :  { %13945 = vmatprep.subr.bf16.mxu1 %v15845_v25  ;;  %v15874_v25 = vcombine.low %v11488_v14, %v11491_v19  ;;  %v15881_v37 = vcombine.high %v11494_v9, %v11497_v23 }
 0x841   :  { %v16272_v54 = vpop.eup %16271 }
 0x842   :  { %v16274_v39 = vpop.eup %16273  ;;  %13774 = vmatpush1.bf16.msra.mxu0 %v15842_v28  ;;  %v11500_v28 = vld [vmem:[#allocation11 + $0x2f98] sm:$0xff] }
 0x843   :  { %v16276_v41 = vpop.eup %16275  ;;  %13946 = vmatpush1.bf16.msra.mxu1 %v15844_v29  ;;  %13775 = vmatprep.subr.bf16.mxu0 %v15849_v31  ;;  %v11503_v29 = vld [vmem:[#allocation11 + $0x2ff8] sm:$0xff]  ;;  %v15878_v31 = vcombine.low %v11493_v30, %v11496_v18 }
 0x844   :  { %v16278_v43 = vpop.eup %16277  ;;  %v15908_v44 = vpack.c.bf16 %v16276_v41, %v16272_v54  ;;  %13947 = vmatprep.subr.bf16.mxu1 %v15851_v32  ;;  %v15880_v32 = vcombine.low %v11494_v9, %v11497_v23  ;;  %v15887_v33 = vcombine.high %v11500_v28, %v11503_v29  ;;  %v15884_v54 = vcombine.low %v11499_v27, %v11502_v57 }
 0x845   :  { %v16280_v50 = vpop.eup %16279  ;;  %v15912_v51 = vpack.c.bf16 %v16278_v43, %v16274_v39  ;;  %v15886_v36 = vcombine.low %v11500_v28, %v11503_v29  ;;  %v11525_v39 = vrot.slane %v16856_v1, %v16721_v15  ;;  %v11529_v41 = vrot.slane %v16856_v1, %v16725_v21 }
 0x846   :  { %v16282_v55 = vpop.eup %16281  ;;  %11116 = vst [vmem:[#allocation14 + $0x40] sm:$0xff] %v15908_v44  ;;  %13776 = vmatpush1.bf16.msra.mxu0 %v15848_v40  ;;  %v11521_v40 = vrot.slane %v16856_v1, %v16650_v0 }
 0x847   :  { %v16284_v58 = vpop.eup %16283  ;;  %14020 = vst [vmem:[#allocation14 + $0x48] sm:$0xff] %v15912_v51  ;;  %13948 = vmatpush1.bf16.msra.mxu1 %v15850_v42  ;;  %13777 = vmatprep.subr.bf16.mxu0 %v15855_v7 }
 0x848   :  { %v16286_v2 = vpop.eup %16285  ;;  %v15911_v46 = vpack.c.bf16 %v16284_v58, %v16280_v50  ;;  %13949 = vmatprep.subr.bf16.mxu1 %v15857_v47 }
 0x849   :  { %v15915_v4 = vpack.c.bf16 %v16286_v2, %v16282_v55 }
 0x84a   :  { %11119 = vst [vmem:[#allocation14 + $0xa0] sm:$0xff] %v15911_v46  ;;  %13778 = vmatpush1.bf16.msra.mxu0 %v15854_v56 }
 0x84b   :  { %14023 = vst [vmem:[#allocation14 + $0xa8] sm:$0xff] %v15915_v4  ;;  %13950 = vmatpush1.bf16.msra.mxu1 %v15856_v59  ;;  %13779 = vmatprep.subr.bf16.mxu0 %v15861_v60 }
 0x84c   :  { %13951 = vmatprep.subr.bf16.mxu1 %v15863_v61 }
 0x84e   :  { %13780 = vmatpush1.bf16.msra.mxu0 %v15860_v8 }
 0x84f   :  { %13952 = vmatpush1.bf16.msra.mxu1 %v15862_v35  ;;  %13781 = vmatprep.subr.bf16.mxu0 %v15867_v10 }
 0x850   :  { %13953 = vmatprep.subr.bf16.mxu1 %v15869_v11 }
 0x852   :  { %13782 = vmatpush1.bf16.msra.mxu0 %v15866_v6 }
 0x853   :  { %13954 = vmatpush1.bf16.msra.mxu1 %v15868_v20  ;;  %13783 = vmatprep.subr.bf16.mxu0 %v15873_v16 }
 0x854   :  { %13955 = vmatprep.subr.bf16.mxu1 %v15875_v17 }
 0x856   :  { %13784 = vmatpush1.bf16.msra.mxu0 %v15872_v24 }
 0x857   :  { %13956 = vmatpush1.bf16.msra.mxu1 %v15874_v25  ;;  %13785 = vmatprep.subr.bf16.mxu0 %v15879_v26 }
 0x858   :  { %13957 = vmatprep.subr.bf16.mxu1 %v15881_v37 }
 0x85a   :  { %13786 = vmatpush1.bf16.msra.mxu0 %v15878_v31 }
 0x85b   :  { %13958 = vmatpush1.bf16.msra.mxu1 %v15880_v32  ;;  %13787 = vmatprep.subr.bf16.mxu0 %v15885_v45 }
 0x85c   :  { %13959 = vmatprep.subr.bf16.mxu1 %v15887_v33 }
 0x85e   :  { %13788 = vmatpush1.bf16.msra.mxu0 %v15884_v54 }
 0x85f   :  { %13960 = vmatpush1.bf16.msra.mxu1 %v15886_v36 }
 0x861   :  { %13790 = vmatmul.mubr.bf16.vlgmr.msra.gmra.mrb[32].mxu0 %v16748_v34 }
 0x862   :  { %13962 = vmatmul.mubr.bf16.vlgmr.msra.gmra.mrb[32].mxu1 %v16748_v34 }
 0x934   :  { %v13791_v42 = vpop.f32.mrb[32].mxu0 }
 0x935   :  { %v15974_v7 = vadd.f32 %v13791_v42, %v11517_v38  ;;  %v13963_v43 = vpop.f32.mrb[32].mxu1  ;;  %v13793_v44 = vpop.f32.mrb[33].mxu0 }
 0x936   :  { %v15978_v47 = vadd.f32 %v13963_v43, %v11525_v39  ;;  %v15975_v49 = vadd.f32 %v13793_v44, %v11521_v40  ;;  %v13965_v22 = vpop.f32.mrb[33].mxu1  ;;  %v13795_v34 = vpop.f32.mrb[34].mxu0 }
 0x937   :  { %16287 = vtanh.f32 %v15974_v7  ;;  %v15979_v50 = vadd.f32 %v13965_v22, %v11529_v41  ;;  %v15976_v62 = vadd.f32 %v13795_v34, %v11517_v38  ;;  %v13967_v51 = vpop.f32.mrb[34].mxu1  ;;  %v13797_v52 = vpop.f32.mrb[35].mxu0 }
 0x938   :  { %16289 = vtanh.f32 %v15978_v47  ;;  %v15980_v15 = vadd.f32 %v13967_v51, %v11525_v39  ;;  %v13969_v53 = vpop.f32.mrb[35].mxu1  ;;  %v15977_v0 = vadd.f32 %v13797_v52, %v11521_v40 }
 0x939   :  { %16291 = vtanh.f32 %v15975_v49  ;;  %v15981_v21 = vadd.f32 %v13969_v53, %v11529_v41 }
 0x93a   :  { %16293 = vtanh.f32 %v15979_v50 }
 0x93b   :  { %16295 = vtanh.f32 %v15976_v62 }
 0x93c   :  { %16297 = vtanh.f32 %v15980_v15 }
 0x93d   :  { %16299 = vtanh.f32 %v15977_v0 }
 0x93e   :  { %16301 = vtanh.f32 %v15981_v21 }
 0x941   :  { %v16288_v1 = vpop.eup %16287 }
 0x942   :  { %v16290_v55 = vpop.eup %16289 }
 0x943   :  { %v16292_v56 = vpop.eup %16291 }
 0x944   :  { %v16294_v58 = vpop.eup %16293  ;;  %v15913_v59 = vpack.c.bf16 %v16292_v56, %v16288_v1 }
 0x945   :  { %v16296_v60 = vpop.eup %16295  ;;  %v15914_v2 = vpack.c.bf16 %v16294_v58, %v16290_v55 }
 0x946   :  { %v16298_v46 = vpop.eup %16297  ;;  %14021 = vst [vmem:[#allocation14 + $0x50] sm:$0xff] %v15913_v59 }
 0x947   :  { %v16300_v61 = vpop.eup %16299  ;;  %14022 = vst [vmem:[#allocation14 + $0x58] sm:$0xff] %v15914_v2 }
 0x948   :  { %v16302_v63 = vpop.eup %16301  ;;  %v15916_v3 = vpack.c.bf16 %v16300_v61, %v16296_v60 }
 0x949   :  { %v15917_v4 = vpack.c.bf16 %v16302_v63, %v16298_v46 }
 0x94a   :  { %14024 = vst [vmem:[#allocation14 + $0xb0] sm:$0xff] %v15916_v3 }
 0x94b   :  { %14025 = vst [vmem:[#allocation14 + $0xb8] sm:$0xff] %v15917_v4 }
 0x94c   :  { %16471 = shalt.err (!%p16468_p4)
}
 0x94d   :  { %s16472_s20 = scalar_lea.hbm %s16896_s7, 3072 }
 0x94e   :  { %p16473_p5 = scmp.ne.s32.totalorder %s16896_s7, %s16472_s20  ;;  %p16476_p6 = scmp.lt.u32.totalorder %s16472_s20, %s16896_s7 }
 0x950   :  { %p16478_p7 = pnand %p16476_p6, %p16473_p5 }
 0x952   :  { %16481 = shalt.err (!%p16478_p7)
}
 0x953   :  { %14037 = dma.vmem_to_hbm [thread:$0]  %s14032_s17, 3072, %s16896_s7, [#allocation4], %s16499_s3, %s16499_s3, %s16500_s15  }
 0x954   :  { %16490 = dma.done.wait [#allocation4], 3072  }
 0x955   :  { %16491 = vsyncadd [#allocation4], 4294964224 }
 0x956   :  { %14041 = vsyncpa [#allocation3], 1 }
 0x957   :  { %14042 = vsyncpa [#allocation6], 1 }
 0x958   :  { %14043 = vsyncpa [#allocation9], 1 }
 0x959   :  { %14044 = vsyncpa [#allocation12], 1 }
 0x95a   :  { %14045 = vsyncpa [#allocation4], 1 }

</bundles_post_ra>
